<compile_context>
chip_gen: v7x
topology: tpu7x:2x2x1
jax: 0.10.0
libtpu: 0.0.40
codegen_flags: <defaults>
</compile_context>

<pallas_src>
import functools

import numpy as np

import jax
import jax.numpy as jnp
from jax.experimental import pallas as pl
from jax.experimental.pallas import tpu as pltpu

D = 15
IMG = 28  # geometry implied by fc1 = Linear(3*3*32, d): 28 -> 14 -> 7 -> 3


def _round_up(x, m):
    return (x + m - 1) // m * m


# -----------------------------------------------------------------------------
# Parameter preparation (host-side, runs once per parameter set):
# lower each stride-2 conv to its equivalent dense matrix on the flattened
# NCHW activation vector, and pre-transpose / pre-broadcast everything so the
# forward pass is pure GEMM + bias + ReLU.
# -----------------------------------------------------------------------------
def _conv_as_dense(w, b, hin, win, stride, pad):
    """w: [Cout, Cin, kh, kw] (PyTorch layout) -> M: [Cin*hin*win, Cout*ho*wo]."""
    w = np.asarray(w, dtype=np.float32)
    b = np.asarray(b, dtype=np.float32)
    cout, cin, kh_, kw_ = w.shape
    ho = (hin + 2 * pad - kh_) // stride + 1
    wo = (win + 2 * pad - kw_) // stride + 1
    mat = np.zeros((cin * hin * win, cout * ho * wo), dtype=np.float32)
    oh = np.arange(ho)
    ow = np.arange(wo)
    for co in range(cout):
        for ci in range(cin):
            for kh in range(kh_):
                ih = stride * oh + kh - pad
                hv = (ih >= 0) & (ih < hin)
                for kw in range(kw_):
                    iw = stride * ow + kw - pad
                    wv = (iw >= 0) & (iw < win)
                    rows = ci * hin * win + ih[hv][:, None] * win + iw[wv][None, :]
                    cols = co * ho * wo + oh[hv][:, None] * wo + ow[wv][None, :]
                    mat[rows, cols] = w[co, ci, kh, kw]
    bias = np.repeat(b, ho * wo)  # NCHW flatten order: channel-major
    return mat, bias, ho, wo


def prepare_params(params):
    m1, b1, h1, w1 = _conv_as_dense(params["conv1_w"], params["conv1_b"], IMG, IMG, 2, 1)  # 784 -> 1568
    m2, b2, h2, w2 = _conv_as_dense(params["conv2_w"], params["conv2_b"], h1, w1, 2, 1)    # 1568 -> 784
    m3, b3, h3, w3 = _conv_as_dense(params["conv3_w"], params["conv3_b"], h2, w2, 2, 0)    # 784 -> 288
    assert (h3, w3) == (3, 3)
    wfc = np.asarray(params["fc1_w"], dtype=np.float32).T   # [288, D], pre-transposed once
    bfc = np.asarray(params["fc1_b"], dtype=np.float32)

    as_row = lambda v: jnp.asarray(np.asarray(v, dtype=np.float32).reshape(1, -1))
    return {
        "m1": jnp.asarray(m1), "b1": as_row(b1),
        "m2": jnp.asarray(m2), "b2": as_row(b2),
        "m3": jnp.asarray(m3), "b3": as_row(b3),
        "wfc": jnp.asarray(wfc), "bfc": as_row(bfc),
    }


# -----------------------------------------------------------------------------
# Fused Pallas kernel: 4 chained GEMMs, everything VMEM-resident.
#   x_ref:  [NB, 784]     (one batch block, flattened NCHW input)
#   m*_ref: dense conv-equivalent matrices, wfc_ref: [288, D]
#   b*_ref: [1, L] biases (broadcast over the batch block)
#   o_ref:  [NB, D]
# -----------------------------------------------------------------------------
def _encoder_kernel(x_ref, m1_ref, b1_ref, m2_ref, b2_ref, m3_ref, b3_ref,
                    wfc_ref, bfc_ref, o_ref):
    h = jnp.dot(x_ref[...], m1_ref[...], preferred_element_type=jnp.float32)
    h = jnp.maximum(h + b1_ref[...], 0.0)   # conv1 + relu1
    h = jnp.dot(h, m2_ref[...], preferred_element_type=jnp.float32)
    h = jnp.maximum(h + b2_ref[...], 0.0)   # conv2 + relu2
    h = jnp.dot(h, m3_ref[...], preferred_element_type=jnp.float32)
    h = jnp.maximum(h + b3_ref[...], 0.0)   # conv3 + relu3 (relu4 is a no-op after this)
    out = jnp.dot(h, wfc_ref[...], preferred_element_type=jnp.float32) + bfc_ref[...]
    o_ref[...] = out.astype(o_ref.dtype)    # fc1 (no output activation)


@functools.partial(jax.jit, static_argnames=("block_n",))
def encoder_forward(prepared, x, block_n=128):
    """x: [N, 1, 28, 28] float32 -> [N, D] float32 (same semantics as Encoder.forward)."""
    n = x.shape[0]
    k_in = IMG * IMG
    x_flat = x.reshape(n, k_in).astype(jnp.float32)          # NCHW flatten (Cin = 1)

    # Batch blocking: parallel grid axis over batch blocks (megacore / 2xTC).
    nb = block_n if n >= block_n else _round_up(max(n, 1), 8)
    n_pad = _round_up(n, nb)
    if n_pad != n:
        x_flat = jnp.pad(x_flat, ((0, n_pad - n), (0, 0)))
    grid = (n_pad // nb,)

    # Weights / biases: whole-array, VMEM-resident (single copy, not pipelined).
    resident = pl.BlockSpec(memory_space=pltpu.MemorySpace.VMEM)

    flops = 2 * n_pad * (784 * 1568 + 1568 * 784 + 784 * 288 + 288 * D)
    bytes_accessed = 4 * (n_pad * (k_in + D)
                          + 784 * 1568 + 1568 * 784 + 784 * 288 + 288 * D)

    out = pl.pallas_call(
        _encoder_kernel,
        out_shape=jax.ShapeDtypeStruct((n_pad, D), jnp.float32),
        grid=grid,
        in_specs=[
            pl.BlockSpec((nb, k_in), lambda i: (i, 0)),       # batch block of inputs
            resident, resident,                               # m1, b1
            resident, resident,                               # m2, b2
            resident, resident,                               # m3, b3
            resident, resident,                               # wfc, bfc
        ],
        out_specs=pl.BlockSpec((nb, D), lambda i: (i, 0)),
        compiler_params=pltpu.CompilerParams(
            dimension_semantics=("parallel",),
            vmem_limit_bytes=40 << 20,   # ~16 MB actually used; safe on v5e/v6e/v7x
        ),
        cost_estimate=pl.CostEstimate(
            flops=flops, transcendentals=0, bytes_accessed=bytes_accessed),
    )(x_flat,
      prepared["m1"], prepared["b1"],
      prepared["m2"], prepared["b2"],
      prepared["m3"], prepared["b3"],
      prepared["wfc"], prepared["bfc"])
    return out[:n]


# -----------------------------------------------------------------------------
# Parameter init (PyTorch-style layouts/initialization) and plain-JAX reference.
# -----------------------------------------------------------------------------
def init_params(key, d=D):
    ks = jax.random.split(key, 8)

    def conv_init(kw_, kb_, cout, cin, k):
        fan_in = cin * k * k
        bound = 1.0 / jnp.sqrt(fan_in)
        w = jax.random.uniform(kw_, (cout, cin, k, k), jnp.float32, -bound, bound)
        b = jax.random.uniform(kb_, (cout,), jnp.float32, -bound, bound)
        return w, b

    def lin_init(kw_, kb_, dout, din):
        bound = 1.0 / jnp.sqrt(din)
        w = jax.random.uniform(kw_, (dout, din), jnp.float32, -bound, bound)
        b = jax.random.uniform(kb_, (dout,), jnp.float32, -bound, bound)
        return w, b

    params = {}
    params["conv1_w"], params["conv1_b"] = conv_init(ks[0], ks[1], 8, 1, 3)
    params["conv2_w"], params["conv2_b"] = conv_init(ks[2], ks[3], 16, 8, 3)
    params["conv3_w"], params["conv3_b"] = conv_init(ks[4], ks[5], 32, 16, 3)
    params["fc1_w"], params["fc1_b"] = lin_init(ks[6], ks[7], d, 3 * 3 * 32)
    return params


def encoder_reference(params, x):
    def conv(x, w, b, stride, pad):
        y = jax.lax.conv_general_dilated(
            x, w, window_strides=(stride, stride),
            padding=[(pad, pad), (pad, pad)],
            dimension_numbers=("NCHW", "OIHW", "NCHW"),
        )
        return y + b.reshape(1, -1, 1, 1)

    x = jnp.maximum(conv(x, params["conv1_w"], params["conv1_b"], 2, 1), 0.0)
    x = jnp.maximum(conv(x, params["conv2_w"], params["conv2_b"], 2, 1), 0.0)
    x = jnp.maximum(conv(x, params["conv3_w"], params["conv3_b"], 2, 0), 0.0)
    flat = jnp.maximum(x.reshape(x.shape[0], -1), 0.0)
    return flat @ params["fc1_w"].T + params["fc1_b"]


if __name__ == "__main__":
    key = jax.random.PRNGKey(0)
    k_params, k_x = jax.random.split(key)
    params = init_params(k_params, d=D)
    prepared = prepare_params(params)

    # Input consistent with fc1(3*3*32): 28x28 single-channel images, batch=2.
    x = jax.random.normal(k_x, (2, 1, IMG, IMG), dtype=jnp.float32)

    out = jax.block_until_ready(encoder_forward(prepared, x))
    ref = jax.block_until_ready(encoder_reference(params, x))

    assert out.shape == (2, D), out.shape
    max_err = float(jnp.max(jnp.abs(out - ref)))
    assert jnp.allclose(out, ref, atol=1e-3, rtol=1e-3), f"mismatch vs reference (max abs err {max_err})"
    print("KERNEL_OK")
</pallas_src>

<mosaic_0001>
module attributes {stable_mosaic.version = 11 : i64} {
  func.func @_encoder_kernel(%arg0: i32, %arg1: memref<8x784xf32, #tpu.memory_space<vmem>>, %arg2: memref<784x1568xf32, #tpu.memory_space<vmem>>, %arg3: memref<1x1568xf32, #tpu.memory_space<vmem>>, %arg4: memref<1568x784xf32, #tpu.memory_space<vmem>>, %arg5: memref<1x784xf32, #tpu.memory_space<vmem>>, %arg6: memref<784x288xf32, #tpu.memory_space<vmem>>, %arg7: memref<1x288xf32, #tpu.memory_space<vmem>>, %arg8: memref<288x15xf32, #tpu.memory_space<vmem>>, %arg9: memref<1x15xf32, #tpu.memory_space<vmem>>, %arg10: memref<8x15xf32, #tpu.memory_space<vmem>>) attributes {dimension_semantics = [#tpu.dimension_semantics<parallel>], iteration_bounds = array<i64: 1>, scalar_prefetch = 0 : i64, scratch_operands = 0 : i64, tpu.core_type = #tpu.core_type<tc>, window_params = [{transform_indices = @transform_0, window_bounds = array<i64: 8, 784>}, {pipeline_mode = #tpu.pipeline_mode<synchronous>, transform_indices = @transform_1, window_bounds = array<i64: 784, 1568>}, {pipeline_mode = #tpu.pipeline_mode<synchronous>, transform_indices = @transform_2, window_bounds = array<i64: 1, 1568>}, {pipeline_mode = #tpu.pipeline_mode<synchronous>, transform_indices = @transform_3, window_bounds = array<i64: 1568, 784>}, {pipeline_mode = #tpu.pipeline_mode<synchronous>, transform_indices = @transform_4, window_bounds = array<i64: 1, 784>}, {pipeline_mode = #tpu.pipeline_mode<synchronous>, transform_indices = @transform_5, window_bounds = array<i64: 784, 288>}, {pipeline_mode = #tpu.pipeline_mode<synchronous>, transform_indices = @transform_6, window_bounds = array<i64: 1, 288>}, {pipeline_mode = #tpu.pipeline_mode<synchronous>, transform_indices = @transform_7, window_bounds = array<i64: 288, 15>}, {pipeline_mode = #tpu.pipeline_mode<synchronous>, transform_indices = @transform_8, window_bounds = array<i64: 1, 15>}, {transform_indices = @transform_9, window_bounds = array<i64: 8, 15>}]} {
    %c0 = arith.constant 0 : index
    %c0_0 = arith.constant 0 : index
    %0 = vector.load %arg1[%c0, %c0_0] : memref<8x784xf32, #tpu.memory_space<vmem>>, vector<8x784xf32>
    %c0_1 = arith.constant 0 : index
    %c0_2 = arith.constant 0 : index
    %1 = vector.load %arg2[%c0_1, %c0_2] : memref<784x1568xf32, #tpu.memory_space<vmem>>, vector<784x1568xf32>
    %cst = arith.constant dense<0.000000e+00> : vector<8x1568xf32>
    %2 = tpu.matmul %0, %1, %cst {dimension_numbers = #tpu.dot_dimension_numbers<[1], [0], [0], [1], [0, 0, 1, 1], [], []>} : vector<8x784xf32>, vector<784x1568xf32>, vector<8x1568xf32> -> vector<8x1568xf32>
    %c0_3 = arith.constant 0 : index
    %c0_4 = arith.constant 0 : index
    %3 = vector.load %arg3[%c0_3, %c0_4] : memref<1x1568xf32, #tpu.memory_space<vmem>>, vector<1x1568xf32>
    %4 = vector.broadcast %3 : vector<1x1568xf32> to vector<8x1568xf32>
    %5 = arith.addf %2, %4 : vector<8x1568xf32>
    %cst_5 = arith.constant 0.000000e+00 : f32
    %6 = vector.broadcast %cst_5 : f32 to vector<8x1568xf32>
    %7 = arith.maximumf %5, %6 : vector<8x1568xf32>
    %c0_6 = arith.constant 0 : index
    %c0_7 = arith.constant 0 : index
    %8 = vector.load %arg4[%c0_6, %c0_7] : memref<1568x784xf32, #tpu.memory_space<vmem>>, vector<1568x784xf32>
    %cst_8 = arith.constant dense<0.000000e+00> : vector<8x784xf32>
    %9 = tpu.matmul %7, %8, %cst_8 {dimension_numbers = #tpu.dot_dimension_numbers<[1], [0], [0], [1], [0, 0, 1, 1], [], []>} : vector<8x1568xf32>, vector<1568x784xf32>, vector<8x784xf32> -> vector<8x784xf32>
    %c0_9 = arith.constant 0 : index
    %c0_10 = arith.constant 0 : index
    %10 = vector.load %arg5[%c0_9, %c0_10] : memref<1x784xf32, #tpu.memory_space<vmem>>, vector<1x784xf32>
    %11 = vector.broadcast %10 : vector<1x784xf32> to vector<8x784xf32>
    %12 = arith.addf %9, %11 : vector<8x784xf32>
    %cst_11 = arith.constant 0.000000e+00 : f32
    %13 = vector.broadcast %cst_11 : f32 to vector<8x784xf32>
    %14 = arith.maximumf %12, %13 : vector<8x784xf32>
    %c0_12 = arith.constant 0 : index
    %c0_13 = arith.constant 0 : index
    %15 = vector.load %arg6[%c0_12, %c0_13] : memref<784x288xf32, #tpu.memory_space<vmem>>, vector<784x288xf32>
    %cst_14 = arith.constant dense<0.000000e+00> : vector<8x288xf32>
    %16 = tpu.matmul %14, %15, %cst_14 {dimension_numbers = #tpu.dot_dimension_numbers<[1], [0], [0], [1], [0, 0, 1, 1], [], []>} : vector<8x784xf32>, vector<784x288xf32>, vector<8x288xf32> -> vector<8x288xf32>
    %c0_15 = arith.constant 0 : index
    %c0_16 = arith.constant 0 : index
    %17 = vector.load %arg7[%c0_15, %c0_16] : memref<1x288xf32, #tpu.memory_space<vmem>>, vector<1x288xf32>
    %18 = vector.broadcast %17 : vector<1x288xf32> to vector<8x288xf32>
    %19 = arith.addf %16, %18 : vector<8x288xf32>
    %cst_17 = arith.constant 0.000000e+00 : f32
    %20 = vector.broadcast %cst_17 : f32 to vector<8x288xf32>
    %21 = arith.maximumf %19, %20 : vector<8x288xf32>
    %c0_18 = arith.constant 0 : index
    %c0_19 = arith.constant 0 : index
    %22 = vector.load %arg8[%c0_18, %c0_19] : memref<288x15xf32, #tpu.memory_space<vmem>>, vector<288x15xf32>
    %cst_20 = arith.constant dense<0.000000e+00> : vector<8x15xf32>
    %23 = tpu.matmul %21, %22, %cst_20 {dimension_numbers = #tpu.dot_dimension_numbers<[1], [0], [0], [1], [0, 0, 1, 1], [], []>} : vector<8x288xf32>, vector<288x15xf32>, vector<8x15xf32> -> vector<8x15xf32>
    %c0_21 = arith.constant 0 : index
    %c0_22 = arith.constant 0 : index
    %24 = vector.load %arg9[%c0_21, %c0_22] : memref<1x15xf32, #tpu.memory_space<vmem>>, vector<1x15xf32>
    %25 = vector.broadcast %24 : vector<1x15xf32> to vector<8x15xf32>
    %26 = arith.addf %23, %25 : vector<8x15xf32>
    %c0_23 = arith.constant 0 : index
    %c0_24 = arith.constant 0 : index
    %27 = vector.load %arg10[%c0_23, %c0_24] : memref<8x15xf32, #tpu.memory_space<vmem>>, vector<8x15xf32>
    tpu.vector_store %arg10[%c0_23, %c0_24], %26 {strides = array<i32>} : memref<8x15xf32, #tpu.memory_space<vmem>>, vector<8x15xf32>,
    return
  }
  func.func @transform_0(%arg0: i32) -> (i32, i32) {
    %c0_i32 = arith.constant 0 : i32
    %c0_i32_0 = arith.constant 0 : i32
    return %arg0, %c0_i32 : i32, i32
  }
  func.func @transform_1(%arg0: i32) -> (i32, i32) {
    %c0_i32 = arith.constant 0 : i32
    %c0_i32_0 = arith.constant 0 : i32
    %c0_i32_1 = arith.constant 0 : i32
    return %c0_i32, %c0_i32_0 : i32, i32
  }
  func.func @transform_2(%arg0: i32) -> (i32, i32) {
    %c0_i32 = arith.constant 0 : i32
    %c0_i32_0 = arith.constant 0 : i32
    %c0_i32_1 = arith.constant 0 : i32
    return %c0_i32, %c0_i32_0 : i32, i32
  }
  func.func @transform_3(%arg0: i32) -> (i32, i32) {
    %c0_i32 = arith.constant 0 : i32
    %c0_i32_0 = arith.constant 0 : i32
    %c0_i32_1 = arith.constant 0 : i32
    return %c0_i32, %c0_i32_0 : i32, i32
  }
  func.func @transform_4(%arg0: i32) -> (i32, i32) {
    %c0_i32 = arith.constant 0 : i32
    %c0_i32_0 = arith.constant 0 : i32
    %c0_i32_1 = arith.constant 0 : i32
    return %c0_i32, %c0_i32_0 : i32, i32
  }
  func.func @transform_5(%arg0: i32) -> (i32, i32) {
    %c0_i32 = arith.constant 0 : i32
    %c0_i32_0 = arith.constant 0 : i32
    %c0_i32_1 = arith.constant 0 : i32
    return %c0_i32, %c0_i32_0 : i32, i32
  }
  func.func @transform_6(%arg0: i32) -> (i32, i32) {
    %c0_i32 = arith.constant 0 : i32
    %c0_i32_0 = arith.constant 0 : i32
    %c0_i32_1 = arith.constant 0 : i32
    return %c0_i32, %c0_i32_0 : i32, i32
  }
  func.func @transform_7(%arg0: i32) -> (i32, i32) {
    %c0_i32 = arith.constant 0 : i32
    %c0_i32_0 = arith.constant 0 : i32
    %c0_i32_1 = arith.constant 0 : i32
    return %c0_i32, %c0_i32_0 : i32, i32
  }
  func.func @transform_8(%arg0: i32) -> (i32, i32) {
    %c0_i32 = arith.constant 0 : i32
    %c0_i32_0 = arith.constant 0 : i32
    %c0_i32_1 = arith.constant 0 : i32
    return %c0_i32, %c0_i32_0 : i32, i32
  }
  func.func @transform_9(%arg0: i32) -> (i32, i32) {
    %c0_i32 = arith.constant 0 : i32
    %c0_i32_0 = arith.constant 0 : i32
    return %arg0, %c0_i32 : i32, i32
  }
}

</mosaic_0001>

<bundles_post_ra>
// kernel: encoder_forward.1
= control target key start
LH: loop header
LB: loop body
LE: loop exit
PB: predicated region body
PF: predicated region fallthrough
CT: control target
= control target key end

     0   :  { %vm1382_vm0 = vcmask 130048   ;;  %vm11483_vm1 = vmmov 0   ;;  %vm4792_vm2 = vcmask 261120   ;;  %vm7851_vm3 = vcmask 121856   ;;  %s20877_s1 = inlined_call_operand.vmem [shape: f32[784,1568], index: 1, kind: input, shape index: {}]   ;;  %s20878_s0 = inlined_call_operand.vmem [shape: f32[8,784], index: 0, kind: input, shape index: {}]   ;;  %s20879_s2 = inlined_call_operand.vmem [shape: f32[1,1568], index: 2, kind: input, shape index: {}]   ;;  %s20880_s3 = inlined_call_operand.vmem [shape: f32[1568,784], index: 3, kind: input, shape index: {}]   ;;  %s20881_s4 = inlined_call_operand.vmem [shape: f32[1,784], index: 4, kind: input, shape index: {}]   ;;  %s20882_s5 = inlined_call_operand.vmem [shape: f32[784,288], index: 5, kind: input, shape index: {}]   ;;  %s20883_s7 = inlined_call_operand.vmem [shape: f32[288,15], index: 7, kind: input, shape index: {}]   ;;  %s20884_s6 = inlined_call_operand.vmem [shape: f32[1,288], index: 6, kind: input, shape index: {}]   ;;  %s20885_s8 = inlined_call_operand.vmem [shape: f32[1,15], index: 8, kind: input, shape index: {}]   ;;  %s20886_s9 = inlined_call_operand.vmem [shape: f32[8,15], index: 9, kind: output, shape index: {}]  }
   0x1   :  { %v40_v0 = vld [vmem:[%s20877_s1 + $0x8] sm:$0xff]  ;;  %v53_v1 = vld [vmem:[%s20877_s1 + $0x70] sm:$0xff]  ;;  %v42_v2 = vld [vmem:[%s20877_s1 + $0x18] sm:$0xff] }
   0x2   :  { %v8379_v3 = vpack.c.bf16 %v53_v1, %v40_v0  ;;  %v55_v4 = vld [vmem:[%s20877_s1 + $0x80] sm:$0xff]  ;;  %v52_v6 = vld [vmem:[%s20877_s1 + $0x68] sm:$0xff]  ;;  %v41_v9 = vld [vmem:[%s20877_s1 + $0x10] sm:$0xff] }
   0x3   :  { %v39_v5 = vld [vmem:[%s20877_s1] sm:$0xff]  ;;  %v8575_v7 = vpack.c.bf16 %v55_v4, %v42_v2  ;;  %v54_v10 = vld [vmem:[%s20877_s1 + $0x78] sm:$0xff]  ;;  %v68_v14 = vld [vmem:[%s20877_s1 + $0xe8] sm:$0xff] }
   0x4   :  { %v8381_v8 = vpack.c.bf16 %v52_v6, %v39_v5  ;;  %v66_v11 = vld [vmem:[%s20877_s1 + $0xd8] sm:$0xff]  ;;  %8380 = vmatprep.subr.bf16.mxu0 %v8379_v3  ;;  %v8577_v12 = vpack.c.bf16 %v54_v10, %v41_v9  ;;  %v79_v13 = vld [vmem:[%s20877_s1 + $0x140] sm:$0xff]  ;;  %v81_v15 = vld [vmem:[%s20877_s1 + $0x150] sm:$0xff] }
   0x5   :  { %8576 = vmatprep.subr.bf16.mxu1 %v8575_v7  ;;  %v8383_v16 = vpack.c.bf16 %v79_v13, %v66_v11  ;;  %v8579_v17 = vpack.c.bf16 %v81_v15, %v68_v14  ;;  %v65_v18 = vld [vmem:[%s20877_s1 + $0xd0] sm:$0xff]  ;;  %v78_v19 = vld [vmem:[%s20877_s1 + $0x138] sm:$0xff]  ;;  %v67_v20 = vld [vmem:[%s20877_s1 + $0xe0] sm:$0xff] }
   0x6   :  { %8382 = vmatpush1.bf16.msra.mxu0 %v8381_v8  ;;  %8578 = vmatpush1.bf16.msra.mxu1 %v8577_v12  ;;  %v8385_v21 = vpack.c.bf16 %v78_v19, %v65_v18  ;;  %v80_v22 = vld [vmem:[%s20877_s1 + $0x148] sm:$0xff]  ;;  %v105_v24 = vld [vmem:[%s20877_s1 + $0x210] sm:$0xff]  ;;  %v94_v27 = vld [vmem:[%s20877_s1 + $0x1b8] sm:$0xff] }
   0x7   :  { %v92_v23 = vld [vmem:[%s20877_s1 + $0x1a8] sm:$0xff]  ;;  %8384 = vmatprep.subr.bf16.mxu0 %v8383_v16  ;;  %8580 = vmatprep.subr.bf16.mxu1 %v8579_v17  ;;  %v8581_v25 = vpack.c.bf16 %v80_v22, %v67_v20  ;;  %v107_v28 = vld [vmem:[%s20877_s1 + $0x220] sm:$0xff]  ;;  %v93_v32 = vld [vmem:[%s20877_s1 + $0x1b0] sm:$0xff] }
   0x8   :  { %v8387_v26 = vpack.c.bf16 %v105_v24, %v92_v23  ;;  %v91_v29 = vld [vmem:[%s20877_s1 + $0x1a0] sm:$0xff]  ;;  %v8583_v30 = vpack.c.bf16 %v107_v28, %v94_v27  ;;  %v104_v31 = vld [vmem:[%s20877_s1 + $0x208] sm:$0xff]  ;;  %v106_v33 = vld [vmem:[%s20877_s1 + $0x218] sm:$0xff] }
   0x9   :  { %v8389_v34 = vpack.c.bf16 %v104_v31, %v91_v29  ;;  %v118_v35 = vld [vmem:[%s20877_s1 + $0x278] sm:$0xff]  ;;  %v131_v36 = vld [vmem:[%s20877_s1 + $0x2e0] sm:$0xff]  ;;  %v120_v37 = vld [vmem:[%s20877_s1 + $0x288] sm:$0xff]  ;;  %v8585_v38 = vpack.c.bf16 %v106_v33, %v93_v32 }
   0xa   :  { %8386 = vmatpush1.bf16.msra.mxu0 %v8385_v21  ;;  %8582 = vmatpush1.bf16.msra.mxu1 %v8581_v25  ;;  %v8391_v39 = vpack.c.bf16 %v131_v36, %v118_v35  ;;  %v133_v40 = vld [vmem:[%s20877_s1 + $0x2f0] sm:$0xff]  ;;  %v130_v42 = vld [vmem:[%s20877_s1 + $0x2d8] sm:$0xff]  ;;  %v119_v44 = vld [vmem:[%s20877_s1 + $0x280] sm:$0xff] }
   0xb   :  { %8388 = vmatprep.subr.bf16.mxu0 %v8387_v26  ;;  %v117_v41 = vld [vmem:[%s20877_s1 + $0x270] sm:$0xff]  ;;  %8584 = vmatprep.subr.bf16.mxu1 %v8583_v30  ;;  %v8587_v43 = vpack.c.bf16 %v133_v40, %v120_v37  ;;  %v132_v45 = vld [vmem:[%s20877_s1 + $0x2e8] sm:$0xff]  ;;  %v146_v48 = vld [vmem:[%s20877_s1 + $0x358] sm:$0xff] }
   0xc   :  { %v144_v46 = vld [vmem:[%s20877_s1 + $0x348] sm:$0xff]  ;;  %v157_v47 = vld [vmem:[%s20877_s1 + $0x3b0] sm:$0xff]  ;;  %v159_v49 = vld [vmem:[%s20877_s1 + $0x3c0] sm:$0xff]  ;;  %v8393_v50 = vpack.c.bf16 %v130_v42, %v117_v41  ;;  %v8589_v51 = vpack.c.bf16 %v132_v45, %v119_v44 }
   0xd   :  { %v8395_v52 = vpack.c.bf16 %v157_v47, %v144_v46  ;;  %v143_v53 = vld [vmem:[%s20877_s1 + $0x340] sm:$0xff]  ;;  %v156_v54 = vld [vmem:[%s20877_s1 + $0x3a8] sm:$0xff]  ;;  %v145_v55 = vld [vmem:[%s20877_s1 + $0x350] sm:$0xff]  ;;  %v8591_v56 = vpack.c.bf16 %v159_v49, %v146_v48 }
   0xe   :  { %8390 = vmatpush1.bf16.msra.mxu0 %v8389_v34  ;;  %8586 = vmatpush1.bf16.msra.mxu1 %v8585_v38  ;;  %v158_v57 = vld [vmem:[%s20877_s1 + $0x3b8] sm:$0xff]  ;;  %v183_v59 = vld [vmem:[%s20877_s1 + $0x480] sm:$0xff]  ;;  %v172_v60 = vld [vmem:[%s20877_s1 + $0x428] sm:$0xff]  ;;  %v8397_v62 = vpack.c.bf16 %v156_v54, %v143_v53 }
   0xf   :  { %8392 = vmatprep.subr.bf16.mxu0 %v8391_v39  ;;  %8588 = vmatprep.subr.bf16.mxu1 %v8587_v43  ;;  %v170_v58 = vld [vmem:[%s20877_s1 + $0x418] sm:$0xff]  ;;  %v185_v61 = vld [vmem:[%s20877_s1 + $0x490] sm:$0xff]  ;;  %v8593_v63 = vpack.c.bf16 %v158_v57, %v145_v55  ;;  %v171_v3 = vld [vmem:[%s20877_s1 + $0x420] sm:$0xff] }
  0x10   :  { %v8399_v0 = vpack.c.bf16 %v183_v59, %v170_v58  ;;  %v169_v1 = vld [vmem:[%s20877_s1 + $0x410] sm:$0xff]  ;;  %v182_v2 = vld [vmem:[%s20877_s1 + $0x478] sm:$0xff]  ;;  %v8595_v4 = vpack.c.bf16 %v185_v61, %v172_v60  ;;  %v184_v5 = vld [vmem:[%s20877_s1 + $0x488] sm:$0xff] }
  0x11   :  { %v196_v6 = vld [vmem:[%s20877_s1 + $0x4e8] sm:$0xff]  ;;  %v209_v7 = vld [vmem:[%s20877_s1 + $0x550] sm:$0xff]  ;;  %v198_v8 = vld [vmem:[%s20877_s1 + $0x4f8] sm:$0xff]  ;;  %v8401_v10 = vpack.c.bf16 %v182_v2, %v169_v1  ;;  %v8597_v11 = vpack.c.bf16 %v184_v5, %v171_v3 }
  0x12   :  { %8394 = vmatpush1.bf16.msra.mxu0 %v8393_v50  ;;  %8590 = vmatpush1.bf16.msra.mxu1 %v8589_v51  ;;  %v211_v9 = vld [vmem:[%s20877_s1 + $0x560] sm:$0xff]  ;;  %v8403_v12 = vpack.c.bf16 %v209_v7, %v196_v6  ;;  %v208_v14 = vld [vmem:[%s20877_s1 + $0x548] sm:$0xff]  ;;  %v197_v15 = vld [vmem:[%s20877_s1 + $0x4f0] sm:$0xff] }
  0x13   :  { %8396 = vmatprep.subr.bf16.mxu0 %v8395_v52  ;;  %8592 = vmatprep.subr.bf16.mxu1 %v8591_v56  ;;  %v195_v13 = vld [vmem:[%s20877_s1 + $0x4e0] sm:$0xff]  ;;  %v8599_v16 = vpack.c.bf16 %v211_v9, %v198_v8  ;;  %v210_v17 = vld [vmem:[%s20877_s1 + $0x558] sm:$0xff]  ;;  %v224_v20 = vld [vmem:[%s20877_s1 + $0x5c8] sm:$0xff] }
  0x14   :  { %v222_v18 = vld [vmem:[%s20877_s1 + $0x5b8] sm:$0xff]  ;;  %v235_v19 = vld [vmem:[%s20877_s1 + $0x620] sm:$0xff]  ;;  %v237_v21 = vld [vmem:[%s20877_s1 + $0x630] sm:$0xff]  ;;  %v8405_v22 = vpack.c.bf16 %v208_v14, %v195_v13  ;;  %v8601_v23 = vpack.c.bf16 %v210_v17, %v197_v15 }
  0x15   :  { %v8407_v24 = vpack.c.bf16 %v235_v19, %v222_v18  ;;  %v221_v25 = vld [vmem:[%s20877_s1 + $0x5b0] sm:$0xff]  ;;  %v234_v26 = vld [vmem:[%s20877_s1 + $0x618] sm:$0xff]  ;;  %v223_v27 = vld [vmem:[%s20877_s1 + $0x5c0] sm:$0xff]  ;;  %v8603_v28 = vpack.c.bf16 %v237_v21, %v224_v20 }
  0x16   :  { %8398 = vmatpush1.bf16.msra.mxu0 %v8397_v62  ;;  %8594 = vmatpush1.bf16.msra.mxu1 %v8593_v63  ;;  %v236_v29 = vld [vmem:[%s20877_s1 + $0x628] sm:$0xff]  ;;  %v261_v31 = vld [vmem:[%s20877_s1 + $0x6f0] sm:$0xff]  ;;  %v250_v32 = vld [vmem:[%s20877_s1 + $0x698] sm:$0xff]  ;;  %v8409_v34 = vpack.c.bf16 %v234_v26, %v221_v25 }
  0x17   :  { %8400 = vmatprep.subr.bf16.mxu0 %v8399_v0  ;;  %8596 = vmatprep.subr.bf16.mxu1 %v8595_v4  ;;  %v248_v30 = vld [vmem:[%s20877_s1 + $0x688] sm:$0xff]  ;;  %v263_v33 = vld [vmem:[%s20877_s1 + $0x700] sm:$0xff]  ;;  %v8605_v35 = vpack.c.bf16 %v236_v29, %v223_v27  ;;  %v249_v39 = vld [vmem:[%s20877_s1 + $0x690] sm:$0xff] }
  0x18   :  { %v8411_v36 = vpack.c.bf16 %v261_v31, %v248_v30  ;;  %v247_v37 = vld [vmem:[%s20877_s1 + $0x680] sm:$0xff]  ;;  %v260_v38 = vld [vmem:[%s20877_s1 + $0x6e8] sm:$0xff]  ;;  %v8607_v40 = vpack.c.bf16 %v263_v33, %v250_v32  ;;  %v262_v41 = vld [vmem:[%s20877_s1 + $0x6f8] sm:$0xff] }
  0x19   :  { %v274_v42 = vld [vmem:[%s20877_s1 + $0x758] sm:$0xff]  ;;  %v287_v43 = vld [vmem:[%s20877_s1 + $0x7c0] sm:$0xff]  ;;  %v276_v44 = vld [vmem:[%s20877_s1 + $0x768] sm:$0xff]  ;;  %v8413_v46 = vpack.c.bf16 %v260_v38, %v247_v37  ;;  %v8609_v47 = vpack.c.bf16 %v262_v41, %v249_v39 }
  0x1a   :  { %8402 = vmatpush1.bf16.msra.mxu0 %v8401_v10  ;;  %8598 = vmatpush1.bf16.msra.mxu1 %v8597_v11  ;;  %v289_v45 = vld [vmem:[%s20877_s1 + $0x7d0] sm:$0xff]  ;;  %v8415_v48 = vpack.c.bf16 %v287_v43, %v274_v42  ;;  %v286_v50 = vld [vmem:[%s20877_s1 + $0x7b8] sm:$0xff]  ;;  %v275_v51 = vld [vmem:[%s20877_s1 + $0x760] sm:$0xff] }
  0x1b   :  { %8404 = vmatprep.subr.bf16.mxu0 %v8403_v12  ;;  %8600 = vmatprep.subr.bf16.mxu1 %v8599_v16  ;;  %v273_v49 = vld [vmem:[%s20877_s1 + $0x750] sm:$0xff]  ;;  %v8611_v52 = vpack.c.bf16 %v289_v45, %v276_v44  ;;  %v288_v53 = vld [vmem:[%s20877_s1 + $0x7c8] sm:$0xff]  ;;  %v302_v56 = vld [vmem:[%s20877_s1 + $0x838] sm:$0xff] }
  0x1c   :  { %v300_v54 = vld [vmem:[%s20877_s1 + $0x828] sm:$0xff]  ;;  %v313_v55 = vld [vmem:[%s20877_s1 + $0x890] sm:$0xff]  ;;  %v315_v57 = vld [vmem:[%s20877_s1 + $0x8a0] sm:$0xff]  ;;  %v8417_v58 = vpack.c.bf16 %v286_v50, %v273_v49  ;;  %v8613_v59 = vpack.c.bf16 %v288_v53, %v275_v51 }
  0x1d   :  { %v8419_v60 = vpack.c.bf16 %v313_v55, %v300_v54  ;;  %v299_v61 = vld [vmem:[%s20877_s1 + $0x820] sm:$0xff]  ;;  %v312_v62 = vld [vmem:[%s20877_s1 + $0x888] sm:$0xff]  ;;  %v301_v63 = vld [vmem:[%s20877_s1 + $0x830] sm:$0xff]  ;;  %v8615_v0 = vpack.c.bf16 %v315_v57, %v302_v56 }
  0x1e   :  { %8406 = vmatpush1.bf16.msra.mxu0 %v8405_v22  ;;  %8602 = vmatpush1.bf16.msra.mxu1 %v8601_v23  ;;  %v314_v1 = vld [vmem:[%s20877_s1 + $0x898] sm:$0xff]  ;;  %v339_v3 = vld [vmem:[%s20877_s1 + $0x960] sm:$0xff]  ;;  %v328_v4 = vld [vmem:[%s20877_s1 + $0x908] sm:$0xff]  ;;  %v8421_v6 = vpack.c.bf16 %v312_v62, %v299_v61 }
  0x1f   :  { %8408 = vmatprep.subr.bf16.mxu0 %v8407_v24  ;;  %8604 = vmatprep.subr.bf16.mxu1 %v8603_v28  ;;  %v326_v2 = vld [vmem:[%s20877_s1 + $0x8f8] sm:$0xff]  ;;  %v341_v5 = vld [vmem:[%s20877_s1 + $0x970] sm:$0xff]  ;;  %v8617_v8 = vpack.c.bf16 %v314_v1, %v301_v63  ;;  %v327_v11 = vld [vmem:[%s20877_s1 + $0x900] sm:$0xff] }
  0x20   :  { %v325_v7 = vld [vmem:[%s20877_s1 + $0x8f0] sm:$0xff]  ;;  %v8423_v9 = vpack.c.bf16 %v339_v3, %v326_v2  ;;  %v338_v10 = vld [vmem:[%s20877_s1 + $0x958] sm:$0xff]  ;;  %v340_v12 = vld [vmem:[%s20877_s1 + $0x968] sm:$0xff]  ;;  %v8619_v13 = vpack.c.bf16 %v341_v5, %v328_v4 }
  0x21   :  { %v352_v14 = vld [vmem:[%s20877_s1 + $0x9c8] sm:$0xff]  ;;  %v365_v15 = vld [vmem:[%s20877_s1 + $0xa30] sm:$0xff]  ;;  %v354_v17 = vld [vmem:[%s20877_s1 + $0x9d8] sm:$0xff]  ;;  %v8425_v19 = vpack.c.bf16 %v338_v10, %v325_v7  ;;  %v8621_v20 = vpack.c.bf16 %v340_v12, %v327_v11 }
  0x22   :  { %8410 = vmatpush1.bf16.msra.mxu0 %v8409_v34  ;;  %8606 = vmatpush1.bf16.msra.mxu1 %v8605_v35  ;;  %v33_v16 = vld [vmem:[%s20878_s0 + $0x8] sm:$0xff]  ;;  %v367_v18 = vld [vmem:[%s20877_s1 + $0xa40] sm:$0xff]  ;;  %v8427_v21 = vpack.c.bf16 %v365_v15, %v352_v14  ;;  %v353_v24 = vld [vmem:[%s20877_s1 + $0x9d0] sm:$0xff] }
  0x23   :  { %8412 = vmatprep.subr.bf16.mxu0 %v8411_v36  ;;  %8608 = vmatprep.subr.bf16.mxu1 %v8607_v40  ;;  %v351_v22 = vld [vmem:[%s20877_s1 + $0x9c0] sm:$0xff]  ;;  %v364_v23 = vld [vmem:[%s20877_s1 + $0xa28] sm:$0xff]  ;;  %v8623_v25 = vpack.c.bf16 %v367_v18, %v354_v17  ;;  %v366_v26 = vld [vmem:[%s20877_s1 + $0xa38] sm:$0xff] }
  0x24   :  { %1450 = vmatprep.mubr.f32.mxu0 %v33_v16  ;;  %1734 = vmatprep.mubr.f32.mxu1 %v33_v16  ;;  %v378_v27 = vld [vmem:[%s20877_s1 + $0xa98] sm:$0xff]  ;;  %v391_v28 = vld [vmem:[%s20877_s1 + $0xb00] sm:$0xff]  ;;  %v380_v29 = vld [vmem:[%s20877_s1 + $0xaa8] sm:$0xff]  ;;  %v8429_v31 = vpack.c.bf16 %v364_v23, %v351_v22  ;;  %v8625_v32 = vpack.c.bf16 %v366_v26, %v353_v24 }
  0x25   :  { %v393_v30 = vld [vmem:[%s20877_s1 + $0xb10] sm:$0xff]  ;;  %v8431_v33 = vpack.c.bf16 %v391_v28, %v378_v27  ;;  %v390_v35 = vld [vmem:[%s20877_s1 + $0xaf8] sm:$0xff]  ;;  %v379_v36 = vld [vmem:[%s20877_s1 + $0xaa0] sm:$0xff] }
  0x26   :  { %8414 = vmatpush1.bf16.msra.mxu0 %v8413_v46  ;;  %8610 = vmatpush1.bf16.msra.mxu1 %v8609_v47  ;;  %v377_v34 = vld [vmem:[%s20877_s1 + $0xa90] sm:$0xff]  ;;  %v8627_v37 = vpack.c.bf16 %v393_v30, %v380_v29  ;;  %v392_v38 = vld [vmem:[%s20877_s1 + $0xb08] sm:$0xff]  ;;  %v406_v41 = vld [vmem:[%s20877_s1 + $0xb78] sm:$0xff] }
  0x27   :  { %8416 = vmatprep.subr.bf16.mxu0 %v8415_v48  ;;  %8612 = vmatprep.subr.bf16.mxu1 %v8611_v52  ;;  %v404_v39 = vld [vmem:[%s20877_s1 + $0xb68] sm:$0xff]  ;;  %v417_v40 = vld [vmem:[%s20877_s1 + $0xbd0] sm:$0xff]  ;;  %v419_v42 = vld [vmem:[%s20877_s1 + $0xbe0] sm:$0xff]  ;;  %v8433_v43 = vpack.c.bf16 %v390_v35, %v377_v34  ;;  %v8629_v44 = vpack.c.bf16 %v392_v38, %v379_v36 }
  0x28   :  { %v8435_v45 = vpack.c.bf16 %v417_v40, %v404_v39  ;;  %v403_v46 = vld [vmem:[%s20877_s1 + $0xb60] sm:$0xff]  ;;  %v416_v47 = vld [vmem:[%s20877_s1 + $0xbc8] sm:$0xff]  ;;  %v405_v48 = vld [vmem:[%s20877_s1 + $0xb70] sm:$0xff]  ;;  %v8631_v49 = vpack.c.bf16 %v419_v42, %v406_v41 }
  0x29   :  { %v418_v50 = vld [vmem:[%s20877_s1 + $0xbd8] sm:$0xff]  ;;  %v443_v52 = vld [vmem:[%s20877_s1 + $0xca0] sm:$0xff]  ;;  %v432_v53 = vld [vmem:[%s20877_s1 + $0xc48] sm:$0xff]  ;;  %v8437_v55 = vpack.c.bf16 %v416_v47, %v403_v46 }
  0x2a   :  { %8418 = vmatpush1.bf16.msra.mxu0 %v8417_v58  ;;  %8614 = vmatpush1.bf16.msra.mxu1 %v8613_v59  ;;  %v430_v51 = vld [vmem:[%s20877_s1 + $0xc38] sm:$0xff]  ;;  %v445_v54 = vld [vmem:[%s20877_s1 + $0xcb0] sm:$0xff]  ;;  %v8633_v56 = vpack.c.bf16 %v418_v50, %v405_v48  ;;  %v444_v62 = vld [vmem:[%s20877_s1 + $0xca8] sm:$0xff] }
  0x2b   :  { %8420 = vmatprep.subr.bf16.mxu0 %v8419_v60  ;;  %8616 = vmatprep.subr.bf16.mxu1 %v8615_v0  ;;  %v8439_v57 = vpack.c.bf16 %v443_v52, %v430_v51  ;;  %v429_v58 = vld [vmem:[%s20877_s1 + $0xc30] sm:$0xff]  ;;  %v442_v59 = vld [vmem:[%s20877_s1 + $0xc98] sm:$0xff]  ;;  %v431_v60 = vld [vmem:[%s20877_s1 + $0xc40] sm:$0xff]  ;;  %v8635_v61 = vpack.c.bf16 %v445_v54, %v432_v53 }
  0x2c   :  { %v456_v63 = vld [vmem:[%s20877_s1 + $0xd08] sm:$0xff]  ;;  %v469_v0 = vld [vmem:[%s20877_s1 + $0xd70] sm:$0xff]  ;;  %v458_v1 = vld [vmem:[%s20877_s1 + $0xd18] sm:$0xff]  ;;  %v8441_v3 = vpack.c.bf16 %v442_v59, %v429_v58  ;;  %v8637_v4 = vpack.c.bf16 %v444_v62, %v431_v60 }
  0x2d   :  { %v471_v2 = vld [vmem:[%s20877_s1 + $0xd80] sm:$0xff]  ;;  %v8443_v5 = vpack.c.bf16 %v469_v0, %v456_v63  ;;  %v468_v7 = vld [vmem:[%s20877_s1 + $0xd68] sm:$0xff]  ;;  %v470_v10 = vld [vmem:[%s20877_s1 + $0xd78] sm:$0xff] }
  0x2e   :  { %8422 = vmatpush1.bf16.msra.mxu0 %v8421_v6  ;;  %8618 = vmatpush1.bf16.msra.mxu1 %v8617_v8  ;;  %v455_v6 = vld [vmem:[%s20877_s1 + $0xd00] sm:$0xff]  ;;  %v457_v8 = vld [vmem:[%s20877_s1 + $0xd10] sm:$0xff]  ;;  %v482_v11 = vld [vmem:[%s20877_s1 + $0xdd8] sm:$0xff] }
  0x2f   :  { %8424 = vmatprep.subr.bf16.mxu0 %v8423_v9  ;;  %8620 = vmatprep.subr.bf16.mxu1 %v8619_v13  ;;  %v8639_v9 = vpack.c.bf16 %v471_v2, %v458_v1  ;;  %v495_v12 = vld [vmem:[%s20877_s1 + $0xe40] sm:$0xff]  ;;  %v484_v13 = vld [vmem:[%s20877_s1 + $0xde8] sm:$0xff]  ;;  %v497_v14 = vld [vmem:[%s20877_s1 + $0xe50] sm:$0xff]  ;;  %v8445_v16 = vpack.c.bf16 %v468_v7, %v455_v6  ;;  %v8641_v17 = vpack.c.bf16 %v470_v10, %v457_v8 }
  0x30   :  { %v32_v15 = vld [vmem:[%s20878_s0] sm:$0xff]  ;;  %v8447_v18 = vpack.c.bf16 %v495_v12, %v482_v11  ;;  %v8643_v22 = vpack.c.bf16 %v497_v14, %v484_v13  ;;  %v496_v23 = vld [vmem:[%s20877_s1 + $0xe48] sm:$0xff]  ;;  %v510_v26 = vld [vmem:[%s20877_s1 + $0xeb8] sm:$0xff] }
  0x31   :  { %v508_v24 = vld [vmem:[%s20877_s1 + $0xea8] sm:$0xff]  ;;  %v523_v27 = vld [vmem:[%s20877_s1 + $0xf20] sm:$0xff]  ;;  %v522_v35 = vld [vmem:[%s20877_s1 + $0xf18] sm:$0xff] }
  0x32   :  { %8426 = vmatpush1.bf16.msra.mxu0 %v8425_v19  ;;  %8622 = vmatpush1.bf16.msra.mxu1 %v8621_v20  ;;  %v481_v19 = vld [vmem:[%s20877_s1 + $0xdd0] sm:$0xff]  ;;  %v494_v20 = vld [vmem:[%s20877_s1 + $0xe38] sm:$0xff]  ;;  %v8647_v34 = vpack.c.bf16 %v523_v27, %v510_v26  ;;  %v536_v38 = vld [vmem:[%s20877_s1 + $0xf88] sm:$0xff] }
  0x33   :  { %8428 = vmatprep.subr.bf16.mxu0 %v8427_v21  ;;  %8624 = vmatprep.subr.bf16.mxu1 %v8623_v25  ;;  %v483_v21 = vld [vmem:[%s20877_s1 + $0xde0] sm:$0xff]  ;;  %v521_v25 = vld [vmem:[%s20877_s1 + $0xf10] sm:$0xff]  ;;  %v8449_v28 = vpack.c.bf16 %v494_v20, %v481_v19  ;;  %v534_v36 = vld [vmem:[%s20877_s1 + $0xf78] sm:$0xff] }
  0x34   :  { %v8645_v29 = vpack.c.bf16 %v496_v23, %v483_v21  ;;  %v8451_v30 = vpack.c.bf16 %v521_v25, %v508_v24  ;;  %v549_v39 = vld [vmem:[%s20877_s1 + $0xff0] sm:$0xff]  ;;  %v548_v47 = vld [vmem:[%s20877_s1 + $0xfe8] sm:$0xff]  ;;  %v562_v50 = vld [vmem:[%s20877_s1 + $0x1058] sm:$0xff] }
  0x35   :  { %v8651_v46 = vpack.c.bf16 %v549_v39, %v536_v38  ;;  %v560_v48 = vld [vmem:[%s20877_s1 + $0x1048] sm:$0xff]  ;;  %v575_v51 = vld [vmem:[%s20877_s1 + $0x10c0] sm:$0xff]  ;;  %v574_v59 = vld [vmem:[%s20877_s1 + $0x10b8] sm:$0xff] }
  0x36   :  { %8430 = vmatpush1.bf16.msra.mxu0 %v8429_v31  ;;  %8626 = vmatpush1.bf16.msra.mxu1 %v8625_v32  ;;  %v507_v31 = vld [vmem:[%s20877_s1 + $0xea0] sm:$0xff]  ;;  %v520_v32 = vld [vmem:[%s20877_s1 + $0xf08] sm:$0xff]  ;;  %v8655_v58 = vpack.c.bf16 %v575_v51, %v562_v50  ;;  %v586_v60 = vld [vmem:[%s20877_s1 + $0x1118] sm:$0xff] }
  0x37   :  { %8432 = vmatprep.subr.bf16.mxu0 %v8431_v33  ;;  %8628 = vmatprep.subr.bf16.mxu1 %v8627_v37  ;;  %v509_v33 = vld [vmem:[%s20877_s1 + $0xeb0] sm:$0xff]  ;;  %v547_v37 = vld [vmem:[%s20877_s1 + $0xfe0] sm:$0xff]  ;;  %v8453_v40 = vpack.c.bf16 %v520_v32, %v507_v31  ;;  %v588_v62 = vld [vmem:[%s20877_s1 + $0x1128] sm:$0xff] }
  0x38   :  { %v8649_v41 = vpack.c.bf16 %v522_v35, %v509_v33  ;;  %v8455_v42 = vpack.c.bf16 %v547_v37, %v534_v36  ;;  %v601_v63 = vld [vmem:[%s20877_s1 + $0x1190] sm:$0xff]  ;;  %v600_v7 = vld [vmem:[%s20877_s1 + $0x1188] sm:$0xff]  ;;  %v614_v10 = vld [vmem:[%s20877_s1 + $0x11f8] sm:$0xff] }
  0x39   :  { %v8659_v6 = vpack.c.bf16 %v601_v63, %v588_v62  ;;  %v612_v8 = vld [vmem:[%s20877_s1 + $0x11e8] sm:$0xff]  ;;  %v627_v11 = vld [vmem:[%s20877_s1 + $0x1260] sm:$0xff]  ;;  %v638_v20 = vld [vmem:[%s20877_s1 + $0x12b8] sm:$0xff] }
  0x3a   :  { %8434 = vmatpush1.bf16.msra.mxu0 %v8433_v43  ;;  %8630 = vmatpush1.bf16.msra.mxu1 %v8629_v44  ;;  %v533_v43 = vld [vmem:[%s20877_s1 + $0xf70] sm:$0xff]  ;;  %v546_v44 = vld [vmem:[%s20877_s1 + $0xfd8] sm:$0xff]  ;;  %v611_v13 = vld [vmem:[%s20877_s1 + $0x11e0] sm:$0xff]  ;;  %v8663_v19 = vpack.c.bf16 %v627_v11, %v614_v10 }
  0x3b   :  { %8436 = vmatprep.subr.bf16.mxu0 %v8435_v45  ;;  %8632 = vmatprep.subr.bf16.mxu1 %v8631_v49  ;;  %v535_v45 = vld [vmem:[%s20877_s1 + $0xf80] sm:$0xff]  ;;  %v573_v49 = vld [vmem:[%s20877_s1 + $0x10b0] sm:$0xff]  ;;  %v8457_v52 = vpack.c.bf16 %v546_v44, %v533_v43  ;;  %v640_v23 = vld [vmem:[%s20877_s1 + $0x12c8] sm:$0xff] }
  0x3c   :  { %v8653_v53 = vpack.c.bf16 %v548_v47, %v535_v45  ;;  %v8459_v54 = vpack.c.bf16 %v573_v49, %v560_v48  ;;  %v651_v21 = vld [vmem:[%s20877_s1 + $0x1320] sm:$0xff]  ;;  %v653_v24 = vld [vmem:[%s20877_s1 + $0x1330] sm:$0xff]  ;;  %v652_v32 = vld [vmem:[%s20877_s1 + $0x1328] sm:$0xff] }
  0x3d   :  { %v8471_v27 = vpack.c.bf16 %v651_v21, %v638_v20  ;;  %v8667_v31 = vpack.c.bf16 %v653_v24, %v640_v23  ;;  %v664_v33 = vld [vmem:[%s20877_s1 + $0x1388] sm:$0xff]  ;;  %v666_v35 = vld [vmem:[%s20877_s1 + $0x1398] sm:$0xff]  ;;  %v679_v36 = vld [vmem:[%s20877_s1 + $0x1400] sm:$0xff] }
  0x3e   :  { %8438 = vmatpush1.bf16.msra.mxu0 %v8437_v55  ;;  %8634 = vmatpush1.bf16.msra.mxu1 %v8633_v56  ;;  %v559_v55 = vld [vmem:[%s20877_s1 + $0x1040] sm:$0xff]  ;;  %v572_v56 = vld [vmem:[%s20877_s1 + $0x10a8] sm:$0xff]  ;;  %v8671_v43 = vpack.c.bf16 %v679_v36, %v666_v35  ;;  %v678_v44 = vld [vmem:[%s20877_s1 + $0x13f8] sm:$0xff] }
  0x3f   :  { %8440 = vmatprep.subr.bf16.mxu0 %v8439_v57  ;;  %8636 = vmatprep.subr.bf16.mxu1 %v8635_v61  ;;  %v561_v57 = vld [vmem:[%s20877_s1 + $0x1050] sm:$0xff]  ;;  %v599_v61 = vld [vmem:[%s20877_s1 + $0x1180] sm:$0xff]  ;;  %v8461_v0 = vpack.c.bf16 %v572_v56, %v559_v55  ;;  %v690_v45 = vld [vmem:[%s20877_s1 + $0x1458] sm:$0xff] }
  0x40   :  { %v8657_v1 = vpack.c.bf16 %v574_v59, %v561_v57  ;;  %v8463_v2 = vpack.c.bf16 %v599_v61, %v586_v60  ;;  %v692_v47 = vld [vmem:[%s20877_s1 + $0x1468] sm:$0xff]  ;;  %v705_v48 = vld [vmem:[%s20877_s1 + $0x14d0] sm:$0xff]  ;;  %v718_v59 = vld [vmem:[%s20877_s1 + $0x1538] sm:$0xff] }
  0x41   :  { %v8675_v55 = vpack.c.bf16 %v705_v48, %v692_v47  ;;  %v704_v56 = vld [vmem:[%s20877_s1 + $0x14c8] sm:$0xff]  ;;  %v731_v60 = vld [vmem:[%s20877_s1 + $0x15a0] sm:$0xff]  ;;  %v793_v36 = vld [vmem:[%s20877_s1 + $0x1790] sm:$0xff] }
  0x42   :  { %8442 = vmatpush1.bf16.msra.mxu0 %v8441_v3  ;;  %8638 = vmatpush1.bf16.msra.mxu1 %v8637_v4  ;;  %v585_v3 = vld [vmem:[%s20877_s1 + $0x1110] sm:$0xff]  ;;  %v598_v4 = vld [vmem:[%s20877_s1 + $0x1178] sm:$0xff]  ;;  %v716_v57 = vld [vmem:[%s20877_s1 + $0x1528] sm:$0xff] }
  0x43   :  { %8444 = vmatprep.subr.bf16.mxu0 %v8443_v5  ;;  %8640 = vmatprep.subr.bf16.mxu1 %v8639_v9  ;;  %v587_v5 = vld [vmem:[%s20877_s1 + $0x1120] sm:$0xff]  ;;  %v625_v9 = vld [vmem:[%s20877_s1 + $0x1250] sm:$0xff]  ;;  %v8465_v12 = vpack.c.bf16 %v598_v4, %v585_v3  ;;  %v8679_v3 = vpack.c.bf16 %v731_v60, %v718_v59  ;;  %v730_v4 = vld [vmem:[%s20877_s1 + $0x1598] sm:$0xff] }
  0x44   :  { %v8661_v14 = vpack.c.bf16 %v600_v7, %v587_v5  ;;  %v742_v5 = vld [vmem:[%s20877_s1 + $0x15f8] sm:$0xff]  ;;  %v744_v7 = vld [vmem:[%s20877_s1 + $0x1608] sm:$0xff]  ;;  %v783_v20 = vld [vmem:[%s20877_s1 + $0x1740] sm:$0xff] }
  0x45   :  { %1451 = vmatmul.mubr.f32.vlgmr.msra.gmra.mrb[0].mxu0 %v32_v15  ;;  %1735 = vmatmul.mubr.f32.vlgmr.msra.gmra.mrb[0].mxu1 %v32_v15  ;;  %v8467_v15 = vpack.c.bf16 %v625_v9, %v612_v8  ;;  %v757_v8 = vld [vmem:[%s20877_s1 + $0x1670] sm:$0xff]  ;;  %v767_v24 = vld [vmem:[%s20877_s1 + $0x16c0] sm:$0xff] }
  0x46   :  { %8446 = vmatpush1.bf16.msra.mxu0 %v8445_v16  ;;  %8642 = vmatpush1.bf16.msra.mxu1 %v8641_v17  ;;  %v624_v16 = vld [vmem:[%s20877_s1 + $0x1248] sm:$0xff]  ;;  %v613_v17 = vld [vmem:[%s20877_s1 + $0x11f0] sm:$0xff]  ;;  %v819_v48 = vld [vmem:[%s20877_s1 + $0x1860] sm:$0xff] }
  0x47   :  { %8448 = vmatprep.subr.bf16.mxu0 %v8447_v18  ;;  %8644 = vmatprep.subr.bf16.mxu1 %v8643_v22  ;;  %v626_v18 = vld [vmem:[%s20877_s1 + $0x1258] sm:$0xff]  ;;  %v8469_v25 = vpack.c.bf16 %v624_v16, %v611_v13  ;;  %v756_v16 = vld [vmem:[%s20877_s1 + $0x1668] sm:$0xff]  ;;  %v845_v60 = vld [vmem:[%s20877_s1 + $0x1930] sm:$0xff] }
  0x48   :  { %v35_v22 = vld [vmem:[%s20878_s0 + $0x18] sm:$0xff]  ;;  %v8665_v26 = vpack.c.bf16 %v626_v18, %v613_v17  ;;  %v768_v17 = vld [vmem:[%s20877_s1 + $0x16c8] sm:$0xff]  ;;  %v781_v18 = vld [vmem:[%s20877_s1 + $0x1730] sm:$0xff] }
  0x49   :  { %1521 = vmatprep.mubr.f32.mxu0 %v35_v22  ;;  %1805 = vmatprep.mubr.f32.mxu1 %v35_v22  ;;  %v754_v13 = vld [vmem:[%s20877_s1 + $0x1658] sm:$0xff]  ;;  %v8491_v23 = vpack.c.bf16 %v781_v18, %v768_v17  ;;  %v34_v17 = vld [vmem:[%s20878_s0 + $0x10] sm:$0xff] }
  0x4a   :  { %8450 = vmatpush1.bf16.msra.mxu0 %v8449_v28  ;;  %8646 = vmatpush1.bf16.msra.mxu1 %v8645_v29  ;;  %v637_v28 = vld [vmem:[%s20877_s1 + $0x12b0] sm:$0xff]  ;;  %v650_v29 = vld [vmem:[%s20877_s1 + $0x1318] sm:$0xff] }
  0x4b   :  { %8452 = vmatprep.subr.bf16.mxu0 %v8451_v30  ;;  %8648 = vmatprep.subr.bf16.mxu1 %v8647_v34  ;;  %v639_v30 = vld [vmem:[%s20877_s1 + $0x12c0] sm:$0xff]  ;;  %v677_v34 = vld [vmem:[%s20877_s1 + $0x13f0] sm:$0xff]  ;;  %v8473_v37 = vpack.c.bf16 %v650_v29, %v637_v28  ;;  %v782_v28 = vld [vmem:[%s20877_s1 + $0x1738] sm:$0xff] }
  0x4c   :  { %v8669_v38 = vpack.c.bf16 %v652_v32, %v639_v30  ;;  %v8475_v39 = vpack.c.bf16 %v677_v34, %v664_v33  ;;  %v794_v29 = vld [vmem:[%s20877_s1 + $0x1798] sm:$0xff]  ;;  %v807_v30 = vld [vmem:[%s20877_s1 + $0x1800] sm:$0xff]  ;;  %v809_v32 = vld [vmem:[%s20877_s1 + $0x1810] sm:$0xff] }
  0x4d   :  { %v8495_v35 = vpack.c.bf16 %v807_v30, %v794_v29  ;;  %v939_v29 = vld [vmem:[%s20877_s1 + $0x1c20] sm:$0xff]  ;;  %v37_v30 = vld [vmem:[%s20878_s0 + $0x28] sm:$0xff] }
  0x4e   :  { %8454 = vmatpush1.bf16.msra.mxu0 %v8453_v40  ;;  %8650 = vmatpush1.bf16.msra.mxu1 %v8649_v41  ;;  %v663_v40 = vld [vmem:[%s20877_s1 + $0x1380] sm:$0xff]  ;;  %v676_v41 = vld [vmem:[%s20877_s1 + $0x13e8] sm:$0xff] }
  0x4f   :  { %8456 = vmatprep.subr.bf16.mxu0 %v8455_v42  ;;  %8652 = vmatprep.subr.bf16.mxu1 %v8651_v46  ;;  %v665_v42 = vld [vmem:[%s20877_s1 + $0x1390] sm:$0xff]  ;;  %v703_v46 = vld [vmem:[%s20877_s1 + $0x14c0] sm:$0xff]  ;;  %v8477_v49 = vpack.c.bf16 %v676_v41, %v663_v40  ;;  %v808_v40 = vld [vmem:[%s20877_s1 + $0x1808] sm:$0xff] }
  0x50   :  { %v8673_v50 = vpack.c.bf16 %v678_v44, %v665_v42  ;;  %v8479_v51 = vpack.c.bf16 %v703_v46, %v690_v45  ;;  %v820_v41 = vld [vmem:[%s20877_s1 + $0x1868] sm:$0xff]  ;;  %v833_v42 = vld [vmem:[%s20877_s1 + $0x18d0] sm:$0xff]  ;;  %v835_v44 = vld [vmem:[%s20877_s1 + $0x18e0] sm:$0xff] }
  0x51   :  { %v8499_v47 = vpack.c.bf16 %v833_v42, %v820_v41  ;;  %v952_v41 = vld [vmem:[%s20877_s1 + $0x1c88] sm:$0xff]  ;;  %v965_v42 = vld [vmem:[%s20877_s1 + $0x1cf0] sm:$0xff] }
  0x52   :  { %8458 = vmatpush1.bf16.msra.mxu0 %v8457_v52  ;;  %8654 = vmatpush1.bf16.msra.mxu1 %v8653_v53  ;;  %v689_v52 = vld [vmem:[%s20877_s1 + $0x1450] sm:$0xff]  ;;  %v702_v53 = vld [vmem:[%s20877_s1 + $0x14b8] sm:$0xff] }
  0x53   :  { %8460 = vmatprep.subr.bf16.mxu0 %v8459_v54  ;;  %8656 = vmatprep.subr.bf16.mxu1 %v8655_v58  ;;  %v691_v54 = vld [vmem:[%s20877_s1 + $0x1460] sm:$0xff]  ;;  %v729_v58 = vld [vmem:[%s20877_s1 + $0x1590] sm:$0xff]  ;;  %v8481_v61 = vpack.c.bf16 %v702_v53, %v689_v52  ;;  %v834_v52 = vld [vmem:[%s20877_s1 + $0x18d8] sm:$0xff] }
  0x54   :  { %v8677_v62 = vpack.c.bf16 %v704_v56, %v691_v54  ;;  %v8483_v63 = vpack.c.bf16 %v729_v58, %v716_v57  ;;  %v846_v53 = vld [vmem:[%s20877_s1 + $0x1938] sm:$0xff]  ;;  %v859_v54 = vld [vmem:[%s20877_s1 + $0x19a0] sm:$0xff]  ;;  %v861_v56 = vld [vmem:[%s20877_s1 + $0x19b0] sm:$0xff] }
  0x55   :  { %v8503_v59 = vpack.c.bf16 %v859_v54, %v846_v53  ;;  %v978_v53 = vld [vmem:[%s20877_s1 + $0x1d58] sm:$0xff]  ;;  %v991_v54 = vld [vmem:[%s20877_s1 + $0x1dc0] sm:$0xff] }
  0x56   :  { %8462 = vmatpush1.bf16.msra.mxu0 %v8461_v0  ;;  %8658 = vmatpush1.bf16.msra.mxu1 %v8657_v1  ;;  %v715_v0 = vld [vmem:[%s20877_s1 + $0x1520] sm:$0xff]  ;;  %v728_v1 = vld [vmem:[%s20877_s1 + $0x1588] sm:$0xff] }
  0x57   :  { %8464 = vmatprep.subr.bf16.mxu0 %v8463_v2  ;;  %8660 = vmatprep.subr.bf16.mxu1 %v8659_v6  ;;  %v717_v2 = vld [vmem:[%s20877_s1 + $0x1530] sm:$0xff]  ;;  %v755_v6 = vld [vmem:[%s20877_s1 + $0x1660] sm:$0xff]  ;;  %v8485_v9 = vpack.c.bf16 %v728_v1, %v715_v0  ;;  %v860_v0 = vld [vmem:[%s20877_s1 + $0x19a8] sm:$0xff] }
  0x58   :  { %v8681_v10 = vpack.c.bf16 %v730_v4, %v717_v2  ;;  %v8487_v11 = vpack.c.bf16 %v755_v6, %v742_v5  ;;  %v872_v1 = vld [vmem:[%s20877_s1 + $0x1a08] sm:$0xff]  ;;  %v885_v2 = vld [vmem:[%s20877_s1 + $0x1a70] sm:$0xff]  ;;  %v887_v4 = vld [vmem:[%s20877_s1 + $0x1a80] sm:$0xff] }
  0x5a   :  { %8466 = vmatpush1.bf16.msra.mxu0 %v8465_v12  ;;  %8662 = vmatpush1.bf16.msra.mxu1 %v8661_v14  ;;  %v741_v12 = vld [vmem:[%s20877_s1 + $0x15f0] sm:$0xff]  ;;  %v743_v14 = vld [vmem:[%s20877_s1 + $0x1600] sm:$0xff] }
  0x5b   :  { %8468 = vmatprep.subr.bf16.mxu0 %v8467_v15  ;;  %8664 = vmatprep.subr.bf16.mxu1 %v8663_v19  ;;  %v8683_v15 = vpack.c.bf16 %v757_v8, %v744_v7  ;;  %v770_v19 = vld [vmem:[%s20877_s1 + $0x16d8] sm:$0xff]  ;;  %v8489_v21 = vpack.c.bf16 %v754_v13, %v741_v12  ;;  %v8685_v22 = vpack.c.bf16 %v756_v16, %v743_v14  ;;  %v871_v8 = vld [vmem:[%s20877_s1 + $0x1a00] sm:$0xff]  ;;  %v913_v16 = vld [vmem:[%s20877_s1 + $0x1b50] sm:$0xff] }
  0x5c   :  { %v8507_v7 = vpack.c.bf16 %v885_v2, %v872_v1  ;;  %v886_v12 = vld [vmem:[%s20877_s1 + $0x1a78] sm:$0xff]  ;;  %v911_v14 = vld [vmem:[%s20877_s1 + $0x1b40] sm:$0xff]  ;;  %v1004_v1 = vld [vmem:[%s20877_s1 + $0x1e28] sm:$0xff] }
  0x5d   :  { %v898_v13 = vld [vmem:[%s20877_s1 + $0x1ad8] sm:$0xff]  ;;  %v1017_v2 = vld [vmem:[%s20877_s1 + $0x1e90] sm:$0xff] }
  0x5e   :  { %8470 = vmatpush1.bf16.msra.mxu0 %v8469_v25  ;;  %8666 = vmatpush1.bf16.msra.mxu1 %v8665_v26  ;;  %v780_v25 = vld [vmem:[%s20877_s1 + $0x1728] sm:$0xff]  ;;  %v769_v26 = vld [vmem:[%s20877_s1 + $0x16d0] sm:$0xff] }
  0x5f   :  { %8472 = vmatprep.subr.bf16.mxu0 %v8471_v27  ;;  %8668 = vmatprep.subr.bf16.mxu1 %v8667_v31  ;;  %v8687_v27 = vpack.c.bf16 %v783_v20, %v770_v19  ;;  %v796_v31 = vld [vmem:[%s20877_s1 + $0x17a8] sm:$0xff]  ;;  %v8493_v33 = vpack.c.bf16 %v780_v25, %v767_v24  ;;  %v8689_v34 = vpack.c.bf16 %v782_v28, %v769_v26  ;;  %v926_v28 = vld [vmem:[%s20877_s1 + $0x1bb8] sm:$0xff] }
  0x60   :  { %v8511_v20 = vpack.c.bf16 %v911_v14, %v898_v13  ;;  %v912_v25 = vld [vmem:[%s20877_s1 + $0x1b48] sm:$0xff]  ;;  %v1030_v13 = vld [vmem:[%s20877_s1 + $0x1ef8] sm:$0xff]  ;;  %v1043_v14 = vld [vmem:[%s20877_s1 + $0x1f60] sm:$0xff] }
  0x61   :  { %v924_v26 = vld [vmem:[%s20877_s1 + $0x1ba8] sm:$0xff] }
  0x62   :  { %8474 = vmatpush1.bf16.msra.mxu0 %v8473_v37  ;;  %8670 = vmatpush1.bf16.msra.mxu1 %v8669_v38  ;;  %v806_v37 = vld [vmem:[%s20877_s1 + $0x17f8] sm:$0xff]  ;;  %v795_v38 = vld [vmem:[%s20877_s1 + $0x17a0] sm:$0xff] }
  0x63   :  { %8476 = vmatprep.subr.bf16.mxu0 %v8475_v39  ;;  %8672 = vmatprep.subr.bf16.mxu1 %v8671_v43  ;;  %v8691_v39 = vpack.c.bf16 %v809_v32, %v796_v31  ;;  %v822_v43 = vld [vmem:[%s20877_s1 + $0x1878] sm:$0xff]  ;;  %v8497_v45 = vpack.c.bf16 %v806_v37, %v793_v36  ;;  %v8693_v46 = vpack.c.bf16 %v808_v40, %v795_v38  ;;  %v925_v36 = vld [vmem:[%s20877_s1 + $0x1bb0] sm:$0xff]  ;;  %v963_v40 = vld [vmem:[%s20877_s1 + $0x1ce0] sm:$0xff] }
  0x64   :  { %v8711_v37 = vpack.c.bf16 %v939_v29, %v926_v28  ;;  %v938_v38 = vld [vmem:[%s20877_s1 + $0x1c18] sm:$0xff] }
  0x66   :  { %8478 = vmatpush1.bf16.msra.mxu0 %v8477_v49  ;;  %8674 = vmatpush1.bf16.msra.mxu1 %v8673_v50  ;;  %v832_v49 = vld [vmem:[%s20877_s1 + $0x18c8] sm:$0xff]  ;;  %v821_v50 = vld [vmem:[%s20877_s1 + $0x1870] sm:$0xff] }
  0x67   :  { %8480 = vmatprep.subr.bf16.mxu0 %v8479_v51  ;;  %8676 = vmatprep.subr.bf16.mxu1 %v8675_v55  ;;  %v8695_v51 = vpack.c.bf16 %v835_v44, %v822_v43  ;;  %v848_v55 = vld [vmem:[%s20877_s1 + $0x1948] sm:$0xff]  ;;  %v8501_v57 = vpack.c.bf16 %v832_v49, %v819_v48  ;;  %v8697_v58 = vpack.c.bf16 %v834_v52, %v821_v50  ;;  %v951_v48 = vld [vmem:[%s20877_s1 + $0x1c80] sm:$0xff]  ;;  %v989_v52 = vld [vmem:[%s20877_s1 + $0x1db0] sm:$0xff] }
  0x68   :  { %v8713_v44 = vpack.c.bf16 %v938_v38, %v925_v36  ;;  %v8715_v49 = vpack.c.bf16 %v965_v42, %v952_v41  ;;  %v964_v50 = vld [vmem:[%s20877_s1 + $0x1ce8] sm:$0xff]  ;;  %v1093_v36 = vld [vmem:[%s20877_s1 + $0x20f0] sm:$0xff]  ;;  %v1095_v38 = vld [vmem:[%s20877_s1 + $0x2100] sm:$0xff] }
  0x69   :  { %v1079_v42 = vld [vmem:[%s20877_s1 + $0x2080] sm:$0xff] }
  0x6a   :  { %8482 = vmatpush1.bf16.msra.mxu0 %v8481_v61  ;;  %8678 = vmatpush1.bf16.msra.mxu1 %v8677_v62  ;;  %v858_v61 = vld [vmem:[%s20877_s1 + $0x1998] sm:$0xff]  ;;  %v847_v62 = vld [vmem:[%s20877_s1 + $0x1940] sm:$0xff] }
  0x6b   :  { %8484 = vmatprep.subr.bf16.mxu0 %v8483_v63  ;;  %8680 = vmatprep.subr.bf16.mxu1 %v8679_v3  ;;  %v8699_v63 = vpack.c.bf16 %v861_v56, %v848_v55  ;;  %v874_v3 = vld [vmem:[%s20877_s1 + $0x1a18] sm:$0xff]  ;;  %v8505_v5 = vpack.c.bf16 %v858_v61, %v845_v60  ;;  %v8701_v6 = vpack.c.bf16 %v860_v0, %v847_v62  ;;  %v977_v60 = vld [vmem:[%s20877_s1 + $0x1d50] sm:$0xff]  ;;  %v1015_v0 = vld [vmem:[%s20877_s1 + $0x1e80] sm:$0xff] }
  0x6c   :  { %v8717_v56 = vpack.c.bf16 %v964_v50, %v951_v48  ;;  %v8719_v61 = vpack.c.bf16 %v991_v54, %v978_v53  ;;  %v990_v62 = vld [vmem:[%s20877_s1 + $0x1db8] sm:$0xff]  ;;  %v1119_v48 = vld [vmem:[%s20877_s1 + $0x21c0] sm:$0xff]  ;;  %v1121_v50 = vld [vmem:[%s20877_s1 + $0x21d0] sm:$0xff] }
  0x6d   :  { %v1105_v54 = vld [vmem:[%s20877_s1 + $0x2150] sm:$0xff] }
  0x6e   :  { %8486 = vmatpush1.bf16.msra.mxu0 %v8485_v9  ;;  %8682 = vmatpush1.bf16.msra.mxu1 %v8681_v10  ;;  %v884_v9 = vld [vmem:[%s20877_s1 + $0x1a68] sm:$0xff]  ;;  %v873_v10 = vld [vmem:[%s20877_s1 + $0x1a10] sm:$0xff] }
  0x6f   :  { %8488 = vmatprep.subr.bf16.mxu0 %v8487_v11  ;;  %8684 = vmatprep.subr.bf16.mxu1 %v8683_v15  ;;  %v8703_v11 = vpack.c.bf16 %v887_v4, %v874_v3  ;;  %v900_v15 = vld [vmem:[%s20877_s1 + $0x1ae8] sm:$0xff]  ;;  %v8509_v18 = vpack.c.bf16 %v884_v9, %v871_v8  ;;  %v8705_v19 = vpack.c.bf16 %v886_v12, %v873_v10  ;;  %v1003_v8 = vld [vmem:[%s20877_s1 + $0x1e20] sm:$0xff]  ;;  %v1041_v12 = vld [vmem:[%s20877_s1 + $0x1f50] sm:$0xff] }
  0x70   :  { %v8707_v24 = vpack.c.bf16 %v913_v16, %v900_v15  ;;  %v8721_v4 = vpack.c.bf16 %v990_v62, %v977_v60  ;;  %v8723_v9 = vpack.c.bf16 %v1017_v2, %v1004_v1  ;;  %v1016_v10 = vld [vmem:[%s20877_s1 + $0x1e88] sm:$0xff]  ;;  %v1145_v60 = vld [vmem:[%s20877_s1 + $0x2290] sm:$0xff]  ;;  %v1147_v62 = vld [vmem:[%s20877_s1 + $0x22a0] sm:$0xff] }
  0x71   :  { %v8725_v16 = vpack.c.bf16 %v1016_v10, %v1003_v8  ;;  %v1131_v2 = vld [vmem:[%s20877_s1 + $0x2220] sm:$0xff]  ;;  %v1173_v10 = vld [vmem:[%s20877_s1 + $0x2370] sm:$0xff] }
  0x72   :  { %8490 = vmatpush1.bf16.msra.mxu0 %v8489_v21  ;;  %8686 = vmatpush1.bf16.msra.mxu1 %v8685_v22  ;;  %v897_v21 = vld [vmem:[%s20877_s1 + $0x1ad0] sm:$0xff]  ;;  %v910_v22 = vld [vmem:[%s20877_s1 + $0x1b38] sm:$0xff]  ;;  %v1171_v8 = vld [vmem:[%s20877_s1 + $0x2360] sm:$0xff] }
  0x73   :  { %8492 = vmatprep.subr.bf16.mxu0 %v8491_v23  ;;  %8688 = vmatprep.subr.bf16.mxu1 %v8687_v27  ;;  %v899_v23 = vld [vmem:[%s20877_s1 + $0x1ae0] sm:$0xff]  ;;  %v937_v27 = vld [vmem:[%s20877_s1 + $0x1c10] sm:$0xff]  ;;  %v8513_v31 = vpack.c.bf16 %v910_v22, %v897_v21  ;;  %v8727_v21 = vpack.c.bf16 %v1043_v14, %v1030_v13  ;;  %v1042_v22 = vld [vmem:[%s20877_s1 + $0x1f58] sm:$0xff] }
  0x74   :  { %v8709_v32 = vpack.c.bf16 %v912_v25, %v899_v23  ;;  %v1054_v23 = vld [vmem:[%s20877_s1 + $0x1fb8] sm:$0xff]  ;;  %v1056_v25 = vld [vmem:[%s20877_s1 + $0x1fc8] sm:$0xff]  ;;  %v1157_v14 = vld [vmem:[%s20877_s1 + $0x22f0] sm:$0xff] }
  0x76   :  { %8494 = vmatpush1.bf16.msra.mxu0 %v8493_v33  ;;  %8690 = vmatpush1.bf16.msra.mxu1 %v8689_v34  ;;  %v8515_v33 = vpack.c.bf16 %v937_v27, %v924_v26  ;;  %v923_v34 = vld [vmem:[%s20877_s1 + $0x1ba0] sm:$0xff]  ;;  %v1069_v26 = vld [vmem:[%s20877_s1 + $0x2030] sm:$0xff] }
  0x77   :  { %8496 = vmatprep.subr.bf16.mxu0 %v8495_v35  ;;  %8692 = vmatprep.subr.bf16.mxu1 %v8691_v39  ;;  %v936_v35 = vld [vmem:[%s20877_s1 + $0x1c08] sm:$0xff]  ;;  %v950_v39 = vld [vmem:[%s20877_s1 + $0x1c78] sm:$0xff] }
  0x78   :  { %v8517_v43 = vpack.c.bf16 %v936_v35, %v923_v34  ;;  %v1068_v34 = vld [vmem:[%s20877_s1 + $0x2028] sm:$0xff] }
  0x79   :  { %v1080_v35 = vld [vmem:[%s20877_s1 + $0x2088] sm:$0xff] }
  0x7a   :  { %8498 = vmatpush1.bf16.msra.mxu0 %v8497_v45  ;;  %8694 = vmatpush1.bf16.msra.mxu1 %v8693_v46  ;;  %v8519_v45 = vpack.c.bf16 %v963_v40, %v950_v39  ;;  %v949_v46 = vld [vmem:[%s20877_s1 + $0x1c70] sm:$0xff]  ;;  %v8539_v41 = vpack.c.bf16 %v1093_v36, %v1080_v35 }
  0x7b   :  { %8500 = vmatprep.subr.bf16.mxu0 %v8499_v47  ;;  %8696 = vmatprep.subr.bf16.mxu1 %v8695_v51  ;;  %v962_v47 = vld [vmem:[%s20877_s1 + $0x1cd8] sm:$0xff]  ;;  %v976_v51 = vld [vmem:[%s20877_s1 + $0x1d48] sm:$0xff] }
  0x7c   :  { %v8521_v55 = vpack.c.bf16 %v962_v47, %v949_v46  ;;  %v1094_v46 = vld [vmem:[%s20877_s1 + $0x20f8] sm:$0xff] }
  0x7d   :  { %v1106_v47 = vld [vmem:[%s20877_s1 + $0x2158] sm:$0xff] }
  0x7e   :  { %8502 = vmatpush1.bf16.msra.mxu0 %v8501_v57  ;;  %8698 = vmatpush1.bf16.msra.mxu1 %v8697_v58  ;;  %v8523_v57 = vpack.c.bf16 %v989_v52, %v976_v51  ;;  %v975_v58 = vld [vmem:[%s20877_s1 + $0x1d40] sm:$0xff]  ;;  %v8543_v53 = vpack.c.bf16 %v1119_v48, %v1106_v47 }
  0x7f   :  { %8504 = vmatprep.subr.bf16.mxu0 %v8503_v59  ;;  %8700 = vmatprep.subr.bf16.mxu1 %v8699_v63  ;;  %v988_v59 = vld [vmem:[%s20877_s1 + $0x1da8] sm:$0xff]  ;;  %v1002_v63 = vld [vmem:[%s20877_s1 + $0x1e18] sm:$0xff] }
  0x80   :  { %v8525_v3 = vpack.c.bf16 %v988_v59, %v975_v58  ;;  %v1120_v58 = vld [vmem:[%s20877_s1 + $0x21c8] sm:$0xff] }
  0x81   :  { %v1132_v59 = vld [vmem:[%s20877_s1 + $0x2228] sm:$0xff] }
  0x82   :  { %8506 = vmatpush1.bf16.msra.mxu0 %v8505_v5  ;;  %8702 = vmatpush1.bf16.msra.mxu1 %v8701_v6  ;;  %v8527_v5 = vpack.c.bf16 %v1015_v0, %v1002_v63  ;;  %v1001_v6 = vld [vmem:[%s20877_s1 + $0x1e10] sm:$0xff]  ;;  %v8547_v1 = vpack.c.bf16 %v1145_v60, %v1132_v59 }
  0x83   :  { %8508 = vmatprep.subr.bf16.mxu0 %v8507_v7  ;;  %8704 = vmatprep.subr.bf16.mxu1 %v8703_v11  ;;  %v1014_v7 = vld [vmem:[%s20877_s1 + $0x1e78] sm:$0xff]  ;;  %v1028_v11 = vld [vmem:[%s20877_s1 + $0x1ee8] sm:$0xff] }
  0x84   :  { %v8529_v15 = vpack.c.bf16 %v1014_v7, %v1001_v6  ;;  %v1146_v6 = vld [vmem:[%s20877_s1 + $0x2298] sm:$0xff] }
  0x85   :  { %1522 = vmatmul.mubr.f32.vlgmr.msra.gmra.mrb[0].mxu0 %v34_v17  ;;  %1806 = vmatmul.mubr.f32.vlgmr.msra.gmra.mrb[0].mxu1 %v34_v17  ;;  %v8531_v17 = vpack.c.bf16 %v1041_v12, %v1028_v11  ;;  %v1158_v7 = vld [vmem:[%s20877_s1 + $0x22f8] sm:$0xff] }
  0x86   :  { %8510 = vmatpush1.bf16.msra.mxu0 %v8509_v18  ;;  %8706 = vmatpush1.bf16.msra.mxu1 %v8705_v19  ;;  %v1027_v18 = vld [vmem:[%s20877_s1 + $0x1ee0] sm:$0xff]  ;;  %v1040_v19 = vld [vmem:[%s20877_s1 + $0x1f48] sm:$0xff]  ;;  %v8551_v13 = vpack.c.bf16 %v1171_v8, %v1158_v7 }
  0x87   :  { %8512 = vmatprep.subr.bf16.mxu0 %v8511_v20  ;;  %8708 = vmatprep.subr.bf16.mxu1 %v8707_v24  ;;  %v1029_v20 = vld [vmem:[%s20877_s1 + $0x1ef0] sm:$0xff]  ;;  %v1067_v24 = vld [vmem:[%s20877_s1 + $0x2020] sm:$0xff]  ;;  %v8533_v27 = vpack.c.bf16 %v1040_v19, %v1027_v18  ;;  %v1172_v18 = vld [vmem:[%s20877_s1 + $0x2368] sm:$0xff] }
  0x88   :  { %1592 = vmatprep.mubr.f32.mxu0 %v37_v30  ;;  %1876 = vmatprep.mubr.f32.mxu1 %v37_v30  ;;  %v8729_v28 = vpack.c.bf16 %v1042_v22, %v1029_v20  ;;  %v8535_v29 = vpack.c.bf16 %v1067_v24, %v1054_v23  ;;  %v1053_v30 = vld [vmem:[%s20877_s1 + $0x1fb0] sm:$0xff]  ;;  %v1184_v19 = vld [vmem:[%s20877_s1 + $0x23c8] sm:$0xff]  ;;  %v1199_v22 = vld [vmem:[%s20877_s1 + $0x2440] sm:$0xff] }
  0x89   :  { %v1197_v20 = vld [vmem:[%s20877_s1 + $0x2430] sm:$0xff] }
  0x8a   :  { %8514 = vmatpush1.bf16.msra.mxu0 %v8513_v31  ;;  %8710 = vmatpush1.bf16.msra.mxu1 %v8709_v32  ;;  %v1066_v31 = vld [vmem:[%s20877_s1 + $0x2018] sm:$0xff]  ;;  %v1055_v32 = vld [vmem:[%s20877_s1 + $0x1fc0] sm:$0xff] }
  0x8b   :  { %8516 = vmatprep.subr.bf16.mxu0 %v8515_v33  ;;  %8712 = vmatprep.subr.bf16.mxu1 %v8711_v37  ;;  %v8731_v33 = vpack.c.bf16 %v1069_v26, %v1056_v25  ;;  %v1082_v37 = vld [vmem:[%s20877_s1 + $0x2098] sm:$0xff]  ;;  %v8537_v39 = vpack.c.bf16 %v1066_v31, %v1053_v30  ;;  %v8733_v40 = vpack.c.bf16 %v1068_v34, %v1055_v32  ;;  %v1183_v26 = vld [vmem:[%s20877_s1 + $0x23c0] sm:$0xff]  ;;  %v1225_v34 = vld [vmem:[%s20877_s1 + $0x2510] sm:$0xff] }
  0x8c   :  { %v8555_v25 = vpack.c.bf16 %v1197_v20, %v1184_v19  ;;  %v1198_v30 = vld [vmem:[%s20877_s1 + $0x2438] sm:$0xff]  ;;  %v1223_v32 = vld [vmem:[%s20877_s1 + $0x2500] sm:$0xff] }
  0x8d   :  { %v1210_v31 = vld [vmem:[%s20877_s1 + $0x2498] sm:$0xff]  ;;  %v59_v20 = vld [vmem:[%s20877_s1 + $0xa0] sm:$0xff] }
  0x8e   :  { %8518 = vmatpush1.bf16.msra.mxu0 %v8517_v43  ;;  %8714 = vmatpush1.bf16.msra.mxu1 %v8713_v44  ;;  %v1092_v43 = vld [vmem:[%s20877_s1 + $0x20e8] sm:$0xff]  ;;  %v1081_v44 = vld [vmem:[%s20877_s1 + $0x2090] sm:$0xff]  ;;  %v46_v19 = vld [vmem:[%s20877_s1 + $0x38] sm:$0xff] }
  0x8f   :  { %8520 = vmatprep.subr.bf16.mxu0 %v8519_v45  ;;  %8716 = vmatprep.subr.bf16.mxu1 %v8715_v49  ;;  %v8735_v45 = vpack.c.bf16 %v1095_v38, %v1082_v37  ;;  %v1108_v49 = vld [vmem:[%s20877_s1 + $0x2168] sm:$0xff]  ;;  %v8541_v51 = vpack.c.bf16 %v1092_v43, %v1079_v42  ;;  %v8737_v52 = vpack.c.bf16 %v1094_v46, %v1081_v44  ;;  %v1209_v38 = vld [vmem:[%s20877_s1 + $0x2490] sm:$0xff]  ;;  %v1251_v46 = vld [vmem:[%s20877_s1 + $0x25e0] sm:$0xff] }
  0x90   :  { %v8559_v37 = vpack.c.bf16 %v1223_v32, %v1210_v31  ;;  %v1224_v42 = vld [vmem:[%s20877_s1 + $0x2508] sm:$0xff]  ;;  %v1249_v44 = vld [vmem:[%s20877_s1 + $0x25d0] sm:$0xff] }
  0x91   :  { %v1236_v43 = vld [vmem:[%s20877_s1 + $0x2568] sm:$0xff]  ;;  %v85_v32 = vld [vmem:[%s20877_s1 + $0x170] sm:$0xff] }
  0x92   :  { %8522 = vmatpush1.bf16.msra.mxu0 %v8521_v55  ;;  %8718 = vmatpush1.bf16.msra.mxu1 %v8717_v56  ;;  %v1118_v55 = vld [vmem:[%s20877_s1 + $0x21b8] sm:$0xff]  ;;  %v1107_v56 = vld [vmem:[%s20877_s1 + $0x2160] sm:$0xff]  ;;  %v72_v31 = vld [vmem:[%s20877_s1 + $0x108] sm:$0xff] }
  0x93   :  { %8524 = vmatprep.subr.bf16.mxu0 %v8523_v57  ;;  %8720 = vmatprep.subr.bf16.mxu1 %v8719_v61  ;;  %v8739_v57 = vpack.c.bf16 %v1121_v50, %v1108_v49  ;;  %v1134_v61 = vld [vmem:[%s20877_s1 + $0x2238] sm:$0xff]  ;;  %v8545_v63 = vpack.c.bf16 %v1118_v55, %v1105_v54  ;;  %v8741_v0 = vpack.c.bf16 %v1120_v58, %v1107_v56  ;;  %v1235_v50 = vld [vmem:[%s20877_s1 + $0x2560] sm:$0xff]  ;;  %v1277_v58 = vld [vmem:[%s20877_s1 + $0x26b0] sm:$0xff] }
  0x94   :  { %v8563_v49 = vpack.c.bf16 %v1249_v44, %v1236_v43  ;;  %v1250_v54 = vld [vmem:[%s20877_s1 + $0x25d8] sm:$0xff]  ;;  %v1275_v56 = vld [vmem:[%s20877_s1 + $0x26a0] sm:$0xff]  ;;  %v109_v43 = vld [vmem:[%s20877_s1 + $0x230] sm:$0xff] }
  0x95   :  { %v1262_v55 = vld [vmem:[%s20877_s1 + $0x2638] sm:$0xff] }
  0x96   :  { %8526 = vmatpush1.bf16.msra.mxu0 %v8525_v3  ;;  %8722 = vmatpush1.bf16.msra.mxu1 %v8721_v4  ;;  %v1144_v3 = vld [vmem:[%s20877_s1 + $0x2288] sm:$0xff]  ;;  %v1133_v4 = vld [vmem:[%s20877_s1 + $0x2230] sm:$0xff]  ;;  %v98_v44 = vld [vmem:[%s20877_s1 + $0x1d8] sm:$0xff] }
  0x97   :  { %8528 = vmatprep.subr.bf16.mxu0 %v8527_v5  ;;  %8724 = vmatprep.subr.bf16.mxu1 %v8723_v9  ;;  %v8743_v5 = vpack.c.bf16 %v1147_v62, %v1134_v61  ;;  %v1160_v9 = vld [vmem:[%s20877_s1 + $0x2308] sm:$0xff]  ;;  %v8549_v11 = vpack.c.bf16 %v1144_v3, %v1131_v2  ;;  %v8745_v12 = vpack.c.bf16 %v1146_v6, %v1133_v4  ;;  %v1261_v62 = vld [vmem:[%s20877_s1 + $0x2630] sm:$0xff]  ;;  %v1303_v6 = vld [vmem:[%s20877_s1 + $0x2780] sm:$0xff] }
  0x98   :  { %v8567_v61 = vpack.c.bf16 %v1275_v56, %v1262_v55  ;;  %v1276_v2 = vld [vmem:[%s20877_s1 + $0x26a8] sm:$0xff]  ;;  %v1301_v4 = vld [vmem:[%s20877_s1 + $0x2770] sm:$0xff]  ;;  %v135_v55 = vld [vmem:[%s20877_s1 + $0x300] sm:$0xff] }
  0x99   :  { %v1288_v3 = vld [vmem:[%s20877_s1 + $0x2708] sm:$0xff] }
  0x9a   :  { %8530 = vmatpush1.bf16.msra.mxu0 %v8529_v15  ;;  %8726 = vmatpush1.bf16.msra.mxu1 %v8725_v16  ;;  %v1170_v15 = vld [vmem:[%s20877_s1 + $0x2358] sm:$0xff]  ;;  %v1159_v16 = vld [vmem:[%s20877_s1 + $0x2300] sm:$0xff]  ;;  %v11462_v56 = vld [vmem:[%s20878_s0 + $0x8] sm:$0xff] }
  0x9b   :  { %8532 = vmatprep.subr.bf16.mxu0 %v8531_v17  ;;  %8728 = vmatprep.subr.bf16.mxu1 %v8727_v21  ;;  %v8747_v17 = vpack.c.bf16 %v1173_v10, %v1160_v9  ;;  %v1186_v21 = vld [vmem:[%s20877_s1 + $0x23d8] sm:$0xff]  ;;  %v8553_v23 = vpack.c.bf16 %v1170_v15, %v1157_v14  ;;  %v8749_v24 = vpack.c.bf16 %v1172_v18, %v1159_v16  ;;  %v1287_v10 = vld [vmem:[%s20877_s1 + $0x2700] sm:$0xff]  ;;  %v44_v15 = vld [vmem:[%s20877_s1 + $0x28] sm:$0xff] }
  0x9c   :  { %v8571_v9 = vpack.c.bf16 %v1301_v4, %v1288_v3  ;;  %v1302_v14 = vld [vmem:[%s20877_s1 + $0x2778] sm:$0xff]  ;;  %v57_v16 = vld [vmem:[%s20877_s1 + $0x90] sm:$0xff]  ;;  %v148_v3 = vld [vmem:[%s20877_s1 + $0x368] sm:$0xff] }
  0x9d   :  { %v161_v4 = vld [vmem:[%s20877_s1 + $0x3d0] sm:$0xff] }
  0x9e   :  { %8534 = vmatpush1.bf16.msra.mxu0 %v8533_v27  ;;  %8730 = vmatpush1.bf16.msra.mxu1 %v8729_v28  ;;  %v1196_v27 = vld [vmem:[%s20877_s1 + $0x2428] sm:$0xff]  ;;  %v1185_v28 = vld [vmem:[%s20877_s1 + $0x23d0] sm:$0xff] }
  0x9f   :  { %8536 = vmatprep.subr.bf16.mxu0 %v8535_v29  ;;  %8732 = vmatprep.subr.bf16.mxu1 %v8731_v33  ;;  %v8751_v29 = vpack.c.bf16 %v1199_v22, %v1186_v21  ;;  %v1212_v33 = vld [vmem:[%s20877_s1 + $0x24a8] sm:$0xff]  ;;  %v8557_v35 = vpack.c.bf16 %v1196_v27, %v1183_v26  ;;  %v8753_v36 = vpack.c.bf16 %v1198_v30, %v1185_v28  ;;  %v45_v27 = vld [vmem:[%s20877_s1 + $0x30] sm:$0xff]  ;;  %v58_v28 = vld [vmem:[%s20877_s1 + $0x98] sm:$0xff] }
  0xa0   :  { %v8771_v22 = vpack.c.bf16 %v57_v16, %v44_v15  ;;  %v56_v26 = vld [vmem:[%s20877_s1 + $0x88] sm:$0xff]  ;;  %v83_v30 = vld [vmem:[%s20877_s1 + $0x160] sm:$0xff]  ;;  %v174_v15 = vld [vmem:[%s20877_s1 + $0x438] sm:$0xff] }
  0xa1   :  { %v187_v16 = vld [vmem:[%s20877_s1 + $0x4a0] sm:$0xff] }
  0xa2   :  { %8538 = vmatpush1.bf16.msra.mxu0 %v8537_v39  ;;  %8734 = vmatpush1.bf16.msra.mxu1 %v8733_v40  ;;  %v1222_v39 = vld [vmem:[%s20877_s1 + $0x24f8] sm:$0xff]  ;;  %v1211_v40 = vld [vmem:[%s20877_s1 + $0x24a0] sm:$0xff] }
  0xa3   :  { %8540 = vmatprep.subr.bf16.mxu0 %v8539_v41  ;;  %8736 = vmatprep.subr.bf16.mxu1 %v8735_v45  ;;  %v8755_v41 = vpack.c.bf16 %v1225_v34, %v1212_v33  ;;  %v1238_v45 = vld [vmem:[%s20877_s1 + $0x2578] sm:$0xff]  ;;  %v8561_v47 = vpack.c.bf16 %v1222_v39, %v1209_v38  ;;  %v8757_v48 = vpack.c.bf16 %v1224_v42, %v1211_v40  ;;  %v38_v33 = vld [vmem:[%s20878_s0 + $0x30] sm:$0xff]  ;;  %v71_v39 = vld [vmem:[%s20877_s1 + $0x100] sm:$0xff] }
  0xa4   :  { %v82_v38 = vld [vmem:[%s20877_s1 + $0x158] sm:$0xff]  ;;  %v8971_v40 = vpack.c.bf16 %v85_v32, %v72_v31  ;;  %v96_v42 = vld [vmem:[%s20877_s1 + $0x1c8] sm:$0xff]  ;;  %v215_v31 = vld [vmem:[%s20877_s1 + $0x580] sm:$0xff] }
  0xa6   :  { %8542 = vmatpush1.bf16.msra.mxu0 %v8541_v51  ;;  %8738 = vmatpush1.bf16.msra.mxu1 %v8737_v52  ;;  %v1248_v51 = vld [vmem:[%s20877_s1 + $0x25c8] sm:$0xff]  ;;  %v1237_v52 = vld [vmem:[%s20877_s1 + $0x2570] sm:$0xff] }
  0xa7   :  { %8544 = vmatprep.subr.bf16.mxu0 %v8543_v53  ;;  %8740 = vmatprep.subr.bf16.mxu1 %v8739_v57  ;;  %v8759_v53 = vpack.c.bf16 %v1251_v46, %v1238_v45  ;;  %v1264_v57 = vld [vmem:[%s20877_s1 + $0x2648] sm:$0xff]  ;;  %v8565_v59 = vpack.c.bf16 %v1248_v51, %v1235_v50  ;;  %v8761_v60 = vpack.c.bf16 %v1250_v54, %v1237_v52  ;;  %v111_v45 = vld [vmem:[%s20877_s1 + $0x240] sm:$0xff]  ;;  %v97_v51 = vld [vmem:[%s20877_s1 + $0x1d0] sm:$0xff] }
  0xa8   :  { %v108_v50 = vld [vmem:[%s20877_s1 + $0x228] sm:$0xff]  ;;  %v8975_v52 = vpack.c.bf16 %v111_v45, %v98_v44  ;;  %v122_v54 = vld [vmem:[%s20877_s1 + $0x298] sm:$0xff] }
  0xaa   :  { %8546 = vmatpush1.bf16.msra.mxu0 %v8545_v63  ;;  %8742 = vmatpush1.bf16.msra.mxu1 %v8741_v0  ;;  %v1274_v63 = vld [vmem:[%s20877_s1 + $0x2698] sm:$0xff]  ;;  %v1263_v0 = vld [vmem:[%s20877_s1 + $0x2640] sm:$0xff] }
  0xab   :  { %8548 = vmatprep.subr.bf16.mxu0 %v8547_v1  ;;  %8744 = vmatprep.subr.bf16.mxu1 %v8743_v5  ;;  %v8763_v1 = vpack.c.bf16 %v1277_v58, %v1264_v57  ;;  %v1290_v5 = vld [vmem:[%s20877_s1 + $0x2718] sm:$0xff]  ;;  %v8569_v7 = vpack.c.bf16 %v1274_v63, %v1261_v62  ;;  %v8765_v8 = vpack.c.bf16 %v1276_v2, %v1263_v0  ;;  %v124_v57 = vld [vmem:[%s20877_s1 + $0x2a8] sm:$0xff]  ;;  %v137_v58 = vld [vmem:[%s20877_s1 + $0x310] sm:$0xff] }
  0xac   :  { %v121_v62 = vld [vmem:[%s20877_s1 + $0x290] sm:$0xff]  ;;  %v134_v63 = vld [vmem:[%s20877_s1 + $0x2f8] sm:$0xff]  ;;  %v123_v0 = vld [vmem:[%s20877_s1 + $0x2a0] sm:$0xff] }
  0xad   :  { %v136_v2 = vld [vmem:[%s20877_s1 + $0x308] sm:$0xff] }
  0xae   :  { %8550 = vmatpush1.bf16.msra.mxu0 %v8549_v11  ;;  %8746 = vmatpush1.bf16.msra.mxu1 %v8745_v12  ;;  %v1300_v11 = vld [vmem:[%s20877_s1 + $0x2768] sm:$0xff]  ;;  %v8767_v12 = vpack.c.bf16 %v1303_v6, %v1290_v5  ;;  %v150_v5 = vld [vmem:[%s20877_s1 + $0x378] sm:$0xff]  ;;  %v163_v6 = vld [vmem:[%s20877_s1 + $0x3e0] sm:$0xff] }
  0xaf   :  { %8552 = vmatprep.subr.bf16.mxu0 %v8551_v13  ;;  %8748 = vmatprep.subr.bf16.mxu1 %v8747_v17  ;;  %v1289_v13 = vld [vmem:[%s20877_s1 + $0x2710] sm:$0xff]  ;;  %v36_v17 = vld [vmem:[%s20878_s0 + $0x20] sm:$0xff]  ;;  %v8573_v18 = vpack.c.bf16 %v1300_v11, %v1287_v10  ;;  %v160_v11 = vld [vmem:[%s20877_s1 + $0x3c8] sm:$0xff] }
  0xb0   :  { %v8769_v21 = vpack.c.bf16 %v1302_v14, %v1289_v13  ;;  %v147_v10 = vld [vmem:[%s20877_s1 + $0x360] sm:$0xff]  ;;  %v8983_v13 = vpack.c.bf16 %v163_v6, %v150_v5  ;;  %v162_v14 = vld [vmem:[%s20877_s1 + $0x3d8] sm:$0xff] }
  0xb2   :  { %8554 = vmatpush1.bf16.msra.mxu0 %v8553_v23  ;;  %8750 = vmatpush1.bf16.msra.mxu1 %v8749_v24  ;;  %v8967_v23 = vpack.c.bf16 %v59_v20, %v46_v19  ;;  %v11481_v24 = vmov 0.0   ;;  %v8789_v19 = vpack.c.bf16 %v160_v11, %v147_v10  ;;  %v292_v11 = vld [vmem:[%s20877_s1 + $0x7e8] sm:$0xff] }
  0xb3   :  { %8556 = vmatprep.subr.bf16.mxu0 %v8555_v25  ;;  %8752 = vmatprep.subr.bf16.mxu1 %v8751_v29  ;;  %v43_v25 = vld [vmem:[%s20877_s1 + $0x20] sm:$0xff]  ;;  %v70_v29 = vld [vmem:[%s20877_s1 + $0xf8] sm:$0xff] }
  0xb4   :  { %v8773_v34 = vpack.c.bf16 %v56_v26, %v43_v25  ;;  %v175_v25 = vld [vmem:[%s20877_s1 + $0x440] sm:$0xff] }
  0xb6   :  { %8558 = vmatpush1.bf16.msra.mxu0 %v8557_v35  ;;  %8754 = vmatpush1.bf16.msra.mxu1 %v8753_v36  ;;  %v8969_v35 = vpack.c.bf16 %v58_v28, %v45_v27  ;;  %v8775_v36 = vpack.c.bf16 %v83_v30, %v70_v29  ;;  %v188_v27 = vld [vmem:[%s20877_s1 + $0x4a8] sm:$0xff]  ;;  %v213_v29 = vld [vmem:[%s20877_s1 + $0x570] sm:$0xff]  ;;  %v202_v30 = vld [vmem:[%s20877_s1 + $0x518] sm:$0xff] }
  0xb7   :  { %8560 = vmatprep.subr.bf16.mxu0 %v8559_v37  ;;  %8756 = vmatprep.subr.bf16.mxu1 %v8755_v41  ;;  %v69_v37 = vld [vmem:[%s20877_s1 + $0xf0] sm:$0xff]  ;;  %v84_v41 = vld [vmem:[%s20877_s1 + $0x168] sm:$0xff] }
  0xb8   :  { %v8777_v46 = vpack.c.bf16 %v82_v38, %v69_v37  ;;  %v200_v28 = vld [vmem:[%s20877_s1 + $0x508] sm:$0xff]  ;;  %v201_v37 = vld [vmem:[%s20877_s1 + $0x510] sm:$0xff]  ;;  %v8991_v38 = vpack.c.bf16 %v215_v31, %v202_v30 }
  0xba   :  { %8562 = vmatpush1.bf16.msra.mxu0 %v8561_v47  ;;  %8758 = vmatpush1.bf16.msra.mxu1 %v8757_v48  ;;  %v8973_v47 = vpack.c.bf16 %v84_v41, %v71_v39  ;;  %v8779_v48 = vpack.c.bf16 %v109_v43, %v96_v42  ;;  %v214_v39 = vld [vmem:[%s20877_s1 + $0x578] sm:$0xff]  ;;  %v239_v41 = vld [vmem:[%s20877_s1 + $0x640] sm:$0xff]  ;;  %v228_v42 = vld [vmem:[%s20877_s1 + $0x5e8] sm:$0xff] }
  0xbb   :  { %8564 = vmatprep.subr.bf16.mxu0 %v8563_v49  ;;  %8760 = vmatprep.subr.bf16.mxu1 %v8759_v53  ;;  %v95_v49 = vld [vmem:[%s20877_s1 + $0x1c0] sm:$0xff]  ;;  %v110_v53 = vld [vmem:[%s20877_s1 + $0x238] sm:$0xff]  ;;  %v241_v43 = vld [vmem:[%s20877_s1 + $0x650] sm:$0xff]  ;;  %v8993_v45 = vpack.c.bf16 %v214_v39, %v201_v37 }
  0xbc   :  { %v356_v37 = vld [vmem:[%s20877_s1 + $0x9e8] sm:$0xff]  ;;  %v358_v39 = vld [vmem:[%s20877_s1 + $0x9f8] sm:$0xff] }
  0xbe   :  { %8566 = vmatpush1.bf16.msra.mxu0 %v8565_v59  ;;  %8762 = vmatpush1.bf16.msra.mxu1 %v8761_v60  ;;  %v8781_v59 = vpack.c.bf16 %v108_v50, %v95_v49  ;;  %v8977_v60 = vpack.c.bf16 %v110_v53, %v97_v51  ;;  %v227_v49 = vld [vmem:[%s20877_s1 + $0x5e0] sm:$0xff]  ;;  %v8995_v50 = vpack.c.bf16 %v241_v43, %v228_v42  ;;  %v240_v51 = vld [vmem:[%s20877_s1 + $0x648] sm:$0xff]  ;;  %v265_v53 = vld [vmem:[%s20877_s1 + $0x710] sm:$0xff] }
  0xbf   :  { %8568 = vmatprep.subr.bf16.mxu0 %v8567_v61  ;;  %8764 = vmatprep.subr.bf16.mxu1 %v8763_v1  ;;  %v8783_v61 = vpack.c.bf16 %v135_v55, %v122_v54  ;;  %v8979_v1 = vpack.c.bf16 %v137_v58, %v124_v57  ;;  %v254_v54 = vld [vmem:[%s20877_s1 + $0x6b8] sm:$0xff]  ;;  %v267_v55 = vld [vmem:[%s20877_s1 + $0x720] sm:$0xff]  ;;  %v8997_v57 = vpack.c.bf16 %v240_v51, %v227_v49  ;;  %v384_v51 = vld [vmem:[%s20877_s1 + $0xac8] sm:$0xff] }
  0xc0   :  { %v382_v49 = vld [vmem:[%s20877_s1 + $0xab8] sm:$0xff] }
  0xc2   :  { %8570 = vmatpush1.bf16.msra.mxu0 %v8569_v7  ;;  %8766 = vmatpush1.bf16.msra.mxu1 %v8765_v8  ;;  %v8785_v7 = vpack.c.bf16 %v134_v63, %v121_v62  ;;  %v8981_v8 = vpack.c.bf16 %v136_v2, %v123_v0  ;;  %v8999_v62 = vpack.c.bf16 %v267_v55, %v254_v54  ;;  %v266_v63 = vld [vmem:[%s20877_s1 + $0x718] sm:$0xff]  ;;  %v280_v2 = vld [vmem:[%s20877_s1 + $0x788] sm:$0xff] }
  0xc3   :  { %8572 = vmatprep.subr.bf16.mxu0 %v8571_v9  ;;  %8768 = vmatprep.subr.bf16.mxu1 %v8767_v12  ;;  %v8787_v9 = vpack.c.bf16 %v161_v4, %v148_v3  ;;  %v149_v12 = vld [vmem:[%s20877_s1 + $0x370] sm:$0xff]  ;;  %v278_v0 = vld [vmem:[%s20877_s1 + $0x778] sm:$0xff] }
  0xc4   :  { %v8985_v20 = vpack.c.bf16 %v162_v14, %v149_v12  ;;  %v293_v3 = vld [vmem:[%s20877_s1 + $0x7f0] sm:$0xff]  ;;  %v304_v12 = vld [vmem:[%s20877_s1 + $0x848] sm:$0xff]  ;;  %v306_v14 = vld [vmem:[%s20877_s1 + $0x858] sm:$0xff] }
  0xc5   :  { %1593 = vmatmul.mubr.f32.vlgmr.msra.gmra.mrb[0].mxu0 %v36_v17  ;;  %1877 = vmatmul.mubr.f32.vlgmr.msra.gmra.mrb[0].mxu1 %v36_v17  ;;  %v176_v17 = vld [vmem:[%s20877_s1 + $0x448] sm:$0xff]  ;;  %v9003_v10 = vpack.c.bf16 %v293_v3, %v280_v2 }
  0xc6   :  { %8574 = vmatpush1.bf16.msra.mxu0 %v8573_v18  ;;  %8770 = vmatpush1.bf16.msra.mxu1 %v8769_v21  ;;  %v189_v18 = vld [vmem:[%s20877_s1 + $0x4b0] sm:$0xff]  ;;  %v8791_v21 = vpack.c.bf16 %v187_v16, %v174_v15  ;;  %v319_v15 = vld [vmem:[%s20877_s1 + $0x8c0] sm:$0xff] }
  0xc7   :  { %1663 = vmatprep.mubr.f32.mxu0 %v11481_v24  ;;  %1947 = vmatprep.mubr.f32.mxu1 %v11481_v24  ;;  %v8987_v26 = vpack.c.bf16 %v189_v18, %v176_v17 }
  0xc8   :  { %8772 = vmatprep.subr.bf16.mxu0 %v8771_v22  ;;  %8968 = vmatprep.subr.bf16.mxu1 %v8967_v23  ;;  %v173_v22 = vld [vmem:[%s20877_s1 + $0x430] sm:$0xff]  ;;  %v186_v23 = vld [vmem:[%s20877_s1 + $0x498] sm:$0xff] }
  0xc9   :  { %v8793_v32 = vpack.c.bf16 %v186_v23, %v173_v22  ;;  %v9007_v22 = vpack.c.bf16 %v319_v15, %v306_v14  ;;  %v318_v23 = vld [vmem:[%s20877_s1 + $0x8b8] sm:$0xff] }
  0xcd   :  { %7857 = vmatmul.mubr.msk.f32.vlgmr.msra.gmra.mrb[0].mxu0 %vm1382_vm0, %v38_v33  ;;  %7858 = vmatmul.mubr.msk.f32.vlgmr.msra.gmra.mrb[0].mxu1 %vm1382_vm0, %v38_v33  ;;  %v8989_v33 = vpack.c.bf16 %v188_v27, %v175_v25  ;;  %v330_v25 = vld [vmem:[%s20877_s1 + $0x918] sm:$0xff]  ;;  %v332_v27 = vld [vmem:[%s20877_s1 + $0x928] sm:$0xff] }
  0xce   :  { %8774 = vmatpush1.bf16.msra.mxu0 %v8773_v34  ;;  %8970 = vmatpush1.bf16.msra.mxu1 %v8969_v35  ;;  %v8795_v34 = vpack.c.bf16 %v213_v29, %v200_v28  ;;  %v199_v35 = vld [vmem:[%s20877_s1 + $0x500] sm:$0xff]  ;;  %v345_v28 = vld [vmem:[%s20877_s1 + $0x990] sm:$0xff] }
  0xcf   :  { %8776 = vmatprep.subr.bf16.mxu0 %v8775_v36  ;;  %8972 = vmatprep.subr.bf16.mxu1 %v8971_v40  ;;  %v212_v36 = vld [vmem:[%s20877_s1 + $0x568] sm:$0xff]  ;;  %v226_v40 = vld [vmem:[%s20877_s1 + $0x5d8] sm:$0xff] }
  0xd0   :  { %2018 = vmatprep.mubr.f32.mxu0 %v11462_v56  ;;  %2302 = vmatprep.mubr.f32.mxu1 %v11462_v56  ;;  %v8797_v44 = vpack.c.bf16 %v212_v36, %v199_v35  ;;  %v9011_v35 = vpack.c.bf16 %v345_v28, %v332_v27  ;;  %v344_v36 = vld [vmem:[%s20877_s1 + $0x988] sm:$0xff] }
  0xd2   :  { %8778 = vmatpush1.bf16.msra.mxu0 %v8777_v46  ;;  %8974 = vmatpush1.bf16.msra.mxu1 %v8973_v47  ;;  %v8799_v46 = vpack.c.bf16 %v239_v41, %v226_v40  ;;  %v225_v47 = vld [vmem:[%s20877_s1 + $0x5d0] sm:$0xff]  ;;  %v371_v40 = vld [vmem:[%s20877_s1 + $0xa60] sm:$0xff] }
  0xd3   :  { %8780 = vmatprep.subr.bf16.mxu0 %v8779_v48  ;;  %8976 = vmatprep.subr.bf16.mxu1 %v8975_v52  ;;  %v238_v48 = vld [vmem:[%s20877_s1 + $0x638] sm:$0xff]  ;;  %v252_v52 = vld [vmem:[%s20877_s1 + $0x6a8] sm:$0xff] }
  0xd4   :  { %v8801_v56 = vpack.c.bf16 %v238_v48, %v225_v47  ;;  %v8803_v58 = vpack.c.bf16 %v265_v53, %v252_v52  ;;  %v9015_v47 = vpack.c.bf16 %v371_v40, %v358_v39  ;;  %v370_v48 = vld [vmem:[%s20877_s1 + $0xa58] sm:$0xff]  ;;  %v397_v52 = vld [vmem:[%s20877_s1 + $0xb30] sm:$0xff] }
  0xd6   :  { %8782 = vmatpush1.bf16.msra.mxu0 %v8781_v59  ;;  %8978 = vmatpush1.bf16.msra.mxu1 %v8977_v60  ;;  %v251_v59 = vld [vmem:[%s20877_s1 + $0x6a0] sm:$0xff]  ;;  %v264_v60 = vld [vmem:[%s20877_s1 + $0x708] sm:$0xff] }
  0xd7   :  { %8784 = vmatprep.subr.bf16.mxu0 %v8783_v61  ;;  %8980 = vmatprep.subr.bf16.mxu1 %v8979_v1  ;;  %v253_v61 = vld [vmem:[%s20877_s1 + $0x6b0] sm:$0xff]  ;;  %v291_v1 = vld [vmem:[%s20877_s1 + $0x7e0] sm:$0xff]  ;;  %v8805_v4 = vpack.c.bf16 %v264_v60, %v251_v59  ;;  %v9019_v59 = vpack.c.bf16 %v397_v52, %v384_v51  ;;  %v396_v60 = vld [vmem:[%s20877_s1 + $0xb28] sm:$0xff] }
  0xd8   :  { %v9001_v5 = vpack.c.bf16 %v266_v63, %v253_v61  ;;  %v8807_v6 = vpack.c.bf16 %v291_v1, %v278_v0  ;;  %v408_v61 = vld [vmem:[%s20877_s1 + $0xb88] sm:$0xff]  ;;  %v410_v63 = vld [vmem:[%s20877_s1 + $0xb98] sm:$0xff]  ;;  %v423_v0 = vld [vmem:[%s20877_s1 + $0xc00] sm:$0xff] }
  0xda   :  { %8786 = vmatpush1.bf16.msra.mxu0 %v8785_v7  ;;  %8982 = vmatpush1.bf16.msra.mxu1 %v8981_v8  ;;  %v277_v7 = vld [vmem:[%s20877_s1 + $0x770] sm:$0xff]  ;;  %v290_v8 = vld [vmem:[%s20877_s1 + $0x7d8] sm:$0xff] }
  0xdb   :  { %8788 = vmatprep.subr.bf16.mxu0 %v8787_v9  ;;  %8984 = vmatprep.subr.bf16.mxu1 %v8983_v13  ;;  %v279_v9 = vld [vmem:[%s20877_s1 + $0x780] sm:$0xff]  ;;  %v317_v13 = vld [vmem:[%s20877_s1 + $0x8b0] sm:$0xff]  ;;  %v8809_v16 = vpack.c.bf16 %v290_v8, %v277_v7  ;;  %v9023_v7 = vpack.c.bf16 %v423_v0, %v410_v63  ;;  %v422_v8 = vld [vmem:[%s20877_s1 + $0xbf8] sm:$0xff] }
  0xdc   :  { %v9005_v17 = vpack.c.bf16 %v292_v11, %v279_v9  ;;  %v8811_v18 = vpack.c.bf16 %v317_v13, %v304_v12  ;;  %v434_v9 = vld [vmem:[%s20877_s1 + $0xc58] sm:$0xff]  ;;  %v436_v11 = vld [vmem:[%s20877_s1 + $0xc68] sm:$0xff]  ;;  %v449_v12 = vld [vmem:[%s20877_s1 + $0xcd0] sm:$0xff] }
  0xdd   :  { %v553_v63 = vld [vmem:[%s20877_s1 + $0x1010] sm:$0xff] }
  0xde   :  { %8790 = vmatpush1.bf16.msra.mxu0 %v8789_v19  ;;  %8986 = vmatpush1.bf16.msra.mxu1 %v8985_v20  ;;  %v303_v19 = vld [vmem:[%s20877_s1 + $0x840] sm:$0xff]  ;;  %v316_v20 = vld [vmem:[%s20877_s1 + $0x8a8] sm:$0xff] }
  0xdf   :  { %8792 = vmatprep.subr.bf16.mxu0 %v8791_v21  ;;  %8988 = vmatprep.subr.bf16.mxu1 %v8987_v26  ;;  %v305_v21 = vld [vmem:[%s20877_s1 + $0x850] sm:$0xff]  ;;  %v343_v26 = vld [vmem:[%s20877_s1 + $0x980] sm:$0xff]  ;;  %v8813_v29 = vpack.c.bf16 %v316_v20, %v303_v19  ;;  %v9027_v19 = vpack.c.bf16 %v449_v12, %v436_v11  ;;  %v448_v20 = vld [vmem:[%s20877_s1 + $0xcc8] sm:$0xff] }
  0xe0   :  { %v9009_v30 = vpack.c.bf16 %v318_v23, %v305_v21  ;;  %v8815_v31 = vpack.c.bf16 %v343_v26, %v330_v25  ;;  %v460_v21 = vld [vmem:[%s20877_s1 + $0xd28] sm:$0xff]  ;;  %v462_v23 = vld [vmem:[%s20877_s1 + $0xd38] sm:$0xff]  ;;  %v475_v25 = vld [vmem:[%s20877_s1 + $0xda0] sm:$0xff] }
  0xe1   :  { %v579_v11 = vld [vmem:[%s20877_s1 + $0x10e0] sm:$0xff] }
  0xe2   :  { %8794 = vmatpush1.bf16.msra.mxu0 %v8793_v32  ;;  %8990 = vmatpush1.bf16.msra.mxu1 %v8989_v33  ;;  %v329_v32 = vld [vmem:[%s20877_s1 + $0x910] sm:$0xff]  ;;  %v342_v33 = vld [vmem:[%s20877_s1 + $0x978] sm:$0xff] }
  0xe3   :  { %8796 = vmatprep.subr.bf16.mxu0 %v8795_v34  ;;  %8992 = vmatprep.subr.bf16.mxu1 %v8991_v38  ;;  %v331_v34 = vld [vmem:[%s20877_s1 + $0x920] sm:$0xff]  ;;  %v369_v38 = vld [vmem:[%s20877_s1 + $0xa50] sm:$0xff]  ;;  %v8817_v41 = vpack.c.bf16 %v342_v33, %v329_v32  ;;  %v9031_v32 = vpack.c.bf16 %v475_v25, %v462_v23  ;;  %v474_v33 = vld [vmem:[%s20877_s1 + $0xd98] sm:$0xff] }
  0xe4   :  { %v9013_v42 = vpack.c.bf16 %v344_v36, %v331_v34  ;;  %v8819_v43 = vpack.c.bf16 %v369_v38, %v356_v37  ;;  %v486_v34 = vld [vmem:[%s20877_s1 + $0xdf8] sm:$0xff]  ;;  %v488_v36 = vld [vmem:[%s20877_s1 + $0xe08] sm:$0xff]  ;;  %v501_v37 = vld [vmem:[%s20877_s1 + $0xe70] sm:$0xff] }
  0xe5   :  { %v605_v23 = vld [vmem:[%s20877_s1 + $0x11b0] sm:$0xff] }
  0xe6   :  { %8798 = vmatpush1.bf16.msra.mxu0 %v8797_v44  ;;  %8994 = vmatpush1.bf16.msra.mxu1 %v8993_v45  ;;  %v355_v44 = vld [vmem:[%s20877_s1 + $0x9e0] sm:$0xff]  ;;  %v368_v45 = vld [vmem:[%s20877_s1 + $0xa48] sm:$0xff] }
  0xe7   :  { %8800 = vmatprep.subr.bf16.mxu0 %v8799_v46  ;;  %8996 = vmatprep.subr.bf16.mxu1 %v8995_v50  ;;  %v357_v46 = vld [vmem:[%s20877_s1 + $0x9f0] sm:$0xff]  ;;  %v395_v50 = vld [vmem:[%s20877_s1 + $0xb20] sm:$0xff]  ;;  %v8821_v53 = vpack.c.bf16 %v368_v45, %v355_v44  ;;  %v9035_v44 = vpack.c.bf16 %v501_v37, %v488_v36  ;;  %v500_v45 = vld [vmem:[%s20877_s1 + $0xe68] sm:$0xff] }
  0xe8   :  { %v9017_v54 = vpack.c.bf16 %v370_v48, %v357_v46  ;;  %v8823_v55 = vpack.c.bf16 %v395_v50, %v382_v49  ;;  %v512_v46 = vld [vmem:[%s20877_s1 + $0xec8] sm:$0xff]  ;;  %v11463_v48 = vld [vmem:[%s20878_s0] sm:$0xff]  ;;  %v514_v49 = vld [vmem:[%s20877_s1 + $0xed8] sm:$0xff] }
  0xe9   :  { %v527_v50 = vld [vmem:[%s20877_s1 + $0xf40] sm:$0xff] }
  0xea   :  { %8802 = vmatpush1.bf16.msra.mxu0 %v8801_v56  ;;  %8998 = vmatpush1.bf16.msra.mxu1 %v8997_v57  ;;  %v381_v56 = vld [vmem:[%s20877_s1 + $0xab0] sm:$0xff]  ;;  %v394_v57 = vld [vmem:[%s20877_s1 + $0xb18] sm:$0xff]  ;;  %v631_v36 = vld [vmem:[%s20877_s1 + $0x1280] sm:$0xff] }
  0xeb   :  { %8804 = vmatprep.subr.bf16.mxu0 %v8803_v58  ;;  %9000 = vmatprep.subr.bf16.mxu1 %v8999_v62  ;;  %v383_v58 = vld [vmem:[%s20877_s1 + $0xac0] sm:$0xff]  ;;  %v421_v62 = vld [vmem:[%s20877_s1 + $0xbf0] sm:$0xff]  ;;  %v8825_v1 = vpack.c.bf16 %v394_v57, %v381_v56  ;;  %v9039_v57 = vpack.c.bf16 %v527_v50, %v514_v49 }
  0xec   :  { %v9021_v2 = vpack.c.bf16 %v396_v60, %v383_v58  ;;  %v8827_v3 = vpack.c.bf16 %v421_v62, %v408_v61  ;;  %v513_v56 = vld [vmem:[%s20877_s1 + $0xed0] sm:$0xff]  ;;  %v526_v58 = vld [vmem:[%s20877_s1 + $0xf38] sm:$0xff]  ;;  %v551_v60 = vld [vmem:[%s20877_s1 + $0x1000] sm:$0xff] }
  0xed   :  { %v11464_v61 = vld [vmem:[%s20878_s0 + $0x18] sm:$0xff]  ;;  %v540_v62 = vld [vmem:[%s20877_s1 + $0xfa8] sm:$0xff] }
  0xee   :  { %8806 = vmatpush1.bf16.msra.mxu0 %v8805_v4  ;;  %9002 = vmatpush1.bf16.msra.mxu1 %v9001_v5  ;;  %v407_v4 = vld [vmem:[%s20877_s1 + $0xb80] sm:$0xff]  ;;  %v420_v5 = vld [vmem:[%s20877_s1 + $0xbe8] sm:$0xff] }
  0xef   :  { %8808 = vmatprep.subr.bf16.mxu0 %v8807_v6  ;;  %9004 = vmatprep.subr.bf16.mxu1 %v9003_v10  ;;  %v409_v6 = vld [vmem:[%s20877_s1 + $0xb90] sm:$0xff]  ;;  %v447_v10 = vld [vmem:[%s20877_s1 + $0xcc0] sm:$0xff]  ;;  %v8829_v13 = vpack.c.bf16 %v420_v5, %v407_v4  ;;  %v550_v4 = vld [vmem:[%s20877_s1 + $0xff8] sm:$0xff] }
  0xf0   :  { %v9025_v14 = vpack.c.bf16 %v422_v8, %v409_v6  ;;  %v8831_v15 = vpack.c.bf16 %v447_v10, %v434_v9  ;;  %v539_v5 = vld [vmem:[%s20877_s1 + $0xfa0] sm:$0xff]  ;;  %v9043_v6 = vpack.c.bf16 %v553_v63, %v540_v62  ;;  %v564_v8 = vld [vmem:[%s20877_s1 + $0x1068] sm:$0xff]  ;;  %v577_v9 = vld [vmem:[%s20877_s1 + $0x10d0] sm:$0xff] }
  0xf1   :  { %v566_v10 = vld [vmem:[%s20877_s1 + $0x1078] sm:$0xff] }
  0xf2   :  { %8810 = vmatpush1.bf16.msra.mxu0 %v8809_v16  ;;  %9006 = vmatpush1.bf16.msra.mxu1 %v9005_v17  ;;  %v433_v16 = vld [vmem:[%s20877_s1 + $0xc50] sm:$0xff]  ;;  %v446_v17 = vld [vmem:[%s20877_s1 + $0xcb8] sm:$0xff] }
  0xf3   :  { %8812 = vmatprep.subr.bf16.mxu0 %v8811_v18  ;;  %9008 = vmatprep.subr.bf16.mxu1 %v9007_v22  ;;  %v435_v18 = vld [vmem:[%s20877_s1 + $0xc60] sm:$0xff]  ;;  %v473_v22 = vld [vmem:[%s20877_s1 + $0xd90] sm:$0xff]  ;;  %v8833_v26 = vpack.c.bf16 %v446_v17, %v433_v16  ;;  %v576_v16 = vld [vmem:[%s20877_s1 + $0x10c8] sm:$0xff] }
  0xf4   :  { %v9029_v27 = vpack.c.bf16 %v448_v20, %v435_v18  ;;  %v8835_v28 = vpack.c.bf16 %v473_v22, %v460_v21  ;;  %v565_v17 = vld [vmem:[%s20877_s1 + $0x1070] sm:$0xff]  ;;  %v9047_v18 = vpack.c.bf16 %v579_v11, %v566_v10  ;;  %v590_v20 = vld [vmem:[%s20877_s1 + $0x1138] sm:$0xff]  ;;  %v603_v21 = vld [vmem:[%s20877_s1 + $0x11a0] sm:$0xff] }
  0xf5   :  { %v592_v22 = vld [vmem:[%s20877_s1 + $0x1148] sm:$0xff] }
  0xf6   :  { %8814 = vmatpush1.bf16.msra.mxu0 %v8813_v29  ;;  %9010 = vmatpush1.bf16.msra.mxu1 %v9009_v30  ;;  %v459_v29 = vld [vmem:[%s20877_s1 + $0xd20] sm:$0xff]  ;;  %v472_v30 = vld [vmem:[%s20877_s1 + $0xd88] sm:$0xff] }
  0xf7   :  { %8816 = vmatprep.subr.bf16.mxu0 %v8815_v31  ;;  %9012 = vmatprep.subr.bf16.mxu1 %v9011_v35  ;;  %v461_v31 = vld [vmem:[%s20877_s1 + $0xd30] sm:$0xff]  ;;  %v499_v35 = vld [vmem:[%s20877_s1 + $0xe60] sm:$0xff]  ;;  %v8837_v38 = vpack.c.bf16 %v472_v30, %v459_v29  ;;  %v602_v29 = vld [vmem:[%s20877_s1 + $0x1198] sm:$0xff] }
  0xf8   :  { %v9033_v39 = vpack.c.bf16 %v474_v33, %v461_v31  ;;  %v8839_v40 = vpack.c.bf16 %v499_v35, %v486_v34  ;;  %v591_v30 = vld [vmem:[%s20877_s1 + $0x1140] sm:$0xff]  ;;  %v9051_v31 = vpack.c.bf16 %v605_v23, %v592_v22  ;;  %v616_v33 = vld [vmem:[%s20877_s1 + $0x1208] sm:$0xff]  ;;  %v629_v34 = vld [vmem:[%s20877_s1 + $0x1270] sm:$0xff] }
  0xf9   :  { %v618_v35 = vld [vmem:[%s20877_s1 + $0x1218] sm:$0xff] }
  0xfa   :  { %8818 = vmatpush1.bf16.msra.mxu0 %v8817_v41  ;;  %9014 = vmatpush1.bf16.msra.mxu1 %v9013_v42  ;;  %v485_v41 = vld [vmem:[%s20877_s1 + $0xdf0] sm:$0xff]  ;;  %v498_v42 = vld [vmem:[%s20877_s1 + $0xe58] sm:$0xff] }
  0xfb   :  { %8820 = vmatprep.subr.bf16.mxu0 %v8819_v43  ;;  %9016 = vmatprep.subr.bf16.mxu1 %v9015_v47  ;;  %v487_v43 = vld [vmem:[%s20877_s1 + $0xe00] sm:$0xff]  ;;  %v525_v47 = vld [vmem:[%s20877_s1 + $0xf30] sm:$0xff]  ;;  %v8841_v51 = vpack.c.bf16 %v498_v42, %v485_v41  ;;  %v628_v41 = vld [vmem:[%s20877_s1 + $0x1268] sm:$0xff] }
  0xfc   :  { %v9037_v52 = vpack.c.bf16 %v500_v45, %v487_v43  ;;  %v617_v42 = vld [vmem:[%s20877_s1 + $0x1210] sm:$0xff]  ;;  %v9055_v43 = vpack.c.bf16 %v631_v36, %v618_v35  ;;  %v642_v45 = vld [vmem:[%s20877_s1 + $0x12d8] sm:$0xff] }
  0xfe   :  { %8822 = vmatpush1.bf16.msra.mxu0 %v8821_v53  ;;  %9018 = vmatpush1.bf16.msra.mxu1 %v9017_v54  ;;  %v8843_v53 = vpack.c.bf16 %v525_v47, %v512_v46  ;;  %v511_v54 = vld [vmem:[%s20877_s1 + $0xec0] sm:$0xff]  ;;  %v644_v47 = vld [vmem:[%s20877_s1 + $0x12e8] sm:$0xff] }
  0xff   :  { %8824 = vmatprep.subr.bf16.mxu0 %v8823_v55  ;;  %9020 = vmatprep.subr.bf16.mxu1 %v9019_v59  ;;  %v524_v55 = vld [vmem:[%s20877_s1 + $0xf28] sm:$0xff]  ;;  %v538_v59 = vld [vmem:[%s20877_s1 + $0xf98] sm:$0xff]  ;;  %v655_v46 = vld [vmem:[%s20877_s1 + $0x1340] sm:$0xff] }
 0x100   :  { %v8845_v0 = vpack.c.bf16 %v524_v55, %v511_v54  ;;  %v643_v54 = vld [vmem:[%s20877_s1 + $0x12e0] sm:$0xff] }
 0x102   :  { %8826 = vmatpush1.bf16.msra.mxu0 %v8825_v1  ;;  %9022 = vmatpush1.bf16.msra.mxu1 %v9021_v2  ;;  %v9041_v1 = vpack.c.bf16 %v526_v58, %v513_v56  ;;  %v8847_v2 = vpack.c.bf16 %v551_v60, %v538_v59  ;;  %v656_v56 = vld [vmem:[%s20877_s1 + $0x1348] sm:$0xff]  ;;  %v681_v58 = vld [vmem:[%s20877_s1 + $0x1410] sm:$0xff]  ;;  %v670_v59 = vld [vmem:[%s20877_s1 + $0x13b8] sm:$0xff] }
 0x103   :  { %8828 = vmatprep.subr.bf16.mxu0 %v8827_v3  ;;  %9024 = vmatprep.subr.bf16.mxu1 %v9023_v7  ;;  %v537_v3 = vld [vmem:[%s20877_s1 + $0xf90] sm:$0xff]  ;;  %v552_v7 = vld [vmem:[%s20877_s1 + $0x1008] sm:$0xff]  ;;  %v683_v60 = vld [vmem:[%s20877_s1 + $0x1420] sm:$0xff]  ;;  %v9061_v62 = vpack.c.bf16 %v656_v56, %v643_v54 }
 0x104   :  { %v8849_v12 = vpack.c.bf16 %v550_v4, %v537_v3  ;;  %v9063_v3 = vpack.c.bf16 %v683_v60, %v670_v59  ;;  %v682_v4 = vld [vmem:[%s20877_s1 + $0x1418] sm:$0xff]  ;;  %v800_v56 = vld [vmem:[%s20877_s1 + $0x17c8] sm:$0xff] }
 0x105   :  { %v798_v54 = vld [vmem:[%s20877_s1 + $0x17b8] sm:$0xff] }
 0x106   :  { %8830 = vmatpush1.bf16.msra.mxu0 %v8829_v13  ;;  %9026 = vmatpush1.bf16.msra.mxu1 %v9025_v14  ;;  %v9045_v13 = vpack.c.bf16 %v552_v7, %v539_v5  ;;  %v8851_v14 = vpack.c.bf16 %v577_v9, %v564_v8  ;;  %v694_v5 = vld [vmem:[%s20877_s1 + $0x1478] sm:$0xff]  ;;  %v696_v7 = vld [vmem:[%s20877_s1 + $0x1488] sm:$0xff]  ;;  %v709_v8 = vld [vmem:[%s20877_s1 + $0x14f0] sm:$0xff] }
 0x107   :  { %8832 = vmatprep.subr.bf16.mxu0 %v8831_v15  ;;  %9028 = vmatprep.subr.bf16.mxu1 %v9027_v19  ;;  %v563_v15 = vld [vmem:[%s20877_s1 + $0x1060] sm:$0xff]  ;;  %v578_v19 = vld [vmem:[%s20877_s1 + $0x10d8] sm:$0xff] }
 0x108   :  { %v8853_v25 = vpack.c.bf16 %v576_v16, %v563_v15  ;;  %v9067_v15 = vpack.c.bf16 %v709_v8, %v696_v7  ;;  %v708_v16 = vld [vmem:[%s20877_s1 + $0x14e8] sm:$0xff] }
 0x10a   :  { %8834 = vmatpush1.bf16.msra.mxu0 %v8833_v26  ;;  %9030 = vmatpush1.bf16.msra.mxu1 %v9029_v27  ;;  %v9049_v26 = vpack.c.bf16 %v578_v19, %v565_v17  ;;  %v8855_v27 = vpack.c.bf16 %v603_v21, %v590_v20  ;;  %v720_v17 = vld [vmem:[%s20877_s1 + $0x1548] sm:$0xff]  ;;  %v722_v19 = vld [vmem:[%s20877_s1 + $0x1558] sm:$0xff]  ;;  %v735_v20 = vld [vmem:[%s20877_s1 + $0x15c0] sm:$0xff] }
 0x10b   :  { %8836 = vmatprep.subr.bf16.mxu0 %v8835_v28  ;;  %9032 = vmatprep.subr.bf16.mxu1 %v9031_v32  ;;  %v589_v28 = vld [vmem:[%s20877_s1 + $0x1130] sm:$0xff]  ;;  %v604_v32 = vld [vmem:[%s20877_s1 + $0x11a8] sm:$0xff] }
 0x10c   :  { %v8857_v37 = vpack.c.bf16 %v602_v29, %v589_v28  ;;  %v9071_v28 = vpack.c.bf16 %v735_v20, %v722_v19  ;;  %v734_v29 = vld [vmem:[%s20877_s1 + $0x15b8] sm:$0xff] }
 0x10d   :  { %2019 = vmatmul.mubr.f32.vlgmr.msra.gmra.mrb[2].mxu0 %v11463_v48  ;;  %2303 = vmatmul.mubr.f32.vlgmr.msra.gmra.mrb[2].mxu1 %v11463_v48  ;;  %v657_v48 = vld [vmem:[%s20877_s1 + $0x1350] sm:$0xff] }
 0x10e   :  { %8838 = vmatpush1.bf16.msra.mxu0 %v8837_v38  ;;  %9034 = vmatpush1.bf16.msra.mxu1 %v9033_v39  ;;  %v9053_v38 = vpack.c.bf16 %v604_v32, %v591_v30  ;;  %v8859_v39 = vpack.c.bf16 %v629_v34, %v616_v33  ;;  %v9059_v55 = vpack.c.bf16 %v657_v48, %v644_v47  ;;  %v746_v30 = vld [vmem:[%s20877_s1 + $0x1618] sm:$0xff]  ;;  %v748_v32 = vld [vmem:[%s20877_s1 + $0x1628] sm:$0xff]  ;;  %v761_v33 = vld [vmem:[%s20877_s1 + $0x1690] sm:$0xff] }
 0x10f   :  { %8840 = vmatprep.subr.bf16.mxu0 %v8839_v40  ;;  %9036 = vmatprep.subr.bf16.mxu1 %v9035_v44  ;;  %v615_v40 = vld [vmem:[%s20877_s1 + $0x1200] sm:$0xff]  ;;  %v630_v44 = vld [vmem:[%s20877_s1 + $0x1278] sm:$0xff] }
 0x110   :  { %2089 = vmatprep.mubr.f32.mxu0 %v11464_v61  ;;  %2373 = vmatprep.mubr.f32.mxu1 %v11464_v61  ;;  %v8861_v49 = vpack.c.bf16 %v628_v41, %v615_v40  ;;  %v9057_v50 = vpack.c.bf16 %v630_v44, %v617_v42  ;;  %v9075_v40 = vpack.c.bf16 %v761_v33, %v748_v32  ;;  %v760_v41 = vld [vmem:[%s20877_s1 + $0x1688] sm:$0xff]  ;;  %v774_v44 = vld [vmem:[%s20877_s1 + $0x16f8] sm:$0xff] }
 0x111   :  { %v772_v42 = vld [vmem:[%s20877_s1 + $0x16e8] sm:$0xff] }
 0x112   :  { %8842 = vmatpush1.bf16.msra.mxu0 %v8841_v51  ;;  %9038 = vmatpush1.bf16.msra.mxu1 %v9037_v52  ;;  %v8863_v51 = vpack.c.bf16 %v655_v46, %v642_v45  ;;  %v641_v52 = vld [vmem:[%s20877_s1 + $0x12d0] sm:$0xff]  ;;  %v787_v45 = vld [vmem:[%s20877_s1 + $0x1760] sm:$0xff] }
 0x113   :  { %8844 = vmatprep.subr.bf16.mxu0 %v8843_v53  ;;  %9040 = vmatprep.subr.bf16.mxu1 %v9039_v57  ;;  %v654_v53 = vld [vmem:[%s20877_s1 + $0x1338] sm:$0xff]  ;;  %v668_v57 = vld [vmem:[%s20877_s1 + $0x13a8] sm:$0xff] }
 0x114   :  { %v8865_v61 = vpack.c.bf16 %v654_v53, %v641_v52  ;;  %v8867_v63 = vpack.c.bf16 %v681_v58, %v668_v57  ;;  %v9079_v52 = vpack.c.bf16 %v787_v45, %v774_v44  ;;  %v786_v53 = vld [vmem:[%s20877_s1 + $0x1758] sm:$0xff]  ;;  %v813_v57 = vld [vmem:[%s20877_s1 + $0x1830] sm:$0xff] }
 0x116   :  { %8846 = vmatpush1.bf16.msra.mxu0 %v8845_v0  ;;  %9042 = vmatpush1.bf16.msra.mxu1 %v9041_v1  ;;  %v667_v0 = vld [vmem:[%s20877_s1 + $0x13a0] sm:$0xff]  ;;  %v680_v1 = vld [vmem:[%s20877_s1 + $0x1408] sm:$0xff] }
 0x117   :  { %8848 = vmatprep.subr.bf16.mxu0 %v8847_v2  ;;  %9044 = vmatprep.subr.bf16.mxu1 %v9043_v6  ;;  %v669_v2 = vld [vmem:[%s20877_s1 + $0x13b0] sm:$0xff]  ;;  %v707_v6 = vld [vmem:[%s20877_s1 + $0x14e0] sm:$0xff]  ;;  %v8869_v9 = vpack.c.bf16 %v680_v1, %v667_v0  ;;  %v9083_v0 = vpack.c.bf16 %v813_v57, %v800_v56  ;;  %v812_v1 = vld [vmem:[%s20877_s1 + $0x1828] sm:$0xff] }
 0x118   :  { %v9065_v10 = vpack.c.bf16 %v682_v4, %v669_v2  ;;  %v8871_v11 = vpack.c.bf16 %v707_v6, %v694_v5  ;;  %v824_v2 = vld [vmem:[%s20877_s1 + $0x1888] sm:$0xff]  ;;  %v826_v4 = vld [vmem:[%s20877_s1 + $0x1898] sm:$0xff]  ;;  %v839_v5 = vld [vmem:[%s20877_s1 + $0x1900] sm:$0xff] }
 0x11a   :  { %8850 = vmatpush1.bf16.msra.mxu0 %v8849_v12  ;;  %9046 = vmatpush1.bf16.msra.mxu1 %v9045_v13  ;;  %v693_v12 = vld [vmem:[%s20877_s1 + $0x1470] sm:$0xff]  ;;  %v706_v13 = vld [vmem:[%s20877_s1 + $0x14d8] sm:$0xff] }
 0x11b   :  { %8852 = vmatprep.subr.bf16.mxu0 %v8851_v14  ;;  %9048 = vmatprep.subr.bf16.mxu1 %v9047_v18  ;;  %v695_v14 = vld [vmem:[%s20877_s1 + $0x1480] sm:$0xff]  ;;  %v733_v18 = vld [vmem:[%s20877_s1 + $0x15b0] sm:$0xff]  ;;  %v8873_v21 = vpack.c.bf16 %v706_v13, %v693_v12  ;;  %v9087_v12 = vpack.c.bf16 %v839_v5, %v826_v4  ;;  %v838_v13 = vld [vmem:[%s20877_s1 + $0x18f8] sm:$0xff] }
 0x11c   :  { %v9069_v22 = vpack.c.bf16 %v708_v16, %v695_v14  ;;  %v8875_v23 = vpack.c.bf16 %v733_v18, %v720_v17  ;;  %v850_v14 = vld [vmem:[%s20877_s1 + $0x1958] sm:$0xff]  ;;  %v852_v16 = vld [vmem:[%s20877_s1 + $0x1968] sm:$0xff]  ;;  %v865_v17 = vld [vmem:[%s20877_s1 + $0x19d0] sm:$0xff] }
 0x11d   :  { %v969_v4 = vld [vmem:[%s20877_s1 + $0x1d10] sm:$0xff] }
 0x11e   :  { %8854 = vmatpush1.bf16.msra.mxu0 %v8853_v25  ;;  %9050 = vmatpush1.bf16.msra.mxu1 %v9049_v26  ;;  %v719_v25 = vld [vmem:[%s20877_s1 + $0x1540] sm:$0xff]  ;;  %v732_v26 = vld [vmem:[%s20877_s1 + $0x15a8] sm:$0xff] }
 0x11f   :  { %8856 = vmatprep.subr.bf16.mxu0 %v8855_v27  ;;  %9052 = vmatprep.subr.bf16.mxu1 %v9051_v31  ;;  %v721_v27 = vld [vmem:[%s20877_s1 + $0x1550] sm:$0xff]  ;;  %v759_v31 = vld [vmem:[%s20877_s1 + $0x1680] sm:$0xff]  ;;  %v8877_v34 = vpack.c.bf16 %v732_v26, %v719_v25  ;;  %v9091_v25 = vpack.c.bf16 %v865_v17, %v852_v16  ;;  %v864_v26 = vld [vmem:[%s20877_s1 + $0x19c8] sm:$0xff] }
 0x120   :  { %v9073_v35 = vpack.c.bf16 %v734_v29, %v721_v27  ;;  %v8879_v36 = vpack.c.bf16 %v759_v31, %v746_v30  ;;  %v876_v27 = vld [vmem:[%s20877_s1 + $0x1a28] sm:$0xff]  ;;  %v878_v29 = vld [vmem:[%s20877_s1 + $0x1a38] sm:$0xff]  ;;  %v891_v30 = vld [vmem:[%s20877_s1 + $0x1aa0] sm:$0xff] }
 0x121   :  { %v995_v16 = vld [vmem:[%s20877_s1 + $0x1de0] sm:$0xff] }
 0x122   :  { %8858 = vmatpush1.bf16.msra.mxu0 %v8857_v37  ;;  %9054 = vmatpush1.bf16.msra.mxu1 %v9053_v38  ;;  %v745_v37 = vld [vmem:[%s20877_s1 + $0x1610] sm:$0xff]  ;;  %v758_v38 = vld [vmem:[%s20877_s1 + $0x1678] sm:$0xff] }
 0x123   :  { %8860 = vmatprep.subr.bf16.mxu0 %v8859_v39  ;;  %9056 = vmatprep.subr.bf16.mxu1 %v9055_v43  ;;  %v747_v39 = vld [vmem:[%s20877_s1 + $0x1620] sm:$0xff]  ;;  %v785_v43 = vld [vmem:[%s20877_s1 + $0x1750] sm:$0xff]  ;;  %v8881_v46 = vpack.c.bf16 %v758_v38, %v745_v37  ;;  %v9095_v37 = vpack.c.bf16 %v891_v30, %v878_v29  ;;  %v890_v38 = vld [vmem:[%s20877_s1 + $0x1a98] sm:$0xff] }
 0x124   :  { %v9077_v47 = vpack.c.bf16 %v760_v41, %v747_v39  ;;  %v8883_v48 = vpack.c.bf16 %v785_v43, %v772_v42  ;;  %v902_v39 = vld [vmem:[%s20877_s1 + $0x1af8] sm:$0xff]  ;;  %v904_v41 = vld [vmem:[%s20877_s1 + $0x1b08] sm:$0xff]  ;;  %v917_v42 = vld [vmem:[%s20877_s1 + $0x1b70] sm:$0xff] }
 0x125   :  { %v1021_v29 = vld [vmem:[%s20877_s1 + $0x1eb0] sm:$0xff] }
 0x126   :  { %8862 = vmatpush1.bf16.msra.mxu0 %v8861_v49  ;;  %9058 = vmatpush1.bf16.msra.mxu1 %v9057_v50  ;;  %v771_v49 = vld [vmem:[%s20877_s1 + $0x16e0] sm:$0xff]  ;;  %v784_v50 = vld [vmem:[%s20877_s1 + $0x1748] sm:$0xff] }
 0x127   :  { %8864 = vmatprep.subr.bf16.mxu0 %v8863_v51  ;;  %9060 = vmatprep.subr.bf16.mxu1 %v9059_v55  ;;  %v773_v51 = vld [vmem:[%s20877_s1 + $0x16f0] sm:$0xff]  ;;  %v811_v55 = vld [vmem:[%s20877_s1 + $0x1820] sm:$0xff]  ;;  %v8885_v58 = vpack.c.bf16 %v784_v50, %v771_v49  ;;  %v9099_v49 = vpack.c.bf16 %v917_v42, %v904_v41  ;;  %v916_v50 = vld [vmem:[%s20877_s1 + $0x1b68] sm:$0xff] }
 0x128   :  { %v9081_v59 = vpack.c.bf16 %v786_v53, %v773_v51  ;;  %v8887_v60 = vpack.c.bf16 %v811_v55, %v798_v54  ;;  %v928_v51 = vld [vmem:[%s20877_s1 + $0x1bc8] sm:$0xff]  ;;  %v11465_v53 = vld [vmem:[%s20878_s0 + $0x10] sm:$0xff]  ;;  %v930_v54 = vld [vmem:[%s20877_s1 + $0x1bd8] sm:$0xff] }
 0x129   :  { %v943_v55 = vld [vmem:[%s20877_s1 + $0x1c40] sm:$0xff] }
 0x12a   :  { %8866 = vmatpush1.bf16.msra.mxu0 %v8865_v61  ;;  %9062 = vmatpush1.bf16.msra.mxu1 %v9061_v62  ;;  %v797_v61 = vld [vmem:[%s20877_s1 + $0x17b0] sm:$0xff]  ;;  %v810_v62 = vld [vmem:[%s20877_s1 + $0x1818] sm:$0xff]  ;;  %v1047_v41 = vld [vmem:[%s20877_s1 + $0x1f80] sm:$0xff] }
 0x12b   :  { %8868 = vmatprep.subr.bf16.mxu0 %v8867_v63  ;;  %9064 = vmatprep.subr.bf16.mxu1 %v9063_v3  ;;  %v799_v63 = vld [vmem:[%s20877_s1 + $0x17c0] sm:$0xff]  ;;  %v837_v3 = vld [vmem:[%s20877_s1 + $0x18f0] sm:$0xff]  ;;  %v8889_v6 = vpack.c.bf16 %v810_v62, %v797_v61  ;;  %v9103_v62 = vpack.c.bf16 %v943_v55, %v930_v54 }
 0x12c   :  { %v9085_v7 = vpack.c.bf16 %v812_v1, %v799_v63  ;;  %v8891_v8 = vpack.c.bf16 %v837_v3, %v824_v2  ;;  %v929_v61 = vld [vmem:[%s20877_s1 + $0x1bd0] sm:$0xff]  ;;  %v942_v63 = vld [vmem:[%s20877_s1 + $0x1c38] sm:$0xff]  ;;  %v967_v1 = vld [vmem:[%s20877_s1 + $0x1d00] sm:$0xff] }
 0x12d   :  { %v11466_v2 = vld [vmem:[%s20878_s0 + $0x28] sm:$0xff] }
 0x12e   :  { %8870 = vmatpush1.bf16.msra.mxu0 %v8869_v9  ;;  %9066 = vmatpush1.bf16.msra.mxu1 %v9065_v10  ;;  %v823_v9 = vld [vmem:[%s20877_s1 + $0x1880] sm:$0xff]  ;;  %v836_v10 = vld [vmem:[%s20877_s1 + $0x18e8] sm:$0xff] }
 0x12f   :  { %8872 = vmatprep.subr.bf16.mxu0 %v8871_v11  ;;  %9068 = vmatprep.subr.bf16.mxu1 %v9067_v15  ;;  %v825_v11 = vld [vmem:[%s20877_s1 + $0x1890] sm:$0xff]  ;;  %v863_v15 = vld [vmem:[%s20877_s1 + $0x19c0] sm:$0xff]  ;;  %v8893_v18 = vpack.c.bf16 %v836_v10, %v823_v9  ;;  %v956_v3 = vld [vmem:[%s20877_s1 + $0x1ca8] sm:$0xff] }
 0x130   :  { %v9089_v19 = vpack.c.bf16 %v838_v13, %v825_v11  ;;  %v8895_v20 = vpack.c.bf16 %v863_v15, %v850_v14  ;;  %v966_v9 = vld [vmem:[%s20877_s1 + $0x1cf8] sm:$0xff]  ;;  %v955_v10 = vld [vmem:[%s20877_s1 + $0x1ca0] sm:$0xff]  ;;  %v9107_v11 = vpack.c.bf16 %v969_v4, %v956_v3  ;;  %v980_v13 = vld [vmem:[%s20877_s1 + $0x1d68] sm:$0xff] }
 0x131   :  { %v993_v14 = vld [vmem:[%s20877_s1 + $0x1dd0] sm:$0xff]  ;;  %v982_v15 = vld [vmem:[%s20877_s1 + $0x1d78] sm:$0xff] }
 0x132   :  { %8874 = vmatpush1.bf16.msra.mxu0 %v8873_v21  ;;  %9070 = vmatpush1.bf16.msra.mxu1 %v9069_v22  ;;  %v849_v21 = vld [vmem:[%s20877_s1 + $0x1950] sm:$0xff]  ;;  %v862_v22 = vld [vmem:[%s20877_s1 + $0x19b8] sm:$0xff] }
 0x133   :  { %8876 = vmatprep.subr.bf16.mxu0 %v8875_v23  ;;  %9072 = vmatprep.subr.bf16.mxu1 %v9071_v28  ;;  %v851_v23 = vld [vmem:[%s20877_s1 + $0x1960] sm:$0xff]  ;;  %v889_v28 = vld [vmem:[%s20877_s1 + $0x1a90] sm:$0xff]  ;;  %v8897_v31 = vpack.c.bf16 %v862_v22, %v849_v21  ;;  %v992_v21 = vld [vmem:[%s20877_s1 + $0x1dc8] sm:$0xff] }
 0x134   :  { %v9093_v32 = vpack.c.bf16 %v864_v26, %v851_v23  ;;  %v8899_v33 = vpack.c.bf16 %v889_v28, %v876_v27  ;;  %v981_v22 = vld [vmem:[%s20877_s1 + $0x1d70] sm:$0xff]  ;;  %v9111_v23 = vpack.c.bf16 %v995_v16, %v982_v15  ;;  %v1006_v26 = vld [vmem:[%s20877_s1 + $0x1e38] sm:$0xff]  ;;  %v1019_v27 = vld [vmem:[%s20877_s1 + $0x1ea0] sm:$0xff] }
 0x135   :  { %v1008_v28 = vld [vmem:[%s20877_s1 + $0x1e48] sm:$0xff] }
 0x136   :  { %8878 = vmatpush1.bf16.msra.mxu0 %v8877_v34  ;;  %9074 = vmatpush1.bf16.msra.mxu1 %v9073_v35  ;;  %v875_v34 = vld [vmem:[%s20877_s1 + $0x1a20] sm:$0xff]  ;;  %v888_v35 = vld [vmem:[%s20877_s1 + $0x1a88] sm:$0xff] }
 0x137   :  { %8880 = vmatprep.subr.bf16.mxu0 %v8879_v36  ;;  %9076 = vmatprep.subr.bf16.mxu1 %v9075_v40  ;;  %v877_v36 = vld [vmem:[%s20877_s1 + $0x1a30] sm:$0xff]  ;;  %v915_v40 = vld [vmem:[%s20877_s1 + $0x1b60] sm:$0xff]  ;;  %v8901_v43 = vpack.c.bf16 %v888_v35, %v875_v34  ;;  %v1018_v34 = vld [vmem:[%s20877_s1 + $0x1e98] sm:$0xff] }
 0x138   :  { %v9097_v44 = vpack.c.bf16 %v890_v38, %v877_v36  ;;  %v8903_v45 = vpack.c.bf16 %v915_v40, %v902_v39  ;;  %v1007_v35 = vld [vmem:[%s20877_s1 + $0x1e40] sm:$0xff]  ;;  %v9115_v36 = vpack.c.bf16 %v1021_v29, %v1008_v28  ;;  %v1032_v38 = vld [vmem:[%s20877_s1 + $0x1f08] sm:$0xff]  ;;  %v1045_v39 = vld [vmem:[%s20877_s1 + $0x1f70] sm:$0xff] }
 0x139   :  { %v1034_v40 = vld [vmem:[%s20877_s1 + $0x1f18] sm:$0xff] }
 0x13a   :  { %8882 = vmatpush1.bf16.msra.mxu0 %v8881_v46  ;;  %9078 = vmatpush1.bf16.msra.mxu1 %v9077_v47  ;;  %v901_v46 = vld [vmem:[%s20877_s1 + $0x1af0] sm:$0xff]  ;;  %v914_v47 = vld [vmem:[%s20877_s1 + $0x1b58] sm:$0xff] }
 0x13b   :  { %8884 = vmatprep.subr.bf16.mxu0 %v8883_v48  ;;  %9080 = vmatprep.subr.bf16.mxu1 %v9079_v52  ;;  %v903_v48 = vld [vmem:[%s20877_s1 + $0x1b00] sm:$0xff]  ;;  %v941_v52 = vld [vmem:[%s20877_s1 + $0x1c30] sm:$0xff]  ;;  %v8905_v56 = vpack.c.bf16 %v914_v47, %v901_v46  ;;  %v1044_v46 = vld [vmem:[%s20877_s1 + $0x1f68] sm:$0xff] }
 0x13c   :  { %v9101_v57 = vpack.c.bf16 %v916_v50, %v903_v48  ;;  %v1033_v47 = vld [vmem:[%s20877_s1 + $0x1f10] sm:$0xff]  ;;  %v9119_v48 = vpack.c.bf16 %v1047_v41, %v1034_v40  ;;  %v1058_v50 = vld [vmem:[%s20877_s1 + $0x1fd8] sm:$0xff] }
 0x13e   :  { %8886 = vmatpush1.bf16.msra.mxu0 %v8885_v58  ;;  %9082 = vmatpush1.bf16.msra.mxu1 %v9081_v59  ;;  %v8907_v58 = vpack.c.bf16 %v941_v52, %v928_v51  ;;  %v927_v59 = vld [vmem:[%s20877_s1 + $0x1bc0] sm:$0xff]  ;;  %v1060_v52 = vld [vmem:[%s20877_s1 + $0x1fe8] sm:$0xff] }
 0x13f   :  { %8888 = vmatprep.subr.bf16.mxu0 %v8887_v60  ;;  %9084 = vmatprep.subr.bf16.mxu1 %v9083_v0  ;;  %v940_v60 = vld [vmem:[%s20877_s1 + $0x1c28] sm:$0xff]  ;;  %v954_v0 = vld [vmem:[%s20877_s1 + $0x1c98] sm:$0xff]  ;;  %v1071_v51 = vld [vmem:[%s20877_s1 + $0x2040] sm:$0xff] }
 0x140   :  { %v8909_v5 = vpack.c.bf16 %v940_v60, %v927_v59  ;;  %v1059_v59 = vld [vmem:[%s20877_s1 + $0x1fe0] sm:$0xff] }
 0x142   :  { %8890 = vmatpush1.bf16.msra.mxu0 %v8889_v6  ;;  %9086 = vmatpush1.bf16.msra.mxu1 %v9085_v7  ;;  %v9105_v6 = vpack.c.bf16 %v942_v63, %v929_v61  ;;  %v8911_v7 = vpack.c.bf16 %v967_v1, %v954_v0  ;;  %v1072_v61 = vld [vmem:[%s20877_s1 + $0x2048] sm:$0xff]  ;;  %v1097_v63 = vld [vmem:[%s20877_s1 + $0x2110] sm:$0xff]  ;;  %v1086_v0 = vld [vmem:[%s20877_s1 + $0x20b8] sm:$0xff] }
 0x143   :  { %8892 = vmatprep.subr.bf16.mxu0 %v8891_v8  ;;  %9088 = vmatprep.subr.bf16.mxu1 %v9087_v12  ;;  %v953_v8 = vld [vmem:[%s20877_s1 + $0x1c90] sm:$0xff]  ;;  %v968_v12 = vld [vmem:[%s20877_s1 + $0x1d08] sm:$0xff]  ;;  %v1099_v1 = vld [vmem:[%s20877_s1 + $0x2120] sm:$0xff]  ;;  %v9125_v3 = vpack.c.bf16 %v1072_v61, %v1059_v59 }
 0x144   :  { %v8913_v17 = vpack.c.bf16 %v966_v9, %v953_v8  ;;  %v9127_v8 = vpack.c.bf16 %v1099_v1, %v1086_v0  ;;  %v1098_v9 = vld [vmem:[%s20877_s1 + $0x2118] sm:$0xff]  ;;  %v1216_v61 = vld [vmem:[%s20877_s1 + $0x24c8] sm:$0xff] }
 0x145   :  { %v1214_v59 = vld [vmem:[%s20877_s1 + $0x24b8] sm:$0xff] }
 0x146   :  { %8894 = vmatpush1.bf16.msra.mxu0 %v8893_v18  ;;  %9090 = vmatpush1.bf16.msra.mxu1 %v9089_v19  ;;  %v9109_v18 = vpack.c.bf16 %v968_v12, %v955_v10  ;;  %v8915_v19 = vpack.c.bf16 %v993_v14, %v980_v13  ;;  %v1110_v10 = vld [vmem:[%s20877_s1 + $0x2178] sm:$0xff]  ;;  %v1112_v12 = vld [vmem:[%s20877_s1 + $0x2188] sm:$0xff]  ;;  %v1125_v13 = vld [vmem:[%s20877_s1 + $0x21f0] sm:$0xff] }
 0x147   :  { %8896 = vmatprep.subr.bf16.mxu0 %v8895_v20  ;;  %9092 = vmatprep.subr.bf16.mxu1 %v9091_v25  ;;  %v979_v20 = vld [vmem:[%s20877_s1 + $0x1d60] sm:$0xff]  ;;  %v994_v25 = vld [vmem:[%s20877_s1 + $0x1dd8] sm:$0xff] }
 0x148   :  { %v8917_v30 = vpack.c.bf16 %v992_v21, %v979_v20  ;;  %v9131_v20 = vpack.c.bf16 %v1125_v13, %v1112_v12  ;;  %v1124_v21 = vld [vmem:[%s20877_s1 + $0x21e8] sm:$0xff] }
 0x14a   :  { %8898 = vmatpush1.bf16.msra.mxu0 %v8897_v31  ;;  %9094 = vmatpush1.bf16.msra.mxu1 %v9093_v32  ;;  %v9113_v31 = vpack.c.bf16 %v994_v25, %v981_v22  ;;  %v8919_v32 = vpack.c.bf16 %v1019_v27, %v1006_v26  ;;  %v1136_v22 = vld [vmem:[%s20877_s1 + $0x2248] sm:$0xff]  ;;  %v1138_v25 = vld [vmem:[%s20877_s1 + $0x2258] sm:$0xff]  ;;  %v1151_v26 = vld [vmem:[%s20877_s1 + $0x22c0] sm:$0xff] }
 0x14b   :  { %8900 = vmatprep.subr.bf16.mxu0 %v8899_v33  ;;  %9096 = vmatprep.subr.bf16.mxu1 %v9095_v37  ;;  %v1005_v33 = vld [vmem:[%s20877_s1 + $0x1e30] sm:$0xff]  ;;  %v1020_v37 = vld [vmem:[%s20877_s1 + $0x1ea8] sm:$0xff] }
 0x14c   :  { %v8921_v42 = vpack.c.bf16 %v1018_v34, %v1005_v33  ;;  %v9135_v33 = vpack.c.bf16 %v1151_v26, %v1138_v25  ;;  %v1150_v34 = vld [vmem:[%s20877_s1 + $0x22b8] sm:$0xff] }
 0x14d   :  { %2090 = vmatmul.mubr.f32.vlgmr.msra.gmra.mrb[2].mxu0 %v11465_v53  ;;  %2374 = vmatmul.mubr.f32.vlgmr.msra.gmra.mrb[2].mxu1 %v11465_v53  ;;  %v1073_v53 = vld [vmem:[%s20877_s1 + $0x2050] sm:$0xff] }
 0x14e   :  { %8902 = vmatpush1.bf16.msra.mxu0 %v8901_v43  ;;  %9098 = vmatpush1.bf16.msra.mxu1 %v9097_v44  ;;  %v9117_v43 = vpack.c.bf16 %v1020_v37, %v1007_v35  ;;  %v8923_v44 = vpack.c.bf16 %v1045_v39, %v1032_v38  ;;  %v9123_v60 = vpack.c.bf16 %v1073_v53, %v1060_v52  ;;  %v1162_v35 = vld [vmem:[%s20877_s1 + $0x2318] sm:$0xff]  ;;  %v1164_v37 = vld [vmem:[%s20877_s1 + $0x2328] sm:$0xff]  ;;  %v1177_v38 = vld [vmem:[%s20877_s1 + $0x2390] sm:$0xff] }
 0x14f   :  { %8904 = vmatprep.subr.bf16.mxu0 %v8903_v45  ;;  %9100 = vmatprep.subr.bf16.mxu1 %v9099_v49  ;;  %v1031_v45 = vld [vmem:[%s20877_s1 + $0x1f00] sm:$0xff]  ;;  %v1046_v49 = vld [vmem:[%s20877_s1 + $0x1f78] sm:$0xff] }
 0x150   :  { %2160 = vmatprep.mubr.f32.mxu0 %v11466_v2  ;;  %2444 = vmatprep.mubr.f32.mxu1 %v11466_v2  ;;  %v8925_v54 = vpack.c.bf16 %v1044_v46, %v1031_v45  ;;  %v9121_v55 = vpack.c.bf16 %v1046_v49, %v1033_v47  ;;  %v9139_v45 = vpack.c.bf16 %v1177_v38, %v1164_v37  ;;  %v1176_v46 = vld [vmem:[%s20877_s1 + $0x2388] sm:$0xff]  ;;  %v1190_v49 = vld [vmem:[%s20877_s1 + $0x23f8] sm:$0xff] }
 0x151   :  { %v1188_v47 = vld [vmem:[%s20877_s1 + $0x23e8] sm:$0xff] }
 0x152   :  { %8906 = vmatpush1.bf16.msra.mxu0 %v8905_v56  ;;  %9102 = vmatpush1.bf16.msra.mxu1 %v9101_v57  ;;  %v8927_v56 = vpack.c.bf16 %v1071_v51, %v1058_v50  ;;  %v1057_v57 = vld [vmem:[%s20877_s1 + $0x1fd0] sm:$0xff]  ;;  %v1203_v50 = vld [vmem:[%s20877_s1 + $0x2460] sm:$0xff] }
 0x153   :  { %8908 = vmatprep.subr.bf16.mxu0 %v8907_v58  ;;  %9104 = vmatprep.subr.bf16.mxu1 %v9103_v62  ;;  %v1070_v58 = vld [vmem:[%s20877_s1 + $0x2038] sm:$0xff]  ;;  %v1084_v62 = vld [vmem:[%s20877_s1 + $0x20a8] sm:$0xff] }
 0x154   :  { %v8929_v2 = vpack.c.bf16 %v1070_v58, %v1057_v57  ;;  %v8931_v4 = vpack.c.bf16 %v1097_v63, %v1084_v62  ;;  %v9143_v57 = vpack.c.bf16 %v1203_v50, %v1190_v49  ;;  %v1202_v58 = vld [vmem:[%s20877_s1 + $0x2458] sm:$0xff]  ;;  %v1229_v62 = vld [vmem:[%s20877_s1 + $0x2530] sm:$0xff] }
 0x156   :  { %8910 = vmatpush1.bf16.msra.mxu0 %v8909_v5  ;;  %9106 = vmatpush1.bf16.msra.mxu1 %v9105_v6  ;;  %v1083_v5 = vld [vmem:[%s20877_s1 + $0x20a0] sm:$0xff]  ;;  %v1096_v6 = vld [vmem:[%s20877_s1 + $0x2108] sm:$0xff] }
 0x157   :  { %8912 = vmatprep.subr.bf16.mxu0 %v8911_v7  ;;  %9108 = vmatprep.subr.bf16.mxu1 %v9107_v11  ;;  %v1085_v7 = vld [vmem:[%s20877_s1 + $0x20b0] sm:$0xff]  ;;  %v1123_v11 = vld [vmem:[%s20877_s1 + $0x21e0] sm:$0xff]  ;;  %v8933_v14 = vpack.c.bf16 %v1096_v6, %v1083_v5  ;;  %v9147_v5 = vpack.c.bf16 %v1229_v62, %v1216_v61  ;;  %v1228_v6 = vld [vmem:[%s20877_s1 + $0x2528] sm:$0xff] }
 0x158   :  { %v9129_v15 = vpack.c.bf16 %v1098_v9, %v1085_v7  ;;  %v8935_v16 = vpack.c.bf16 %v1123_v11, %v1110_v10  ;;  %v1240_v7 = vld [vmem:[%s20877_s1 + $0x2588] sm:$0xff]  ;;  %v1242_v9 = vld [vmem:[%s20877_s1 + $0x2598] sm:$0xff]  ;;  %v1255_v10 = vld [vmem:[%s20877_s1 + $0x2600] sm:$0xff] }
 0x15a   :  { %8914 = vmatpush1.bf16.msra.mxu0 %v8913_v17  ;;  %9110 = vmatpush1.bf16.msra.mxu1 %v9109_v18  ;;  %v1109_v17 = vld [vmem:[%s20877_s1 + $0x2170] sm:$0xff]  ;;  %v1122_v18 = vld [vmem:[%s20877_s1 + $0x21d8] sm:$0xff] }
 0x15b   :  { %8916 = vmatprep.subr.bf16.mxu0 %v8915_v19  ;;  %9112 = vmatprep.subr.bf16.mxu1 %v9111_v23  ;;  %v1111_v19 = vld [vmem:[%s20877_s1 + $0x2180] sm:$0xff]  ;;  %v1149_v23 = vld [vmem:[%s20877_s1 + $0x22b0] sm:$0xff]  ;;  %v8937_v27 = vpack.c.bf16 %v1122_v18, %v1109_v17  ;;  %v9151_v17 = vpack.c.bf16 %v1255_v10, %v1242_v9  ;;  %v1254_v18 = vld [vmem:[%s20877_s1 + $0x25f8] sm:$0xff] }
 0x15c   :  { %v9133_v28 = vpack.c.bf16 %v1124_v21, %v1111_v19  ;;  %v8939_v29 = vpack.c.bf16 %v1149_v23, %v1136_v22  ;;  %v1266_v19 = vld [vmem:[%s20877_s1 + $0x2658] sm:$0xff]  ;;  %v1268_v21 = vld [vmem:[%s20877_s1 + $0x2668] sm:$0xff]  ;;  %v1281_v22 = vld [vmem:[%s20877_s1 + $0x26d0] sm:$0xff] }
 0x15d   :  { %v115_v9 = vld [vmem:[%s20877_s1 + $0x260] sm:$0xff] }
 0x15e   :  { %8918 = vmatpush1.bf16.msra.mxu0 %v8917_v30  ;;  %9114 = vmatpush1.bf16.msra.mxu1 %v9113_v31  ;;  %v1135_v30 = vld [vmem:[%s20877_s1 + $0x2240] sm:$0xff]  ;;  %v1148_v31 = vld [vmem:[%s20877_s1 + $0x22a8] sm:$0xff] }
 0x15f   :  { %8920 = vmatprep.subr.bf16.mxu0 %v8919_v32  ;;  %9116 = vmatprep.subr.bf16.mxu1 %v9115_v36  ;;  %v1137_v32 = vld [vmem:[%s20877_s1 + $0x2250] sm:$0xff]  ;;  %v1175_v36 = vld [vmem:[%s20877_s1 + $0x2380] sm:$0xff]  ;;  %v8941_v39 = vpack.c.bf16 %v1148_v31, %v1135_v30  ;;  %v9155_v30 = vpack.c.bf16 %v1281_v22, %v1268_v21  ;;  %v1280_v31 = vld [vmem:[%s20877_s1 + $0x26c8] sm:$0xff] }
 0x160   :  { %v9137_v40 = vpack.c.bf16 %v1150_v34, %v1137_v32  ;;  %v8943_v41 = vpack.c.bf16 %v1175_v36, %v1162_v35  ;;  %v1292_v32 = vld [vmem:[%s20877_s1 + $0x2728] sm:$0xff]  ;;  %v1294_v34 = vld [vmem:[%s20877_s1 + $0x2738] sm:$0xff]  ;;  %v1307_v35 = vld [vmem:[%s20877_s1 + $0x27a0] sm:$0xff] }
 0x161   :  { %v128_v21 = vld [vmem:[%s20877_s1 + $0x2c8] sm:$0xff]  ;;  %v141_v22 = vld [vmem:[%s20877_s1 + $0x330] sm:$0xff] }
 0x162   :  { %8922 = vmatpush1.bf16.msra.mxu0 %v8921_v42  ;;  %9118 = vmatpush1.bf16.msra.mxu1 %v9117_v43  ;;  %v1161_v42 = vld [vmem:[%s20877_s1 + $0x2310] sm:$0xff]  ;;  %v1174_v43 = vld [vmem:[%s20877_s1 + $0x2378] sm:$0xff] }
 0x163   :  { %8924 = vmatprep.subr.bf16.mxu0 %v8923_v44  ;;  %9120 = vmatprep.subr.bf16.mxu1 %v9119_v48  ;;  %v1163_v44 = vld [vmem:[%s20877_s1 + $0x2320] sm:$0xff]  ;;  %v1201_v48 = vld [vmem:[%s20877_s1 + $0x2450] sm:$0xff]  ;;  %v8945_v51 = vpack.c.bf16 %v1174_v43, %v1161_v42  ;;  %v1306_v43 = vld [vmem:[%s20877_s1 + $0x2798] sm:$0xff] }
 0x164   :  { %v9141_v52 = vpack.c.bf16 %v1176_v46, %v1163_v44  ;;  %v8947_v53 = vpack.c.bf16 %v1201_v48, %v1188_v47  ;;  %v1293_v42 = vld [vmem:[%s20877_s1 + $0x2730] sm:$0xff]  ;;  %v48_v44 = vld [vmem:[%s20877_s1 + $0x48] sm:$0xff]  ;;  %v50_v47 = vld [vmem:[%s20877_s1 + $0x58] sm:$0xff] }
 0x165   :  { %v63_v48 = vld [vmem:[%s20877_s1 + $0xc0] sm:$0xff]  ;;  %v9161_v49 = vpack.c.bf16 %v1306_v43, %v1293_v42 }
 0x166   :  { %8926 = vmatpush1.bf16.msra.mxu0 %v8925_v54  ;;  %9122 = vmatpush1.bf16.msra.mxu1 %v9121_v55  ;;  %v1187_v54 = vld [vmem:[%s20877_s1 + $0x23e0] sm:$0xff]  ;;  %v1200_v55 = vld [vmem:[%s20877_s1 + $0x2448] sm:$0xff] }
 0x167   :  { %8928 = vmatprep.subr.bf16.mxu0 %v8927_v56  ;;  %9124 = vmatprep.subr.bf16.mxu1 %v9123_v60  ;;  %v1189_v56 = vld [vmem:[%s20877_s1 + $0x23f0] sm:$0xff]  ;;  %v1227_v60 = vld [vmem:[%s20877_s1 + $0x2520] sm:$0xff]  ;;  %v8949_v63 = vpack.c.bf16 %v1200_v55, %v1187_v54  ;;  %v60_v54 = vld [vmem:[%s20877_s1 + $0xa8] sm:$0xff] }
 0x168   :  { %v9145_v0 = vpack.c.bf16 %v1202_v58, %v1189_v56  ;;  %v8951_v1 = vpack.c.bf16 %v1227_v60, %v1214_v59  ;;  %v49_v55 = vld [vmem:[%s20877_s1 + $0x50] sm:$0xff]  ;;  %v62_v56 = vld [vmem:[%s20877_s1 + $0xb8] sm:$0xff]  ;;  %v87_v58 = vld [vmem:[%s20877_s1 + $0x180] sm:$0xff] }
 0x169   :  { %v76_v59 = vld [vmem:[%s20877_s1 + $0x128] sm:$0xff]  ;;  %v89_v60 = vld [vmem:[%s20877_s1 + $0x190] sm:$0xff]  ;;  %v9361_v62 = vpack.c.bf16 %v62_v56, %v49_v55  ;;  %v190_v56 = vld [vmem:[%s20877_s1 + $0x4b8] sm:$0xff] }
 0x16a   :  { %8930 = vmatpush1.bf16.msra.mxu0 %v8929_v2  ;;  %9126 = vmatpush1.bf16.msra.mxu1 %v9125_v3  ;;  %v1213_v2 = vld [vmem:[%s20877_s1 + $0x24b0] sm:$0xff]  ;;  %v1226_v3 = vld [vmem:[%s20877_s1 + $0x2518] sm:$0xff] }
 0x16b   :  { %8932 = vmatprep.subr.bf16.mxu0 %v8931_v4  ;;  %9128 = vmatprep.subr.bf16.mxu1 %v9127_v8  ;;  %v1215_v4 = vld [vmem:[%s20877_s1 + $0x24c0] sm:$0xff]  ;;  %v1253_v8 = vld [vmem:[%s20877_s1 + $0x25f0] sm:$0xff]  ;;  %v8953_v11 = vpack.c.bf16 %v1226_v3, %v1213_v2  ;;  %v9363_v3 = vpack.c.bf16 %v89_v60, %v76_v59  ;;  %v192_v59 = vld [vmem:[%s20877_s1 + $0x4c8] sm:$0xff] }
 0x16c   :  { %v9149_v12 = vpack.c.bf16 %v1228_v6, %v1215_v4  ;;  %v8955_v13 = vpack.c.bf16 %v1253_v8, %v1240_v7  ;;  %v75_v2 = vld [vmem:[%s20877_s1 + $0x120] sm:$0xff]  ;;  %v88_v4 = vld [vmem:[%s20877_s1 + $0x188] sm:$0xff]  ;;  %v113_v6 = vld [vmem:[%s20877_s1 + $0x250] sm:$0xff] }
 0x16d   :  { %v11468_v7 = vld [vmem:[%s20878_s0 + $0x30] sm:$0xff]  ;;  %v102_v8 = vld [vmem:[%s20877_s1 + $0x1f8] sm:$0xff]  ;;  %v204_v60 = vld [vmem:[%s20877_s1 + $0x528] sm:$0xff] }
 0x16e   :  { %8934 = vmatpush1.bf16.msra.mxu0 %v8933_v14  ;;  %9130 = vmatpush1.bf16.msra.mxu1 %v9129_v15  ;;  %v1239_v14 = vld [vmem:[%s20877_s1 + $0x2580] sm:$0xff]  ;;  %v1252_v15 = vld [vmem:[%s20877_s1 + $0x25e8] sm:$0xff]  ;;  %v177_v55 = vld [vmem:[%s20877_s1 + $0x450] sm:$0xff] }
 0x16f   :  { %8936 = vmatprep.subr.bf16.mxu0 %v8935_v16  ;;  %9132 = vmatprep.subr.bf16.mxu1 %v9131_v20  ;;  %v1241_v16 = vld [vmem:[%s20877_s1 + $0x2590] sm:$0xff]  ;;  %v1279_v20 = vld [vmem:[%s20877_s1 + $0x26c0] sm:$0xff]  ;;  %v8957_v23 = vpack.c.bf16 %v1252_v15, %v1239_v14  ;;  %v112_v14 = vld [vmem:[%s20877_s1 + $0x248] sm:$0xff] }
 0x170   :  { %v9153_v25 = vpack.c.bf16 %v1254_v18, %v1241_v16  ;;  %v8959_v26 = vpack.c.bf16 %v1279_v20, %v1266_v19  ;;  %v101_v15 = vld [vmem:[%s20877_s1 + $0x1f0] sm:$0xff]  ;;  %v9367_v16 = vpack.c.bf16 %v115_v9, %v102_v8  ;;  %v126_v18 = vld [vmem:[%s20877_s1 + $0x2b8] sm:$0xff]  ;;  %v139_v19 = vld [vmem:[%s20877_s1 + $0x320] sm:$0xff] }
 0x171   :  { %v11469_v20 = vld [vmem:[%s20878_s0 + $0x8] sm:$0xff]  ;;  %v230_v8 = vld [vmem:[%s20877_s1 + $0x5f8] sm:$0xff]  ;;  %v243_v9 = vld [vmem:[%s20877_s1 + $0x660] sm:$0xff] }
 0x172   :  { %8938 = vmatpush1.bf16.msra.mxu0 %v8937_v27  ;;  %9134 = vmatpush1.bf16.msra.mxu1 %v9133_v28  ;;  %v1265_v27 = vld [vmem:[%s20877_s1 + $0x2650] sm:$0xff]  ;;  %v1278_v28 = vld [vmem:[%s20877_s1 + $0x26b8] sm:$0xff] }
 0x173   :  { %8940 = vmatprep.subr.bf16.mxu0 %v8939_v29  ;;  %9136 = vmatprep.subr.bf16.mxu1 %v9135_v33  ;;  %v1267_v29 = vld [vmem:[%s20877_s1 + $0x2660] sm:$0xff]  ;;  %v1305_v33 = vld [vmem:[%s20877_s1 + $0x2790] sm:$0xff]  ;;  %v8961_v36 = vpack.c.bf16 %v1278_v28, %v1265_v27  ;;  %v138_v28 = vld [vmem:[%s20877_s1 + $0x318] sm:$0xff] }
 0x174   :  { %v9157_v37 = vpack.c.bf16 %v1280_v31, %v1267_v29  ;;  %v8963_v38 = vpack.c.bf16 %v1305_v33, %v1292_v32  ;;  %v125_v27 = vld [vmem:[%s20877_s1 + $0x2b0] sm:$0xff]  ;;  %v127_v29 = vld [vmem:[%s20877_s1 + $0x2c0] sm:$0xff]  ;;  %v140_v31 = vld [vmem:[%s20877_s1 + $0x328] sm:$0xff] }
 0x175   :  { %v152_v32 = vld [vmem:[%s20877_s1 + $0x388] sm:$0xff]  ;;  %v165_v33 = vld [vmem:[%s20877_s1 + $0x3f0] sm:$0xff] }
 0x176   :  { %8942 = vmatpush1.bf16.msra.mxu0 %v8941_v39  ;;  %9138 = vmatpush1.bf16.msra.mxu1 %v9137_v40  ;;  %v1291_v39 = vld [vmem:[%s20877_s1 + $0x2720] sm:$0xff]  ;;  %v1304_v40 = vld [vmem:[%s20877_s1 + $0x2788] sm:$0xff] }
 0x177   :  { %8944 = vmatprep.subr.bf16.mxu0 %v8943_v41  ;;  %9140 = vmatprep.subr.bf16.mxu1 %v9139_v45  ;;  %v9159_v41 = vpack.c.bf16 %v1307_v35, %v1294_v34  ;;  %v61_v45 = vld [vmem:[%s20877_s1 + $0xb0] sm:$0xff]  ;;  %v8965_v46 = vpack.c.bf16 %v1304_v40, %v1291_v39  ;;  %v154_v34 = vld [vmem:[%s20877_s1 + $0x398] sm:$0xff]  ;;  %v167_v35 = vld [vmem:[%s20877_s1 + $0x400] sm:$0xff] }
 0x178   :  { %v9163_v50 = vpack.c.bf16 %v61_v45, %v48_v44  ;;  %v151_v39 = vld [vmem:[%s20877_s1 + $0x380] sm:$0xff]  ;;  %v164_v40 = vld [vmem:[%s20877_s1 + $0x3e8] sm:$0xff]  ;;  %v9375_v43 = vpack.c.bf16 %v167_v35, %v154_v34  ;;  %v166_v44 = vld [vmem:[%s20877_s1 + $0x3f8] sm:$0xff] }
 0x179   :  { %v178_v45 = vld [vmem:[%s20877_s1 + $0x458] sm:$0xff]  ;;  %v295_v34 = vld [vmem:[%s20877_s1 + $0x800] sm:$0xff]  ;;  %v284_v35 = vld [vmem:[%s20877_s1 + $0x7a8] sm:$0xff] }
 0x17a   :  { %8946 = vmatpush1.bf16.msra.mxu0 %v8945_v51  ;;  %9142 = vmatpush1.bf16.msra.mxu1 %v9141_v52  ;;  %v11467_v51 = vld [vmem:[%s20878_s0 + $0x20] sm:$0xff]  ;;  %v9359_v52 = vpack.c.bf16 %v63_v48, %v50_v47 }
 0x17b   :  { %8948 = vmatprep.subr.bf16.mxu0 %v8947_v53  ;;  %9144 = vmatprep.subr.bf16.mxu1 %v9143_v57  ;;  %v47_v53 = vld [vmem:[%s20877_s1 + $0x40] sm:$0xff]  ;;  %v74_v57 = vld [vmem:[%s20877_s1 + $0x118] sm:$0xff] }
 0x17c   :  { %v9165_v61 = vpack.c.bf16 %v60_v54, %v47_v53 }
 0x17e   :  { %8950 = vmatpush1.bf16.msra.mxu0 %v8949_v63  ;;  %9146 = vmatpush1.bf16.msra.mxu1 %v9145_v0  ;;  %v9167_v63 = vpack.c.bf16 %v87_v58, %v74_v57  ;;  %v73_v0 = vld [vmem:[%s20877_s1 + $0x110] sm:$0xff]  ;;  %v179_v57 = vld [vmem:[%s20877_s1 + $0x460] sm:$0xff] }
 0x17f   :  { %8952 = vmatprep.subr.bf16.mxu0 %v8951_v1  ;;  %9148 = vmatprep.subr.bf16.mxu1 %v9147_v5  ;;  %v86_v1 = vld [vmem:[%s20877_s1 + $0x178] sm:$0xff]  ;;  %v100_v5 = vld [vmem:[%s20877_s1 + $0x1e8] sm:$0xff] }
 0x180   :  { %v9169_v10 = vpack.c.bf16 %v86_v1, %v73_v0  ;;  %v9185_v0 = vpack.c.bf16 %v190_v56, %v177_v55  ;;  %v9381_v1 = vpack.c.bf16 %v192_v59, %v179_v57  ;;  %v307_v56 = vld [vmem:[%s20877_s1 + $0x860] sm:$0xff]  ;;  %v320_v57 = vld [vmem:[%s20877_s1 + $0x8c8] sm:$0xff] }
 0x182   :  { %8954 = vmatpush1.bf16.msra.mxu0 %v8953_v11  ;;  %9150 = vmatpush1.bf16.msra.mxu1 %v9149_v12  ;;  %v9365_v11 = vpack.c.bf16 %v88_v4, %v75_v2  ;;  %v9171_v12 = vpack.c.bf16 %v113_v6, %v100_v5  ;;  %v216_v4 = vld [vmem:[%s20877_s1 + $0x588] sm:$0xff]  ;;  %v205_v5 = vld [vmem:[%s20877_s1 + $0x530] sm:$0xff] }
 0x183   :  { %8956 = vmatprep.subr.bf16.mxu0 %v8955_v13  ;;  %9152 = vmatprep.subr.bf16.mxu1 %v9151_v17  ;;  %v99_v13 = vld [vmem:[%s20877_s1 + $0x1e0] sm:$0xff]  ;;  %v114_v17 = vld [vmem:[%s20877_s1 + $0x258] sm:$0xff] }
 0x186   :  { %8958 = vmatpush1.bf16.msra.mxu0 %v8957_v23  ;;  %9154 = vmatpush1.bf16.msra.mxu1 %v9153_v25  ;;  %v9173_v23 = vpack.c.bf16 %v112_v14, %v99_v13  ;;  %v9369_v25 = vpack.c.bf16 %v114_v17, %v101_v15  ;;  %v9191_v14 = vpack.c.bf16 %v243_v9, %v230_v8  ;;  %v229_v15 = vld [vmem:[%s20877_s1 + $0x5f0] sm:$0xff]  ;;  %v231_v17 = vld [vmem:[%s20877_s1 + $0x600] sm:$0xff]  ;;  %v348_v8 = vld [vmem:[%s20877_s1 + $0x9a8] sm:$0xff] }
 0x187   :  { %8960 = vmatprep.subr.bf16.mxu0 %v8959_v26  ;;  %9156 = vmatprep.subr.bf16.mxu1 %v9155_v30  ;;  %v9175_v26 = vpack.c.bf16 %v139_v19, %v126_v18  ;;  %v9371_v30 = vpack.c.bf16 %v141_v22, %v128_v21  ;;  %v244_v19 = vld [vmem:[%s20877_s1 + $0x668] sm:$0xff]  ;;  %v269_v21 = vld [vmem:[%s20877_s1 + $0x730] sm:$0xff]  ;;  %v258_v22 = vld [vmem:[%s20877_s1 + $0x6d8] sm:$0xff] }
 0x188   :  { %v360_v9 = vld [vmem:[%s20877_s1 + $0xa08] sm:$0xff] }
 0x18a   :  { %8962 = vmatpush1.bf16.msra.mxu0 %v8961_v36  ;;  %9158 = vmatpush1.bf16.msra.mxu1 %v9157_v37  ;;  %v9177_v36 = vpack.c.bf16 %v138_v28, %v125_v27  ;;  %v9373_v37 = vpack.c.bf16 %v140_v31, %v127_v29  ;;  %v255_v28 = vld [vmem:[%s20877_s1 + $0x6c0] sm:$0xff]  ;;  %v268_v29 = vld [vmem:[%s20877_s1 + $0x728] sm:$0xff] }
 0x18b   :  { %8964 = vmatprep.subr.bf16.mxu0 %v8963_v38  ;;  %9160 = vmatprep.subr.bf16.mxu1 %v9159_v41  ;;  %v9179_v38 = vpack.c.bf16 %v165_v33, %v152_v32  ;;  %v153_v41 = vld [vmem:[%s20877_s1 + $0x390] sm:$0xff]  ;;  %v270_v32 = vld [vmem:[%s20877_s1 + $0x738] sm:$0xff] }
 0x18c   :  { %v9377_v53 = vpack.c.bf16 %v166_v44, %v153_v41  ;;  %v282_v33 = vld [vmem:[%s20877_s1 + $0x798] sm:$0xff] }
 0x18d   :  { %2161 = vmatmul.mubr.f32.vlgmr.msra.gmra.mrb[2].mxu0 %v11467_v51  ;;  %2445 = vmatmul.mubr.f32.vlgmr.msra.gmra.mrb[2].mxu1 %v11467_v51  ;;  %v294_v41 = vld [vmem:[%s20877_s1 + $0x7f8] sm:$0xff] }
 0x18e   :  { %8966 = vmatpush1.bf16.msra.mxu0 %v8965_v46  ;;  %9162 = vmatpush1.bf16.msra.mxu1 %v9161_v49  ;;  %v191_v46 = vld [vmem:[%s20877_s1 + $0x4c0] sm:$0xff]  ;;  %v180_v49 = vld [vmem:[%s20877_s1 + $0x468] sm:$0xff] }
 0x18f   :  { %2231 = vmatprep.mubr.f32.mxu0 %v11481_v24  ;;  %2515 = vmatprep.mubr.f32.mxu1 %v11481_v24  ;;  %v9183_v54 = vpack.c.bf16 %v191_v46, %v178_v45  ;;  %v296_v45 = vld [vmem:[%s20877_s1 + $0x808] sm:$0xff] }
 0x190   :  { %9164 = vmatprep.subr.bf16.mxu0 %v9163_v50  ;;  %9360 = vmatprep.subr.bf16.mxu1 %v9359_v52  ;;  %v193_v50 = vld [vmem:[%s20877_s1 + $0x4d0] sm:$0xff]  ;;  %v9181_v52 = vpack.c.bf16 %v164_v40, %v151_v39  ;;  %v9199_v39 = vpack.c.bf16 %v295_v34, %v282_v33  ;;  %v308_v46 = vld [vmem:[%s20877_s1 + $0x868] sm:$0xff] }
 0x191   :  { %v9379_v58 = vpack.c.bf16 %v193_v50, %v180_v49  ;;  %v281_v40 = vld [vmem:[%s20877_s1 + $0x790] sm:$0xff]  ;;  %v310_v50 = vld [vmem:[%s20877_s1 + $0x878] sm:$0xff]  ;;  %v400_v33 = vld [vmem:[%s20877_s1 + $0xb48] sm:$0xff] }
 0x192   :  { %v321_v49 = vld [vmem:[%s20877_s1 + $0x8d0] sm:$0xff]  ;;  %v412_v34 = vld [vmem:[%s20877_s1 + $0xba8] sm:$0xff] }
 0x193   :  { %v9203_v55 = vpack.c.bf16 %v321_v49, %v308_v46  ;;  %v426_v46 = vld [vmem:[%s20877_s1 + $0xc18] sm:$0xff] }
 0x194   :  { %v438_v49 = vld [vmem:[%s20877_s1 + $0xc78] sm:$0xff] }
 0x195   :  { %7859 = vmatmul.mubr.msk.f32.vlgmr.msra.gmra.mrb[2].mxu0 %vm1382_vm0, %v11468_v7  ;;  %7860 = vmatmul.mubr.msk.f32.vlgmr.msra.gmra.mrb[2].mxu1 %vm1382_vm0, %v11468_v7  ;;  %v218_v7 = vld [vmem:[%s20877_s1 + $0x598] sm:$0xff] }
 0x196   :  { %9166 = vmatpush1.bf16.msra.mxu0 %v9165_v61  ;;  %9362 = vmatpush1.bf16.msra.mxu1 %v9361_v62  ;;  %v217_v61 = vld [vmem:[%s20877_s1 + $0x590] sm:$0xff]  ;;  %v206_v62 = vld [vmem:[%s20877_s1 + $0x538] sm:$0xff]  ;;  %v9385_v13 = vpack.c.bf16 %v218_v7, %v205_v5 }
 0x197   :  { %9168 = vmatprep.subr.bf16.mxu0 %v9167_v63  ;;  %9364 = vmatprep.subr.bf16.mxu1 %v9363_v3  ;;  %v219_v63 = vld [vmem:[%s20877_s1 + $0x5a0] sm:$0xff]  ;;  %v9187_v2 = vpack.c.bf16 %v217_v61, %v204_v60  ;;  %v322_v60 = vld [vmem:[%s20877_s1 + $0x8d8] sm:$0xff] }
 0x198   :  { %2586 = vmatprep.mubr.f32.mxu0 %v11469_v20  ;;  %2870 = vmatprep.mubr.f32.mxu1 %v11469_v20  ;;  %v203_v3 = vld [vmem:[%s20877_s1 + $0x520] sm:$0xff]  ;;  %v9383_v6 = vpack.c.bf16 %v219_v63, %v206_v62  ;;  %v256_v20 = vld [vmem:[%s20877_s1 + $0x6c8] sm:$0xff]  ;;  %v334_v61 = vld [vmem:[%s20877_s1 + $0x938] sm:$0xff] }
 0x199   :  { %v9195_v27 = vpack.c.bf16 %v269_v21, %v256_v20  ;;  %v347_v62 = vld [vmem:[%s20877_s1 + $0x9a0] sm:$0xff]  ;;  %v336_v63 = vld [vmem:[%s20877_s1 + $0x948] sm:$0xff]  ;;  %v346_v5 = vld [vmem:[%s20877_s1 + $0x998] sm:$0xff] }
 0x19a   :  { %9170 = vmatpush1.bf16.msra.mxu0 %v9169_v10  ;;  %9366 = vmatpush1.bf16.msra.mxu1 %v9365_v11  ;;  %v232_v10 = vld [vmem:[%s20877_s1 + $0x608] sm:$0xff]  ;;  %v245_v11 = vld [vmem:[%s20877_s1 + $0x670] sm:$0xff]  ;;  %v374_v20 = vld [vmem:[%s20877_s1 + $0xa78] sm:$0xff] }
 0x19b   :  { %9172 = vmatprep.subr.bf16.mxu0 %v9171_v12  ;;  %9368 = vmatprep.subr.bf16.mxu1 %v9367_v16  ;;  %v9189_v12 = vpack.c.bf16 %v216_v4, %v203_v3  ;;  %v242_v16 = vld [vmem:[%s20877_s1 + $0x658] sm:$0xff]  ;;  %v9387_v18 = vpack.c.bf16 %v245_v11, %v232_v10  ;;  %v9207_v3 = vpack.c.bf16 %v347_v62, %v334_v61  ;;  %v333_v4 = vld [vmem:[%s20877_s1 + $0x930] sm:$0xff]  ;;  %v452_v61 = vld [vmem:[%s20877_s1 + $0xce8] sm:$0xff] }
 0x19c   :  { %v373_v10 = vld [vmem:[%s20877_s1 + $0xa70] sm:$0xff]  ;;  %v362_v11 = vld [vmem:[%s20877_s1 + $0xa18] sm:$0xff]  ;;  %v464_v62 = vld [vmem:[%s20877_s1 + $0xd48] sm:$0xff] }
 0x19d   :  { %v386_v21 = vld [vmem:[%s20877_s1 + $0xad8] sm:$0xff] }
 0x19e   :  { %9174 = vmatpush1.bf16.msra.mxu0 %v9173_v23  ;;  %9370 = vmatpush1.bf16.msra.mxu1 %v9369_v25  ;;  %v271_v23 = vld [vmem:[%s20877_s1 + $0x740] sm:$0xff]  ;;  %v9193_v25 = vpack.c.bf16 %v242_v16, %v229_v15  ;;  %v9211_v15 = vpack.c.bf16 %v373_v10, %v360_v9  ;;  %v478_v9 = vld [vmem:[%s20877_s1 + $0xdb8] sm:$0xff] }
 0x19f   :  { %9176 = vmatprep.subr.bf16.mxu0 %v9175_v26  ;;  %9372 = vmatprep.subr.bf16.mxu1 %v9371_v30  ;;  %v9389_v26 = vpack.c.bf16 %v244_v19, %v231_v17  ;;  %v257_v30 = vld [vmem:[%s20877_s1 + $0x6d0] sm:$0xff]  ;;  %v9391_v31 = vpack.c.bf16 %v271_v23, %v258_v22  ;;  %v359_v16 = vld [vmem:[%s20877_s1 + $0xa00] sm:$0xff]  ;;  %v372_v17 = vld [vmem:[%s20877_s1 + $0xa68] sm:$0xff] }
 0x1a0   :  { %v14056_v42 = vpop.f32.mrb[0].mxu0  ;;  %v14067_v47 = vpop.f32.mrb[0].mxu1  ;;  %v399_v22 = vld [vmem:[%s20877_s1 + $0xb40] sm:$0xff]  ;;  %v388_v23 = vld [vmem:[%s20877_s1 + $0xae8] sm:$0xff]  ;;  %v490_v10 = vld [vmem:[%s20877_s1 + $0xe18] sm:$0xff] }
 0x1a1   :  { %v14069_v48 = vpop.f32.mrb[1].mxu0  ;;  %v14077_v51 = vpop.f32.mrb[1].mxu1 }
 0x1a2   :  { %9178 = vmatpush1.bf16.msra.mxu0 %v9177_v36  ;;  %9374 = vmatpush1.bf16.msra.mxu1 %v9373_v37  ;;  %v297_v36 = vld [vmem:[%s20877_s1 + $0x810] sm:$0xff]  ;;  %v9197_v37 = vpack.c.bf16 %v268_v29, %v255_v28  ;;  %v9215_v28 = vpack.c.bf16 %v399_v22, %v386_v21  ;;  %v504_v21 = vld [vmem:[%s20877_s1 + $0xe88] sm:$0xff] }
 0x1a3   :  { %9180 = vmatprep.subr.bf16.mxu0 %v9179_v38  ;;  %9376 = vmatprep.subr.bf16.mxu1 %v9375_v43  ;;  %v9393_v38 = vpack.c.bf16 %v270_v32, %v257_v30  ;;  %v283_v43 = vld [vmem:[%s20877_s1 + $0x7a0] sm:$0xff]  ;;  %v9395_v44 = vpack.c.bf16 %v297_v36, %v284_v35  ;;  %v385_v29 = vld [vmem:[%s20877_s1 + $0xad0] sm:$0xff]  ;;  %v398_v30 = vld [vmem:[%s20877_s1 + $0xb38] sm:$0xff] }
 0x1a4   :  { %v425_v35 = vld [vmem:[%s20877_s1 + $0xc10] sm:$0xff]  ;;  %v414_v36 = vld [vmem:[%s20877_s1 + $0xbb8] sm:$0xff]  ;;  %v516_v22 = vld [vmem:[%s20877_s1 + $0xee8] sm:$0xff] }
 0x1a6   :  { %9182 = vmatpush1.bf16.msra.mxu0 %v9181_v52  ;;  %9378 = vmatpush1.bf16.msra.mxu1 %v9377_v53  ;;  %v323_v52 = vld [vmem:[%s20877_s1 + $0x8e0] sm:$0xff]  ;;  %v9201_v53 = vpack.c.bf16 %v294_v41, %v281_v40  ;;  %v9219_v40 = vpack.c.bf16 %v425_v35, %v412_v34  ;;  %v530_v35 = vld [vmem:[%s20877_s1 + $0xf58] sm:$0xff] }
 0x1a7   :  { %9184 = vmatprep.subr.bf16.mxu0 %v9183_v54  ;;  %9380 = vmatprep.subr.bf16.mxu1 %v9379_v58  ;;  %v9397_v54 = vpack.c.bf16 %v296_v45, %v283_v43  ;;  %v309_v58 = vld [vmem:[%s20877_s1 + $0x870] sm:$0xff]  ;;  %v9399_v59 = vpack.c.bf16 %v323_v52, %v310_v50  ;;  %v411_v41 = vld [vmem:[%s20877_s1 + $0xba0] sm:$0xff]  ;;  %v424_v43 = vld [vmem:[%s20877_s1 + $0xc08] sm:$0xff] }
 0x1a8   :  { %v451_v50 = vld [vmem:[%s20877_s1 + $0xce0] sm:$0xff]  ;;  %v440_v52 = vld [vmem:[%s20877_s1 + $0xc88] sm:$0xff] }
 0x1aa   :  { %9186 = vmatpush1.bf16.msra.mxu0 %v9185_v0  ;;  %9382 = vmatpush1.bf16.msra.mxu1 %v9381_v1  ;;  %v349_v0 = vld [vmem:[%s20877_s1 + $0x9b0] sm:$0xff]  ;;  %v9205_v1 = vpack.c.bf16 %v320_v57, %v307_v56  ;;  %v9223_v56 = vpack.c.bf16 %v451_v50, %v438_v49  ;;  %v543_v49 = vld [vmem:[%s20877_s1 + $0xfc0] sm:$0xff] }
 0x1ab   :  { %9188 = vmatprep.subr.bf16.mxu0 %v9187_v2  ;;  %9384 = vmatprep.subr.bf16.mxu1 %v9383_v6  ;;  %v9401_v2 = vpack.c.bf16 %v322_v60, %v309_v58  ;;  %v335_v6 = vld [vmem:[%s20877_s1 + $0x940] sm:$0xff]  ;;  %v9403_v7 = vpack.c.bf16 %v349_v0, %v336_v63  ;;  %v437_v57 = vld [vmem:[%s20877_s1 + $0xc70] sm:$0xff]  ;;  %v450_v58 = vld [vmem:[%s20877_s1 + $0xcd8] sm:$0xff] }
 0x1ac   :  { %v477_v63 = vld [vmem:[%s20877_s1 + $0xdb0] sm:$0xff]  ;;  %v466_v0 = vld [vmem:[%s20877_s1 + $0xd58] sm:$0xff] }
 0x1ae   :  { %9190 = vmatpush1.bf16.msra.mxu0 %v9189_v12  ;;  %9386 = vmatpush1.bf16.msra.mxu1 %v9385_v13  ;;  %v375_v12 = vld [vmem:[%s20877_s1 + $0xa80] sm:$0xff]  ;;  %v9209_v13 = vpack.c.bf16 %v346_v5, %v333_v4  ;;  %v9227_v4 = vpack.c.bf16 %v477_v63, %v464_v62  ;;  %v569_v62 = vld [vmem:[%s20877_s1 + $0x1090] sm:$0xff] }
 0x1af   :  { %9192 = vmatprep.subr.bf16.mxu0 %v9191_v14  ;;  %9388 = vmatprep.subr.bf16.mxu1 %v9387_v18  ;;  %v9405_v14 = vpack.c.bf16 %v348_v8, %v335_v6  ;;  %v361_v18 = vld [vmem:[%s20877_s1 + $0xa10] sm:$0xff]  ;;  %v9407_v19 = vpack.c.bf16 %v375_v12, %v362_v11  ;;  %v463_v5 = vld [vmem:[%s20877_s1 + $0xd40] sm:$0xff]  ;;  %v476_v6 = vld [vmem:[%s20877_s1 + $0xda8] sm:$0xff] }
 0x1b0   :  { %v503_v11 = vld [vmem:[%s20877_s1 + $0xe80] sm:$0xff]  ;;  %v492_v12 = vld [vmem:[%s20877_s1 + $0xe28] sm:$0xff] }
 0x1b2   :  { %9194 = vmatpush1.bf16.msra.mxu0 %v9193_v25  ;;  %9390 = vmatpush1.bf16.msra.mxu1 %v9389_v26  ;;  %v401_v25 = vld [vmem:[%s20877_s1 + $0xb50] sm:$0xff]  ;;  %v9213_v26 = vpack.c.bf16 %v372_v17, %v359_v16  ;;  %v9231_v16 = vpack.c.bf16 %v503_v11, %v490_v10  ;;  %v595_v10 = vld [vmem:[%s20877_s1 + $0x1160] sm:$0xff] }
 0x1b3   :  { %9196 = vmatprep.subr.bf16.mxu0 %v9195_v27  ;;  %9392 = vmatprep.subr.bf16.mxu1 %v9391_v31  ;;  %v9409_v27 = vpack.c.bf16 %v374_v20, %v361_v18  ;;  %v387_v31 = vld [vmem:[%s20877_s1 + $0xae0] sm:$0xff]  ;;  %v9411_v32 = vpack.c.bf16 %v401_v25, %v388_v23  ;;  %v489_v17 = vld [vmem:[%s20877_s1 + $0xe10] sm:$0xff]  ;;  %v502_v18 = vld [vmem:[%s20877_s1 + $0xe78] sm:$0xff] }
 0x1b4   :  { %v529_v23 = vld [vmem:[%s20877_s1 + $0xf50] sm:$0xff]  ;;  %v11470_v25 = vld [vmem:[%s20878_s0] sm:$0xff] }
 0x1b6   :  { %9198 = vmatpush1.bf16.msra.mxu0 %v9197_v37  ;;  %9394 = vmatpush1.bf16.msra.mxu1 %v9393_v38  ;;  %v427_v37 = vld [vmem:[%s20877_s1 + $0xc20] sm:$0xff]  ;;  %v9217_v38 = vpack.c.bf16 %v398_v30, %v385_v29  ;;  %v9235_v30 = vpack.c.bf16 %v529_v23, %v516_v22  ;;  %v621_v22 = vld [vmem:[%s20877_s1 + $0x1230] sm:$0xff] }
 0x1b7   :  { %9200 = vmatprep.subr.bf16.mxu0 %v9199_v39  ;;  %9396 = vmatprep.subr.bf16.mxu1 %v9395_v44  ;;  %v9413_v39 = vpack.c.bf16 %v400_v33, %v387_v31  ;;  %v413_v44 = vld [vmem:[%s20877_s1 + $0xbb0] sm:$0xff]  ;;  %v9415_v45 = vpack.c.bf16 %v427_v37, %v414_v36  ;;  %v515_v31 = vld [vmem:[%s20877_s1 + $0xee0] sm:$0xff]  ;;  %v542_v36 = vld [vmem:[%s20877_s1 + $0xfb8] sm:$0xff] }
 0x1b8   :  { %v517_v33 = vld [vmem:[%s20877_s1 + $0xef0] sm:$0xff]  ;;  %v555_v37 = vld [vmem:[%s20877_s1 + $0x1020] sm:$0xff] }
 0x1ba   :  { %9202 = vmatpush1.bf16.msra.mxu0 %v9201_v53  ;;  %9398 = vmatpush1.bf16.msra.mxu1 %v9397_v54  ;;  %v453_v53 = vld [vmem:[%s20877_s1 + $0xcf0] sm:$0xff]  ;;  %v9221_v54 = vpack.c.bf16 %v424_v43, %v411_v41  ;;  %v9433_v43 = vpack.c.bf16 %v530_v35, %v517_v33  ;;  %v647_v35 = vld [vmem:[%s20877_s1 + $0x1300] sm:$0xff] }
 0x1bb   :  { %9204 = vmatprep.subr.bf16.mxu0 %v9203_v55  ;;  %9400 = vmatprep.subr.bf16.mxu1 %v9399_v59  ;;  %v9417_v55 = vpack.c.bf16 %v426_v46, %v413_v44  ;;  %v439_v59 = vld [vmem:[%s20877_s1 + $0xc80] sm:$0xff]  ;;  %v9419_v60 = vpack.c.bf16 %v453_v53, %v440_v52  ;;  %v9239_v44 = vpack.c.bf16 %v555_v37, %v542_v36  ;;  %v554_v46 = vld [vmem:[%s20877_s1 + $0x1018] sm:$0xff]  ;;  %v556_v52 = vld [vmem:[%s20877_s1 + $0x1028] sm:$0xff] }
 0x1bc   :  { %v568_v53 = vld [vmem:[%s20877_s1 + $0x1088] sm:$0xff]  ;;  %v645_v33 = vld [vmem:[%s20877_s1 + $0x12f0] sm:$0xff] }
 0x1bd   :  { %v660_v37 = vld [vmem:[%s20877_s1 + $0x1368] sm:$0xff] }
 0x1be   :  { %9206 = vmatpush1.bf16.msra.mxu0 %v9205_v1  ;;  %9402 = vmatpush1.bf16.msra.mxu1 %v9401_v2  ;;  %v479_v1 = vld [vmem:[%s20877_s1 + $0xdc0] sm:$0xff]  ;;  %v9225_v2 = vpack.c.bf16 %v450_v58, %v437_v57  ;;  %v9437_v58 = vpack.c.bf16 %v556_v52, %v543_v49  ;;  %v684_v49 = vld [vmem:[%s20877_s1 + $0x1428] sm:$0xff] }
 0x1bf   :  { %9208 = vmatprep.subr.bf16.mxu0 %v9207_v3  ;;  %9404 = vmatprep.subr.bf16.mxu1 %v9403_v7  ;;  %v9421_v3 = vpack.c.bf16 %v452_v61, %v439_v59  ;;  %v465_v7 = vld [vmem:[%s20877_s1 + $0xd50] sm:$0xff]  ;;  %v9423_v8 = vpack.c.bf16 %v479_v1, %v466_v0  ;;  %v580_v61 = vld [vmem:[%s20877_s1 + $0x10e8] sm:$0xff]  ;;  %v582_v0 = vld [vmem:[%s20877_s1 + $0x10f8] sm:$0xff] }
 0x1c0   :  { %v594_v1 = vld [vmem:[%s20877_s1 + $0x1158] sm:$0xff] }
 0x1c2   :  { %9210 = vmatpush1.bf16.msra.mxu0 %v9209_v13  ;;  %9406 = vmatpush1.bf16.msra.mxu1 %v9405_v14  ;;  %v505_v13 = vld [vmem:[%s20877_s1 + $0xe90] sm:$0xff]  ;;  %v9229_v14 = vpack.c.bf16 %v476_v6, %v463_v5  ;;  %v9441_v6 = vpack.c.bf16 %v582_v0, %v569_v62  ;;  %v710_v62 = vld [vmem:[%s20877_s1 + $0x14f8] sm:$0xff] }
 0x1c3   :  { %9212 = vmatprep.subr.bf16.mxu0 %v9211_v15  ;;  %9408 = vmatprep.subr.bf16.mxu1 %v9407_v19  ;;  %v9425_v15 = vpack.c.bf16 %v478_v9, %v465_v7  ;;  %v491_v19 = vld [vmem:[%s20877_s1 + $0xe20] sm:$0xff]  ;;  %v9427_v20 = vpack.c.bf16 %v505_v13, %v492_v12  ;;  %v606_v9 = vld [vmem:[%s20877_s1 + $0x11b8] sm:$0xff]  ;;  %v608_v12 = vld [vmem:[%s20877_s1 + $0x11c8] sm:$0xff] }
 0x1c4   :  { %v9429_v29 = vpack.c.bf16 %v504_v21, %v491_v19  ;;  %v620_v13 = vld [vmem:[%s20877_s1 + $0x1228] sm:$0xff] }
 0x1c5   :  { %v632_v21 = vld [vmem:[%s20877_s1 + $0x1288] sm:$0xff] }
 0x1c6   :  { %9214 = vmatpush1.bf16.msra.mxu0 %v9213_v26  ;;  %9410 = vmatpush1.bf16.msra.mxu1 %v9409_v27  ;;  %v518_v26 = vld [vmem:[%s20877_s1 + $0xef8] sm:$0xff]  ;;  %v531_v27 = vld [vmem:[%s20877_s1 + $0xf60] sm:$0xff] }
 0x1c7   :  { %9216 = vmatprep.subr.bf16.mxu0 %v9215_v28  ;;  %9412 = vmatprep.subr.bf16.mxu1 %v9411_v32  ;;  %v9233_v28 = vpack.c.bf16 %v502_v18, %v489_v17  ;;  %v528_v32 = vld [vmem:[%s20877_s1 + $0xf48] sm:$0xff]  ;;  %v9431_v34 = vpack.c.bf16 %v531_v27, %v518_v26  ;;  %v9445_v18 = vpack.c.bf16 %v608_v12, %v595_v10  ;;  %v646_v26 = vld [vmem:[%s20877_s1 + $0x12f8] sm:$0xff]  ;;  %v659_v27 = vld [vmem:[%s20877_s1 + $0x1360] sm:$0xff] }
 0x1c8   :  { %v9237_v41 = vpack.c.bf16 %v528_v32, %v515_v31  ;;  %v9255_v32 = vpack.c.bf16 %v659_v27, %v646_v26  ;;  %v736_v10 = vld [vmem:[%s20877_s1 + $0x15c8] sm:$0xff] }
 0x1c9   :  { %v764_v26 = vld [vmem:[%s20877_s1 + $0x16a8] sm:$0xff] }
 0x1ca   :  { %9218 = vmatpush1.bf16.msra.mxu0 %v9217_v38  ;;  %9414 = vmatpush1.bf16.msra.mxu1 %v9413_v39  ;;  %v11471_v38 = vld [vmem:[%s20878_s0 + $0x18] sm:$0xff]  ;;  %v544_v39 = vld [vmem:[%s20877_s1 + $0xfc8] sm:$0xff] }
 0x1cb   :  { %9220 = vmatprep.subr.bf16.mxu0 %v9219_v40  ;;  %9416 = vmatprep.subr.bf16.mxu1 %v9415_v45  ;;  %v557_v40 = vld [vmem:[%s20877_s1 + $0x1030] sm:$0xff]  ;;  %v776_v27 = vld [vmem:[%s20877_s1 + $0x1708] sm:$0xff] }
 0x1cc   :  { %v541_v45 = vld [vmem:[%s20877_s1 + $0xfb0] sm:$0xff]  ;;  %v9435_v50 = vpack.c.bf16 %v557_v40, %v544_v39  ;;  %v674_v40 = vld [vmem:[%s20877_s1 + $0x13d8] sm:$0xff] }
 0x1cd   :  { %v9241_v57 = vpack.c.bf16 %v554_v46, %v541_v45  ;;  %v685_v39 = vld [vmem:[%s20877_s1 + $0x1430] sm:$0xff]  ;;  %v671_v46 = vld [vmem:[%s20877_s1 + $0x13c0] sm:$0xff] }
 0x1ce   :  { %9222 = vmatpush1.bf16.msra.mxu0 %v9221_v54  ;;  %9418 = vmatpush1.bf16.msra.mxu1 %v9417_v55  ;;  %v581_v54 = vld [vmem:[%s20877_s1 + $0x10f0] sm:$0xff]  ;;  %v570_v55 = vld [vmem:[%s20877_s1 + $0x1098] sm:$0xff] }
 0x1cf   :  { %9224 = vmatprep.subr.bf16.mxu0 %v9223_v56  ;;  %9420 = vmatprep.subr.bf16.mxu1 %v9419_v60  ;;  %v583_v56 = vld [vmem:[%s20877_s1 + $0x1100] sm:$0xff]  ;;  %v9243_v59 = vpack.c.bf16 %v581_v54, %v568_v53  ;;  %v686_v53 = vld [vmem:[%s20877_s1 + $0x1438] sm:$0xff] }
 0x1d0   :  { %v567_v60 = vld [vmem:[%s20877_s1 + $0x1080] sm:$0xff]  ;;  %v9439_v63 = vpack.c.bf16 %v583_v56, %v570_v55  ;;  %v698_v54 = vld [vmem:[%s20877_s1 + $0x1498] sm:$0xff]  ;;  %v700_v56 = vld [vmem:[%s20877_s1 + $0x14a8] sm:$0xff] }
 0x1d1   :  { %v9245_v5 = vpack.c.bf16 %v580_v61, %v567_v60  ;;  %v711_v55 = vld [vmem:[%s20877_s1 + $0x1500] sm:$0xff]  ;;  %v697_v61 = vld [vmem:[%s20877_s1 + $0x1490] sm:$0xff] }
 0x1d2   :  { %9226 = vmatpush1.bf16.msra.mxu0 %v9225_v2  ;;  %9422 = vmatpush1.bf16.msra.mxu1 %v9421_v3  ;;  %v607_v2 = vld [vmem:[%s20877_s1 + $0x11c0] sm:$0xff]  ;;  %v596_v3 = vld [vmem:[%s20877_s1 + $0x1168] sm:$0xff]  ;;  %v9263_v60 = vpack.c.bf16 %v711_v55, %v698_v54 }
 0x1d3   :  { %9228 = vmatprep.subr.bf16.mxu0 %v9227_v4  ;;  %9424 = vmatprep.subr.bf16.mxu1 %v9423_v8  ;;  %v609_v4 = vld [vmem:[%s20877_s1 + $0x11d0] sm:$0xff]  ;;  %v9247_v7 = vpack.c.bf16 %v607_v2, %v594_v1  ;;  %v712_v1 = vld [vmem:[%s20877_s1 + $0x1508] sm:$0xff] }
 0x1d4   :  { %v593_v8 = vld [vmem:[%s20877_s1 + $0x1150] sm:$0xff]  ;;  %v9443_v11 = vpack.c.bf16 %v609_v4, %v596_v3  ;;  %v724_v2 = vld [vmem:[%s20877_s1 + $0x1568] sm:$0xff]  ;;  %v726_v4 = vld [vmem:[%s20877_s1 + $0x1578] sm:$0xff] }
 0x1d5   :  { %2587 = vmatmul.mubr.f32.vlgmr.msra.gmra.mrb[4].mxu0 %v11470_v25  ;;  %2871 = vmatmul.mubr.f32.vlgmr.msra.gmra.mrb[4].mxu1 %v11470_v25  ;;  %v9249_v17 = vpack.c.bf16 %v606_v9, %v593_v8  ;;  %v634_v25 = vld [vmem:[%s20877_s1 + $0x1298] sm:$0xff]  ;;  %v737_v3 = vld [vmem:[%s20877_s1 + $0x15d0] sm:$0xff]  ;;  %v723_v9 = vld [vmem:[%s20877_s1 + $0x1560] sm:$0xff] }
 0x1d6   :  { %9230 = vmatpush1.bf16.msra.mxu0 %v9229_v14  ;;  %9426 = vmatpush1.bf16.msra.mxu1 %v9425_v15  ;;  %v633_v14 = vld [vmem:[%s20877_s1 + $0x1290] sm:$0xff]  ;;  %v622_v15 = vld [vmem:[%s20877_s1 + $0x1238] sm:$0xff]  ;;  %v9449_v31 = vpack.c.bf16 %v634_v25, %v621_v22  ;;  %v9267_v8 = vpack.c.bf16 %v737_v3, %v724_v2  ;;  %v816_v54 = vld [vmem:[%s20877_s1 + $0x1848] sm:$0xff] }
 0x1d7   :  { %9232 = vmatprep.subr.bf16.mxu0 %v9231_v16  ;;  %9428 = vmatprep.subr.bf16.mxu1 %v9427_v20  ;;  %v635_v16 = vld [vmem:[%s20877_s1 + $0x12a0] sm:$0xff]  ;;  %v9251_v19 = vpack.c.bf16 %v633_v14, %v620_v13  ;;  %v738_v13 = vld [vmem:[%s20877_s1 + $0x15d8] sm:$0xff]  ;;  %v828_v55 = vld [vmem:[%s20877_s1 + $0x18a8] sm:$0xff] }
 0x1d8   :  { %2657 = vmatprep.mubr.f32.mxu0 %v11471_v38  ;;  %2941 = vmatprep.mubr.f32.mxu1 %v11471_v38  ;;  %v619_v20 = vld [vmem:[%s20877_s1 + $0x1220] sm:$0xff]  ;;  %v9447_v23 = vpack.c.bf16 %v635_v16, %v622_v15  ;;  %v672_v38 = vld [vmem:[%s20877_s1 + $0x13c8] sm:$0xff]  ;;  %v750_v14 = vld [vmem:[%s20877_s1 + $0x1638] sm:$0xff] }
 0x1d9   :  { %v9259_v45 = vpack.c.bf16 %v685_v39, %v672_v38  ;;  %v763_v15 = vld [vmem:[%s20877_s1 + $0x16a0] sm:$0xff]  ;;  %v752_v16 = vld [vmem:[%s20877_s1 + $0x1648] sm:$0xff]  ;;  %v762_v22 = vld [vmem:[%s20877_s1 + $0x1698] sm:$0xff] }
 0x1da   :  { %9234 = vmatpush1.bf16.msra.mxu0 %v9233_v28  ;;  %9430 = vmatpush1.bf16.msra.mxu1 %v9429_v29  ;;  %v648_v28 = vld [vmem:[%s20877_s1 + $0x1308] sm:$0xff]  ;;  %v661_v29 = vld [vmem:[%s20877_s1 + $0x1370] sm:$0xff]  ;;  %v790_v38 = vld [vmem:[%s20877_s1 + $0x1778] sm:$0xff] }
 0x1db   :  { %9236 = vmatprep.subr.bf16.mxu0 %v9235_v30  ;;  %9432 = vmatprep.subr.bf16.mxu1 %v9431_v34  ;;  %v9253_v30 = vpack.c.bf16 %v632_v21, %v619_v20  ;;  %v658_v34 = vld [vmem:[%s20877_s1 + $0x1358] sm:$0xff]  ;;  %v9451_v36 = vpack.c.bf16 %v661_v29, %v648_v28  ;;  %v9271_v20 = vpack.c.bf16 %v763_v15, %v750_v14  ;;  %v749_v21 = vld [vmem:[%s20877_s1 + $0x1630] sm:$0xff]  ;;  %v868_v14 = vld [vmem:[%s20877_s1 + $0x19e8] sm:$0xff] }
 0x1dc   :  { %v789_v28 = vld [vmem:[%s20877_s1 + $0x1770] sm:$0xff]  ;;  %v778_v29 = vld [vmem:[%s20877_s1 + $0x1718] sm:$0xff]  ;;  %v880_v15 = vld [vmem:[%s20877_s1 + $0x1a48] sm:$0xff] }
 0x1dd   :  { %v802_v39 = vld [vmem:[%s20877_s1 + $0x17d8] sm:$0xff] }
 0x1de   :  { %9238 = vmatpush1.bf16.msra.mxu0 %v9237_v41  ;;  %9434 = vmatpush1.bf16.msra.mxu1 %v9433_v43  ;;  %v687_v41 = vld [vmem:[%s20877_s1 + $0x1440] sm:$0xff]  ;;  %v9257_v43 = vpack.c.bf16 %v658_v34, %v645_v33  ;;  %v9275_v33 = vpack.c.bf16 %v789_v28, %v776_v27  ;;  %v842_v2 = vld [vmem:[%s20877_s1 + $0x1918] sm:$0xff] }
 0x1df   :  { %9240 = vmatprep.subr.bf16.mxu0 %v9239_v44  ;;  %9436 = vmatprep.subr.bf16.mxu1 %v9435_v50  ;;  %v9453_v44 = vpack.c.bf16 %v660_v37, %v647_v35  ;;  %v673_v50 = vld [vmem:[%s20877_s1 + $0x13d0] sm:$0xff]  ;;  %v9455_v52 = vpack.c.bf16 %v687_v41, %v674_v40  ;;  %v775_v34 = vld [vmem:[%s20877_s1 + $0x1700] sm:$0xff]  ;;  %v788_v35 = vld [vmem:[%s20877_s1 + $0x1768] sm:$0xff] }
 0x1e0   :  { %v815_v40 = vld [vmem:[%s20877_s1 + $0x1840] sm:$0xff]  ;;  %v804_v41 = vld [vmem:[%s20877_s1 + $0x17e8] sm:$0xff]  ;;  %v854_v3 = vld [vmem:[%s20877_s1 + $0x1978] sm:$0xff] }
 0x1e1   :  { %v894_v27 = vld [vmem:[%s20877_s1 + $0x1ab8] sm:$0xff] }
 0x1e2   :  { %9242 = vmatpush1.bf16.msra.mxu0 %v9241_v57  ;;  %9438 = vmatpush1.bf16.msra.mxu1 %v9437_v58  ;;  %v713_v57 = vld [vmem:[%s20877_s1 + $0x1510] sm:$0xff]  ;;  %v9261_v58 = vpack.c.bf16 %v684_v49, %v671_v46  ;;  %v9279_v46 = vpack.c.bf16 %v815_v40, %v802_v39  ;;  %v906_v28 = vld [vmem:[%s20877_s1 + $0x1b18] sm:$0xff]  ;;  %v920_v39 = vld [vmem:[%s20877_s1 + $0x1b88] sm:$0xff] }
 0x1e3   :  { %9244 = vmatprep.subr.bf16.mxu0 %v9243_v59  ;;  %9440 = vmatprep.subr.bf16.mxu1 %v9439_v63  ;;  %v9457_v59 = vpack.c.bf16 %v686_v53, %v673_v50  ;;  %v699_v63 = vld [vmem:[%s20877_s1 + $0x14a0] sm:$0xff]  ;;  %v9459_v0 = vpack.c.bf16 %v713_v57, %v700_v56  ;;  %v801_v49 = vld [vmem:[%s20877_s1 + $0x17d0] sm:$0xff]  ;;  %v814_v50 = vld [vmem:[%s20877_s1 + $0x1838] sm:$0xff] }
 0x1e4   :  { %v841_v56 = vld [vmem:[%s20877_s1 + $0x1910] sm:$0xff]  ;;  %v830_v57 = vld [vmem:[%s20877_s1 + $0x18b8] sm:$0xff]  ;;  %v932_v40 = vld [vmem:[%s20877_s1 + $0x1be8] sm:$0xff] }
 0x1e6   :  { %9246 = vmatpush1.bf16.msra.mxu0 %v9245_v5  ;;  %9442 = vmatpush1.bf16.msra.mxu1 %v9441_v6  ;;  %v739_v5 = vld [vmem:[%s20877_s1 + $0x15e0] sm:$0xff]  ;;  %v9265_v6 = vpack.c.bf16 %v710_v62, %v697_v61  ;;  %v9283_v61 = vpack.c.bf16 %v841_v56, %v828_v55  ;;  %v946_v56 = vld [vmem:[%s20877_s1 + $0x1c58] sm:$0xff] }
 0x1e7   :  { %9248 = vmatprep.subr.bf16.mxu0 %v9247_v7  ;;  %9444 = vmatprep.subr.bf16.mxu1 %v9443_v11  ;;  %v9461_v7 = vpack.c.bf16 %v712_v1, %v699_v63  ;;  %v725_v11 = vld [vmem:[%s20877_s1 + $0x1570] sm:$0xff]  ;;  %v9463_v12 = vpack.c.bf16 %v739_v5, %v726_v4  ;;  %v827_v62 = vld [vmem:[%s20877_s1 + $0x18a0] sm:$0xff]  ;;  %v840_v63 = vld [vmem:[%s20877_s1 + $0x1908] sm:$0xff] }
 0x1e8   :  { %v867_v4 = vld [vmem:[%s20877_s1 + $0x19e0] sm:$0xff]  ;;  %v856_v5 = vld [vmem:[%s20877_s1 + $0x1988] sm:$0xff] }
 0x1ea   :  { %9250 = vmatpush1.bf16.msra.mxu0 %v9249_v17  ;;  %9446 = vmatpush1.bf16.msra.mxu1 %v9445_v18  ;;  %v765_v17 = vld [vmem:[%s20877_s1 + $0x16b0] sm:$0xff]  ;;  %v9269_v18 = vpack.c.bf16 %v736_v10, %v723_v9  ;;  %v9287_v9 = vpack.c.bf16 %v867_v4, %v854_v3  ;;  %v959_v3 = vld [vmem:[%s20877_s1 + $0x1cc0] sm:$0xff] }
 0x1eb   :  { %9252 = vmatprep.subr.bf16.mxu0 %v9251_v19  ;;  %9448 = vmatprep.subr.bf16.mxu1 %v9447_v23  ;;  %v9465_v19 = vpack.c.bf16 %v738_v13, %v725_v11  ;;  %v751_v23 = vld [vmem:[%s20877_s1 + $0x1640] sm:$0xff]  ;;  %v9467_v25 = vpack.c.bf16 %v765_v17, %v752_v16  ;;  %v853_v10 = vld [vmem:[%s20877_s1 + $0x1970] sm:$0xff]  ;;  %v866_v11 = vld [vmem:[%s20877_s1 + $0x19d8] sm:$0xff] }
 0x1ec   :  { %v893_v16 = vld [vmem:[%s20877_s1 + $0x1ab0] sm:$0xff]  ;;  %v882_v17 = vld [vmem:[%s20877_s1 + $0x1a58] sm:$0xff] }
 0x1ee   :  { %9254 = vmatpush1.bf16.msra.mxu0 %v9253_v30  ;;  %9450 = vmatpush1.bf16.msra.mxu1 %v9449_v31  ;;  %v791_v30 = vld [vmem:[%s20877_s1 + $0x1780] sm:$0xff]  ;;  %v9273_v31 = vpack.c.bf16 %v762_v22, %v749_v21  ;;  %v9291_v21 = vpack.c.bf16 %v893_v16, %v880_v15  ;;  %v985_v15 = vld [vmem:[%s20877_s1 + $0x1d90] sm:$0xff] }
 0x1ef   :  { %9256 = vmatprep.subr.bf16.mxu0 %v9255_v32  ;;  %9452 = vmatprep.subr.bf16.mxu1 %v9451_v36  ;;  %v9469_v32 = vpack.c.bf16 %v764_v26, %v751_v23  ;;  %v777_v36 = vld [vmem:[%s20877_s1 + $0x1710] sm:$0xff]  ;;  %v9471_v37 = vpack.c.bf16 %v791_v30, %v778_v29  ;;  %v879_v22 = vld [vmem:[%s20877_s1 + $0x1a40] sm:$0xff]  ;;  %v892_v23 = vld [vmem:[%s20877_s1 + $0x1aa8] sm:$0xff] }
 0x1f0   :  { %v919_v29 = vld [vmem:[%s20877_s1 + $0x1b80] sm:$0xff]  ;;  %v908_v30 = vld [vmem:[%s20877_s1 + $0x1b28] sm:$0xff] }
 0x1f2   :  { %9258 = vmatpush1.bf16.msra.mxu0 %v9257_v43  ;;  %9454 = vmatpush1.bf16.msra.mxu1 %v9453_v44  ;;  %v817_v43 = vld [vmem:[%s20877_s1 + $0x1850] sm:$0xff]  ;;  %v9277_v44 = vpack.c.bf16 %v788_v35, %v775_v34  ;;  %v9295_v34 = vpack.c.bf16 %v919_v29, %v906_v28  ;;  %v1011_v28 = vld [vmem:[%s20877_s1 + $0x1e60] sm:$0xff] }
 0x1f3   :  { %9260 = vmatprep.subr.bf16.mxu0 %v9259_v45  ;;  %9456 = vmatprep.subr.bf16.mxu1 %v9455_v52  ;;  %v9473_v45 = vpack.c.bf16 %v790_v38, %v777_v36  ;;  %v803_v52 = vld [vmem:[%s20877_s1 + $0x17e0] sm:$0xff]  ;;  %v9475_v53 = vpack.c.bf16 %v817_v43, %v804_v41  ;;  %v905_v35 = vld [vmem:[%s20877_s1 + $0x1b10] sm:$0xff]  ;;  %v918_v36 = vld [vmem:[%s20877_s1 + $0x1b78] sm:$0xff] }
 0x1f4   :  { %v945_v41 = vld [vmem:[%s20877_s1 + $0x1c50] sm:$0xff] }
 0x1f5   :  { %v14778_v43 = vld [vmem:[%s20878_s0 + $0x10] sm:$0xff] }
 0x1f6   :  { %9262 = vmatpush1.bf16.msra.mxu0 %v9261_v58  ;;  %9458 = vmatpush1.bf16.msra.mxu1 %v9457_v59  ;;  %v843_v58 = vld [vmem:[%s20877_s1 + $0x1920] sm:$0xff]  ;;  %v9281_v59 = vpack.c.bf16 %v814_v50, %v801_v49  ;;  %v9299_v50 = vpack.c.bf16 %v945_v41, %v932_v40  ;;  %v1037_v40 = vld [vmem:[%s20877_s1 + $0x1f30] sm:$0xff] }
 0x1f7   :  { %9264 = vmatprep.subr.bf16.mxu0 %v9263_v60  ;;  %9460 = vmatprep.subr.bf16.mxu1 %v9459_v0  ;;  %v9477_v60 = vpack.c.bf16 %v816_v54, %v803_v52  ;;  %v829_v0 = vld [vmem:[%s20877_s1 + $0x18b0] sm:$0xff]  ;;  %v9479_v1 = vpack.c.bf16 %v843_v58, %v830_v57  ;;  %v931_v52 = vld [vmem:[%s20877_s1 + $0x1be0] sm:$0xff]  ;;  %v958_v57 = vld [vmem:[%s20877_s1 + $0x1cb8] sm:$0xff] }
 0x1f8   :  { %v933_v54 = vld [vmem:[%s20877_s1 + $0x1bf0] sm:$0xff]  ;;  %v971_v58 = vld [vmem:[%s20877_s1 + $0x1d20] sm:$0xff] }
 0x1fa   :  { %9266 = vmatpush1.bf16.msra.mxu0 %v9265_v6  ;;  %9462 = vmatpush1.bf16.msra.mxu1 %v9461_v7  ;;  %v869_v6 = vld [vmem:[%s20877_s1 + $0x19f0] sm:$0xff]  ;;  %v9285_v7 = vpack.c.bf16 %v840_v63, %v827_v62  ;;  %v9497_v63 = vpack.c.bf16 %v946_v56, %v933_v54  ;;  %v1074_v56 = vld [vmem:[%s20877_s1 + $0x2058] sm:$0xff] }
 0x1fb   :  { %9268 = vmatprep.subr.bf16.mxu0 %v9267_v8  ;;  %9464 = vmatprep.subr.bf16.mxu1 %v9463_v12  ;;  %v9481_v8 = vpack.c.bf16 %v842_v2, %v829_v0  ;;  %v855_v12 = vld [vmem:[%s20877_s1 + $0x1980] sm:$0xff]  ;;  %v9483_v13 = vpack.c.bf16 %v869_v6, %v856_v5  ;;  %v9303_v0 = vpack.c.bf16 %v971_v58, %v958_v57  ;;  %v970_v2 = vld [vmem:[%s20877_s1 + $0x1d18] sm:$0xff]  ;;  %v972_v5 = vld [vmem:[%s20877_s1 + $0x1d28] sm:$0xff] }
 0x1fc   :  { %v984_v6 = vld [vmem:[%s20877_s1 + $0x1d88] sm:$0xff]  ;;  %v1063_v57 = vld [vmem:[%s20877_s1 + $0x2000] sm:$0xff] }
 0x1fe   :  { %9270 = vmatpush1.bf16.msra.mxu0 %v9269_v18  ;;  %9466 = vmatpush1.bf16.msra.mxu1 %v9465_v19  ;;  %v895_v18 = vld [vmem:[%s20877_s1 + $0x1ac0] sm:$0xff]  ;;  %v9289_v19 = vpack.c.bf16 %v866_v11, %v853_v10  ;;  %v9501_v11 = vpack.c.bf16 %v972_v5, %v959_v3  ;;  %v1100_v5 = vld [vmem:[%s20877_s1 + $0x2128] sm:$0xff] }
 0x1ff   :  { %9272 = vmatprep.subr.bf16.mxu0 %v9271_v20  ;;  %9468 = vmatprep.subr.bf16.mxu1 %v9467_v25  ;;  %v9485_v20 = vpack.c.bf16 %v868_v14, %v855_v12  ;;  %v881_v25 = vld [vmem:[%s20877_s1 + $0x1a50] sm:$0xff]  ;;  %v9487_v26 = vpack.c.bf16 %v895_v18, %v882_v17  ;;  %v996_v14 = vld [vmem:[%s20877_s1 + $0x1de8] sm:$0xff]  ;;  %v998_v17 = vld [vmem:[%s20877_s1 + $0x1df8] sm:$0xff] }
 0x200   :  { %v1010_v18 = vld [vmem:[%s20877_s1 + $0x1e58] sm:$0xff] }
 0x202   :  { %9274 = vmatpush1.bf16.msra.mxu0 %v9273_v31  ;;  %9470 = vmatpush1.bf16.msra.mxu1 %v9469_v32  ;;  %v921_v31 = vld [vmem:[%s20877_s1 + $0x1b90] sm:$0xff]  ;;  %v9293_v32 = vpack.c.bf16 %v892_v23, %v879_v22  ;;  %v9505_v23 = vpack.c.bf16 %v998_v17, %v985_v15  ;;  %v1126_v17 = vld [vmem:[%s20877_s1 + $0x21f8] sm:$0xff] }
 0x203   :  { %9276 = vmatprep.subr.bf16.mxu0 %v9275_v33  ;;  %9472 = vmatprep.subr.bf16.mxu1 %v9471_v37  ;;  %v9489_v33 = vpack.c.bf16 %v894_v27, %v881_v25  ;;  %v907_v37 = vld [vmem:[%s20877_s1 + $0x1b20] sm:$0xff]  ;;  %v9491_v38 = vpack.c.bf16 %v921_v31, %v908_v30  ;;  %v1022_v27 = vld [vmem:[%s20877_s1 + $0x1eb8] sm:$0xff]  ;;  %v1024_v30 = vld [vmem:[%s20877_s1 + $0x1ec8] sm:$0xff] }
 0x204   :  { %v9493_v49 = vpack.c.bf16 %v920_v39, %v907_v37  ;;  %v1036_v31 = vld [vmem:[%s20877_s1 + $0x1f28] sm:$0xff] }
 0x205   :  { %v1048_v39 = vld [vmem:[%s20877_s1 + $0x1f88] sm:$0xff] }
 0x206   :  { %9278 = vmatpush1.bf16.msra.mxu0 %v9277_v44  ;;  %9474 = vmatpush1.bf16.msra.mxu1 %v9473_v45  ;;  %v934_v44 = vld [vmem:[%s20877_s1 + $0x1bf8] sm:$0xff]  ;;  %v947_v45 = vld [vmem:[%s20877_s1 + $0x1c60] sm:$0xff] }
 0x207   :  { %9280 = vmatprep.subr.bf16.mxu0 %v9279_v46  ;;  %9476 = vmatprep.subr.bf16.mxu1 %v9475_v53  ;;  %v9297_v46 = vpack.c.bf16 %v918_v36, %v905_v35  ;;  %v944_v53 = vld [vmem:[%s20877_s1 + $0x1c48] sm:$0xff]  ;;  %v9495_v55 = vpack.c.bf16 %v947_v45, %v934_v44  ;;  %v9509_v36 = vpack.c.bf16 %v1024_v30, %v1011_v28  ;;  %v1050_v44 = vld [vmem:[%s20877_s1 + $0x1f98] sm:$0xff] }
 0x208   :  { %v9301_v62 = vpack.c.bf16 %v944_v53, %v931_v52  ;;  %v1062_v45 = vld [vmem:[%s20877_s1 + $0x1ff8] sm:$0xff]  ;;  %v9513_v53 = vpack.c.bf16 %v1050_v44, %v1037_v40  ;;  %v1152_v30 = vld [vmem:[%s20877_s1 + $0x22c8] sm:$0xff] }
 0x209   :  { %v1178_v44 = vld [vmem:[%s20877_s1 + $0x2398] sm:$0xff] }
 0x20a   :  { %9282 = vmatpush1.bf16.msra.mxu0 %v9281_v59  ;;  %9478 = vmatpush1.bf16.msra.mxu1 %v9477_v60  ;;  %v14809_v59 = vld [vmem:[%s20878_s0 + $0x28] sm:$0xff] }
 0x20b   :  { %9284 = vmatprep.subr.bf16.mxu0 %v9283_v61  ;;  %9480 = vmatprep.subr.bf16.mxu1 %v9479_v1  ;;  %v960_v60 = vld [vmem:[%s20877_s1 + $0x1cc8] sm:$0xff]  ;;  %v973_v61 = vld [vmem:[%s20877_s1 + $0x1d30] sm:$0xff] }
 0x20c   :  { %v957_v1 = vld [vmem:[%s20877_s1 + $0x1cb0] sm:$0xff]  ;;  %v9499_v4 = vpack.c.bf16 %v973_v61, %v960_v60  ;;  %v1076_v60 = vld [vmem:[%s20877_s1 + $0x2068] sm:$0xff] }
 0x20d   :  { %v9305_v10 = vpack.c.bf16 %v970_v2, %v957_v1  ;;  %v1088_v61 = vld [vmem:[%s20877_s1 + $0x20c8] sm:$0xff]  ;;  %v9517_v2 = vpack.c.bf16 %v1076_v60, %v1063_v57 }
 0x20e   :  { %9286 = vmatpush1.bf16.msra.mxu0 %v9285_v7  ;;  %9482 = vmatpush1.bf16.msra.mxu1 %v9481_v8  ;;  %v997_v7 = vld [vmem:[%s20877_s1 + $0x1df0] sm:$0xff]  ;;  %v986_v8 = vld [vmem:[%s20877_s1 + $0x1d98] sm:$0xff]  ;;  %v1204_v60 = vld [vmem:[%s20877_s1 + $0x2468] sm:$0xff] }
 0x20f   :  { %9288 = vmatprep.subr.bf16.mxu0 %v9287_v9  ;;  %9484 = vmatprep.subr.bf16.mxu1 %v9483_v13  ;;  %v999_v9 = vld [vmem:[%s20877_s1 + $0x1e00] sm:$0xff]  ;;  %v9307_v12 = vpack.c.bf16 %v997_v7, %v984_v6  ;;  %v1089_v6 = vld [vmem:[%s20877_s1 + $0x20d0] sm:$0xff] }
 0x210   :  { %v983_v13 = vld [vmem:[%s20877_s1 + $0x1d80] sm:$0xff]  ;;  %v9503_v16 = vpack.c.bf16 %v999_v9, %v986_v8  ;;  %v1102_v8 = vld [vmem:[%s20877_s1 + $0x2138] sm:$0xff] }
 0x211   :  { %v9309_v22 = vpack.c.bf16 %v996_v14, %v983_v13  ;;  %v1114_v9 = vld [vmem:[%s20877_s1 + $0x2198] sm:$0xff]  ;;  %v9521_v14 = vpack.c.bf16 %v1102_v8, %v1089_v6 }
 0x212   :  { %9290 = vmatpush1.bf16.msra.mxu0 %v9289_v19  ;;  %9486 = vmatpush1.bf16.msra.mxu1 %v9485_v20  ;;  %v1023_v19 = vld [vmem:[%s20877_s1 + $0x1ec0] sm:$0xff]  ;;  %v1012_v20 = vld [vmem:[%s20877_s1 + $0x1e68] sm:$0xff]  ;;  %v1230_v8 = vld [vmem:[%s20877_s1 + $0x2538] sm:$0xff] }
 0x213   :  { %9292 = vmatprep.subr.bf16.mxu0 %v9291_v21  ;;  %9488 = vmatprep.subr.bf16.mxu1 %v9487_v26  ;;  %v1025_v21 = vld [vmem:[%s20877_s1 + $0x1ed0] sm:$0xff]  ;;  %v9311_v25 = vpack.c.bf16 %v1023_v19, %v1010_v18  ;;  %v1115_v18 = vld [vmem:[%s20877_s1 + $0x21a0] sm:$0xff] }
 0x214   :  { %v1009_v26 = vld [vmem:[%s20877_s1 + $0x1e50] sm:$0xff]  ;;  %v9507_v29 = vpack.c.bf16 %v1025_v21, %v1012_v20  ;;  %v1128_v20 = vld [vmem:[%s20877_s1 + $0x2208] sm:$0xff] }
 0x215   :  { %2658 = vmatmul.mubr.f32.vlgmr.msra.gmra.mrb[4].mxu0 %v14778_v43  ;;  %2942 = vmatmul.mubr.f32.vlgmr.msra.gmra.mrb[4].mxu1 %v14778_v43  ;;  %v9313_v35 = vpack.c.bf16 %v1022_v27, %v1009_v26  ;;  %v1140_v21 = vld [vmem:[%s20877_s1 + $0x2268] sm:$0xff]  ;;  %v9525_v27 = vpack.c.bf16 %v1128_v20, %v1115_v18 }
 0x216   :  { %9294 = vmatpush1.bf16.msra.mxu0 %v9293_v32  ;;  %9490 = vmatpush1.bf16.msra.mxu1 %v9489_v33  ;;  %v1049_v32 = vld [vmem:[%s20877_s1 + $0x1f90] sm:$0xff]  ;;  %v1038_v33 = vld [vmem:[%s20877_s1 + $0x1f38] sm:$0xff]  ;;  %v1256_v20 = vld [vmem:[%s20877_s1 + $0x2608] sm:$0xff] }
 0x217   :  { %9296 = vmatprep.subr.bf16.mxu0 %v9295_v34  ;;  %9492 = vmatprep.subr.bf16.mxu1 %v9491_v38  ;;  %v1051_v34 = vld [vmem:[%s20877_s1 + $0x1fa0] sm:$0xff]  ;;  %v9315_v37 = vpack.c.bf16 %v1049_v32, %v1036_v31  ;;  %v1141_v31 = vld [vmem:[%s20877_s1 + $0x2270] sm:$0xff] }
 0x218   :  { %2728 = vmatprep.mubr.f32.mxu0 %v14809_v59  ;;  %3012 = vmatprep.mubr.f32.mxu1 %v14809_v59  ;;  %v1035_v38 = vld [vmem:[%s20877_s1 + $0x1f20] sm:$0xff]  ;;  %v9511_v41 = vpack.c.bf16 %v1051_v34, %v1038_v33  ;;  %v1154_v33 = vld [vmem:[%s20877_s1 + $0x22d8] sm:$0xff] }
 0x219   :  { %v9317_v52 = vpack.c.bf16 %v1048_v39, %v1035_v38  ;;  %v1166_v34 = vld [vmem:[%s20877_s1 + $0x2338] sm:$0xff]  ;;  %v9529_v39 = vpack.c.bf16 %v1154_v33, %v1141_v31 }
 0x21a   :  { %9298 = vmatpush1.bf16.msra.mxu0 %v9297_v46  ;;  %9494 = vmatpush1.bf16.msra.mxu1 %v9493_v49  ;;  %v1075_v46 = vld [vmem:[%s20877_s1 + $0x2060] sm:$0xff]  ;;  %v1064_v49 = vld [vmem:[%s20877_s1 + $0x2008] sm:$0xff]  ;;  %v1282_v33 = vld [vmem:[%s20877_s1 + $0x26d8] sm:$0xff] }
 0x21b   :  { %9300 = vmatprep.subr.bf16.mxu0 %v9299_v50  ;;  %9496 = vmatprep.subr.bf16.mxu1 %v9495_v55  ;;  %v1077_v50 = vld [vmem:[%s20877_s1 + $0x2070] sm:$0xff]  ;;  %v9319_v54 = vpack.c.bf16 %v1075_v46, %v1062_v45  ;;  %v1167_v45 = vld [vmem:[%s20877_s1 + $0x2340] sm:$0xff] }
 0x21c   :  { %v1061_v55 = vld [vmem:[%s20877_s1 + $0x1ff0] sm:$0xff]  ;;  %v9515_v58 = vpack.c.bf16 %v1077_v50, %v1064_v49  ;;  %v1180_v49 = vld [vmem:[%s20877_s1 + $0x23a8] sm:$0xff] }
 0x21d   :  { %v9321_v1 = vpack.c.bf16 %v1074_v56, %v1061_v55  ;;  %v1192_v50 = vld [vmem:[%s20877_s1 + $0x2408] sm:$0xff]  ;;  %v9533_v56 = vpack.c.bf16 %v1180_v49, %v1167_v45 }
 0x21e   :  { %9302 = vmatpush1.bf16.msra.mxu0 %v9301_v62  ;;  %9498 = vmatpush1.bf16.msra.mxu1 %v9497_v63  ;;  %v1101_v62 = vld [vmem:[%s20877_s1 + $0x2130] sm:$0xff]  ;;  %v1090_v63 = vld [vmem:[%s20877_s1 + $0x20d8] sm:$0xff]  ;;  %v1308_v49 = vld [vmem:[%s20877_s1 + $0x27a8] sm:$0xff] }
 0x21f   :  { %9304 = vmatprep.subr.bf16.mxu0 %v9303_v0  ;;  %9500 = vmatprep.subr.bf16.mxu1 %v9499_v4  ;;  %v1103_v0 = vld [vmem:[%s20877_s1 + $0x2140] sm:$0xff]  ;;  %v9323_v3 = vpack.c.bf16 %v1101_v62, %v1088_v61  ;;  %v1193_v61 = vld [vmem:[%s20877_s1 + $0x2410] sm:$0xff] }
 0x220   :  { %v1087_v4 = vld [vmem:[%s20877_s1 + $0x20c0] sm:$0xff]  ;;  %v9519_v7 = vpack.c.bf16 %v1103_v0, %v1090_v63  ;;  %v1206_v63 = vld [vmem:[%s20877_s1 + $0x2478] sm:$0xff] }
 0x221   :  { %v9325_v13 = vpack.c.bf16 %v1100_v5, %v1087_v4  ;;  %v1218_v0 = vld [vmem:[%s20877_s1 + $0x24d8] sm:$0xff]  ;;  %v9537_v5 = vpack.c.bf16 %v1206_v63, %v1193_v61 }
 0x222   :  { %9306 = vmatpush1.bf16.msra.mxu0 %v9305_v10  ;;  %9502 = vmatpush1.bf16.msra.mxu1 %v9501_v11  ;;  %v1127_v10 = vld [vmem:[%s20877_s1 + $0x2200] sm:$0xff]  ;;  %v1116_v11 = vld [vmem:[%s20877_s1 + $0x21a8] sm:$0xff] }
 0x223   :  { %9308 = vmatprep.subr.bf16.mxu0 %v9307_v12  ;;  %9504 = vmatprep.subr.bf16.mxu1 %v9503_v16  ;;  %v1129_v12 = vld [vmem:[%s20877_s1 + $0x2210] sm:$0xff]  ;;  %v9327_v15 = vpack.c.bf16 %v1127_v10, %v1114_v9  ;;  %v1219_v9 = vld [vmem:[%s20877_s1 + $0x24e0] sm:$0xff] }
 0x224   :  { %v1113_v16 = vld [vmem:[%s20877_s1 + $0x2190] sm:$0xff]  ;;  %v9523_v19 = vpack.c.bf16 %v1129_v12, %v1116_v11  ;;  %v1232_v11 = vld [vmem:[%s20877_s1 + $0x2548] sm:$0xff] }
 0x225   :  { %v9329_v26 = vpack.c.bf16 %v1126_v17, %v1113_v16  ;;  %v1244_v12 = vld [vmem:[%s20877_s1 + $0x25a8] sm:$0xff]  ;;  %v9541_v17 = vpack.c.bf16 %v1232_v11, %v1219_v9  ;;  %v77_v11 = vld [vmem:[%s20877_s1 + $0x130] sm:$0xff] }
 0x226   :  { %9310 = vmatpush1.bf16.msra.mxu0 %v9309_v22  ;;  %9506 = vmatpush1.bf16.msra.mxu1 %v9505_v23  ;;  %v1153_v22 = vld [vmem:[%s20877_s1 + $0x22d0] sm:$0xff]  ;;  %v1142_v23 = vld [vmem:[%s20877_s1 + $0x2278] sm:$0xff] }
 0x227   :  { %9312 = vmatprep.subr.bf16.mxu0 %v9311_v25  ;;  %9508 = vmatprep.subr.bf16.mxu1 %v9507_v29  ;;  %v1155_v25 = vld [vmem:[%s20877_s1 + $0x22e0] sm:$0xff]  ;;  %v9331_v28 = vpack.c.bf16 %v1153_v22, %v1140_v21  ;;  %v1245_v21 = vld [vmem:[%s20877_s1 + $0x25b0] sm:$0xff] }
 0x228   :  { %v1139_v29 = vld [vmem:[%s20877_s1 + $0x2260] sm:$0xff]  ;;  %v9527_v32 = vpack.c.bf16 %v1155_v25, %v1142_v23  ;;  %v1258_v23 = vld [vmem:[%s20877_s1 + $0x2618] sm:$0xff] }
 0x229   :  { %v9333_v38 = vpack.c.bf16 %v1152_v30, %v1139_v29  ;;  %v1270_v25 = vld [vmem:[%s20877_s1 + $0x2678] sm:$0xff]  ;;  %v9545_v30 = vpack.c.bf16 %v1258_v23, %v1245_v21 }
 0x22a   :  { %9314 = vmatpush1.bf16.msra.mxu0 %v9313_v35  ;;  %9510 = vmatpush1.bf16.msra.mxu1 %v9509_v36  ;;  %v1179_v35 = vld [vmem:[%s20877_s1 + $0x23a0] sm:$0xff]  ;;  %v1168_v36 = vld [vmem:[%s20877_s1 + $0x2348] sm:$0xff] }
 0x22b   :  { %9316 = vmatprep.subr.bf16.mxu0 %v9315_v37  ;;  %9512 = vmatprep.subr.bf16.mxu1 %v9511_v41  ;;  %v1181_v37 = vld [vmem:[%s20877_s1 + $0x23b0] sm:$0xff]  ;;  %v9335_v40 = vpack.c.bf16 %v1179_v35, %v1166_v34  ;;  %v1271_v34 = vld [vmem:[%s20877_s1 + $0x2680] sm:$0xff] }
 0x22c   :  { %v1165_v41 = vld [vmem:[%s20877_s1 + $0x2330] sm:$0xff]  ;;  %v9531_v46 = vpack.c.bf16 %v1181_v37, %v1168_v36  ;;  %v1284_v36 = vld [vmem:[%s20877_s1 + $0x26e8] sm:$0xff] }
 0x22d   :  { %v9337_v55 = vpack.c.bf16 %v1178_v44, %v1165_v41  ;;  %v1296_v37 = vld [vmem:[%s20877_s1 + $0x2748] sm:$0xff]  ;;  %v9549_v44 = vpack.c.bf16 %v1284_v36, %v1271_v34  ;;  %v766_v34 = vld [vmem:[%s20877_s1 + $0x16b8] sm:$0xff] }
 0x22e   :  { %9318 = vmatpush1.bf16.msra.mxu0 %v9317_v52  ;;  %9514 = vmatpush1.bf16.msra.mxu1 %v9513_v53  ;;  %v1205_v52 = vld [vmem:[%s20877_s1 + $0x2470] sm:$0xff]  ;;  %v1194_v53 = vld [vmem:[%s20877_s1 + $0x2418] sm:$0xff] }
 0x22f   :  { %9320 = vmatprep.subr.bf16.mxu0 %v9319_v54  ;;  %9516 = vmatprep.subr.bf16.mxu1 %v9515_v58  ;;  %v1207_v54 = vld [vmem:[%s20877_s1 + $0x2480] sm:$0xff]  ;;  %v9339_v57 = vpack.c.bf16 %v1205_v52, %v1192_v50  ;;  %v1297_v52 = vld [vmem:[%s20877_s1 + $0x2750] sm:$0xff] }
 0x230   :  { %v1191_v58 = vld [vmem:[%s20877_s1 + $0x2400] sm:$0xff]  ;;  %v9535_v62 = vpack.c.bf16 %v1207_v54, %v1194_v53  ;;  %v1310_v53 = vld [vmem:[%s20877_s1 + $0x27b8] sm:$0xff] }
 0x231   :  { %v9341_v4 = vpack.c.bf16 %v1204_v60, %v1191_v58  ;;  %v259_v54 = vld [vmem:[%s20877_s1 + $0x6e0] sm:$0xff]  ;;  %v688_v58 = vld [vmem:[%s20877_s1 + $0x1448] sm:$0xff]  ;;  %v9553_v60 = vpack.c.bf16 %v1310_v53, %v1297_v52 }
 0x232   :  { %9322 = vmatpush1.bf16.msra.mxu0 %v9321_v1  ;;  %9518 = vmatpush1.bf16.msra.mxu1 %v9517_v2  ;;  %v1231_v1 = vld [vmem:[%s20877_s1 + $0x2540] sm:$0xff]  ;;  %v1220_v2 = vld [vmem:[%s20877_s1 + $0x24e8] sm:$0xff] }
 0x233   :  { %9324 = vmatprep.subr.bf16.mxu0 %v9323_v3  ;;  %9520 = vmatprep.subr.bf16.mxu1 %v9519_v7  ;;  %v1233_v3 = vld [vmem:[%s20877_s1 + $0x2550] sm:$0xff]  ;;  %v9343_v6 = vpack.c.bf16 %v1231_v1, %v1218_v0  ;;  %v51_v0 = vld [vmem:[%s20877_s1 + $0x60] sm:$0xff]  ;;  %v64_v1 = vld [vmem:[%s20877_s1 + $0xc8] sm:$0xff] }
 0x234   :  { %v1217_v7 = vld [vmem:[%s20877_s1 + $0x24d0] sm:$0xff]  ;;  %v9539_v10 = vpack.c.bf16 %v1233_v3, %v1220_v2  ;;  %v467_v2 = vld [vmem:[%s20877_s1 + $0xd60] sm:$0xff]  ;;  %v480_v3 = vld [vmem:[%s20877_s1 + $0xdc8] sm:$0xff] }
 0x235   :  { %v9345_v16 = vpack.c.bf16 %v1230_v8, %v1217_v7  ;;  %v714_v7 = vld [vmem:[%s20877_s1 + $0x1518] sm:$0xff]  ;;  %v9557_v8 = vpack.c.bf16 %v64_v1, %v51_v0  ;;  %v9589_v9 = vpack.c.bf16 %v480_v3, %v467_v2  ;;  %v792_v52 = vld [vmem:[%s20877_s1 + $0x1788] sm:$0xff]  ;;  %v389_v0 = vld [vmem:[%s20877_s1 + $0xaf0] sm:$0xff] }
 0x236   :  { %9326 = vmatpush1.bf16.msra.mxu0 %v9325_v13  ;;  %9522 = vmatpush1.bf16.msra.mxu1 %v9521_v14  ;;  %v1257_v13 = vld [vmem:[%s20877_s1 + $0x2610] sm:$0xff]  ;;  %v1246_v14 = vld [vmem:[%s20877_s1 + $0x25b8] sm:$0xff] }
 0x237   :  { %9328 = vmatprep.subr.bf16.mxu0 %v9327_v15  ;;  %9524 = vmatprep.subr.bf16.mxu1 %v9523_v19  ;;  %v1259_v15 = vld [vmem:[%s20877_s1 + $0x2620] sm:$0xff]  ;;  %v9347_v18 = vpack.c.bf16 %v1257_v13, %v1244_v12  ;;  %v90_v12 = vld [vmem:[%s20877_s1 + $0x198] sm:$0xff]  ;;  %v493_v13 = vld [vmem:[%s20877_s1 + $0xe30] sm:$0xff] }
 0x238   :  { %v1243_v19 = vld [vmem:[%s20877_s1 + $0x25a0] sm:$0xff]  ;;  %v9543_v22 = vpack.c.bf16 %v1259_v15, %v1246_v14  ;;  %v506_v15 = vld [vmem:[%s20877_s1 + $0xe98] sm:$0xff]  ;;  %v9561_v21 = vpack.c.bf16 %v90_v12, %v77_v11  ;;  %v597_v12 = vld [vmem:[%s20877_s1 + $0x1170] sm:$0xff] }
 0x239   :  { %v9349_v29 = vpack.c.bf16 %v1256_v20, %v1243_v19  ;;  %v727_v19 = vld [vmem:[%s20877_s1 + $0x1580] sm:$0xff]  ;;  %v740_v20 = vld [vmem:[%s20877_s1 + $0x15e8] sm:$0xff]  ;;  %v402_v1 = vld [vmem:[%s20877_s1 + $0xb58] sm:$0xff] }
 0x23a   :  { %9330 = vmatpush1.bf16.msra.mxu0 %v9329_v26  ;;  %9526 = vmatpush1.bf16.msra.mxu1 %v9525_v27  ;;  %v1283_v26 = vld [vmem:[%s20877_s1 + $0x26e0] sm:$0xff]  ;;  %v1272_v27 = vld [vmem:[%s20877_s1 + $0x2688] sm:$0xff]  ;;  %v194_v11 = vld [vmem:[%s20877_s1 + $0x4d8] sm:$0xff] }
 0x23b   :  { %9332 = vmatprep.subr.bf16.mxu0 %v9331_v28  ;;  %9528 = vmatprep.subr.bf16.mxu1 %v9527_v32  ;;  %v1285_v28 = vld [vmem:[%s20877_s1 + $0x26f0] sm:$0xff]  ;;  %v9351_v31 = vpack.c.bf16 %v1283_v26, %v1270_v25  ;;  %v103_v25 = vld [vmem:[%s20877_s1 + $0x200] sm:$0xff]  ;;  %v116_v26 = vld [vmem:[%s20877_s1 + $0x268] sm:$0xff] }
 0x23c   :  { %v1269_v32 = vld [vmem:[%s20877_s1 + $0x2670] sm:$0xff]  ;;  %v9547_v35 = vpack.c.bf16 %v1285_v28, %v1272_v27  ;;  %v519_v27 = vld [vmem:[%s20877_s1 + $0xf00] sm:$0xff]  ;;  %v9595_v28 = vpack.c.bf16 %v740_v20, %v727_v19  ;;  %v9565_v36 = vpack.c.bf16 %v116_v26, %v103_v25  ;;  %v844_v20 = vld [vmem:[%s20877_s1 + $0x1928] sm:$0xff] }
 0x23d   :  { %v9353_v41 = vpack.c.bf16 %v1282_v33, %v1269_v32  ;;  %v11476_v32 = vld [vmem:[%s20878_s0 + $0x18] sm:$0xff]  ;;  %v753_v33 = vld [vmem:[%s20877_s1 + $0x1650] sm:$0xff]  ;;  %v831_v19 = vld [vmem:[%s20877_s1 + $0x18c0] sm:$0xff] }
 0x23e   :  { %9334 = vmatpush1.bf16.msra.mxu0 %v9333_v38  ;;  %9530 = vmatpush1.bf16.msra.mxu1 %v9529_v39  ;;  %v1309_v38 = vld [vmem:[%s20877_s1 + $0x27b0] sm:$0xff]  ;;  %v1298_v39 = vld [vmem:[%s20877_s1 + $0x2758] sm:$0xff]  ;;  %v207_v25 = vld [vmem:[%s20877_s1 + $0x540] sm:$0xff] }
 0x23f   :  { %9336 = vmatprep.subr.bf16.mxu0 %v9335_v40  ;;  %9532 = vmatprep.subr.bf16.mxu1 %v9531_v46  ;;  %v1311_v40 = vld [vmem:[%s20877_s1 + $0x27c0] sm:$0xff]  ;;  %v9355_v45 = vpack.c.bf16 %v1309_v38, %v1296_v37  ;;  %v220_v26 = vld [vmem:[%s20877_s1 + $0x5a8] sm:$0xff] }
 0x240   :  { %v1295_v46 = vld [vmem:[%s20877_s1 + $0x2740] sm:$0xff]  ;;  %v9551_v50 = vpack.c.bf16 %v1311_v40, %v1298_v39  ;;  %v129_v39 = vld [vmem:[%s20877_s1 + $0x2d0] sm:$0xff]  ;;  %v142_v40 = vld [vmem:[%s20877_s1 + $0x338] sm:$0xff] }
 0x241   :  { %v9569_v53 = vpack.c.bf16 %v142_v40, %v129_v39  ;;  %v246_v39 = vld [vmem:[%s20877_s1 + $0x678] sm:$0xff]  ;;  %v649_v40 = vld [vmem:[%s20877_s1 + $0x1310] sm:$0xff] }
 0x242   :  { %9338 = vmatpush1.bf16.msra.mxu0 %v9337_v55  ;;  %9534 = vmatpush1.bf16.msra.mxu1 %v9533_v56  ;;  %v272_v55 = vld [vmem:[%s20877_s1 + $0x748] sm:$0xff]  ;;  %v9357_v56 = vpack.c.bf16 %v1308_v49, %v1295_v46  ;;  %v363_v46 = vld [vmem:[%s20877_s1 + $0xa20] sm:$0xff] }
 0x243   :  { %9340 = vmatprep.subr.bf16.mxu0 %v9339_v57  ;;  %9536 = vmatprep.subr.bf16.mxu1 %v9535_v62  ;;  %v675_v57 = vld [vmem:[%s20877_s1 + $0x13e0] sm:$0xff]  ;;  %v9555_v61 = vpack.c.bf16 %v272_v55, %v259_v54  ;;  %v376_v49 = vld [vmem:[%s20877_s1 + $0xa88] sm:$0xff] }
 0x244   :  { %v15158_v62 = vld [vmem:[%s20878_s0 + $0x20] sm:$0xff]  ;;  %v9587_v63 = vpack.c.bf16 %v688_v58, %v675_v57  ;;  %v9571_v55 = vpack.c.bf16 %v376_v49, %v363_v46  ;;  %v168_v57 = vld [vmem:[%s20877_s1 + $0x408] sm:$0xff] }
 0x245   :  { %v571_v58 = vld [vmem:[%s20877_s1 + $0x10a0] sm:$0xff]  ;;  %v1104_v46 = vld [vmem:[%s20877_s1 + $0x2148] sm:$0xff] }
 0x246   :  { %9342 = vmatpush1.bf16.msra.mxu0 %v9341_v4  ;;  %9538 = vmatpush1.bf16.msra.mxu1 %v9537_v5  ;;  %v285_v4 = vld [vmem:[%s20877_s1 + $0x7b0] sm:$0xff]  ;;  %v298_v5 = vld [vmem:[%s20877_s1 + $0x818] sm:$0xff] }
 0x247   :  { %9344 = vmatprep.subr.bf16.mxu0 %v9343_v6  ;;  %9540 = vmatprep.subr.bf16.mxu1 %v9539_v10  ;;  %v701_v6 = vld [vmem:[%s20877_s1 + $0x14b0] sm:$0xff]  ;;  %v9559_v10 = vpack.c.bf16 %v298_v5, %v285_v4  ;;  %v818_v5 = vld [vmem:[%s20877_s1 + $0x1858] sm:$0xff] }
 0x248   :  { %v9591_v14 = vpack.c.bf16 %v714_v7, %v701_v6  ;;  %v805_v4 = vld [vmem:[%s20877_s1 + $0x17f0] sm:$0xff] }
 0x24a   :  { %9346 = vmatpush1.bf16.msra.mxu0 %v9345_v16  ;;  %9542 = vmatpush1.bf16.msra.mxu1 %v9541_v17  ;;  %v311_v16 = vld [vmem:[%s20877_s1 + $0x880] sm:$0xff]  ;;  %v324_v17 = vld [vmem:[%s20877_s1 + $0x8e8] sm:$0xff] }
 0x24b   :  { %9348 = vmatprep.subr.bf16.mxu0 %v9347_v18  ;;  %9544 = vmatprep.subr.bf16.mxu1 %v9543_v22  ;;  %v15209_v18 = vld [vmem:[%s20878_s0 + $0x30] sm:$0xff]  ;;  %v9593_v22 = vpack.c.bf16 %v506_v15, %v493_v13  ;;  %v9563_v23 = vpack.c.bf16 %v324_v17, %v311_v16  ;;  %v9607_v13 = vpack.c.bf16 %v818_v5, %v805_v4  ;;  %v415_v15 = vld [vmem:[%s20877_s1 + $0xbc0] sm:$0xff]  ;;  %v428_v16 = vld [vmem:[%s20877_s1 + $0xc28] sm:$0xff]  ;;  %v1317_v17 = vlaneseq }
 0x24c   :  { %v3391_v4 = vld [vmem:[%s20880_s3 + $0x40] sm:$0xff] }
 0x24e   :  { %9350 = vmatpush1.bf16.msra.mxu0 %v9349_v29  ;;  %9546 = vmatpush1.bf16.msra.mxu1 %v9545_v30  ;;  %v532_v29 = vld [vmem:[%s20877_s1 + $0xf68] sm:$0xff]  ;;  %v337_v30 = vld [vmem:[%s20877_s1 + $0x950] sm:$0xff] }
 0x24f   :  { %9352 = vmatprep.subr.bf16.mxu0 %v9351_v31  ;;  %9548 = vmatprep.subr.bf16.mxu1 %v9547_v35  ;;  %v350_v31 = vld [vmem:[%s20877_s1 + $0x9b8] sm:$0xff]  ;;  %v11477_v35 = vld [vmem:[%s20878_s0 + $0x8] sm:$0xff]  ;;  %v9597_v37 = vpack.c.bf16 %v532_v29, %v519_v27  ;;  %v623_v27 = vld [vmem:[%s20877_s1 + $0x1240] sm:$0xff] }
 0x250   :  { %v9567_v38 = vpack.c.bf16 %v350_v31, %v337_v30  ;;  %v636_v29 = vld [vmem:[%s20877_s1 + $0x12a8] sm:$0xff]  ;;  %v441_v30 = vld [vmem:[%s20877_s1 + $0xc90] sm:$0xff]  ;;  %v454_v31 = vld [vmem:[%s20877_s1 + $0xcf8] sm:$0xff] }
 0x252   :  { %9354 = vmatpush1.bf16.msra.mxu0 %v9353_v41  ;;  %9550 = vmatpush1.bf16.msra.mxu1 %v9549_v44  ;;  %v545_v41 = vld [vmem:[%s20877_s1 + $0xfd0] sm:$0xff]  ;;  %v9599_v44 = vpack.c.bf16 %v766_v34, %v753_v33  ;;  %v870_v34 = vld [vmem:[%s20877_s1 + $0x19f8] sm:$0xff] }
 0x253   :  { %9356 = vmatprep.subr.bf16.mxu0 %v9355_v45  ;;  %9552 = vmatprep.subr.bf16.mxu1 %v9551_v50  ;;  %v558_v45 = vld [vmem:[%s20877_s1 + $0x1038] sm:$0xff]  ;;  %v779_v50 = vld [vmem:[%s20877_s1 + $0x1720] sm:$0xff]  ;;  %v857_v33 = vld [vmem:[%s20877_s1 + $0x1990] sm:$0xff] }
 0x254   :  { %v9601_v54 = vpack.c.bf16 %v558_v45, %v545_v41  ;;  %v9615_v41 = vpack.c.bf16 %v870_v34, %v857_v33  ;;  %v1091_v45 = vld [vmem:[%s20877_s1 + $0x20e0] sm:$0xff]  ;;  %v3412_v33 = vld [vmem:[%s20880_s3 + $0xe8] sm:$0xff] }
 0x255   :  { %2729 = vmatmul.mubr.f32.vlgmr.msra.gmra.mrb[4].mxu0 %v15158_v62  ;;  %3013 = vmatmul.mubr.f32.vlgmr.msra.gmra.mrb[4].mxu1 %v15158_v62  ;;  %v3419_v34 = vld [vmem:[%s20880_s3 + $0x120] sm:$0xff] }
 0x256   :  { %9358 = vmatpush1.bf16.msra.mxu0 %v9357_v56  ;;  %9554 = vmatpush1.bf16.msra.mxu1 %v9553_v60  ;;  %v155_v56 = vld [vmem:[%s20877_s1 + $0x3a0] sm:$0xff] }
 0x257   :  { %2799 = vmatprep.mubr.f32.mxu0 %v11481_v24  ;;  %3083 = vmatprep.mubr.f32.mxu1 %v11481_v24  ;;  %v9573_v7 = vpack.c.bf16 %v168_v57, %v155_v56  ;;  %v896_v56 = vld [vmem:[%s20877_s1 + $0x1ac8] sm:$0xff]  ;;  %v1299_v57 = vld [vmem:[%s20877_s1 + $0x2760] sm:$0xff] }
 0x258   :  { %9556 = vmatprep.subr.bf16.mxu0 %v9555_v61  ;;  %9588 = vmatprep.subr.bf16.mxu1 %v9587_v63  ;;  %v9603_v61 = vpack.c.bf16 %v792_v52, %v779_v50  ;;  %v584_v63 = vld [vmem:[%s20877_s1 + $0x1108] sm:$0xff]  ;;  %v15381_v50 = vld [vmem:[%s20879_s2] sm:$0xff] }
 0x25d   :  { %7861 = vmatmul.mubr.msk.f32.vlgmr.msra.gmra.mrb[4].mxu0 %vm1382_vm0, %v15209_v18  ;;  %7862 = vmatmul.mubr.msk.f32.vlgmr.msra.gmra.mrb[4].mxu1 %vm1382_vm0, %v15209_v18 }
 0x25e   :  { %9558 = vmatpush3.bf16.msra.mxu0 %v9557_v8  ;;  %9590 = vmatpush3.bf16.msra.mxu1 %v9589_v9  ;;  %v9605_v8 = vpack.c.bf16 %v584_v63, %v571_v58  ;;  %v9575_v9 = vpack.c.bf16 %v402_v1, %v389_v0  ;;  %v1312_v58 = vld [vmem:[%s20877_s1 + $0x27c8] sm:$0xff]  ;;  %v1130_v0 = vld [vmem:[%s20877_s1 + $0x2218] sm:$0xff] }
 0x25f   :  { %9560 = vmatprep.subr.bf16.mxu0 %v9559_v10  ;;  %9592 = vmatprep.subr.bf16.mxu1 %v9591_v14  ;;  %v181_v10 = vld [vmem:[%s20877_s1 + $0x470] sm:$0xff]  ;;  %v610_v14 = vld [vmem:[%s20877_s1 + $0x11d8] sm:$0xff]  ;;  %v3384_v1 = vld [vmem:[%s20880_s3 + $0x8] sm:$0xff] }
 0x260   :  { %3224 = vmatprep.mubr.f32.mxu1 %v11476_v32  ;;  %3154 = vmatprep.mubr.f32.mxu0 %v11477_v35  ;;  %v15349_v32 = vshrl.u32 %v1317_v17, 7  ;;  %v9581_v35 = vpack.c.bf16 %v220_v26, %v207_v25  ;;  %v11478_v17 = vld [vmem:[%s20878_s0] sm:$0xff]  ;;  %v948_v25 = vld [vmem:[%s20877_s1 + $0x1c68] sm:$0xff] }
 0x262   :  { %9562 = vmatpush3.bf16.msra.mxu0 %v9561_v21  ;;  %9594 = vmatpush3.bf16.msra.mxu1 %v9593_v22  ;;  %v9577_v21 = vpack.c.bf16 %v194_v11, %v181_v10  ;;  %v9609_v22 = vpack.c.bf16 %v610_v14, %v597_v12  ;;  %v15376_v49 = vsub.s32 1, %v15349_v32  ;;  %v11482_v10 = vmov 0.0|0.0   ;;  %v3390_v14 = vld [vmem:[%s20880_s3 + $0x38] sm:$0xff] }
 0x263   :  { %9564 = vmatprep.subr.bf16.mxu0 %v9563_v23  ;;  %9596 = vmatprep.subr.bf16.mxu1 %v9595_v28  ;;  %v9579_v23 = vpack.c.bf16 %v428_v16, %v415_v15  ;;  %v9611_v28 = vpack.c.bf16 %v844_v20, %v831_v19  ;;  %v9654_v12 = vpack.c.bf16 %v3391_v4, %v3384_v1  ;;  %v1143_v15 = vld [vmem:[%s20877_s1 + $0x2280] sm:$0xff]  ;;  %v1156_v19 = vld [vmem:[%s20877_s1 + $0x22e8] sm:$0xff]  ;;  %v3398_v20 = vld [vmem:[%s20880_s3 + $0x78] sm:$0xff] }
 0x264   :  { %v1324_v63 = vrot.slane %v15381_v50, %v15376_v49  ;;  %v9627_v26 = vpack.c.bf16 %v1156_v19, %v1143_v15  ;;  %v3440_v1 = vld [vmem:[%s20880_s3 + $0x1c8] sm:$0xff]  ;;  %v3447_v4 = vld [vmem:[%s20880_s3 + $0x200] sm:$0xff]  ;;  %v3461_v19 = vld [vmem:[%s20880_s3 + $0x270] sm:$0xff] }
 0x265   :  { %v1247_v15 = vld [vmem:[%s20877_s1 + $0x25c0] sm:$0xff] }
 0x266   :  { %9566 = vmatpush3.bf16.msra.mxu0 %v9565_v36  ;;  %9598 = vmatpush3.bf16.msra.mxu1 %v9597_v37  ;;  %v9613_v36 = vpack.c.bf16 %v636_v29, %v623_v27  ;;  %v9583_v37 = vpack.c.bf16 %v454_v31, %v441_v30  ;;  %v11362_v16 = vadd.f32 %v14069_v48, %v1324_v63  ;;  %v1169_v29 = vld [vmem:[%s20877_s1 + $0x2350] sm:$0xff]  ;;  %v1182_v30 = vld [vmem:[%s20877_s1 + $0x23b8] sm:$0xff] }
 0x267   :  { %9568 = vmatprep.subr.bf16.mxu0 %v9567_v38  ;;  %9600 = vmatprep.subr.bf16.mxu1 %v9599_v44  ;;  %v233_v38 = vld [vmem:[%s20877_s1 + $0x610] sm:$0xff]  ;;  %v662_v44 = vld [vmem:[%s20877_s1 + $0x1378] sm:$0xff] }
 0x268   :  { %v15284_v60 = vpop.f32.mrb[2].mxu0  ;;  %v15295_v2 = vpop.f32.mrb[2].mxu1  ;;  %v9585_v52 = vpack.c.bf16 %v246_v39, %v233_v38  ;;  %v15459_v31 = vmax.f32 %v11362_v16, 0.0  ;;  %v961_v38 = vld [vmem:[%s20877_s1 + $0x1cd0] sm:$0xff]  ;;  %v974_v39 = vld [vmem:[%s20877_s1 + $0x1d38] sm:$0xff]  ;;  %v1260_v16 = vld [vmem:[%s20877_s1 + $0x2628] sm:$0xff] }
 0x269   :  { %v15297_v3 = vpop.f32.mrb[3].mxu0  ;;  %v15305_v6 = vpop.f32.mrb[3].mxu1  ;;  %v1221_v63 = vld [vmem:[%s20877_s1 + $0x24f0] sm:$0xff] }
 0x26a   :  { %9570 = vmatpush3.bf16.msra.mxu0 %v9569_v53  ;;  %9602 = vmatpush3.bf16.msra.mxu1 %v9601_v54  ;;  %v9617_v53 = vpack.c.bf16 %v662_v44, %v649_v40  ;;  %v9619_v54 = vpack.c.bf16 %v1104_v46, %v1091_v45  ;;  %v3418_v40 = vld [vmem:[%s20880_s3 + $0x118] sm:$0xff]  ;;  %v1208_v44 = vld [vmem:[%s20877_s1 + $0x2488] sm:$0xff]  ;;  %v3433_v46 = vld [vmem:[%s20880_s3 + $0x190] sm:$0xff] }
 0x26b   :  { %9572 = vmatprep.subr.bf16.mxu0 %v9571_v55  ;;  %9604 = vmatprep.subr.bf16.mxu1 %v9603_v61  ;;  %v883_v55 = vld [vmem:[%s20877_s1 + $0x1a60] sm:$0xff]  ;;  %v1117_v61 = vld [vmem:[%s20877_s1 + $0x21b0] sm:$0xff]  ;;  %v3426_v45 = vld [vmem:[%s20880_s3 + $0x158] sm:$0xff] }
 0x26c   :  { %v9621_v5 = vpack.c.bf16 %v896_v56, %v883_v55  ;;  %v9623_v11 = vpack.c.bf16 %v1130_v0, %v1117_v61  ;;  %v987_v55 = vld [vmem:[%s20877_s1 + $0x1da0] sm:$0xff]  ;;  %v1000_v56 = vld [vmem:[%s20877_s1 + $0x1e08] sm:$0xff]  ;;  %v1234_v0 = vld [vmem:[%s20877_s1 + $0x2558] sm:$0xff] }
 0x26d   :  { %v3432_v61 = vld [vmem:[%s20880_s3 + $0x188] sm:$0xff] }
 0x26e   :  { %9574 = vmatpush3.bf16.msra.mxu0 %v9573_v7  ;;  %9606 = vmatpush3.bf16.msra.mxu1 %v9605_v8  ;;  %v9652_v7 = vpack.c.bf16 %v1312_v58, %v1299_v57  ;;  %v909_v8 = vld [vmem:[%s20877_s1 + $0x1b30] sm:$0xff]  ;;  %v9666_v58 = vpack.c.bf16 %v3433_v46, %v3426_v45 }
 0x26f   :  { %9576 = vmatprep.subr.bf16.mxu0 %v9575_v9  ;;  %9608 = vmatprep.subr.bf16.mxu1 %v9607_v13  ;;  %v922_v9 = vld [vmem:[%s20877_s1 + $0x1b98] sm:$0xff]  ;;  %v3383_v13 = vld [vmem:[%s20880_s3] sm:$0xff]  ;;  %v3425_v57 = vld [vmem:[%s20880_s3 + $0x150] sm:$0xff] }
 0x270   :  { %v9625_v48 = vpack.c.bf16 %v922_v9, %v909_v8  ;;  %v9639_v8 = vpack.c.bf16 %v1234_v0, %v1221_v63  ;;  %v1013_v9 = vld [vmem:[%s20877_s1 + $0x1e70] sm:$0xff] }
 0x271   :  { %v3481_v46 = vld [vmem:[%s20880_s3 + $0x310] sm:$0xff] }
 0x272   :  { %9578 = vmatpush3.bf16.msra.mxu0 %v9577_v21  ;;  %9610 = vmatpush3.bf16.msra.mxu1 %v9609_v22  ;;  %v3405_v21 = vld [vmem:[%s20880_s3 + $0xb0] sm:$0xff]  ;;  %v9656_v22 = vpack.c.bf16 %v3390_v14, %v3383_v13  ;;  %v9670_v13 = vpack.c.bf16 %v3447_v4, %v3440_v1  ;;  %v3446_v14 = vld [vmem:[%s20880_s3 + $0x1f8] sm:$0xff] }
 0x273   :  { %9580 = vmatprep.subr.bf16.mxu0 %v9579_v23  ;;  %9612 = vmatprep.subr.bf16.mxu1 %v9611_v28  ;;  %v935_v23 = vld [vmem:[%s20877_s1 + $0x1c00] sm:$0xff]  ;;  %v9658_v27 = vpack.c.bf16 %v3405_v21, %v3398_v20  ;;  %v3404_v28 = vld [vmem:[%s20880_s3 + $0xa8] sm:$0xff]  ;;  %v3517_v63 = vld [vmem:[%s20880_s3 + $0x430] sm:$0xff] }
 0x274   :  { %v3509_v4 = vld [vmem:[%s20880_s3 + $0x3f0] sm:$0xff] }
 0x276   :  { %9582 = vmatpush3.bf16.msra.mxu0 %v9581_v35  ;;  %9614 = vmatpush3.bf16.msra.mxu1 %v9613_v36  ;;  %v9629_v35 = vpack.c.bf16 %v948_v25, %v935_v23  ;;  %v1052_v23 = vld [vmem:[%s20877_s1 + $0x1fa8] sm:$0xff]  ;;  %v3453_v25 = vld [vmem:[%s20880_s3 + $0x230] sm:$0xff] }
 0x277   :  { %9584 = vmatprep.subr.bf16.mxu0 %v9583_v37  ;;  %9616 = vmatprep.subr.bf16.mxu1 %v9615_v41  ;;  %v9631_v37 = vpack.c.bf16 %v1182_v30, %v1169_v29  ;;  %v1195_v41 = vld [vmem:[%s20877_s1 + $0x2420] sm:$0xff]  ;;  %v3468_v29 = vld [vmem:[%s20880_s3 + $0x2a8] sm:$0xff] }
 0x278   :  { %v3475_v30 = vld [vmem:[%s20880_s3 + $0x2e0] sm:$0xff] }
 0x27a   :  { %9586 = vmatpush3.bf16.msra.mxu0 %v9585_v52  ;;  %9618 = vmatpush3.bf16.msra.mxu1 %v9617_v53  ;;  %v9633_v52 = vpack.c.bf16 %v974_v39, %v961_v38  ;;  %v9678_v38 = vpack.c.bf16 %v3475_v30, %v3468_v29  ;;  %v3467_v39 = vld [vmem:[%s20880_s3 + $0x2a0] sm:$0xff]  ;;  %v3565_v29 = vld [vmem:[%s20880_s3 + $0x5b0] sm:$0xff]  ;;  %v3572_v30 = vld [vmem:[%s20880_s3 + $0x5e8] sm:$0xff] }
 0x27b   :  { %9620 = vmatprep.subr.bf16.mxu0 %v9619_v54  ;;  %9651 = vmatprep.subr.bf16.mxu1 %v11482_v10  ;;  %v9635_v54 = vpack.c.bf16 %v1208_v44, %v1195_v41 }
 0x27d   :  { %3155 = vmatmul.mubr.f32.vlgmr.msra.gmra.mrb[6].mxu0 %v11478_v17  ;;  %3225 = vmatmul.mubr.f32.vlgmr.msra.gmra.mrb[6].mxu1 %v14778_v43  ;;  %v3397_v43 = vld [vmem:[%s20880_s3 + $0x70] sm:$0xff]  ;;  %v3454_v17 = vld [vmem:[%s20880_s3 + $0x238] sm:$0xff] }
 0x27e   :  { %9622 = vmatpush3.bf16.msra.mxu0 %v9621_v5  ;;  %9653 = vmatpush3.bf16.msra.mxu1 %v9652_v7  ;;  %v9660_v36 = vpack.c.bf16 %v3404_v28, %v3397_v43  ;;  %v9637_v5 = vpack.c.bf16 %v1000_v56, %v987_v55  ;;  %v9668_v7 = vpack.c.bf16 %v3432_v61, %v3425_v57  ;;  %v1286_v28 = vld [vmem:[%s20877_s1 + $0x26f8] sm:$0xff]  ;;  %v3495_v57 = vld [vmem:[%s20880_s3 + $0x380] sm:$0xff] }
 0x27f   :  { %8347 = vmatprep.mubr.msk.f32.mxu1 %vm11483_vm1, %v11481_v24  ;;  %9624 = vmatprep.subr.bf16.mxu0 %v9623_v11  ;;  %v1026_v11 = vld [vmem:[%s20877_s1 + $0x1ed8] sm:$0xff]  ;;  %v9674_v43 = vpack.c.bf16 %v3461_v19, %v3454_v17  ;;  %v3537_v17 = vld [vmem:[%s20880_s3 + $0x4d0] sm:$0xff]  ;;  %v3544_v19 = vld [vmem:[%s20880_s3 + $0x508] sm:$0xff] }
 0x280   :  { %9655 = vmatprep.subr.bf16.mxu1 %v9654_v12  ;;  %3294 = vmatprep.mubr.f32.mxu0 %v14809_v59  ;;  %v3411_v59 = vld [vmem:[%s20880_s3 + $0xe0] sm:$0xff]  ;;  %v9641_v20 = vpack.c.bf16 %v1026_v11, %v1013_v9  ;;  %v3510_v61 = vld [vmem:[%s20880_s3 + $0x3f8] sm:$0xff] }
 0x281   :  { %8348 = vmatmul.mubr.msk.f32.vlgmr.msra.gmra.mrb[8].mxu1 %vm1382_vm0, %v15209_v18  ;;  %v9662_v18 = vpack.c.bf16 %v3419_v34, %v3412_v33  ;;  %v9664_v53 = vpack.c.bf16 %v3418_v40, %v3411_v59  ;;  %v3439_v12 = vld [vmem:[%s20880_s3 + $0x1c0] sm:$0xff]  ;;  %v3474_v59 = vld [vmem:[%s20880_s3 + $0x2d8] sm:$0xff]  ;;  %v3489_v40 = vld [vmem:[%s20880_s3 + $0x350] sm:$0xff]  ;;  %v9690_v1 = vpack.c.bf16 %v3517_v63, %v3510_v61 }
 0x282   :  { %9626 = vmatpush3.bf16.msra.mxu0 %v9625_v48  ;;  %9657 = vmatpush1.bf16.msra.mxu1 %v9656_v22  ;;  %v9672_v21 = vpack.c.bf16 %v3446_v14, %v3439_v12  ;;  %v9643_v48 = vpack.c.bf16 %v1260_v16, %v1247_v15  ;;  %v1039_v22 = vld [vmem:[%s20877_s1 + $0x1f40] sm:$0xff]  ;;  %v9680_v44 = vpack.c.bf16 %v3474_v59, %v3467_v39  ;;  %v3530_v12 = vld [vmem:[%s20880_s3 + $0x498] sm:$0xff]  ;;  %v3545_v14 = vld [vmem:[%s20880_s3 + $0x510] sm:$0xff]  ;;  %v15681_v59 = vsub.s32 3, %v15349_v32 }
 0x283   :  { %4860 = vmatprep.mubr.f32.mxu1 %v15459_v31  ;;  %9628 = vmatprep.subr.bf16.mxu0 %v9627_v26  ;;  %v3460_v26 = vld [vmem:[%s20880_s3 + $0x268] sm:$0xff]  ;;  %v9645_v33 = vpack.c.bf16 %v1052_v23, %v1039_v22  ;;  %v3523_v11 = vld [vmem:[%s20880_s3 + $0x460] sm:$0xff]  ;;  %v3586_v39 = vld [vmem:[%s20880_s3 + $0x658] sm:$0xff] }
 0x284   :  { %9659 = vmatprep.subr.bf16.mxu1 %v9658_v27  ;;  %v1273_v27 = vld [vmem:[%s20877_s1 + $0x2690] sm:$0xff]  ;;  %v9676_v34 = vpack.c.bf16 %v3460_v26, %v3453_v25  ;;  %v9696_v15 = vpack.c.bf16 %v3530_v12, %v3523_v11  ;;  %v3551_v23 = vld [vmem:[%s20880_s3 + $0x540] sm:$0xff]  ;;  %v3558_v25 = vld [vmem:[%s20880_s3 + $0x578] sm:$0xff] }
 0x285   :  { %v3573_v26 = vld [vmem:[%s20880_s3 + $0x5f0] sm:$0xff]  ;;  %v3607_v61 = vld [vmem:[%s20880_s3 + $0x700] sm:$0xff]  ;;  %v3614_v63 = vld [vmem:[%s20880_s3 + $0x738] sm:$0xff] }
 0x286   :  { %9630 = vmatpush3.bf16.msra.mxu0 %v9629_v35  ;;  %9661 = vmatpush1.bf16.msra.mxu1 %v9660_v36  ;;  %v9647_v35 = vpack.c.bf16 %v1286_v28, %v1273_v27  ;;  %v1065_v36 = vld [vmem:[%s20877_s1 + $0x2010] sm:$0xff]  ;;  %v9704_v27 = vpack.c.bf16 %v3558_v25, %v3551_v23  ;;  %v3643_v11 = vld [vmem:[%s20880_s3 + $0x820] sm:$0xff] }
 0x287   :  { %9632 = vmatprep.subr.bf16.mxu0 %v9631_v37  ;;  %9663 = vmatprep.subr.bf16.mxu1 %v9662_v18  ;;  %v1078_v37 = vld [vmem:[%s20877_s1 + $0x2078] sm:$0xff]  ;;  %v3671_v23 = vld [vmem:[%s20880_s3 + $0x900] sm:$0xff] }
 0x288   :  { %v3482_v18 = vld [vmem:[%s20880_s3 + $0x318] sm:$0xff]  ;;  %v9649_v41 = vpack.c.bf16 %v1078_v37, %v1065_v36  ;;  %v15672_v36 = vsub.s32 0, %v15349_v32 }
 0x289   :  { %v9682_v45 = vpack.c.bf16 %v3489_v40, %v3482_v18  ;;  %v3594_v18 = vld [vmem:[%s20880_s3 + $0x698] sm:$0xff]  ;;  %v3601_v40 = vld [vmem:[%s20880_s3 + $0x6d0] sm:$0xff] }
 0x28a   :  { %9634 = vmatpush3.bf16.msra.mxu0 %v9633_v52  ;;  %9665 = vmatpush1.bf16.msra.mxu1 %v9664_v53  ;;  %v3488_v52 = vld [vmem:[%s20880_s3 + $0x348] sm:$0xff] }
 0x28b   :  { %9636 = vmatprep.subr.bf16.mxu0 %v9635_v54  ;;  %9667 = vmatprep.subr.bf16.mxu1 %v9666_v58  ;;  %v3496_v53 = vld [vmem:[%s20880_s3 + $0x388] sm:$0xff]  ;;  %v3503_v54 = vld [vmem:[%s20880_s3 + $0x3c0] sm:$0xff]  ;;  %v9684_v55 = vpack.c.bf16 %v3488_v52, %v3481_v46  ;;  %v3502_v58 = vld [vmem:[%s20880_s3 + $0x3b8] sm:$0xff] }
 0x28c   :  { %v9686_v56 = vpack.c.bf16 %v3503_v54, %v3496_v53  ;;  %v9688_v0 = vpack.c.bf16 %v3502_v58, %v3495_v57  ;;  %v3593_v46 = vld [vmem:[%s20880_s3 + $0x690] sm:$0xff]  ;;  %v3600_v52 = vld [vmem:[%s20880_s3 + $0x6c8] sm:$0xff]  ;;  %v1332_v53 = vrot.slane %v15381_v50, %v15681_v59 }
 0x28d   :  { %v3608_v54 = vld [vmem:[%s20880_s3 + $0x708] sm:$0xff] }
 0x28e   :  { %9638 = vmatpush3.bf16.msra.mxu0 %v9637_v5  ;;  %9669 = vmatpush1.bf16.msra.mxu1 %v9668_v7  ;;  %v3524_v5 = vld [vmem:[%s20880_s3 + $0x468] sm:$0xff]  ;;  %v3531_v7 = vld [vmem:[%s20880_s3 + $0x4a0] sm:$0xff] }
 0x28f   :  { %9640 = vmatprep.subr.bf16.mxu0 %v9639_v8  ;;  %9671 = vmatprep.subr.bf16.mxu1 %v9670_v13  ;;  %v9694_v9 = vpack.c.bf16 %v3531_v7, %v3524_v5  ;;  %v3538_v13 = vld [vmem:[%s20880_s3 + $0x4d8] sm:$0xff]  ;;  %v3621_v7 = vld [vmem:[%s20880_s3 + $0x770] sm:$0xff] }
 0x290   :  { %v9698_v16 = vpack.c.bf16 %v3545_v14, %v3538_v13  ;;  %v3635_v14 = vld [vmem:[%s20880_s3 + $0x7e0] sm:$0xff] }
 0x292   :  { %9642 = vmatpush3.bf16.msra.mxu0 %v9641_v20  ;;  %9673 = vmatpush1.bf16.msra.mxu1 %v9672_v21  ;;  %v3552_v20 = vld [vmem:[%s20880_s3 + $0x548] sm:$0xff]  ;;  %v3559_v21 = vld [vmem:[%s20880_s3 + $0x580] sm:$0xff] }
 0x293   :  { %9644 = vmatprep.subr.bf16.mxu0 %v9643_v48  ;;  %9675 = vmatprep.subr.bf16.mxu1 %v9674_v43  ;;  %v9700_v48 = vpack.c.bf16 %v3544_v19, %v3537_v17  ;;  %v9702_v22 = vpack.c.bf16 %v3559_v21, %v3552_v20  ;;  %v3566_v43 = vld [vmem:[%s20880_s3 + $0x5b8] sm:$0xff]  ;;  %v3657_v17 = vld [vmem:[%s20880_s3 + $0x890] sm:$0xff] }
 0x294   :  { %v9706_v28 = vpack.c.bf16 %v3573_v26, %v3566_v43  ;;  %v3649_v21 = vld [vmem:[%s20880_s3 + $0x850] sm:$0xff]  ;;  %v3663_v26 = vld [vmem:[%s20880_s3 + $0x8c0] sm:$0xff] }
 0x296   :  { %9646 = vmatpush3.bf16.msra.mxu0 %v9645_v33  ;;  %9677 = vmatpush1.bf16.msra.mxu1 %v9676_v34  ;;  %v3580_v33 = vld [vmem:[%s20880_s3 + $0x628] sm:$0xff]  ;;  %v3587_v34 = vld [vmem:[%s20880_s3 + $0x660] sm:$0xff] }
 0x297   :  { %9648 = vmatprep.subr.bf16.mxu0 %v9647_v35  ;;  %9679 = vmatprep.subr.bf16.mxu1 %v9678_v38  ;;  %v9708_v35 = vpack.c.bf16 %v3572_v30, %v3565_v29  ;;  %v9710_v37 = vpack.c.bf16 %v3587_v34, %v3580_v33  ;;  %v3579_v38 = vld [vmem:[%s20880_s3 + $0x620] sm:$0xff]  ;;  %v3685_v29 = vld [vmem:[%s20880_s3 + $0x970] sm:$0xff] }
 0x298   :  { %v3677_v34 = vld [vmem:[%s20880_s3 + $0x930] sm:$0xff] }
 0x29a   :  { %9650 = vmatpush3.bf16.msra.mxu0 %v9649_v41  ;;  %9681 = vmatpush1.bf16.msra.mxu1 %v9680_v44  ;;  %v9712_v41 = vpack.c.bf16 %v3586_v39, %v3579_v38  ;;  %v1320_v44 = vrot.slane %v15381_v50, %v15672_v36  ;;  %v3699_v38 = vld [vmem:[%s20880_s3 + $0x9e0] sm:$0xff] }
 0x29b   :  { %9683 = vmatprep.subr.bf16.mxu1 %v9682_v45  ;;  %v9714_v45 = vpack.c.bf16 %v3601_v40, %v3594_v18  ;;  %v3691_v40 = vld [vmem:[%s20880_s3 + $0x9a0] sm:$0xff] }
 0x29c   :  { %v11361_v57 = vadd.f32 %v14056_v42, %v1320_v44  ;;  %v3629_v42 = vld [vmem:[%s20880_s3 + $0x7b0] sm:$0xff]  ;;  %v3706_v44 = vld [vmem:[%s20880_s3 + $0xa18] sm:$0xff] }
 0x29d   :  { %3295 = vmatmul.mubr.f32.vlgmr.msra.gmra.mrb[8].mxu0 %v15158_v62  ;;  %v3516_v62 = vld [vmem:[%s20880_s3 + $0x428] sm:$0xff] }
 0x29e   :  { %5286 = vmatprep.mubr.f32.mxu0 %v11481_v24  ;;  %9685 = vmatpush1.bf16.msra.mxu1 %v9684_v55  ;;  %v9692_v8 = vpack.c.bf16 %v3516_v62, %v3509_v4  ;;  %v3615_v55 = vld [vmem:[%s20880_s3 + $0x740] sm:$0xff]  ;;  %v9720_v4 = vpack.c.bf16 %v3614_v63, %v3607_v61  ;;  %v15719_v62 = vmax.f32 %v11361_v57, 0.0  ;;  %v3726_v63 = vld [vmem:[%s20880_s3 + $0xab8] sm:$0xff] }
 0x29f   :  { %9687 = vmatprep.subr.bf16.mxu1 %v9686_v56  ;;  %v9716_v56 = vpack.c.bf16 %v3600_v52, %v3593_v46  ;;  %v9718_v58 = vpack.c.bf16 %v3615_v55, %v3608_v54  ;;  %v3712_v54 = vld [vmem:[%s20880_s3 + $0xa48] sm:$0xff]  ;;  %v3719_v61 = vld [vmem:[%s20880_s3 + $0xa80] sm:$0xff] }
 0x2a0   :  { %v3720_v55 = vld [vmem:[%s20880_s3 + $0xa88] sm:$0xff] }
 0x2a2   :  { %9689 = vmatpush1.bf16.msra.mxu1 %v9688_v0  ;;  %v11364_v0 = vadd.f32 %v14077_v51, %v1332_v53  ;;  %v3628_v51 = vld [vmem:[%s20880_s3 + $0x7a8] sm:$0xff]  ;;  %v3705_v53 = vld [vmem:[%s20880_s3 + $0xa10] sm:$0xff] }
 0x2a3   :  { %9691 = vmatprep.subr.bf16.mxu1 %v9690_v1  ;;  %v3622_v1 = vld [vmem:[%s20880_s3 + $0x778] sm:$0xff]  ;;  %v9724_v12 = vpack.c.bf16 %v3628_v51, %v3621_v7  ;;  %v9748_v57 = vpack.c.bf16 %v3712_v54, %v3705_v53  ;;  %v3740_v7 = vld [vmem:[%s20880_s3 + $0xb28] sm:$0xff]  ;;  %v15900_v53 = vsub.s32 2, %v15349_v32 }
 0x2a4   :  { %v9722_v5 = vpack.c.bf16 %v3629_v42, %v3622_v1  ;;  %v3741_v1 = vld [vmem:[%s20880_s3 + $0xb30] sm:$0xff]  ;;  %v9752_v42 = vpack.c.bf16 %v3726_v63, %v3719_v61  ;;  %v3748_v51 = vld [vmem:[%s20880_s3 + $0xb68] sm:$0xff] }
 0x2a5   :  { %v3825_v61 = vld [vmem:[%s20880_s3 + $0xdd0] sm:$0xff] }
 0x2a6   :  { %9693 = vmatpush1.bf16.msra.mxu1 %v9692_v8  ;;  %v15727_v8 = vmax.f32 %v11364_v0, 0.0  ;;  %v3734_v0 = vld [vmem:[%s20880_s3 + $0xaf8] sm:$0xff] }
 0x2a7   :  { %9695 = vmatprep.subr.bf16.mxu1 %v9694_v9  ;;  %v3636_v9 = vld [vmem:[%s20880_s3 + $0x7e8] sm:$0xff] }
 0x2a8   :  { %v9726_v13 = vpack.c.bf16 %v3643_v11, %v3636_v9  ;;  %v3755_v9 = vld [vmem:[%s20880_s3 + $0xba0] sm:$0xff] }
 0x2aa   :  { %9697 = vmatpush1.bf16.msra.mxu1 %v9696_v15  ;;  %v3642_v15 = vld [vmem:[%s20880_s3 + $0x818] sm:$0xff] }
 0x2ab   :  { %9699 = vmatprep.subr.bf16.mxu1 %v9698_v16  ;;  %v3650_v16 = vld [vmem:[%s20880_s3 + $0x858] sm:$0xff]  ;;  %v9728_v19 = vpack.c.bf16 %v3642_v15, %v3635_v14 }
 0x2ac   :  { %v9730_v20 = vpack.c.bf16 %v3657_v17, %v3650_v16  ;;  %v3754_v14 = vld [vmem:[%s20880_s3 + $0xb98] sm:$0xff]  ;;  %v3769_v16 = vld [vmem:[%s20880_s3 + $0xc10] sm:$0xff] }
 0x2ad   :  { %v3762_v15 = vld [vmem:[%s20880_s3 + $0xbd8] sm:$0xff] }
 0x2ae   :  { %9701 = vmatpush1.bf16.msra.mxu1 %v9700_v48  ;;  %v3656_v48 = vld [vmem:[%s20880_s3 + $0x888] sm:$0xff] }
 0x2af   :  { %9703 = vmatprep.subr.bf16.mxu1 %v9702_v22  ;;  %v3664_v22 = vld [vmem:[%s20880_s3 + $0x8c8] sm:$0xff]  ;;  %v9732_v25 = vpack.c.bf16 %v3656_v48, %v3649_v21 }
 0x2b0   :  { %v9734_v43 = vpack.c.bf16 %v3671_v23, %v3664_v22  ;;  %v3768_v21 = vld [vmem:[%s20880_s3 + $0xc08] sm:$0xff]  ;;  %v3783_v22 = vld [vmem:[%s20880_s3 + $0xc80] sm:$0xff] }
 0x2b1   :  { %v3776_v48 = vld [vmem:[%s20880_s3 + $0xc48] sm:$0xff] }
 0x2b2   :  { %9705 = vmatpush1.bf16.msra.mxu1 %v9704_v27  ;;  %v3670_v27 = vld [vmem:[%s20880_s3 + $0x8f8] sm:$0xff] }
 0x2b3   :  { %9707 = vmatprep.subr.bf16.mxu1 %v9706_v28  ;;  %v3678_v28 = vld [vmem:[%s20880_s3 + $0x938] sm:$0xff]  ;;  %v9736_v30 = vpack.c.bf16 %v3670_v27, %v3663_v26 }
 0x2b4   :  { %v9738_v33 = vpack.c.bf16 %v3685_v29, %v3678_v28  ;;  %v3782_v26 = vld [vmem:[%s20880_s3 + $0xc78] sm:$0xff]  ;;  %v3797_v28 = vld [vmem:[%s20880_s3 + $0xcf0] sm:$0xff] }
 0x2b5   :  { %v3790_v27 = vld [vmem:[%s20880_s3 + $0xcb8] sm:$0xff] }
 0x2b6   :  { %9709 = vmatpush1.bf16.msra.mxu1 %v9708_v35  ;;  %v3684_v35 = vld [vmem:[%s20880_s3 + $0x968] sm:$0xff] }
 0x2b7   :  { %9711 = vmatprep.subr.bf16.mxu1 %v9710_v37  ;;  %v3692_v37 = vld [vmem:[%s20880_s3 + $0x9a8] sm:$0xff]  ;;  %v9740_v39 = vpack.c.bf16 %v3684_v35, %v3677_v34  ;;  %v9770_v34 = vpack.c.bf16 %v3797_v28, %v3790_v27 }
 0x2b8   :  { %v9742_v18 = vpack.c.bf16 %v3699_v38, %v3692_v37  ;;  %v3796_v35 = vld [vmem:[%s20880_s3 + $0xce8] sm:$0xff]  ;;  %v4735_v38 = vld [vmem:[%s20880_s3 + $0x2a40] sm:$0xff] }
 0x2b9   :  { %v3804_v37 = vld [vmem:[%s20880_s3 + $0xd28] sm:$0xff] }
 0x2ba   :  { %9713 = vmatpush1.bf16.msra.mxu1 %v9712_v41  ;;  %v3698_v41 = vld [vmem:[%s20880_s3 + $0x9d8] sm:$0xff]  ;;  %v3860_v28 = vld [vmem:[%s20880_s3 + $0xee8] sm:$0xff] }
 0x2bb   :  { %9715 = vmatprep.subr.bf16.mxu1 %v9714_v45  ;;  %v3713_v45 = vld [vmem:[%s20880_s3 + $0xa50] sm:$0xff]  ;;  %v9744_v46 = vpack.c.bf16 %v3698_v41, %v3691_v40  ;;  %v4727_v40 = vld [vmem:[%s20880_s3 + $0x2a00] sm:$0xff]  ;;  %v4734_v41 = vld [vmem:[%s20880_s3 + $0x2a38] sm:$0xff] }
 0x2bc   :  { %v9746_v52 = vpack.c.bf16 %v3713_v45, %v3706_v44  ;;  %v10040_v44 = vpack.c.bf16 %v4734_v41, %v4727_v40  ;;  %v3873_v40 = vld [vmem:[%s20880_s3 + $0xf50] sm:$0xff]  ;;  %v3880_v41 = vld [vmem:[%s20880_s3 + $0xf88] sm:$0xff] }
 0x2be   :  { %9717 = vmatpush1.bf16.msra.mxu1 %v9716_v56  ;;  %v3727_v56 = vld [vmem:[%s20880_s3 + $0xac0] sm:$0xff] }
 0x2bf   :  { %9719 = vmatprep.subr.bf16.mxu1 %v9718_v58  ;;  %v9750_v58 = vpack.c.bf16 %v3727_v56, %v3720_v55  ;;  %v3810_v55 = vld [vmem:[%s20880_s3 + $0xd58] sm:$0xff] }
 0x2c0   :  { %v3818_v56 = vld [vmem:[%s20880_s3 + $0xd98] sm:$0xff] }
 0x2c1   :  { %4861 = vmatmul.mubr.f32.vlgmr.msra.gmra.mrb[10].mxu1 %v15719_v62 }
 0x2c2   :  { %9721 = vmatpush1.bf16.msra.mxu1 %v9720_v4  ;;  %4931 = vmatprep.mubr.f32.mxu1 %v15727_v8  ;;  %v9754_v4 = vpack.c.bf16 %v3741_v1, %v3734_v0  ;;  %v4741_v0 = vld [vmem:[%s20880_s3 + $0x2a70] sm:$0xff]  ;;  %v4748_v1 = vld [vmem:[%s20880_s3 + $0x2aa8] sm:$0xff] }
 0x2c3   :  { %9723 = vmatprep.subr.bf16.mxu1 %v9722_v5  ;;  %v3733_v5 = vld [vmem:[%s20880_s3 + $0xaf0] sm:$0xff] }
 0x2c4   :  { %v9756_v11 = vpack.c.bf16 %v3740_v7, %v3733_v5  ;;  %v3386_v5 = vld [vmem:[%s20880_s3 + $0x18] sm:$0xff]  ;;  %v1328_v7 = vrot.slane %v15381_v50, %v15900_v53 }
 0x2c6   :  { %9725 = vmatpush1.bf16.msra.mxu1 %v9724_v12  ;;  %v9758_v12 = vpack.c.bf16 %v3755_v9, %v3748_v51  ;;  %v9778_v51 = vpack.c.bf16 %v3825_v61, %v3818_v56  ;;  %v3817_v9 = vld [vmem:[%s20880_s3 + $0xd90] sm:$0xff]  ;;  %v3902_v56 = vld [vmem:[%s20880_s3 + $0x1038] sm:$0xff] }
 0x2c7   :  { %9727 = vmatprep.subr.bf16.mxu1 %v9726_v13  ;;  %v3747_v13 = vld [vmem:[%s20880_s3 + $0xb60] sm:$0xff] }
 0x2c8   :  { %v9760_v17 = vpack.c.bf16 %v3754_v14, %v3747_v13  ;;  %v3832_v14 = vld [vmem:[%s20880_s3 + $0xe08] sm:$0xff] }
 0x2ca   :  { %9729 = vmatpush1.bf16.msra.mxu1 %v9728_v19  ;;  %v9762_v19 = vpack.c.bf16 %v3769_v16, %v3762_v15  ;;  %v3839_v15 = vld [vmem:[%s20880_s3 + $0xe40] sm:$0xff] }
 0x2cb   :  { %9731 = vmatprep.subr.bf16.mxu1 %v9730_v20  ;;  %v3761_v20 = vld [vmem:[%s20880_s3 + $0xbd0] sm:$0xff] }
 0x2cc   :  { %v9764_v23 = vpack.c.bf16 %v3768_v21, %v3761_v20  ;;  %v9782_v20 = vpack.c.bf16 %v3839_v15, %v3832_v14  ;;  %v3838_v21 = vld [vmem:[%s20880_s3 + $0xe38] sm:$0xff]  ;;  %v3929_v15 = vld [vmem:[%s20880_s3 + $0x1110] sm:$0xff] }
 0x2ce   :  { %9733 = vmatpush1.bf16.msra.mxu1 %v9732_v25  ;;  %v9766_v25 = vpack.c.bf16 %v3783_v22, %v3776_v48  ;;  %v3846_v22 = vld [vmem:[%s20880_s3 + $0xe78] sm:$0xff] }
 0x2cf   :  { %9735 = vmatprep.subr.bf16.mxu1 %v9734_v43  ;;  %v3775_v43 = vld [vmem:[%s20880_s3 + $0xc40] sm:$0xff] }
 0x2d0   :  { %v9768_v29 = vpack.c.bf16 %v3782_v26, %v3775_v43  ;;  %v3845_v26 = vld [vmem:[%s20880_s3 + $0xe70] sm:$0xff] }
 0x2d2   :  { %9737 = vmatpush1.bf16.msra.mxu1 %v9736_v30  ;;  %v3789_v30 = vld [vmem:[%s20880_s3 + $0xcb0] sm:$0xff] }
 0x2d3   :  { %9739 = vmatprep.subr.bf16.mxu1 %v9738_v33  ;;  %v4728_v33 = vld [vmem:[%s20880_s3 + $0x2a08] sm:$0xff]  ;;  %v9772_v45 = vpack.c.bf16 %v3796_v35, %v3789_v30  ;;  %v3866_v35 = vld [vmem:[%s20880_s3 + $0xf18] sm:$0xff] }
 0x2d6   :  { %9741 = vmatpush1.bf16.msra.mxu1 %v9740_v39  ;;  %v3811_v39 = vld [vmem:[%s20880_s3 + $0xd60] sm:$0xff] }
 0x2d7   :  { %9743 = vmatprep.subr.bf16.mxu1 %v9742_v18  ;;  %v10038_v18 = vpack.c.bf16 %v4735_v38, %v4728_v33  ;;  %v9774_v54 = vpack.c.bf16 %v3811_v39, %v3804_v37  ;;  %v3874_v37 = vld [vmem:[%s20880_s3 + $0xf58] sm:$0xff]  ;;  %v3881_v38 = vld [vmem:[%s20880_s3 + $0xf90] sm:$0xff] }
 0x2d9   :  { %10039 = vmatprep.subr.bf16.mxu0 %v10038_v18  ;;  %v9794_v18 = vpack.c.bf16 %v3881_v38, %v3874_v37  ;;  %v3986_v37 = vld [vmem:[%s20880_s3 + $0x12d8] sm:$0xff]  ;;  %v3993_v38 = vld [vmem:[%s20880_s3 + $0x1310] sm:$0xff] }
 0x2da   :  { %9745 = vmatpush1.bf16.msra.mxu1 %v9744_v46  ;;  %v3803_v46 = vld [vmem:[%s20880_s3 + $0xd20] sm:$0xff]  ;;  %10041 = vmatpush1.bf16.msra.mxu0 %v10040_v44  ;;  %v3888_v44 = vld [vmem:[%s20880_s3 + $0xfc8] sm:$0xff] }
 0x2db   :  { %9747 = vmatprep.subr.bf16.mxu1 %v9746_v52  ;;  %v4742_v52 = vld [vmem:[%s20880_s3 + $0x2a78] sm:$0xff] }
 0x2de   :  { %9749 = vmatpush1.bf16.msra.mxu1 %v9748_v57  ;;  %v4749_v57 = vld [vmem:[%s20880_s3 + $0x2ab0] sm:$0xff] }
 0x2df   :  { %9751 = vmatprep.subr.bf16.mxu1 %v9750_v58  ;;  %v1339_v58 = vsub.s32 5, %v15349_v32  ;;  %v10042_v63 = vpack.c.bf16 %v4749_v57, %v4742_v52  ;;  %v3909_v57 = vld [vmem:[%s20880_s3 + $0x1070] sm:$0xff] }
 0x2e1   :  { %10043 = vmatprep.subr.bf16.mxu0 %v10042_v63  ;;  %v1340_v13 = vrot.slane %v15381_v50, %v1339_v58  ;;  %v3831_v50 = vld [vmem:[%s20880_s3 + $0xe00] sm:$0xff]  ;;  %v9802_v63 = vpack.c.bf16 %v3909_v57, %v3902_v56  ;;  %v4006_v56 = vld [vmem:[%s20880_s3 + $0x1378] sm:$0xff] }
 0x2e2   :  { %9753 = vmatpush1.bf16.msra.mxu1 %v9752_v42  ;;  %v10044_v42 = vpack.c.bf16 %v4748_v1, %v4741_v0  ;;  %v3901_v0 = vld [vmem:[%s20880_s3 + $0x1030] sm:$0xff]  ;;  %v3908_v1 = vld [vmem:[%s20880_s3 + $0x1068] sm:$0xff] }
 0x2e3   :  { %9755 = vmatprep.subr.bf16.mxu1 %v9754_v4  ;;  %v9776_v4 = vpack.c.bf16 %v3810_v55, %v3803_v46  ;;  %v11366_v48 = vadd.f32 %v15297_v3, %v1340_v13  ;;  %v3852_v3 = vld [vmem:[%s20880_s3 + $0xea8] sm:$0xff]  ;;  %v9796_v46 = vpack.c.bf16 %v3880_v41, %v3873_v40  ;;  %v3894_v55 = vld [vmem:[%s20880_s3 + $0xff8] sm:$0xff]  ;;  %v3985_v40 = vld [vmem:[%s20880_s3 + $0x12d0] sm:$0xff] }
 0x2e4   :  { %10045 = vmatpush1.bf16.msra.mxu0 %v10044_v42  ;;  %v9788_v30 = vpack.c.bf16 %v3852_v3, %v3845_v26  ;;  %v3916_v42 = vld [vmem:[%s20880_s3 + $0x10a8] sm:$0xff]  ;;  %v3957_v26 = vld [vmem:[%s20880_s3 + $0x11f0] sm:$0xff] }
 0x2e5   :  { %v15966_v27 = vmax.f32 %v11366_v48, 0.0  ;;  %v3950_v48 = vld [vmem:[%s20880_s3 + $0x11b8] sm:$0xff]  ;;  %v3964_v3 = vld [vmem:[%s20880_s3 + $0x1228] sm:$0xff] }
 0x2e6   :  { %9757 = vmatpush1.bf16.msra.mxu1 %v9756_v11  ;;  %v3824_v11 = vld [vmem:[%s20880_s3 + $0xdc8] sm:$0xff] }
 0x2e7   :  { %9759 = vmatprep.subr.bf16.mxu1 %v9758_v12  ;;  %v3393_v12 = vld [vmem:[%s20880_s3 + $0x50] sm:$0xff]  ;;  %v3992_v41 = vld [vmem:[%s20880_s3 + $0x1308] sm:$0xff] }
 0x2e8   :  { %v10046_v16 = vpack.c.bf16 %v3393_v12, %v3386_v5  ;;  %v9804_v5 = vpack.c.bf16 %v3908_v1, %v3901_v0  ;;  %v3937_v12 = vld [vmem:[%s20880_s3 + $0x1150] sm:$0xff] }
 0x2ea   :  { %9761 = vmatpush1.bf16.msra.mxu1 %v9760_v17  ;;  %v9780_v17 = vpack.c.bf16 %v3824_v11, %v3817_v9  ;;  %10047 = vmatprep.subr.bf16.mxu0 %v10046_v16  ;;  %v3922_v9 = vld [vmem:[%s20880_s3 + $0x10d8] sm:$0xff]  ;;  %v3936_v16 = vld [vmem:[%s20880_s3 + $0x1148] sm:$0xff] }
 0x2eb   :  { %9763 = vmatprep.subr.bf16.mxu1 %v9762_v19  ;;  %v11363_v19 = vadd.f32 %v14067_v47, %v1328_v7  ;;  %v3853_v47 = vld [vmem:[%s20880_s3 + $0xeb0] sm:$0xff]  ;;  %v3930_v11 = vld [vmem:[%s20880_s3 + $0x1118] sm:$0xff] }
 0x2ec   :  { %v9786_v43 = vpack.c.bf16 %v3853_v47, %v3846_v22  ;;  %v9810_v14 = vpack.c.bf16 %v3937_v12, %v3930_v11  ;;  %v3958_v22 = vld [vmem:[%s20880_s3 + $0x11f8] sm:$0xff]  ;;  %v3965_v47 = vld [vmem:[%s20880_s3 + $0x1230] sm:$0xff] }
 0x2ee   :  { %9765 = vmatpush1.bf16.msra.mxu1 %v9764_v23  ;;  %v9784_v23 = vpack.c.bf16 %v3838_v21, %v3831_v50  ;;  %v3943_v21 = vld [vmem:[%s20880_s3 + $0x1180] sm:$0xff] }
 0x2ef   :  { %9767 = vmatprep.subr.bf16.mxu1 %v9766_v25  ;;  %v15958_v25 = vmax.f32 %v11363_v19, 0.0  ;;  %v3951_v19 = vld [vmem:[%s20880_s3 + $0x11c0] sm:$0xff] }
 0x2f2   :  { %9769 = vmatpush1.bf16.msra.mxu1 %v9768_v29  ;;  %v3867_v29 = vld [vmem:[%s20880_s3 + $0xf20] sm:$0xff] }
 0x2f3   :  { %9771 = vmatprep.subr.bf16.mxu1 %v9770_v34  ;;  %v9790_v33 = vpack.c.bf16 %v3867_v29, %v3860_v28  ;;  %v3859_v34 = vld [vmem:[%s20880_s3 + $0xee0] sm:$0xff]  ;;  %v3972_v28 = vld [vmem:[%s20880_s3 + $0x1268] sm:$0xff] }
 0x2f4   :  { %v9792_v39 = vpack.c.bf16 %v3866_v35, %v3859_v34  ;;  %v3979_v29 = vld [vmem:[%s20880_s3 + $0x12a0] sm:$0xff]  ;;  %v3978_v35 = vld [vmem:[%s20880_s3 + $0x1298] sm:$0xff] }
 0x2f5   :  { %v3971_v34 = vld [vmem:[%s20880_s3 + $0x1260] sm:$0xff] }
 0x2f6   :  { %9773 = vmatpush1.bf16.msra.mxu1 %v9772_v45  ;;  %v3895_v45 = vld [vmem:[%s20880_s3 + $0x1000] sm:$0xff] }
 0x2f7   :  { %9775 = vmatprep.subr.bf16.mxu1 %v9774_v54  ;;  %v9798_v52 = vpack.c.bf16 %v3895_v45, %v3888_v44  ;;  %v3887_v54 = vld [vmem:[%s20880_s3 + $0xfc0] sm:$0xff]  ;;  %v4000_v44 = vld [vmem:[%s20880_s3 + $0x1348] sm:$0xff] }
 0x2f8   :  { %v9800_v61 = vpack.c.bf16 %v3894_v55, %v3887_v54  ;;  %v4007_v45 = vld [vmem:[%s20880_s3 + $0x1380] sm:$0xff] }
 0x2f9   :  { %v9830_v54 = vpack.c.bf16 %v4007_v45, %v4000_v44  ;;  %v3999_v55 = vld [vmem:[%s20880_s3 + $0x1340] sm:$0xff]  ;;  %v4070_v44 = vld [vmem:[%s20880_s3 + $0x1578] sm:$0xff] }
 0x2fa   :  { %9777 = vmatpush1.bf16.msra.mxu1 %v9776_v4  ;;  %v3923_v4 = vld [vmem:[%s20880_s3 + $0x10e0] sm:$0xff] }
 0x2fb   :  { %9779 = vmatprep.subr.bf16.mxu1 %v9778_v51  ;;  %v9806_v7 = vpack.c.bf16 %v3923_v4, %v3916_v42  ;;  %v3915_v51 = vld [vmem:[%s20880_s3 + $0x10a0] sm:$0xff]  ;;  %v9832_v42 = vpack.c.bf16 %v4006_v56, %v3999_v55  ;;  %v4069_v55 = vld [vmem:[%s20880_s3 + $0x1570] sm:$0xff] }
 0x2fc   :  { %v9808_v13 = vpack.c.bf16 %v3922_v9, %v3915_v51  ;;  %v4020_v51 = vld [vmem:[%s20880_s3 + $0x13e8] sm:$0xff] }
 0x2fe   :  { %9781 = vmatpush1.bf16.msra.mxu1 %v9780_v17  ;;  %v3944_v17 = vld [vmem:[%s20880_s3 + $0x1188] sm:$0xff] }
 0x2ff   :  { %9783 = vmatprep.subr.bf16.mxu1 %v9782_v20  ;;  %v9812_v20 = vpack.c.bf16 %v3936_v16, %v3929_v15  ;;  %v9814_v50 = vpack.c.bf16 %v3951_v19, %v3944_v17 }
 0x301   :  { %4932 = vmatmul.mubr.f32.vlgmr.msra.gmra.mrb[10].mxu1 %v15958_v25 }
 0x302   :  { %9785 = vmatpush1.bf16.msra.mxu1 %v9784_v23  ;;  %5002 = vmatprep.mubr.f32.mxu1 %v15966_v27  ;;  %v9816_v23 = vpack.c.bf16 %v3950_v48, %v3943_v21  ;;  %v4027_v21 = vld [vmem:[%s20880_s3 + $0x1420] sm:$0xff]  ;;  %v4034_v48 = vld [vmem:[%s20880_s3 + $0x1458] sm:$0xff] }
 0x303   :  { %9787 = vmatprep.subr.bf16.mxu1 %v9786_v43  ;;  %v9818_v43 = vpack.c.bf16 %v3965_v47, %v3958_v22  ;;  %v1347_v22 = vsub.s32 7, %v15349_v32  ;;  %v4042_v47 = vld [vmem:[%s20880_s3 + $0x1498] sm:$0xff] }
 0x306   :  { %9789 = vmatpush1.bf16.msra.mxu1 %v9788_v30  ;;  %v9820_v30 = vpack.c.bf16 %v3964_v3, %v3957_v26  ;;  %v16158_v26 = vld [vmem:[%s20879_s2] sm:$0xff] }
 0x307   :  { %9791 = vmatprep.subr.bf16.mxu1 %v9790_v33  ;;  %v9822_v33 = vpack.c.bf16 %v3979_v29, %v3972_v28  ;;  %v4041_v29 = vld [vmem:[%s20880_s3 + $0x1490] sm:$0xff] }
 0x30a   :  { %9793 = vmatpush1.bf16.msra.mxu1 %v9792_v39  ;;  %v9824_v39 = vpack.c.bf16 %v3978_v35, %v3971_v34  ;;  %v4056_v34 = vld [vmem:[%s20880_s3 + $0x1508] sm:$0xff]  ;;  %v4063_v35 = vld [vmem:[%s20880_s3 + $0x1540] sm:$0xff] }
 0x30b   :  { %9795 = vmatprep.subr.bf16.mxu1 %v9794_v18  ;;  %v9826_v18 = vpack.c.bf16 %v3993_v38, %v3986_v37 }
 0x30e   :  { %9797 = vmatpush1.bf16.msra.mxu1 %v9796_v46  ;;  %v16099_v46 = vld [vmem:[%s20879_s2 + $0x8] sm:$0x1f] }
 0x30f   :  { %9799 = vmatprep.subr.bf16.mxu1 %v9798_v52  ;;  %v9828_v52 = vpack.c.bf16 %v3992_v41, %v3985_v40  ;;  %v1352_v57 = vrot.slane %v16099_v46, %v15672_v36  ;;  %v1360_v0 = vrot.slane %v16099_v46, %v15900_v53  ;;  %v1364_v1 = vrot.slane %v16099_v46, %v15681_v59  ;;  %v4062_v40 = vld [vmem:[%s20880_s3 + $0x1538] sm:$0xff] }
 0x312   :  { %9801 = vmatpush1.bf16.msra.mxu1 %v9800_v61  ;;  %v4014_v61 = vld [vmem:[%s20880_s3 + $0x13b8] sm:$0xff] }
 0x313   :  { %9803 = vmatprep.subr.bf16.mxu1 %v9802_v63  ;;  %v4021_v63 = vld [vmem:[%s20880_s3 + $0x13f0] sm:$0xff] }
 0x316   :  { %9805 = vmatpush1.bf16.msra.mxu1 %v9804_v5  ;;  %v9834_v5 = vpack.c.bf16 %v4021_v63, %v4014_v61  ;;  %v4091_v61 = vld [vmem:[%s20880_s3 + $0x1620] sm:$0xff] }
 0x317   :  { %9807 = vmatprep.subr.bf16.mxu1 %v9806_v7  ;;  %v4013_v7 = vld [vmem:[%s20880_s3 + $0x13b0] sm:$0xff] }
 0x318   :  { %v9836_v19 = vpack.c.bf16 %v4020_v51, %v4013_v7 }
 0x31a   :  { %9809 = vmatpush1.bf16.msra.mxu1 %v9808_v13  ;;  %v4028_v13 = vld [vmem:[%s20880_s3 + $0x1428] sm:$0xff] }
 0x31b   :  { %9811 = vmatprep.subr.bf16.mxu1 %v9810_v14  ;;  %v4035_v14 = vld [vmem:[%s20880_s3 + $0x1460] sm:$0xff] }
 0x31e   :  { %9813 = vmatpush1.bf16.msra.mxu1 %v9812_v20  ;;  %v16140_v20 = vsub.s32 4, %v15349_v32 }
 0x31f   :  { %9815 = vmatprep.subr.bf16.mxu1 %v9814_v50  ;;  %v9838_v50 = vpack.c.bf16 %v4035_v14, %v4028_v13  ;;  %v4104_v13 = vld [vmem:[%s20880_s3 + $0x1688] sm:$0xff] }
 0x320   :  { %v1336_v3 = vrot.slane %v16158_v26, %v16140_v20  ;;  %v4112_v14 = vld [vmem:[%s20880_s3 + $0x16c8] sm:$0xff] }
 0x322   :  { %9817 = vmatpush1.bf16.msra.mxu1 %v9816_v23  ;;  %v4049_v23 = vld [vmem:[%s20880_s3 + $0x14d0] sm:$0xff]  ;;  %v11365_v38 = vadd.f32 %v15284_v60, %v1336_v3  ;;  %v1368_v3 = vrot.slane %v16099_v46, %v16140_v20 }
 0x323   :  { %9819 = vmatprep.subr.bf16.mxu1 %v9818_v43  ;;  %v9840_v43 = vpack.c.bf16 %v4034_v48, %v4027_v21  ;;  %v9842_v28 = vpack.c.bf16 %v4049_v23, %v4042_v47  ;;  %v4077_v60 = vld [vmem:[%s20880_s3 + $0x15b0] sm:$0xff]  ;;  %v4111_v21 = vld [vmem:[%s20880_s3 + $0x16c0] sm:$0xff]  ;;  %v4118_v48 = vld [vmem:[%s20880_s3 + $0x16f8] sm:$0xff] }
 0x324   :  { %v4133_v47 = vld [vmem:[%s20880_s3 + $0x1770] sm:$0xff]  ;;  %v9864_v23 = vpack.c.bf16 %v4118_v48, %v4111_v21  ;;  %v4188_v48 = vld [vmem:[%s20880_s3 + $0x1928] sm:$0xff] }
 0x325   :  { %v4181_v21 = vld [vmem:[%s20880_s3 + $0x18f0] sm:$0xff] }
 0x326   :  { %9821 = vmatpush1.bf16.msra.mxu1 %v9820_v30  ;;  %v4048_v30 = vld [vmem:[%s20880_s3 + $0x14c8] sm:$0xff] }
 0x327   :  { %9823 = vmatprep.subr.bf16.mxu1 %v9822_v33  ;;  %v1348_v33 = vrot.slane %v16158_v26, %v1347_v22  ;;  %v9844_v37 = vpack.c.bf16 %v4048_v30, %v4041_v29  ;;  %v4126_v22 = vld [vmem:[%s20880_s3 + $0x1738] sm:$0xff]  ;;  %v4125_v29 = vld [vmem:[%s20880_s3 + $0x1730] sm:$0xff]  ;;  %v4132_v30 = vld [vmem:[%s20880_s3 + $0x1768] sm:$0xff] }
 0x329   :  { %v11368_v41 = vadd.f32 %v15305_v6, %v1348_v33  ;;  %v4076_v6 = vld [vmem:[%s20880_s3 + $0x15a8] sm:$0xff] }
 0x32a   :  { %9825 = vmatpush1.bf16.msra.mxu1 %v9824_v39  ;;  %v9846_v39 = vpack.c.bf16 %v4063_v35, %v4056_v34  ;;  %v9852_v63 = vpack.c.bf16 %v4076_v6, %v4069_v55  ;;  %v4140_v35 = vld [vmem:[%s20880_s3 + $0x17a8] sm:$0xff]  ;;  %v4161_v55 = vld [vmem:[%s20880_s3 + $0x1850] sm:$0xff] }
 0x32b   :  { %9827 = vmatprep.subr.bf16.mxu1 %v9826_v18  ;;  %v4055_v18 = vld [vmem:[%s20880_s3 + $0x1500] sm:$0xff]  ;;  %v16197_v56 = vmax.f32 %v11368_v41, 0.0 }
 0x32c   :  { %v9848_v45 = vpack.c.bf16 %v4062_v40, %v4055_v18  ;;  %v9868_v40 = vpack.c.bf16 %v4132_v30, %v4125_v29  ;;  %v4210_v29 = vld [vmem:[%s20880_s3 + $0x19d8] sm:$0xff]  ;;  %v4217_v30 = vld [vmem:[%s20880_s3 + $0x1a10] sm:$0xff] }
 0x32e   :  { %9829 = vmatpush1.bf16.msra.mxu1 %v9828_v52  ;;  %v16189_v52 = vmax.f32 %v11365_v38, 0.0 }
 0x32f   :  { %9831 = vmatprep.subr.bf16.mxu1 %v9830_v54  ;;  %v9850_v54 = vpack.c.bf16 %v4077_v60, %v4070_v44  ;;  %v4139_v60 = vld [vmem:[%s20880_s3 + $0x17a0] sm:$0xff] }
 0x330   :  { %v2801_v4 = vpop.f32.mrb[4].mxu0  ;;  %v3085_v11 = vpop.f32.mrb[4].mxu1 }
 0x331   :  { %v16125_v9 = vadd.f32 %v2801_v4, %v1352_v57  ;;  %v16127_v12 = vpop.f32.mrb[5].mxu0  ;;  %v16135_v15 = vadd.f32 %v3085_v11, %v1360_v0  ;;  %v3087_v16 = vpop.f32.mrb[5].mxu1  ;;  %v4084_v57 = vld [vmem:[%s20880_s3 + $0x15e8] sm:$0xff]  ;;  %v4098_v4 = vld [vmem:[%s20880_s3 + $0x1658] sm:$0xff]  ;;  %v4097_v11 = vld [vmem:[%s20880_s3 + $0x1650] sm:$0xff] }
 0x332   :  { %v16137_v17 = vadd.f32 %v3087_v16, %v1364_v1  ;;  %9833 = vmatpush1.bf16.msra.mxu1 %v9832_v42  ;;  %v9854_v0 = vpack.c.bf16 %v4091_v61, %v4084_v57  ;;  %v4083_v1 = vld [vmem:[%s20880_s3 + $0x15e0] sm:$0xff]  ;;  %v4090_v42 = vld [vmem:[%s20880_s3 + $0x1618] sm:$0xff] }
 0x333   :  { %9835 = vmatprep.subr.bf16.mxu1 %v9834_v5  ;;  %v4105_v5 = vld [vmem:[%s20880_s3 + $0x1690] sm:$0xff]  ;;  %v9856_v7 = vpack.c.bf16 %v4090_v42, %v4083_v1  ;;  %v4119_v16 = vld [vmem:[%s20880_s3 + $0x1700] sm:$0xff]  ;;  %v4160_v42 = vld [vmem:[%s20880_s3 + $0x1848] sm:$0xff] }
 0x334   :  { %v9858_v51 = vpack.c.bf16 %v4105_v5, %v4098_v4  ;;  %v4153_v1 = vld [vmem:[%s20880_s3 + $0x1810] sm:$0xff]  ;;  %v4168_v4 = vld [vmem:[%s20880_s3 + $0x1888] sm:$0xff]  ;;  %v4175_v5 = vld [vmem:[%s20880_s3 + $0x18c0] sm:$0xff] }
 0x336   :  { %9837 = vmatpush1.bf16.msra.mxu1 %v9836_v19  ;;  %v9860_v19 = vpack.c.bf16 %v4104_v13, %v4097_v11  ;;  %v4167_v11 = vld [vmem:[%s20880_s3 + $0x1880] sm:$0xff]  ;;  %v4174_v13 = vld [vmem:[%s20880_s3 + $0x18b8] sm:$0xff] }
 0x337   :  { %9839 = vmatprep.subr.bf16.mxu1 %v9838_v50  ;;  %v9862_v50 = vpack.c.bf16 %v4119_v16, %v4112_v14  ;;  %v4182_v14 = vld [vmem:[%s20880_s3 + $0x18f8] sm:$0xff]  ;;  %v4189_v16 = vld [vmem:[%s20880_s3 + $0x1930] sm:$0xff] }
 0x33a   :  { %9841 = vmatpush1.bf16.msra.mxu1 %v9840_v43 }
 0x33b   :  { %9843 = vmatprep.subr.bf16.mxu1 %v9842_v28  ;;  %v9866_v28 = vpack.c.bf16 %v4133_v47, %v4126_v22  ;;  %v4196_v22 = vld [vmem:[%s20880_s3 + $0x1968] sm:$0xff]  ;;  %v4203_v47 = vld [vmem:[%s20880_s3 + $0x19a0] sm:$0xff] }
 0x33e   :  { %9845 = vmatpush1.bf16.msra.mxu1 %v9844_v37  ;;  %v4147_v37 = vld [vmem:[%s20880_s3 + $0x17e0] sm:$0xff] }
 0x33f   :  { %9847 = vmatprep.subr.bf16.mxu1 %v9846_v39  ;;  %v9870_v44 = vpack.c.bf16 %v4147_v37, %v4140_v35  ;;  %v4209_v35 = vld [vmem:[%s20880_s3 + $0x19d0] sm:$0xff]  ;;  %v4216_v37 = vld [vmem:[%s20880_s3 + $0x1a08] sm:$0xff] }
 0x341   :  { %5003 = vmatmul.mubr.f32.vlgmr.msra.gmra.mrb[10].mxu1 %v16189_v52 }
 0x342   :  { %9849 = vmatpush1.bf16.msra.mxu1 %v9848_v45  ;;  %5073 = vmatprep.mubr.f32.mxu1 %v16197_v56  ;;  %v4146_v45 = vld [vmem:[%s20880_s3 + $0x17d8] sm:$0xff] }
 0x343   :  { %9851 = vmatprep.subr.bf16.mxu1 %v9850_v54  ;;  %v4154_v54 = vld [vmem:[%s20880_s3 + $0x1818] sm:$0xff] }
 0x346   :  { %9853 = vmatpush1.bf16.msra.mxu1 %v9852_v63  ;;  %v9872_v63 = vpack.c.bf16 %v4146_v45, %v4139_v60  ;;  %v4238_v60 = vld [vmem:[%s20880_s3 + $0x1ab8] sm:$0xff]  ;;  %v4245_v45 = vld [vmem:[%s20880_s3 + $0x1af0] sm:$0xff] }
 0x347   :  { %9855 = vmatprep.subr.bf16.mxu1 %v9854_v0  ;;  %v9874_v0 = vpack.c.bf16 %v4161_v55, %v4154_v54 }
 0x34a   :  { %9857 = vmatpush1.bf16.msra.mxu1 %v9856_v7  ;;  %v9876_v7 = vpack.c.bf16 %v4160_v42, %v4153_v1  ;;  %v4252_v42 = vld [vmem:[%s20880_s3 + $0x1b28] sm:$0xff] }
 0x34b   :  { %9859 = vmatprep.subr.bf16.mxu1 %v9858_v51  ;;  %v9878_v51 = vpack.c.bf16 %v4175_v5, %v4168_v4  ;;  %v4259_v4 = vld [vmem:[%s20880_s3 + $0x1b60] sm:$0xff] }
 0x34e   :  { %9861 = vmatpush1.bf16.msra.mxu1 %v9860_v19  ;;  %v9880_v19 = vpack.c.bf16 %v4174_v13, %v4167_v11  ;;  %v1343_v11 = vsub.s32 6, %v15349_v32  ;;  %v7019_v32 = vld [vmem:[%s20882_s5 + $0x758] sm:$0xff] }
 0x34f   :  { %9863 = vmatprep.subr.bf16.mxu1 %v9862_v50  ;;  %v9882_v50 = vpack.c.bf16 %v4189_v16, %v4182_v14  ;;  %v9902_v14 = vpack.c.bf16 %v4259_v4, %v4252_v42  ;;  %v4258_v16 = vld [vmem:[%s20880_s3 + $0x1b58] sm:$0xff] }
 0x350   :  { %v7904_v43 = vpop.f32.mrb[6].mxu0  ;;  %v7939_v34 = vpop.f32.mrb[6].mxu1 }
 0x351   :  { %v7905_v33 = vpop.f32.mrb[7].mxu0  ;;  %v7940_v39 = vpop.f32.mrb[7].mxu1 }
 0x352   :  { %v7906_v38 = vadd.f32 %v7905_v33, %v7904_v43  ;;  %9865 = vmatpush1.bf16.msra.mxu1 %v9864_v23  ;;  %v7941_v18 = vadd.f32 %v7940_v39, %v7939_v34  ;;  %v9884_v23 = vpack.c.bf16 %v4188_v48, %v4181_v21  ;;  %v9886_v43 = vpack.c.bf16 %v4203_v47, %v4196_v22  ;;  %v4231_v39 = vld [vmem:[%s20880_s3 + $0x1a80] sm:$0xff]  ;;  %v4266_v21 = vld [vmem:[%s20880_s3 + $0x1b98] sm:$0xff]  ;;  %v3400_v22 = vld [vmem:[%s20880_s3 + $0x88] sm:$0xff] }
 0x353   :  { %9867 = vmatprep.subr.bf16.mxu1 %v9866_v28  ;;  %v4202_v28 = vld [vmem:[%s20880_s3 + $0x1998] sm:$0xff]  ;;  %v9890_v34 = vpack.c.bf16 %v4217_v30, %v4210_v29  ;;  %v3407_v47 = vld [vmem:[%s20880_s3 + $0xc0] sm:$0xff] }
 0x354   :  { %v3157_v41 = vadd.f32 %v7906_v38, %v1368_v3  ;;  %v16269_v6 = vpop.f32.mrb[8].mxu1  ;;  %v4195_v3 = vld [vmem:[%s20880_s3 + $0x1960] sm:$0xff]  ;;  %v4224_v38 = vld [vmem:[%s20880_s3 + $0x1a48] sm:$0xff] }
 0x355   :  { %v8349_v61 = vpop.f32.mrb[9].mxu1  ;;  %v9888_v33 = vpack.c.bf16 %v4202_v28, %v4195_v3  ;;  %v4265_v3 = vld [vmem:[%s20880_s3 + $0x1b90] sm:$0xff]  ;;  %v1344_v28 = vrot.slane %v16158_v26, %v1343_v11  ;;  %v10050_v26 = vpack.c.bf16 %v3407_v47, %v3400_v22 }
 0x356   :  { %v16271_v57 = vadd.f32 %v7941_v18, %v3157_v41  ;;  %9869 = vmatpush1.bf16.msra.mxu1 %v9868_v40  ;;  %v9892_v18 = vpack.c.bf16 %v4216_v37, %v4209_v35  ;;  %v9894_v40 = vpack.c.bf16 %v4231_v39, %v4224_v38  ;;  %v4223_v41 = vld [vmem:[%s20880_s3 + $0x1a40] sm:$0xff]  ;;  %v9898_v61 = vpack.c.bf16 %v4245_v45, %v4238_v60  ;;  %v4280_v35 = vld [vmem:[%s20880_s3 + $0x1c08] sm:$0xff]  ;;  %v3414_v39 = vld [vmem:[%s20880_s3 + $0xf8] sm:$0xff] }
 0x357   :  { %9871 = vmatprep.subr.bf16.mxu1 %v9870_v44  ;;  %v4230_v44 = vld [vmem:[%s20880_s3 + $0x1a78] sm:$0xff]  ;;  %v1356_v37 = vrot.slane %v16099_v46, %v15376_v49  ;;  %v4287_v38 = vld [vmem:[%s20880_s3 + $0x1c40] sm:$0xff]  ;;  %v3449_v22 = vld [vmem:[%s20880_s3 + $0x210] sm:$0xff] }
 0x358   :  { %v9896_v54 = vpack.c.bf16 %v4230_v44, %v4223_v41  ;;  %v11367_v41 = vadd.f32 %v15295_v2, %v1344_v28  ;;  %v9910_v44 = vpack.c.bf16 %v4287_v38, %v4280_v35  ;;  %v4279_v45 = vld [vmem:[%s20880_s3 + $0x1c00] sm:$0xff]  ;;  %v3420_v2 = vld [vmem:[%s20880_s3 + $0x128] sm:$0xff]  ;;  %v3441_v28 = vld [vmem:[%s20880_s3 + $0x1d0] sm:$0xff] }
 0x359   :  { %v4329_v35 = vld [vmem:[%s20880_s3 + $0x1d90] sm:$0xff] }
 0x35a   :  { %9873 = vmatpush1.bf16.msra.mxu1 %v9872_v63  ;;  %v4237_v63 = vld [vmem:[%s20880_s3 + $0x1ab0] sm:$0xff]  ;;  %v16444_v4 = vmax.f32 %v11367_v41, 0.0  ;;  %v3455_v41 = vld [vmem:[%s20880_s3 + $0x240] sm:$0xff] }
 0x35b   :  { %9875 = vmatprep.subr.bf16.mxu1 %v9874_v0  ;;  %v4244_v0 = vld [vmem:[%s20880_s3 + $0x1ae8] sm:$0xff] }
 0x35e   :  { %9877 = vmatpush1.bf16.msra.mxu1 %v9876_v7  ;;  %v9900_v7 = vpack.c.bf16 %v4244_v0, %v4237_v63  ;;  %v4294_v63 = vld [vmem:[%s20880_s3 + $0x1c78] sm:$0xff]  ;;  %v4301_v0 = vld [vmem:[%s20880_s3 + $0x1cb0] sm:$0xff] }
 0x35f   :  { %9879 = vmatprep.subr.bf16.mxu1 %v9878_v51  ;;  %v4251_v51 = vld [vmem:[%s20880_s3 + $0x1b20] sm:$0xff] }
 0x362   :  { %9881 = vmatpush1.bf16.msra.mxu1 %v9880_v19  ;;  %v3385_v19 = vld [vmem:[%s20880_s3 + $0x10] sm:$0xff] }
 0x363   :  { %9883 = vmatprep.subr.bf16.mxu1 %v9882_v50  ;;  %v3392_v50 = vld [vmem:[%s20880_s3 + $0x48] sm:$0xff] }
 0x366   :  { %9885 = vmatpush1.bf16.msra.mxu1 %v9884_v23  ;;  %v9904_v23 = vpack.c.bf16 %v4258_v16, %v4251_v51  ;;  %v4293_v51 = vld [vmem:[%s20880_s3 + $0x1c70] sm:$0xff] }
 0x367   :  { %9887 = vmatprep.subr.bf16.mxu1 %v9886_v43  ;;  %v10048_v43 = vpack.c.bf16 %v3392_v50, %v3385_v19  ;;  %v3434_v50 = vld [vmem:[%s20880_s3 + $0x198] sm:$0xff] }
 0x36a   :  { %9889 = vmatpush1.bf16.msra.mxu1 %v9888_v33  ;;  %v3399_v33 = vld [vmem:[%s20880_s3 + $0x80] sm:$0xff] }
 0x36b   :  { %9891 = vmatprep.subr.bf16.mxu1 %v9890_v34  ;;  %v3406_v34 = vld [vmem:[%s20880_s3 + $0xb8] sm:$0xff] }
 0x36c   :  { %v10052_v46 = vpack.c.bf16 %v3406_v34, %v3399_v33  ;;  %v3448_v33 = vld [vmem:[%s20880_s3 + $0x208] sm:$0xff]  ;;  %v4322_v34 = vld [vmem:[%s20880_s3 + $0x1d58] sm:$0xff] }
 0x36e   :  { %9893 = vmatpush1.bf16.msra.mxu1 %v9892_v18  ;;  %v3421_v18 = vld [vmem:[%s20880_s3 + $0x130] sm:$0xff] }
 0x36f   :  { %9895 = vmatprep.subr.bf16.mxu1 %v9894_v40  ;;  %v10054_v60 = vpack.c.bf16 %v3421_v18, %v3414_v39  ;;  %v10064_v39 = vpack.c.bf16 %v3448_v33, %v3441_v28  ;;  %v9922_v18 = vpack.c.bf16 %v4329_v35, %v4322_v34  ;;  %v3498_v28 = vld [vmem:[%s20880_s3 + $0x398] sm:$0xff] }
 0x370   :  { %v7974_v55 = vpop.f32.mrb[8].mxu0 }
 0x371   :  { %v7975_v1 = vpop.f32.mrb[9].mxu0 }
 0x372   :  { %v7976_v5 = vadd.f32 %v7975_v1, %v7974_v55  ;;  %9897 = vmatpush1.bf16.msra.mxu1 %v9896_v54  ;;  %v4286_v54 = vld [vmem:[%s20880_s3 + $0x1c38] sm:$0xff]  ;;  %v3413_v55 = vld [vmem:[%s20880_s3 + $0xf0] sm:$0xff]  ;;  %v3428_v1 = vld [vmem:[%s20880_s3 + $0x168] sm:$0xff] }
 0x373   :  { %9899 = vmatprep.subr.bf16.mxu1 %v9898_v61  ;;  %v11370_v61 = vadd.f32 %v16127_v12, %v1356_v37  ;;  %v3435_v12 = vld [vmem:[%s20880_s3 + $0x1a0] sm:$0xff]  ;;  %v9912_v42 = vpack.c.bf16 %v4286_v54, %v4279_v45  ;;  %v3456_v37 = vld [vmem:[%s20880_s3 + $0x248] sm:$0xff] }
 0x374   :  { %v3297_v13 = vadd.f32 %v7976_v5, %v16271_v57  ;;  %v4273_v57 = vld [vmem:[%s20880_s3 + $0x1bd0] sm:$0xff]  ;;  %v10056_v5 = vpack.c.bf16 %v3420_v2, %v3413_v55  ;;  %v10058_v19 = vpack.c.bf16 %v3435_v12, %v3428_v1  ;;  %v4336_v45 = vld [vmem:[%s20880_s3 + $0x1dc8] sm:$0xff]  ;;  %v4343_v54 = vld [vmem:[%s20880_s3 + $0x1e00] sm:$0xff] }
 0x375   :  { %v9906_v30 = vpack.c.bf16 %v4273_v57, %v4266_v21  ;;  %v16455_v16 = vmax.f32 %v11370_v61, 0.0  ;;  %v4308_v21 = vld [vmem:[%s20880_s3 + $0x1ce8] sm:$0xff]  ;;  %v4315_v57 = vld [vmem:[%s20880_s3 + $0x1d20] sm:$0xff]  ;;  %v3470_v55 = vld [vmem:[%s20880_s3 + $0x2b8] sm:$0xff] }
 0x376   :  { %v3367_v48 = vadd.f32 %v16269_v6, %v3297_v13  ;;  %9901 = vmatpush1.bf16.msra.mxu1 %v9900_v7  ;;  %v4272_v6 = vld [vmem:[%s20880_s3 + $0x1bc8] sm:$0xff]  ;;  %v9914_v7 = vpack.c.bf16 %v4301_v0, %v4294_v63  ;;  %v3477_v61 = vld [vmem:[%s20880_s3 + $0x2f0] sm:$0xff]  ;;  %v9926_v0 = vpack.c.bf16 %v4343_v54, %v4336_v45  ;;  %v4335_v1 = vld [vmem:[%s20880_s3 + $0x1dc0] sm:$0xff] }
 0x377   :  { %9903 = vmatprep.subr.bf16.mxu1 %v9902_v14  ;;  %v9908_v40 = vpack.c.bf16 %v4272_v6, %v4265_v3  ;;  %v4300_v13 = vld [vmem:[%s20880_s3 + $0x1ca8] sm:$0xff]  ;;  %v3427_v14 = vld [vmem:[%s20880_s3 + $0x160] sm:$0xff]  ;;  %v4314_v6 = vld [vmem:[%s20880_s3 + $0x1d18] sm:$0xff] }
 0x378   :  { %v16393_v29 = vmax.f32 %v3367_v48, 0.0  ;;  %v3442_v48 = vld [vmem:[%s20880_s3 + $0x1d8] sm:$0xff]  ;;  %v9916_v47 = vpack.c.bf16 %v4300_v13, %v4293_v51  ;;  %v4307_v3 = vld [vmem:[%s20880_s3 + $0x1ce0] sm:$0xff]  ;;  %v4357_v13 = vld [vmem:[%s20880_s3 + $0x1e70] sm:$0xff] }
 0x379   :  { %v9920_v38 = vpack.c.bf16 %v4314_v6, %v4307_v3  ;;  %v4342_v12 = vld [vmem:[%s20880_s3 + $0x1df8] sm:$0xff]  ;;  %v4364_v3 = vld [vmem:[%s20880_s3 + $0x1ea8] sm:$0xff]  ;;  %v4371_v6 = vld [vmem:[%s20880_s3 + $0x1ee0] sm:$0xff] }
 0x37a   :  { %7864 = vmatmul.mubr.msk.f32.vlgmr.msra.gmra.mrb[10].mxu0 %vm4792_vm2, %v16393_v29  ;;  %9905 = vmatpush1.bf16.msra.mxu1 %v9904_v23  ;;  %v10060_v23 = vpack.c.bf16 %v3434_v50, %v3427_v14  ;;  %v4350_v51 = vld [vmem:[%s20880_s3 + $0x1e38] sm:$0xff]  ;;  %v3484_v14 = vld [vmem:[%s20880_s3 + $0x328] sm:$0xff]  ;;  %v9928_v50 = vpack.c.bf16 %v4342_v12, %v4335_v1  ;;  %v9934_v35 = vpack.c.bf16 %v4371_v6, %v4364_v3  ;;  %v4399_v12 = vld [vmem:[%s20880_s3 + $0x1fc0] sm:$0xff] }
 0x37b   :  { %10049 = vmatpush1.bf16.msra.mxu0 %v10048_v43  ;;  %5357 = vmatprep.mubr.f32.mxu0 %v15459_v31  ;;  %v9918_v43 = vpack.c.bf16 %v4315_v57, %v4308_v21  ;;  %v9930_v57 = vpack.c.bf16 %v4357_v13, %v4350_v51  ;;  %v4392_v1 = vld [vmem:[%s20880_s3 + $0x1f88] sm:$0xff] }
 0x37c   :  { %9907 = vmatprep.subr.bf16.mxu1 %v9906_v30  ;;  %10051 = vmatprep.subr.bf16.mxu0 %v10050_v26  ;;  %v10062_v30 = vpack.c.bf16 %v3449_v22, %v3442_v48  ;;  %v3463_v26 = vld [vmem:[%s20880_s3 + $0x280] sm:$0xff]  ;;  %v4349_v48 = vld [vmem:[%s20880_s3 + $0x1e30] sm:$0xff]  ;;  %v4356_v22 = vld [vmem:[%s20880_s3 + $0x1e68] sm:$0xff]  ;;  %v9942_v13 = vpack.c.bf16 %v4399_v12, %v4392_v1 }
 0x37d   :  { %v9932_v33 = vpack.c.bf16 %v4356_v22, %v4349_v48  ;;  %v4406_v48 = vld [vmem:[%s20880_s3 + $0x1ff8] sm:$0xff]  ;;  %v4413_v22 = vld [vmem:[%s20880_s3 + $0x2030] sm:$0xff] }
 0x37e   :  { %9909 = vmatpush1.bf16.msra.mxu1 %v9908_v40  ;;  %v4321_v40 = vld [vmem:[%s20880_s3 + $0x1d50] sm:$0xff]  ;;  %v9946_v6 = vpack.c.bf16 %v4413_v22, %v4406_v48 }
 0x37f   :  { %10053 = vmatpush1.bf16.msra.mxu0 %v10052_v46  ;;  %9911 = vmatprep.subr.bf16.mxu1 %v9910_v44  ;;  %v4328_v46 = vld [vmem:[%s20880_s3 + $0x1d88] sm:$0xff]  ;;  %v10066_v44 = vpack.c.bf16 %v3463_v26, %v3456_v37  ;;  %v4363_v37 = vld [vmem:[%s20880_s3 + $0x1ea0] sm:$0xff]  ;;  %v4370_v26 = vld [vmem:[%s20880_s3 + $0x1ed8] sm:$0xff] }
 0x380   :  { %10055 = vmatprep.subr.bf16.mxu0 %v10054_v60  ;;  %v3462_v60 = vld [vmem:[%s20880_s3 + $0x278] sm:$0xff]  ;;  %v9924_v2 = vpack.c.bf16 %v4328_v46, %v4321_v40  ;;  %v4385_v46 = vld [vmem:[%s20880_s3 + $0x1f50] sm:$0xff] }
 0x381   :  { %5074 = vmatmul.mubr.f32.vlgmr.msra.gmra.mrb[10].mxu1 %v16444_v4  ;;  %v10068_v63 = vpack.c.bf16 %v3462_v60, %v3455_v41  ;;  %v4378_v40 = vld [vmem:[%s20880_s3 + $0x1f18] sm:$0xff]  ;;  %v3512_v41 = vld [vmem:[%s20880_s3 + $0x408] sm:$0xff]  ;;  %v9936_v60 = vpack.c.bf16 %v4370_v26, %v4363_v37  ;;  %v4427_v26 = vld [vmem:[%s20880_s3 + $0x20a0] sm:$0xff] }
 0x382   :  { %9913 = vmatpush1.bf16.msra.mxu1 %v9912_v42  ;;  %5144 = vmatprep.mubr.f32.mxu1 %v16455_v16  ;;  %v3469_v42 = vld [vmem:[%s20880_s3 + $0x2b0] sm:$0xff]  ;;  %v9938_v54 = vpack.c.bf16 %v4385_v46, %v4378_v40  ;;  %v4420_v37 = vld [vmem:[%s20880_s3 + $0x2068] sm:$0xff] }
 0x383   :  { %10057 = vmatpush1.bf16.msra.mxu0 %v10056_v5  ;;  %9915 = vmatprep.subr.bf16.mxu1 %v9914_v7  ;;  %v10070_v5 = vpack.c.bf16 %v3477_v61, %v3470_v55  ;;  %v3476_v7 = vld [vmem:[%s20880_s3 + $0x2e8] sm:$0xff]  ;;  %v4377_v55 = vld [vmem:[%s20880_s3 + $0x1f10] sm:$0xff]  ;;  %v9950_v46 = vpack.c.bf16 %v4427_v26, %v4420_v37 }
 0x384   :  { %10059 = vmatprep.subr.bf16.mxu0 %v10058_v19  ;;  %v3491_v19 = vld [vmem:[%s20880_s3 + $0x360] sm:$0xff]  ;;  %v10072_v21 = vpack.c.bf16 %v3476_v7, %v3469_v42  ;;  %v4384_v61 = vld [vmem:[%s20880_s3 + $0x1f48] sm:$0xff]  ;;  %v3526_v42 = vld [vmem:[%s20880_s3 + $0x478] sm:$0xff] }
 0x385   :  { %v9940_v7 = vpack.c.bf16 %v4384_v61, %v4377_v55  ;;  %v4434_v55 = vld [vmem:[%s20880_s3 + $0x20d8] sm:$0xff]  ;;  %v4441_v61 = vld [vmem:[%s20880_s3 + $0x2110] sm:$0xff] }
 0x386   :  { %9917 = vmatpush1.bf16.msra.mxu1 %v9916_v47  ;;  %v3483_v47 = vld [vmem:[%s20880_s3 + $0x320] sm:$0xff]  ;;  %v9954_v12 = vpack.c.bf16 %v4441_v61, %v4434_v55 }
 0x387   :  { %10061 = vmatpush1.bf16.msra.mxu0 %v10060_v23  ;;  %9919 = vmatprep.subr.bf16.mxu1 %v9918_v43  ;;  %v10074_v23 = vpack.c.bf16 %v3491_v19, %v3484_v14  ;;  %v3490_v43 = vld [vmem:[%s20880_s3 + $0x358] sm:$0xff]  ;;  %v4391_v14 = vld [vmem:[%s20880_s3 + $0x1f80] sm:$0xff] }
 0x388   :  { %10063 = vmatprep.subr.bf16.mxu0 %v10062_v30  ;;  %v3505_v30 = vld [vmem:[%s20880_s3 + $0x3d0] sm:$0xff]  ;;  %v10076_v34 = vpack.c.bf16 %v3490_v43, %v3483_v47  ;;  %v4398_v19 = vld [vmem:[%s20880_s3 + $0x1fb8] sm:$0xff]  ;;  %v3540_v47 = vld [vmem:[%s20880_s3 + $0x4e8] sm:$0xff] }
 0x389   :  { %v9944_v43 = vpack.c.bf16 %v4398_v19, %v4391_v14  ;;  %v4448_v14 = vld [vmem:[%s20880_s3 + $0x2148] sm:$0xff]  ;;  %v4455_v19 = vld [vmem:[%s20880_s3 + $0x2180] sm:$0xff] }
 0x38a   :  { %9921 = vmatpush1.bf16.msra.mxu1 %v9920_v38  ;;  %v3497_v38 = vld [vmem:[%s20880_s3 + $0x390] sm:$0xff]  ;;  %v9958_v22 = vpack.c.bf16 %v4455_v19, %v4448_v14 }
 0x38b   :  { %10065 = vmatpush1.bf16.msra.mxu0 %v10064_v39  ;;  %9923 = vmatprep.subr.bf16.mxu1 %v9922_v18  ;;  %v10078_v39 = vpack.c.bf16 %v3505_v30, %v3498_v28  ;;  %v3504_v18 = vld [vmem:[%s20880_s3 + $0x3c8] sm:$0xff]  ;;  %v4405_v28 = vld [vmem:[%s20880_s3 + $0x1ff0] sm:$0xff] }
 0x38c   :  { %10067 = vmatprep.subr.bf16.mxu0 %v10066_v44  ;;  %v3519_v44 = vld [vmem:[%s20880_s3 + $0x440] sm:$0xff]  ;;  %v10080_v45 = vpack.c.bf16 %v3504_v18, %v3497_v38  ;;  %v4412_v30 = vld [vmem:[%s20880_s3 + $0x2028] sm:$0xff]  ;;  %v3554_v38 = vld [vmem:[%s20880_s3 + $0x558] sm:$0xff] }
 0x38d   :  { %v9948_v18 = vpack.c.bf16 %v4412_v30, %v4405_v28  ;;  %v4462_v28 = vld [vmem:[%s20880_s3 + $0x21b8] sm:$0xff]  ;;  %v4469_v30 = vld [vmem:[%s20880_s3 + $0x21f0] sm:$0xff] }
 0x38e   :  { %9925 = vmatpush1.bf16.msra.mxu1 %v9924_v2  ;;  %v3511_v2 = vld [vmem:[%s20880_s3 + $0x400] sm:$0xff]  ;;  %v9962_v26 = vpack.c.bf16 %v4469_v30, %v4462_v28  ;;  %v4489_v19 = vld [vmem:[%s20880_s3 + $0x2290] sm:$0xff] }
 0x38f   :  { %10069 = vmatpush1.bf16.msra.mxu0 %v10068_v63  ;;  %9927 = vmatprep.subr.bf16.mxu1 %v9926_v0  ;;  %v10082_v63 = vpack.c.bf16 %v3519_v44, %v3512_v41  ;;  %v3518_v0 = vld [vmem:[%s20880_s3 + $0x438] sm:$0xff]  ;;  %v4419_v41 = vld [vmem:[%s20880_s3 + $0x2060] sm:$0xff] }
 0x390   :  { %10071 = vmatprep.subr.bf16.mxu0 %v10070_v5  ;;  %v3533_v5 = vld [vmem:[%s20880_s3 + $0x4b0] sm:$0xff]  ;;  %v10084_v51 = vpack.c.bf16 %v3518_v0, %v3511_v2  ;;  %v4426_v44 = vld [vmem:[%s20880_s3 + $0x2098] sm:$0xff]  ;;  %v3568_v2 = vld [vmem:[%s20880_s3 + $0x5c8] sm:$0xff] }
 0x391   :  { %v9952_v0 = vpack.c.bf16 %v4426_v44, %v4419_v41  ;;  %v4476_v41 = vld [vmem:[%s20880_s3 + $0x2228] sm:$0xff]  ;;  %v4483_v44 = vld [vmem:[%s20880_s3 + $0x2260] sm:$0xff] }
 0x392   :  { %9929 = vmatpush1.bf16.msra.mxu1 %v9928_v50  ;;  %v3525_v50 = vld [vmem:[%s20880_s3 + $0x470] sm:$0xff]  ;;  %v9966_v61 = vpack.c.bf16 %v4483_v44, %v4476_v41  ;;  %v16837_v41 = vmax.f32 %v16125_v9, 0.0 }
 0x393   :  { %10073 = vmatpush1.bf16.msra.mxu0 %v10072_v21  ;;  %9931 = vmatprep.subr.bf16.mxu1 %v9930_v57  ;;  %v10086_v21 = vpack.c.bf16 %v3533_v5, %v3526_v42  ;;  %v3532_v57 = vld [vmem:[%s20880_s3 + $0x4a8] sm:$0xff]  ;;  %v4433_v42 = vld [vmem:[%s20880_s3 + $0x20d0] sm:$0xff] }
 0x394   :  { %10075 = vmatprep.subr.bf16.mxu0 %v10074_v23  ;;  %v3547_v23 = vld [vmem:[%s20880_s3 + $0x520] sm:$0xff]  ;;  %v10088_v3 = vpack.c.bf16 %v3532_v57, %v3525_v50  ;;  %v4440_v5 = vld [vmem:[%s20880_s3 + $0x2108] sm:$0xff]  ;;  %v3582_v50 = vld [vmem:[%s20880_s3 + $0x638] sm:$0xff] }
 0x395   :  { %v9956_v57 = vpack.c.bf16 %v4440_v5, %v4433_v42  ;;  %v4490_v42 = vld [vmem:[%s20880_s3 + $0x2298] sm:$0xff]  ;;  %v4497_v5 = vld [vmem:[%s20880_s3 + $0x22d0] sm:$0xff] }
 0x396   :  { %9933 = vmatpush1.bf16.msra.mxu1 %v9932_v33  ;;  %v3539_v33 = vld [vmem:[%s20880_s3 + $0x4e0] sm:$0xff] }
 0x397   :  { %10077 = vmatpush1.bf16.msra.mxu0 %v10076_v34  ;;  %9935 = vmatprep.subr.bf16.mxu1 %v9934_v35  ;;  %v10090_v34 = vpack.c.bf16 %v3547_v23, %v3540_v47  ;;  %v3546_v35 = vld [vmem:[%s20880_s3 + $0x518] sm:$0xff]  ;;  %v4447_v47 = vld [vmem:[%s20880_s3 + $0x2140] sm:$0xff] }
 0x398   :  { %10079 = vmatprep.subr.bf16.mxu0 %v10078_v39  ;;  %v3561_v39 = vld [vmem:[%s20880_s3 + $0x590] sm:$0xff]  ;;  %v10092_v40 = vpack.c.bf16 %v3546_v35, %v3539_v33  ;;  %v4454_v23 = vld [vmem:[%s20880_s3 + $0x2178] sm:$0xff]  ;;  %v3596_v33 = vld [vmem:[%s20880_s3 + $0x6a8] sm:$0xff] }
 0x399   :  { %v9960_v35 = vpack.c.bf16 %v4454_v23, %v4447_v47  ;;  %v4504_v47 = vld [vmem:[%s20880_s3 + $0x2308] sm:$0xff]  ;;  %v4511_v23 = vld [vmem:[%s20880_s3 + $0x2340] sm:$0xff] }
 0x39a   :  { %9937 = vmatpush1.bf16.msra.mxu1 %v9936_v60  ;;  %v3553_v60 = vld [vmem:[%s20880_s3 + $0x550] sm:$0xff]  ;;  %v9974_v30 = vpack.c.bf16 %v4511_v23, %v4504_v47 }
 0x39b   :  { %10081 = vmatpush1.bf16.msra.mxu0 %v10080_v45  ;;  %9939 = vmatprep.subr.bf16.mxu1 %v9938_v54  ;;  %v10094_v45 = vpack.c.bf16 %v3561_v39, %v3554_v38  ;;  %v3560_v54 = vld [vmem:[%s20880_s3 + $0x588] sm:$0xff]  ;;  %v4461_v38 = vld [vmem:[%s20880_s3 + $0x21b0] sm:$0xff] }
 0x39c   :  { %10083 = vmatprep.subr.bf16.mxu0 %v10082_v63  ;;  %v3575_v63 = vld [vmem:[%s20880_s3 + $0x600] sm:$0xff]  ;;  %v10096_v1 = vpack.c.bf16 %v3560_v54, %v3553_v60  ;;  %v4468_v39 = vld [vmem:[%s20880_s3 + $0x21e8] sm:$0xff]  ;;  %v3610_v60 = vld [vmem:[%s20880_s3 + $0x718] sm:$0xff] }
 0x39d   :  { %v9964_v54 = vpack.c.bf16 %v4468_v39, %v4461_v38  ;;  %v4518_v38 = vld [vmem:[%s20880_s3 + $0x2378] sm:$0xff]  ;;  %v4525_v39 = vld [vmem:[%s20880_s3 + $0x23b0] sm:$0xff] }
 0x39e   :  { %9941 = vmatpush1.bf16.msra.mxu1 %v9940_v7  ;;  %v3567_v7 = vld [vmem:[%s20880_s3 + $0x5c0] sm:$0xff] }
 0x39f   :  { %10085 = vmatpush1.bf16.msra.mxu0 %v10084_v51  ;;  %9943 = vmatprep.subr.bf16.mxu1 %v9942_v13  ;;  %v10098_v51 = vpack.c.bf16 %v3575_v63, %v3568_v2  ;;  %v3574_v13 = vld [vmem:[%s20880_s3 + $0x5f8] sm:$0xff]  ;;  %v4475_v2 = vld [vmem:[%s20880_s3 + $0x2220] sm:$0xff] }
 0x3a0   :  { %10087 = vmatprep.subr.bf16.mxu0 %v10086_v21  ;;  %v3589_v21 = vld [vmem:[%s20880_s3 + $0x670] sm:$0xff]  ;;  %v10100_v48 = vpack.c.bf16 %v3574_v13, %v3567_v7  ;;  %v4482_v63 = vld [vmem:[%s20880_s3 + $0x2258] sm:$0xff]  ;;  %v3624_v7 = vld [vmem:[%s20880_s3 + $0x788] sm:$0xff] }
 0x3a1   :  { %v9968_v13 = vpack.c.bf16 %v4482_v63, %v4475_v2  ;;  %v3658_v2 = vld [vmem:[%s20880_s3 + $0x898] sm:$0xff]  ;;  %v4532_v63 = vld [vmem:[%s20880_s3 + $0x23e8] sm:$0xff] }
 0x3a2   :  { %9945 = vmatpush1.bf16.msra.mxu1 %v9944_v43  ;;  %v3581_v43 = vld [vmem:[%s20880_s3 + $0x630] sm:$0xff] }
 0x3a3   :  { %10089 = vmatpush1.bf16.msra.mxu0 %v10088_v3  ;;  %9947 = vmatprep.subr.bf16.mxu1 %v9946_v6  ;;  %v10102_v3 = vpack.c.bf16 %v3589_v21, %v3582_v50  ;;  %v3588_v6 = vld [vmem:[%s20880_s3 + $0x668] sm:$0xff]  ;;  %v3623_v21 = vld [vmem:[%s20880_s3 + $0x780] sm:$0xff] }
 0x3a4   :  { %10091 = vmatprep.subr.bf16.mxu0 %v10090_v34  ;;  %v3603_v34 = vld [vmem:[%s20880_s3 + $0x6e0] sm:$0xff]  ;;  %v10104_v37 = vpack.c.bf16 %v3588_v6, %v3581_v43  ;;  %v4496_v50 = vld [vmem:[%s20880_s3 + $0x22c8] sm:$0xff]  ;;  %v3638_v43 = vld [vmem:[%s20880_s3 + $0x7f8] sm:$0xff] }
 0x3a5   :  { %v9972_v6 = vpack.c.bf16 %v4496_v50, %v4489_v19  ;;  %v3672_v19 = vld [vmem:[%s20880_s3 + $0x908] sm:$0xff]  ;;  %v4546_v50 = vld [vmem:[%s20880_s3 + $0x2458] sm:$0xff] }
 0x3a6   :  { %9949 = vmatpush1.bf16.msra.mxu1 %v9948_v18  ;;  %v3595_v18 = vld [vmem:[%s20880_s3 + $0x6a0] sm:$0xff] }
 0x3a7   :  { %10093 = vmatpush1.bf16.msra.mxu0 %v10092_v40  ;;  %9951 = vmatprep.subr.bf16.mxu1 %v9950_v46  ;;  %v10106_v40 = vpack.c.bf16 %v3603_v34, %v3596_v33  ;;  %v3602_v46 = vld [vmem:[%s20880_s3 + $0x6d8] sm:$0xff]  ;;  %v4503_v33 = vld [vmem:[%s20880_s3 + $0x2300] sm:$0xff] }
 0x3a8   :  { %10095 = vmatprep.subr.bf16.mxu0 %v10094_v45  ;;  %v3617_v45 = vld [vmem:[%s20880_s3 + $0x750] sm:$0xff]  ;;  %v10108_v55 = vpack.c.bf16 %v3602_v46, %v3595_v18  ;;  %v4510_v34 = vld [vmem:[%s20880_s3 + $0x2338] sm:$0xff]  ;;  %v3652_v18 = vld [vmem:[%s20880_s3 + $0x868] sm:$0xff] }
 0x3a9   :  { %v9976_v46 = vpack.c.bf16 %v4510_v34, %v4503_v33  ;;  %v4560_v33 = vld [vmem:[%s20880_s3 + $0x24c8] sm:$0xff]  ;;  %v4567_v34 = vld [vmem:[%s20880_s3 + $0x2500] sm:$0xff] }
 0x3aa   :  { %9953 = vmatpush1.bf16.msra.mxu1 %v9952_v0  ;;  %v10110_v0 = vpack.c.bf16 %v3617_v45, %v3610_v60  ;;  %v9978_v60 = vpack.c.bf16 %v4525_v39, %v4518_v38  ;;  %v4517_v45 = vld [vmem:[%s20880_s3 + $0x2370] sm:$0xff]  ;;  %v9990_v39 = vpack.c.bf16 %v4567_v34, %v4560_v33 }
 0x3ab   :  { %10097 = vmatpush1.bf16.msra.mxu0 %v10096_v1  ;;  %9955 = vmatprep.subr.bf16.mxu1 %v9954_v12  ;;  %v3609_v1 = vld [vmem:[%s20880_s3 + $0x710] sm:$0xff]  ;;  %v3616_v12 = vld [vmem:[%s20880_s3 + $0x748] sm:$0xff] }
 0x3ac   :  { %10099 = vmatprep.subr.bf16.mxu0 %v10098_v51  ;;  %v3631_v51 = vld [vmem:[%s20880_s3 + $0x7c0] sm:$0xff]  ;;  %v10112_v14 = vpack.c.bf16 %v3616_v12, %v3609_v1  ;;  %v3673_v1 = vld [vmem:[%s20880_s3 + $0x910] sm:$0xff] }
 0x3ae   :  { %9957 = vmatpush1.bf16.msra.mxu1 %v9956_v57  ;;  %v9970_v57 = vpack.c.bf16 %v4497_v5, %v4490_v42 }
 0x3af   :  { %10101 = vmatpush1.bf16.msra.mxu0 %v10100_v48  ;;  %9959 = vmatprep.subr.bf16.mxu1 %v9958_v22  ;;  %v10114_v48 = vpack.c.bf16 %v3631_v51, %v3624_v7  ;;  %v3630_v22 = vld [vmem:[%s20880_s3 + $0x7b8] sm:$0xff]  ;;  %v4531_v7 = vld [vmem:[%s20880_s3 + $0x23e0] sm:$0xff] }
 0x3b0   :  { %10103 = vmatprep.subr.bf16.mxu0 %v10102_v3  ;;  %v3645_v3 = vld [vmem:[%s20880_s3 + $0x830] sm:$0xff]  ;;  %v10116_v28 = vpack.c.bf16 %v3630_v22, %v3623_v21  ;;  %v4538_v51 = vld [vmem:[%s20880_s3 + $0x2418] sm:$0xff] }
 0x3b1   :  { %v4553_v21 = vld [vmem:[%s20880_s3 + $0x2490] sm:$0xff]  ;;  %v9984_v22 = vpack.c.bf16 %v4538_v51, %v4531_v7  ;;  %v4588_v7 = vld [vmem:[%s20880_s3 + $0x25a8] sm:$0xff]  ;;  %v4595_v51 = vld [vmem:[%s20880_s3 + $0x25e0] sm:$0xff] }
 0x3b2   :  { %9961 = vmatpush1.bf16.msra.mxu1 %v9960_v35  ;;  %v3637_v35 = vld [vmem:[%s20880_s3 + $0x7f0] sm:$0xff]  ;;  %v9986_v23 = vpack.c.bf16 %v4553_v21, %v4546_v50  ;;  %v9998_v21 = vpack.c.bf16 %v4595_v51, %v4588_v7 }
 0x3b3   :  { %10105 = vmatpush1.bf16.msra.mxu0 %v10104_v37  ;;  %9963 = vmatprep.subr.bf16.mxu1 %v9962_v26  ;;  %v10118_v37 = vpack.c.bf16 %v3645_v3, %v3638_v43  ;;  %v3644_v26 = vld [vmem:[%s20880_s3 + $0x828] sm:$0xff]  ;;  %v4545_v43 = vld [vmem:[%s20880_s3 + $0x2450] sm:$0xff] }
 0x3b4   :  { %10107 = vmatprep.subr.bf16.mxu0 %v10106_v40  ;;  %v3659_v40 = vld [vmem:[%s20880_s3 + $0x8a0] sm:$0xff]  ;;  %v10120_v44 = vpack.c.bf16 %v3644_v26, %v3637_v35  ;;  %v4552_v3 = vld [vmem:[%s20880_s3 + $0x2488] sm:$0xff]  ;;  %v3694_v35 = vld [vmem:[%s20880_s3 + $0x9b8] sm:$0xff] }
 0x3b5   :  { %v10122_v9 = vpack.c.bf16 %v3659_v40, %v3652_v18  ;;  %v9988_v26 = vpack.c.bf16 %v4552_v3, %v4545_v43  ;;  %v4559_v18 = vld [vmem:[%s20880_s3 + $0x24c0] sm:$0xff]  ;;  %v4566_v40 = vld [vmem:[%s20880_s3 + $0x24f8] sm:$0xff]  ;;  %v4609_v3 = vld [vmem:[%s20880_s3 + $0x2650] sm:$0xff] }
 0x3b6   :  { %9965 = vmatpush1.bf16.msra.mxu1 %v9964_v54  ;;  %v4524_v54 = vld [vmem:[%s20880_s3 + $0x23a8] sm:$0xff]  ;;  %v4602_v43 = vld [vmem:[%s20880_s3 + $0x2618] sm:$0xff] }
 0x3b7   :  { %10109 = vmatpush1.bf16.msra.mxu0 %v10108_v55  ;;  %9967 = vmatprep.subr.bf16.mxu1 %v9966_v61  ;;  %v3651_v55 = vld [vmem:[%s20880_s3 + $0x860] sm:$0xff]  ;;  %v16849_v61 = vmax.f32 %v16137_v17, 0.0  ;;  %v3666_v17 = vld [vmem:[%s20880_s3 + $0x8d8] sm:$0xff]  ;;  %v9980_v12 = vpack.c.bf16 %v4524_v54, %v4517_v45  ;;  %v4581_v54 = vld [vmem:[%s20880_s3 + $0x2570] sm:$0xff]  ;;  %v10002_v34 = vpack.c.bf16 %v4609_v3, %v4602_v43 }
 0x3b8   :  { %10111 = vmatprep.subr.bf16.mxu0 %v10110_v0  ;;  %v4539_v0 = vld [vmem:[%s20880_s3 + $0x2420] sm:$0xff]  ;;  %v10124_v42 = vpack.c.bf16 %v3658_v2, %v3651_v55  ;;  %v4574_v45 = vld [vmem:[%s20880_s3 + $0x2538] sm:$0xff]  ;;  %v3708_v55 = vld [vmem:[%s20880_s3 + $0xa28] sm:$0xff]  ;;  %v9992_v2 = vpack.c.bf16 %v4566_v40, %v4559_v18 }
 0x3b9   :  { %v9982_v5 = vpack.c.bf16 %v4539_v0, %v4532_v63  ;;  %v9994_v0 = vpack.c.bf16 %v4581_v54, %v4574_v45  ;;  %v4616_v18 = vld [vmem:[%s20880_s3 + $0x2688] sm:$0xff]  ;;  %v4623_v40 = vld [vmem:[%s20880_s3 + $0x26c0] sm:$0xff] }
 0x3ba   :  { %5358 = vmatmul.mubr.f32.vlgmr.msra.gmra.mrb[12].mxu0 %v15719_v62  ;;  %9969 = vmatpush1.bf16.msra.mxu1 %v9968_v13  ;;  %v3665_v13 = vld [vmem:[%s20880_s3 + $0x8d0] sm:$0xff]  ;;  %v10006_v54 = vpack.c.bf16 %v4623_v40, %v4616_v18 }
 0x3bb   :  { %10113 = vmatpush1.bf16.msra.mxu0 %v10112_v14  ;;  %5428 = vmatprep.mubr.f32.mxu0 %v15727_v8  ;;  %v10126_v14 = vpack.c.bf16 %v3673_v1, %v3666_v17  ;;  %v10128_v47 = vpack.c.bf16 %v3672_v19, %v3665_v13  ;;  %v4573_v17 = vld [vmem:[%s20880_s3 + $0x2530] sm:$0xff]  ;;  %v4580_v1 = vld [vmem:[%s20880_s3 + $0x2568] sm:$0xff]  ;;  %v3722_v13 = vld [vmem:[%s20880_s3 + $0xa98] sm:$0xff] }
 0x3bc   :  { %9971 = vmatprep.subr.bf16.mxu1 %v9970_v57  ;;  %10115 = vmatprep.subr.bf16.mxu0 %v10114_v48  ;;  %v3680_v57 = vld [vmem:[%s20880_s3 + $0x948] sm:$0xff]  ;;  %v3687_v48 = vld [vmem:[%s20880_s3 + $0x980] sm:$0xff]  ;;  %v9996_v19 = vpack.c.bf16 %v4580_v1, %v4573_v17  ;;  %v4630_v17 = vld [vmem:[%s20880_s3 + $0x26f8] sm:$0xff] }
 0x3bd   :  { %v4637_v1 = vld [vmem:[%s20880_s3 + $0x2730] sm:$0xff] }
 0x3be   :  { %9973 = vmatpush1.bf16.msra.mxu1 %v9972_v6  ;;  %v3679_v6 = vld [vmem:[%s20880_s3 + $0x940] sm:$0xff]  ;;  %v10010_v51 = vpack.c.bf16 %v4637_v1, %v4630_v17 }
 0x3bf   :  { %10117 = vmatpush1.bf16.msra.mxu0 %v10116_v28  ;;  %9975 = vmatprep.subr.bf16.mxu1 %v9974_v30  ;;  %v10130_v28 = vpack.c.bf16 %v3687_v48, %v3680_v57  ;;  %v3686_v30 = vld [vmem:[%s20880_s3 + $0x978] sm:$0xff]  ;;  %v4587_v57 = vld [vmem:[%s20880_s3 + $0x25a0] sm:$0xff] }
 0x3c0   :  { %10119 = vmatprep.subr.bf16.mxu0 %v10118_v37  ;;  %v3701_v37 = vld [vmem:[%s20880_s3 + $0x9f0] sm:$0xff]  ;;  %v10132_v38 = vpack.c.bf16 %v3686_v30, %v3679_v6  ;;  %v4594_v48 = vld [vmem:[%s20880_s3 + $0x25d8] sm:$0xff]  ;;  %v3736_v6 = vld [vmem:[%s20880_s3 + $0xb08] sm:$0xff] }
 0x3c1   :  { %5145 = vmatmul.mubr.f32.vlgmr.msra.gmra.mrb[10].mxu1 %v16837_v41  ;;  %v10000_v30 = vpack.c.bf16 %v4594_v48, %v4587_v57  ;;  %v4644_v57 = vld [vmem:[%s20880_s3 + $0x2768] sm:$0xff]  ;;  %v4651_v48 = vld [vmem:[%s20880_s3 + $0x27a0] sm:$0xff] }
 0x3c2   :  { %9977 = vmatpush1.bf16.msra.mxu1 %v9976_v46  ;;  %5215 = vmatprep.mubr.f32.mxu1 %v16849_v61  ;;  %v3693_v46 = vld [vmem:[%s20880_s3 + $0x9b0] sm:$0xff]  ;;  %v10014_v3 = vpack.c.bf16 %v4651_v48, %v4644_v57 }
 0x3c3   :  { %10121 = vmatpush1.bf16.msra.mxu0 %v10120_v44  ;;  %9979 = vmatprep.subr.bf16.mxu1 %v9978_v60  ;;  %v10134_v44 = vpack.c.bf16 %v3701_v37, %v3694_v35  ;;  %v3700_v60 = vld [vmem:[%s20880_s3 + $0x9e8] sm:$0xff]  ;;  %v4601_v35 = vld [vmem:[%s20880_s3 + $0x2610] sm:$0xff] }
 0x3c4   :  { %10123 = vmatprep.subr.bf16.mxu0 %v10122_v9  ;;  %v3715_v9 = vld [vmem:[%s20880_s3 + $0xa60] sm:$0xff]  ;;  %v10136_v63 = vpack.c.bf16 %v3700_v60, %v3693_v46  ;;  %v4608_v37 = vld [vmem:[%s20880_s3 + $0x2648] sm:$0xff]  ;;  %v3750_v46 = vld [vmem:[%s20880_s3 + $0xb78] sm:$0xff] }
 0x3c5   :  { %v10004_v60 = vpack.c.bf16 %v4608_v37, %v4601_v35  ;;  %v4658_v35 = vld [vmem:[%s20880_s3 + $0x27d8] sm:$0xff]  ;;  %v4665_v37 = vld [vmem:[%s20880_s3 + $0x2810] sm:$0xff] }
 0x3c6   :  { %9981 = vmatpush1.bf16.msra.mxu1 %v9980_v12  ;;  %v3707_v12 = vld [vmem:[%s20880_s3 + $0xa20] sm:$0xff]  ;;  %v10018_v40 = vpack.c.bf16 %v4665_v37, %v4658_v35 }
 0x3c7   :  { %10125 = vmatpush1.bf16.msra.mxu0 %v10124_v42  ;;  %9983 = vmatprep.subr.bf16.mxu1 %v9982_v5  ;;  %v10138_v42 = vpack.c.bf16 %v3715_v9, %v3708_v55  ;;  %v3714_v5 = vld [vmem:[%s20880_s3 + $0xa58] sm:$0xff]  ;;  %v4615_v55 = vld [vmem:[%s20880_s3 + $0x2680] sm:$0xff] }
 0x3c8   :  { %10127 = vmatprep.subr.bf16.mxu0 %v10126_v14  ;;  %v3729_v14 = vld [vmem:[%s20880_s3 + $0xad0] sm:$0xff]  ;;  %v10140_v50 = vpack.c.bf16 %v3714_v5, %v3707_v12  ;;  %v4622_v9 = vld [vmem:[%s20880_s3 + $0x26b8] sm:$0xff]  ;;  %v3764_v12 = vld [vmem:[%s20880_s3 + $0xbe8] sm:$0xff] }
 0x3c9   :  { %v10008_v5 = vpack.c.bf16 %v4622_v9, %v4615_v55  ;;  %v4672_v55 = vld [vmem:[%s20880_s3 + $0x2848] sm:$0xff]  ;;  %v4679_v9 = vld [vmem:[%s20880_s3 + $0x2880] sm:$0xff] }
 0x3ca   :  { %9985 = vmatpush1.bf16.msra.mxu1 %v9984_v22  ;;  %v3721_v22 = vld [vmem:[%s20880_s3 + $0xa90] sm:$0xff]  ;;  %v10022_v1 = vpack.c.bf16 %v4679_v9, %v4672_v55 }
 0x3cb   :  { %10129 = vmatpush1.bf16.msra.mxu0 %v10128_v47  ;;  %9987 = vmatprep.subr.bf16.mxu1 %v9986_v23  ;;  %v10142_v47 = vpack.c.bf16 %v3729_v14, %v3722_v13  ;;  %v3728_v23 = vld [vmem:[%s20880_s3 + $0xac8] sm:$0xff]  ;;  %v4629_v13 = vld [vmem:[%s20880_s3 + $0x26f0] sm:$0xff] }
 0x3cc   :  { %10131 = vmatprep.subr.bf16.mxu0 %v10130_v28  ;;  %v3743_v28 = vld [vmem:[%s20880_s3 + $0xb40] sm:$0xff]  ;;  %v10144_v33 = vpack.c.bf16 %v3728_v23, %v3721_v22  ;;  %v4636_v14 = vld [vmem:[%s20880_s3 + $0x2728] sm:$0xff]  ;;  %v3778_v22 = vld [vmem:[%s20880_s3 + $0xc58] sm:$0xff] }
 0x3cd   :  { %v10012_v23 = vpack.c.bf16 %v4636_v14, %v4629_v13  ;;  %v4686_v13 = vld [vmem:[%s20880_s3 + $0x28b8] sm:$0xff]  ;;  %v4693_v14 = vld [vmem:[%s20880_s3 + $0x28f0] sm:$0xff] }
 0x3ce   :  { %9989 = vmatpush1.bf16.msra.mxu1 %v9988_v26  ;;  %v3735_v26 = vld [vmem:[%s20880_s3 + $0xb00] sm:$0xff]  ;;  %v10026_v48 = vpack.c.bf16 %v4693_v14, %v4686_v13  ;;  %v4713_v9 = vld [vmem:[%s20880_s3 + $0x2990] sm:$0xff] }
 0x3cf   :  { %10133 = vmatpush1.bf16.msra.mxu0 %v10132_v38  ;;  %9991 = vmatprep.subr.bf16.mxu1 %v9990_v39  ;;  %v10146_v38 = vpack.c.bf16 %v3743_v28, %v3736_v6  ;;  %v3742_v39 = vld [vmem:[%s20880_s3 + $0xb38] sm:$0xff]  ;;  %v4643_v6 = vld [vmem:[%s20880_s3 + $0x2760] sm:$0xff] }
 0x3d0   :  { %10135 = vmatprep.subr.bf16.mxu0 %v10134_v44  ;;  %v3757_v44 = vld [vmem:[%s20880_s3 + $0xbb0] sm:$0xff]  ;;  %v10148_v45 = vpack.c.bf16 %v3742_v39, %v3735_v26  ;;  %v4650_v28 = vld [vmem:[%s20880_s3 + $0x2798] sm:$0xff]  ;;  %v3792_v26 = vld [vmem:[%s20880_s3 + $0xcc8] sm:$0xff] }
 0x3d1   :  { %v10016_v39 = vpack.c.bf16 %v4650_v28, %v4643_v6  ;;  %v4700_v6 = vld [vmem:[%s20880_s3 + $0x2928] sm:$0xff]  ;;  %v4707_v28 = vld [vmem:[%s20880_s3 + $0x2960] sm:$0xff] }
 0x3d2   :  { %9993 = vmatpush1.bf16.msra.mxu1 %v9992_v2  ;;  %v3749_v2 = vld [vmem:[%s20880_s3 + $0xb70] sm:$0xff]  ;;  %v10030_v37 = vpack.c.bf16 %v4707_v28, %v4700_v6  ;;  %v17231_v6 = vmax.f32 %v16135_v15, 0.0  ;;  %v3882_v15 = vld [vmem:[%s20880_s3 + $0xf98] sm:$0xff] }
 0x3d3   :  { %10137 = vmatpush1.bf16.msra.mxu0 %v10136_v63  ;;  %9995 = vmatprep.subr.bf16.mxu1 %v9994_v0  ;;  %v10150_v63 = vpack.c.bf16 %v3757_v44, %v3750_v46  ;;  %v3756_v0 = vld [vmem:[%s20880_s3 + $0xba8] sm:$0xff]  ;;  %v4657_v46 = vld [vmem:[%s20880_s3 + $0x27d0] sm:$0xff] }
 0x3d4   :  { %10139 = vmatprep.subr.bf16.mxu0 %v10138_v42  ;;  %v3771_v42 = vld [vmem:[%s20880_s3 + $0xc20] sm:$0xff]  ;;  %v10152_v7 = vpack.c.bf16 %v3756_v0, %v3749_v2  ;;  %v4664_v44 = vld [vmem:[%s20880_s3 + $0x2808] sm:$0xff]  ;;  %v3806_v2 = vld [vmem:[%s20880_s3 + $0xd38] sm:$0xff] }
 0x3d5   :  { %v10020_v0 = vpack.c.bf16 %v4664_v44, %v4657_v46  ;;  %v4714_v46 = vld [vmem:[%s20880_s3 + $0x2998] sm:$0xff]  ;;  %v4721_v44 = vld [vmem:[%s20880_s3 + $0x29d0] sm:$0xff] }
 0x3d6   :  { %9997 = vmatpush1.bf16.msra.mxu1 %v9996_v19  ;;  %v3763_v19 = vld [vmem:[%s20880_s3 + $0xbe0] sm:$0xff] }
 0x3d7   :  { %10141 = vmatpush1.bf16.msra.mxu0 %v10140_v50  ;;  %9999 = vmatprep.subr.bf16.mxu1 %v9998_v21  ;;  %v10154_v50 = vpack.c.bf16 %v3771_v42, %v3764_v12  ;;  %v3770_v21 = vld [vmem:[%s20880_s3 + $0xc18] sm:$0xff]  ;;  %v4671_v12 = vld [vmem:[%s20880_s3 + $0x2840] sm:$0xff] }
 0x3d8   :  { %10143 = vmatprep.subr.bf16.mxu0 %v10142_v47  ;;  %v3785_v47 = vld [vmem:[%s20880_s3 + $0xc90] sm:$0xff]  ;;  %v10156_v43 = vpack.c.bf16 %v3770_v21, %v3763_v19  ;;  %v4678_v42 = vld [vmem:[%s20880_s3 + $0x2878] sm:$0xff]  ;;  %v3820_v19 = vld [vmem:[%s20880_s3 + $0xda8] sm:$0xff] }
 0x3d9   :  { %v10024_v21 = vpack.c.bf16 %v4678_v42, %v4671_v12  ;;  %v3388_v12 = vld [vmem:[%s20880_s3 + $0x28] sm:$0xff]  ;;  %v3395_v42 = vld [vmem:[%s20880_s3 + $0x60] sm:$0xff] }
 0x3da   :  { %10001 = vmatpush1.bf16.msra.mxu1 %v10000_v30  ;;  %v3777_v30 = vld [vmem:[%s20880_s3 + $0xc50] sm:$0xff]  ;;  %v10438_v14 = vpack.c.bf16 %v3395_v42, %v3388_v12 }
 0x3db   :  { %10145 = vmatpush1.bf16.msra.mxu0 %v10144_v33  ;;  %10003 = vmatprep.subr.bf16.mxu1 %v10002_v34  ;;  %v10158_v33 = vpack.c.bf16 %v3785_v47, %v3778_v22  ;;  %v3784_v34 = vld [vmem:[%s20880_s3 + $0xc88] sm:$0xff]  ;;  %v4685_v22 = vld [vmem:[%s20880_s3 + $0x28b0] sm:$0xff] }
 0x3dc   :  { %10147 = vmatprep.subr.bf16.mxu0 %v10146_v38  ;;  %v3799_v38 = vld [vmem:[%s20880_s3 + $0xd00] sm:$0xff]  ;;  %v10160_v18 = vpack.c.bf16 %v3784_v34, %v3777_v30  ;;  %v4692_v47 = vld [vmem:[%s20880_s3 + $0x28e8] sm:$0xff]  ;;  %v3834_v30 = vld [vmem:[%s20880_s3 + $0xe18] sm:$0xff] }
 0x3dd   :  { %v10028_v34 = vpack.c.bf16 %v4692_v47, %v4685_v22  ;;  %v3402_v22 = vld [vmem:[%s20880_s3 + $0x98] sm:$0xff]  ;;  %v3409_v47 = vld [vmem:[%s20880_s3 + $0xd0] sm:$0xff] }
 0x3de   :  { %10005 = vmatpush1.bf16.msra.mxu1 %v10004_v60  ;;  %v3791_v60 = vld [vmem:[%s20880_s3 + $0xcc0] sm:$0xff] }
 0x3df   :  { %10149 = vmatpush1.bf16.msra.mxu0 %v10148_v45  ;;  %10007 = vmatprep.subr.bf16.mxu1 %v10006_v54  ;;  %v10162_v45 = vpack.c.bf16 %v3799_v38, %v3792_v26  ;;  %v3798_v54 = vld [vmem:[%s20880_s3 + $0xcf8] sm:$0xff]  ;;  %v4699_v26 = vld [vmem:[%s20880_s3 + $0x2920] sm:$0xff] }
 0x3e0   :  { %10151 = vmatprep.subr.bf16.mxu0 %v10150_v63  ;;  %v3813_v63 = vld [vmem:[%s20880_s3 + $0xd70] sm:$0xff]  ;;  %v10164_v17 = vpack.c.bf16 %v3798_v54, %v3791_v60  ;;  %v4706_v38 = vld [vmem:[%s20880_s3 + $0x2958] sm:$0xff]  ;;  %v3848_v60 = vld [vmem:[%s20880_s3 + $0xe88] sm:$0xff] }
 0x3e1   :  { %v10032_v54 = vpack.c.bf16 %v4706_v38, %v4699_v26  ;;  %v3416_v26 = vld [vmem:[%s20880_s3 + $0x108] sm:$0xff]  ;;  %v3423_v38 = vld [vmem:[%s20880_s3 + $0x140] sm:$0xff] }
 0x3e2   :  { %10009 = vmatpush1.bf16.msra.mxu1 %v10008_v5  ;;  %v3805_v5 = vld [vmem:[%s20880_s3 + $0xd30] sm:$0xff] }
 0x3e3   :  { %10153 = vmatpush1.bf16.msra.mxu0 %v10152_v7  ;;  %10011 = vmatprep.subr.bf16.mxu1 %v10010_v51  ;;  %v10166_v7 = vpack.c.bf16 %v3813_v63, %v3806_v2  ;;  %v3812_v51 = vld [vmem:[%s20880_s3 + $0xd68] sm:$0xff]  ;;  %v3847_v63 = vld [vmem:[%s20880_s3 + $0xe80] sm:$0xff] }
 0x3e4   :  { %10155 = vmatprep.subr.bf16.mxu0 %v10154_v50  ;;  %v3827_v50 = vld [vmem:[%s20880_s3 + $0xde0] sm:$0xff]  ;;  %v10168_v57 = vpack.c.bf16 %v3812_v51, %v3805_v5  ;;  %v4720_v2 = vld [vmem:[%s20880_s3 + $0x29c8] sm:$0xff]  ;;  %v3862_v5 = vld [vmem:[%s20880_s3 + $0xef8] sm:$0xff] }
 0x3e5   :  { %v10036_v51 = vpack.c.bf16 %v4720_v2, %v4713_v9  ;;  %v3896_v9 = vld [vmem:[%s20880_s3 + $0x1008] sm:$0xff]  ;;  %v3430_v2 = vld [vmem:[%s20880_s3 + $0x178] sm:$0xff] }
 0x3e6   :  { %10013 = vmatpush1.bf16.msra.mxu1 %v10012_v23  ;;  %v3819_v23 = vld [vmem:[%s20880_s3 + $0xda0] sm:$0xff] }
 0x3e7   :  { %10157 = vmatpush1.bf16.msra.mxu0 %v10156_v43  ;;  %10015 = vmatprep.subr.bf16.mxu1 %v10014_v3  ;;  %v10170_v43 = vpack.c.bf16 %v3827_v50, %v3820_v19  ;;  %v3826_v3 = vld [vmem:[%s20880_s3 + $0xdd8] sm:$0xff]  ;;  %v3861_v19 = vld [vmem:[%s20880_s3 + $0xef0] sm:$0xff]  ;;  %v3387_v50 = vld [vmem:[%s20880_s3 + $0x20] sm:$0xff] }
 0x3e8   :  { %10159 = vmatprep.subr.bf16.mxu0 %v10158_v33  ;;  %v3841_v33 = vld [vmem:[%s20880_s3 + $0xe50] sm:$0xff]  ;;  %v10172_v35 = vpack.c.bf16 %v3826_v3, %v3819_v23  ;;  %v3876_v23 = vld [vmem:[%s20880_s3 + $0xf68] sm:$0xff] }
 0x3ea   :  { %10017 = vmatpush1.bf16.msra.mxu1 %v10016_v39  ;;  %v10174_v39 = vpack.c.bf16 %v3841_v33, %v3834_v30  ;;  %v10442_v30 = vpack.c.bf16 %v3409_v47, %v3402_v22  ;;  %v3875_v33 = vld [vmem:[%s20880_s3 + $0xf60] sm:$0xff] }
 0x3eb   :  { %10161 = vmatpush1.bf16.msra.mxu0 %v10160_v18  ;;  %10019 = vmatprep.subr.bf16.mxu1 %v10018_v40  ;;  %v3833_v18 = vld [vmem:[%s20880_s3 + $0xe10] sm:$0xff]  ;;  %v3840_v40 = vld [vmem:[%s20880_s3 + $0xe48] sm:$0xff] }
 0x3ec   :  { %10163 = vmatprep.subr.bf16.mxu0 %v10162_v45  ;;  %v3855_v45 = vld [vmem:[%s20880_s3 + $0xec0] sm:$0xff]  ;;  %v10176_v55 = vpack.c.bf16 %v3840_v40, %v3833_v18  ;;  %v3897_v18 = vld [vmem:[%s20880_s3 + $0x1010] sm:$0xff] }
 0x3ee   :  { %10021 = vmatpush1.bf16.msra.mxu1 %v10020_v0  ;;  %v10034_v0 = vpack.c.bf16 %v4721_v44, %v4714_v46  ;;  %v10188_v46 = vpack.c.bf16 %v3882_v15, %v3875_v33  ;;  %v10446_v44 = vpack.c.bf16 %v3423_v38, %v3416_v26  ;;  %v3458_v33 = vld [vmem:[%s20880_s3 + $0x258] sm:$0xff] }
 0x3ef   :  { %10165 = vmatpush1.bf16.msra.mxu0 %v10164_v17  ;;  %10023 = vmatprep.subr.bf16.mxu1 %v10022_v1  ;;  %v10178_v17 = vpack.c.bf16 %v3855_v45, %v3848_v60  ;;  %v3854_v1 = vld [vmem:[%s20880_s3 + $0xeb8] sm:$0xff]  ;;  %v3889_v60 = vld [vmem:[%s20880_s3 + $0xfd0] sm:$0xff]  ;;  %v3415_v45 = vld [vmem:[%s20880_s3 + $0x100] sm:$0xff] }
 0x3f0   :  { %10167 = vmatprep.subr.bf16.mxu0 %v10166_v7  ;;  %v3869_v7 = vld [vmem:[%s20880_s3 + $0xf30] sm:$0xff]  ;;  %v10180_v13 = vpack.c.bf16 %v3854_v1, %v3847_v63  ;;  %v10192_v12 = vpack.c.bf16 %v3896_v9, %v3889_v60  ;;  %v3472_v60 = vld [vmem:[%s20880_s3 + $0x2c8] sm:$0xff] }
 0x3f1   :  { %v3437_v63 = vld [vmem:[%s20880_s3 + $0x1b0] sm:$0xff] }
 0x3f2   :  { %10025 = vmatpush1.bf16.msra.mxu1 %v10024_v21  ;;  %v3394_v21 = vld [vmem:[%s20880_s3 + $0x58] sm:$0xff]  ;;  %v10450_v42 = vpack.c.bf16 %v3437_v63, %v3430_v2 }
 0x3f3   :  { %10169 = vmatpush1.bf16.msra.mxu0 %v10168_v57  ;;  %10027 = vmatprep.subr.bf16.mxu1 %v10026_v48  ;;  %v10182_v57 = vpack.c.bf16 %v3869_v7, %v3862_v5  ;;  %v3868_v48 = vld [vmem:[%s20880_s3 + $0xf28] sm:$0xff]  ;;  %v10440_v3 = vpack.c.bf16 %v3394_v21, %v3387_v50  ;;  %v3903_v5 = vld [vmem:[%s20880_s3 + $0x1040] sm:$0xff]  ;;  %v3429_v7 = vld [vmem:[%s20880_s3 + $0x170] sm:$0xff] }
 0x3f4   :  { %10171 = vmatprep.subr.bf16.mxu0 %v10170_v43  ;;  %v3883_v43 = vld [vmem:[%s20880_s3 + $0xfa0] sm:$0xff]  ;;  %v10184_v28 = vpack.c.bf16 %v3868_v48, %v3861_v19  ;;  %v3444_v19 = vld [vmem:[%s20880_s3 + $0x1e8] sm:$0xff]  ;;  %v3918_v21 = vld [vmem:[%s20880_s3 + $0x10b8] sm:$0xff] }
 0x3f5   :  { %v3451_v50 = vld [vmem:[%s20880_s3 + $0x220] sm:$0xff] }
 0x3f6   :  { %10029 = vmatpush1.bf16.msra.mxu1 %v10028_v34  ;;  %v3401_v34 = vld [vmem:[%s20880_s3 + $0x90] sm:$0xff]  ;;  %v10454_v47 = vpack.c.bf16 %v3451_v50, %v3444_v19 }
 0x3f7   :  { %10173 = vmatpush1.bf16.msra.mxu0 %v10172_v35  ;;  %10031 = vmatprep.subr.bf16.mxu1 %v10030_v37  ;;  %v3408_v35 = vld [vmem:[%s20880_s3 + $0xc8] sm:$0xff]  ;;  %v10186_v37 = vpack.c.bf16 %v3883_v43, %v3876_v23  ;;  %v3917_v23 = vld [vmem:[%s20880_s3 + $0x10b0] sm:$0xff]  ;;  %v3443_v43 = vld [vmem:[%s20880_s3 + $0x1e0] sm:$0xff] }
 0x3f8   :  { %10175 = vmatprep.subr.bf16.mxu0 %v10174_v39  ;;  %v3890_v39 = vld [vmem:[%s20880_s3 + $0xfd8] sm:$0xff]  ;;  %v10444_v40 = vpack.c.bf16 %v3408_v35, %v3401_v34  ;;  %v3465_v34 = vld [vmem:[%s20880_s3 + $0x290] sm:$0xff]  ;;  %v3932_v35 = vld [vmem:[%s20880_s3 + $0x1128] sm:$0xff] }
 0x3f9   :  { %v10458_v38 = vpack.c.bf16 %v3465_v34, %v3458_v33 }
 0x3fa   :  { %5429 = vmatmul.mubr.f32.vlgmr.msra.gmra.mrb[12].mxu0 %v15958_v25  ;;  %10033 = vmatpush1.bf16.msra.mxu1 %v10032_v54  ;;  %v3422_v54 = vld [vmem:[%s20880_s3 + $0x138] sm:$0xff] }
 0x3fb   :  { %10177 = vmatpush1.bf16.msra.mxu0 %v10176_v55  ;;  %5499 = vmatprep.mubr.f32.mxu0 %v15966_v27  ;;  %v10190_v55 = vpack.c.bf16 %v3897_v18, %v3890_v39  ;;  %v10448_v1 = vpack.c.bf16 %v3422_v54, %v3415_v45  ;;  %v3931_v39 = vld [vmem:[%s20880_s3 + $0x1120] sm:$0xff]  ;;  %v3457_v18 = vld [vmem:[%s20880_s3 + $0x250] sm:$0xff]  ;;  %v3946_v54 = vld [vmem:[%s20880_s3 + $0x1198] sm:$0xff] }
 0x3fc   :  { %10035 = vmatprep.subr.bf16.mxu1 %v10034_v0  ;;  %10179 = vmatprep.subr.bf16.mxu0 %v10178_v17  ;;  %v3904_v0 = vld [vmem:[%s20880_s3 + $0x1048] sm:$0xff]  ;;  %v3911_v17 = vld [vmem:[%s20880_s3 + $0x1080] sm:$0xff] }
 0x3fd   :  { %v3479_v45 = vld [vmem:[%s20880_s3 + $0x300] sm:$0xff] }
 0x3fe   :  { %10037 = vmatpush1.bf16.msra.mxu1 %v10036_v51  ;;  %v3436_v51 = vld [vmem:[%s20880_s3 + $0x1a8] sm:$0xff]  ;;  %v10462_v63 = vpack.c.bf16 %v3479_v45, %v3472_v60 }
 0x3ff   :  { %10181 = vmatpush1.bf16.msra.mxu0 %v10180_v13  ;;  %10439 = vmatprep.subr.bf16.mxu1 %v10438_v14  ;;  %v10194_v13 = vpack.c.bf16 %v3911_v17, %v3904_v0  ;;  %v3910_v14 = vld [vmem:[%s20880_s3 + $0x1078] sm:$0xff]  ;;  %v10452_v48 = vpack.c.bf16 %v3436_v51, %v3429_v7  ;;  %v3945_v0 = vld [vmem:[%s20880_s3 + $0x1190] sm:$0xff]  ;;  %v3471_v17 = vld [vmem:[%s20880_s3 + $0x2c0] sm:$0xff] }
 0x400   :  { %10183 = vmatprep.subr.bf16.mxu0 %v10182_v57  ;;  %v3925_v57 = vld [vmem:[%s20880_s3 + $0x10f0] sm:$0xff]  ;;  %v10196_v22 = vpack.c.bf16 %v3910_v14, %v3903_v5  ;;  %v3486_v5 = vld [vmem:[%s20880_s3 + $0x338] sm:$0xff]  ;;  %v3960_v51 = vld [vmem:[%s20880_s3 + $0x1208] sm:$0xff] }
 0x401   :  { %5216 = vmatmul.mubr.f32.vlgmr.msra.gmra.mrb[10].mxu1 %v17231_v6  ;;  %v3493_v7 = vld [vmem:[%s20880_s3 + $0x370] sm:$0xff] }
 0x402   :  { %10441 = vmatpush1.bf16.msra.mxu1 %v10440_v3  ;;  %5854 = vmatprep.mubr.f32.mxu1 %v15459_v31  ;;  %v3450_v3 = vld [vmem:[%s20880_s3 + $0x218] sm:$0xff]  ;;  %v10466_v50 = vpack.c.bf16 %v3493_v7, %v3486_v5 }
 0x403   :  { %10185 = vmatpush1.bf16.msra.mxu0 %v10184_v28  ;;  %10443 = vmatprep.subr.bf16.mxu1 %v10442_v30  ;;  %v10198_v28 = vpack.c.bf16 %v3925_v57, %v3918_v21  ;;  %v3924_v30 = vld [vmem:[%s20880_s3 + $0x10e8] sm:$0xff]  ;;  %v10456_v15 = vpack.c.bf16 %v3450_v3, %v3443_v43  ;;  %v3959_v21 = vld [vmem:[%s20880_s3 + $0x1200] sm:$0xff]  ;;  %v3485_v57 = vld [vmem:[%s20880_s3 + $0x330] sm:$0xff] }
 0x404   :  { %10187 = vmatprep.subr.bf16.mxu0 %v10186_v37  ;;  %v3939_v37 = vld [vmem:[%s20880_s3 + $0x1160] sm:$0xff]  ;;  %v10200_v26 = vpack.c.bf16 %v3924_v30, %v3917_v23  ;;  %v3500_v23 = vld [vmem:[%s20880_s3 + $0x3a8] sm:$0xff]  ;;  %v3974_v3 = vld [vmem:[%s20880_s3 + $0x1278] sm:$0xff] }
 0x405   :  { %v3507_v43 = vld [vmem:[%s20880_s3 + $0x3e0] sm:$0xff] }
 0x406   :  { %10445 = vmatpush1.bf16.msra.mxu1 %v10444_v40  ;;  %v3464_v40 = vld [vmem:[%s20880_s3 + $0x288] sm:$0xff]  ;;  %v10470_v34 = vpack.c.bf16 %v3507_v43, %v3500_v23 }
 0x407   :  { %10189 = vmatpush1.bf16.msra.mxu0 %v10188_v46  ;;  %10447 = vmatprep.subr.bf16.mxu1 %v10446_v44  ;;  %v10202_v46 = vpack.c.bf16 %v3939_v37, %v3932_v35  ;;  %v3938_v44 = vld [vmem:[%s20880_s3 + $0x1158] sm:$0xff]  ;;  %v10460_v9 = vpack.c.bf16 %v3464_v40, %v3457_v18  ;;  %v3973_v35 = vld [vmem:[%s20880_s3 + $0x1270] sm:$0xff]  ;;  %v3499_v37 = vld [vmem:[%s20880_s3 + $0x3a0] sm:$0xff] }
 0x408   :  { %10191 = vmatprep.subr.bf16.mxu0 %v10190_v55  ;;  %v3953_v55 = vld [vmem:[%s20880_s3 + $0x11d0] sm:$0xff]  ;;  %v10204_v2 = vpack.c.bf16 %v3938_v44, %v3931_v39  ;;  %v3514_v39 = vld [vmem:[%s20880_s3 + $0x418] sm:$0xff]  ;;  %v3988_v40 = vld [vmem:[%s20880_s3 + $0x12e8] sm:$0xff] }
 0x409   :  { %v3521_v18 = vld [vmem:[%s20880_s3 + $0x450] sm:$0xff] }
 0x40a   :  { %10449 = vmatpush1.bf16.msra.mxu1 %v10448_v1  ;;  %v3478_v1 = vld [vmem:[%s20880_s3 + $0x2f8] sm:$0xff]  ;;  %v10474_v45 = vpack.c.bf16 %v3521_v18, %v3514_v39 }
 0x40b   :  { %10193 = vmatpush1.bf16.msra.mxu0 %v10192_v12  ;;  %10451 = vmatprep.subr.bf16.mxu1 %v10450_v42  ;;  %v10206_v12 = vpack.c.bf16 %v3953_v55, %v3946_v54  ;;  %v3952_v42 = vld [vmem:[%s20880_s3 + $0x11c8] sm:$0xff]  ;;  %v10464_v14 = vpack.c.bf16 %v3478_v1, %v3471_v17  ;;  %v3987_v54 = vld [vmem:[%s20880_s3 + $0x12e0] sm:$0xff]  ;;  %v3513_v55 = vld [vmem:[%s20880_s3 + $0x410] sm:$0xff] }
 0x40c   :  { %10195 = vmatprep.subr.bf16.mxu0 %v10194_v13  ;;  %v3967_v13 = vld [vmem:[%s20880_s3 + $0x1240] sm:$0xff]  ;;  %v10208_v19 = vpack.c.bf16 %v3952_v42, %v3945_v0  ;;  %v3528_v0 = vld [vmem:[%s20880_s3 + $0x488] sm:$0xff]  ;;  %v4002_v1 = vld [vmem:[%s20880_s3 + $0x1358] sm:$0xff] }
 0x40d   :  { %v3535_v17 = vld [vmem:[%s20880_s3 + $0x4c0] sm:$0xff] }
 0x40e   :  { %10453 = vmatpush1.bf16.msra.mxu1 %v10452_v48  ;;  %v3492_v48 = vld [vmem:[%s20880_s3 + $0x368] sm:$0xff]  ;;  %v10478_v7 = vpack.c.bf16 %v3535_v17, %v3528_v0 }
 0x40f   :  { %10197 = vmatpush1.bf16.msra.mxu0 %v10196_v22  ;;  %10455 = vmatprep.subr.bf16.mxu1 %v10454_v47  ;;  %v10210_v22 = vpack.c.bf16 %v3967_v13, %v3960_v51  ;;  %v3966_v47 = vld [vmem:[%s20880_s3 + $0x1238] sm:$0xff]  ;;  %v10468_v30 = vpack.c.bf16 %v3492_v48, %v3485_v57  ;;  %v4001_v51 = vld [vmem:[%s20880_s3 + $0x1350] sm:$0xff]  ;;  %v3527_v13 = vld [vmem:[%s20880_s3 + $0x480] sm:$0xff] }
 0x410   :  { %10199 = vmatprep.subr.bf16.mxu0 %v10198_v28  ;;  %v3981_v28 = vld [vmem:[%s20880_s3 + $0x12b0] sm:$0xff]  ;;  %v10212_v33 = vpack.c.bf16 %v3966_v47, %v3959_v21  ;;  %v3542_v21 = vld [vmem:[%s20880_s3 + $0x4f8] sm:$0xff]  ;;  %v4016_v48 = vld [vmem:[%s20880_s3 + $0x13c8] sm:$0xff] }
 0x411   :  { %v3549_v57 = vld [vmem:[%s20880_s3 + $0x530] sm:$0xff] }
 0x412   :  { %10457 = vmatpush1.bf16.msra.mxu1 %v10456_v15  ;;  %v3506_v15 = vld [vmem:[%s20880_s3 + $0x3d8] sm:$0xff]  ;;  %v10482_v43 = vpack.c.bf16 %v3549_v57, %v3542_v21 }
 0x413   :  { %10201 = vmatpush1.bf16.msra.mxu0 %v10200_v26  ;;  %10459 = vmatprep.subr.bf16.mxu1 %v10458_v38  ;;  %v10214_v26 = vpack.c.bf16 %v3981_v28, %v3974_v3  ;;  %v3980_v38 = vld [vmem:[%s20880_s3 + $0x12a8] sm:$0xff]  ;;  %v10472_v44 = vpack.c.bf16 %v3506_v15, %v3499_v37  ;;  %v4015_v3 = vld [vmem:[%s20880_s3 + $0x13c0] sm:$0xff]  ;;  %v3541_v28 = vld [vmem:[%s20880_s3 + $0x4f0] sm:$0xff] }
 0x414   :  { %10203 = vmatprep.subr.bf16.mxu0 %v10202_v46  ;;  %v3995_v46 = vld [vmem:[%s20880_s3 + $0x1320] sm:$0xff]  ;;  %v10216_v60 = vpack.c.bf16 %v3980_v38, %v3973_v35  ;;  %v3556_v35 = vld [vmem:[%s20880_s3 + $0x568] sm:$0xff]  ;;  %v4030_v15 = vld [vmem:[%s20880_s3 + $0x1438] sm:$0xff] }
 0x415   :  { %v3563_v37 = vld [vmem:[%s20880_s3 + $0x5a0] sm:$0xff] }
 0x416   :  { %10461 = vmatpush1.bf16.msra.mxu1 %v10460_v9  ;;  %v3520_v9 = vld [vmem:[%s20880_s3 + $0x448] sm:$0xff]  ;;  %v10486_v18 = vpack.c.bf16 %v3563_v37, %v3556_v35  ;;  %v4071_v37 = vld [vmem:[%s20880_s3 + $0x1580] sm:$0xff] }
 0x417   :  { %10205 = vmatpush1.bf16.msra.mxu0 %v10204_v2  ;;  %10463 = vmatprep.subr.bf16.mxu1 %v10462_v63  ;;  %v10218_v2 = vpack.c.bf16 %v3995_v46, %v3988_v40  ;;  %v3994_v63 = vld [vmem:[%s20880_s3 + $0x1318] sm:$0xff]  ;;  %v10476_v42 = vpack.c.bf16 %v3520_v9, %v3513_v55  ;;  %v4029_v40 = vld [vmem:[%s20880_s3 + $0x1430] sm:$0xff]  ;;  %v3555_v46 = vld [vmem:[%s20880_s3 + $0x560] sm:$0xff] }
 0x418   :  { %10207 = vmatprep.subr.bf16.mxu0 %v10206_v12  ;;  %v4009_v12 = vld [vmem:[%s20880_s3 + $0x1390] sm:$0xff]  ;;  %v10220_v5 = vpack.c.bf16 %v3994_v63, %v3987_v54  ;;  %v3570_v54 = vld [vmem:[%s20880_s3 + $0x5d8] sm:$0xff]  ;;  %v4044_v9 = vld [vmem:[%s20880_s3 + $0x14a8] sm:$0xff] }
 0x419   :  { %v3577_v55 = vld [vmem:[%s20880_s3 + $0x610] sm:$0xff] }
 0x41a   :  { %10465 = vmatpush1.bf16.msra.mxu1 %v10464_v14  ;;  %v3534_v14 = vld [vmem:[%s20880_s3 + $0x4b8] sm:$0xff]  ;;  %v10490_v17 = vpack.c.bf16 %v3577_v55, %v3570_v54 }
 0x41b   :  { %10209 = vmatpush1.bf16.msra.mxu0 %v10208_v19  ;;  %10467 = vmatprep.subr.bf16.mxu1 %v10466_v50  ;;  %v10222_v19 = vpack.c.bf16 %v4009_v12, %v4002_v1  ;;  %v4008_v50 = vld [vmem:[%s20880_s3 + $0x1388] sm:$0xff]  ;;  %v10480_v47 = vpack.c.bf16 %v3534_v14, %v3527_v13  ;;  %v4043_v1 = vld [vmem:[%s20880_s3 + $0x14a0] sm:$0xff]  ;;  %v3569_v12 = vld [vmem:[%s20880_s3 + $0x5d0] sm:$0xff] }
 0x41c   :  { %10211 = vmatprep.subr.bf16.mxu0 %v10210_v22  ;;  %v4023_v22 = vld [vmem:[%s20880_s3 + $0x1400] sm:$0xff]  ;;  %v10224_v23 = vpack.c.bf16 %v4008_v50, %v4001_v51  ;;  %v3584_v51 = vld [vmem:[%s20880_s3 + $0x648] sm:$0xff]  ;;  %v4058_v14 = vld [vmem:[%s20880_s3 + $0x1518] sm:$0xff] }
 0x41d   :  { %v3591_v13 = vld [vmem:[%s20880_s3 + $0x680] sm:$0xff] }
 0x41e   :  { %10469 = vmatpush1.bf16.msra.mxu1 %v10468_v30  ;;  %v3548_v30 = vld [vmem:[%s20880_s3 + $0x528] sm:$0xff]  ;;  %v10494_v57 = vpack.c.bf16 %v3591_v13, %v3584_v51 }
 0x41f   :  { %10213 = vmatpush1.bf16.msra.mxu0 %v10212_v33  ;;  %10471 = vmatprep.subr.bf16.mxu1 %v10470_v34  ;;  %v10226_v33 = vpack.c.bf16 %v4023_v22, %v4016_v48  ;;  %v4022_v34 = vld [vmem:[%s20880_s3 + $0x13f8] sm:$0xff]  ;;  %v10484_v38 = vpack.c.bf16 %v3548_v30, %v3541_v28  ;;  %v3583_v48 = vld [vmem:[%s20880_s3 + $0x640] sm:$0xff] }
 0x420   :  { %10215 = vmatprep.subr.bf16.mxu0 %v10214_v26  ;;  %v4037_v26 = vld [vmem:[%s20880_s3 + $0x1470] sm:$0xff]  ;;  %v10228_v39 = vpack.c.bf16 %v4022_v34, %v4015_v3  ;;  %v3590_v22 = vld [vmem:[%s20880_s3 + $0x678] sm:$0xff]  ;;  %v4072_v3 = vld [vmem:[%s20880_s3 + $0x1588] sm:$0xff] }
 0x421   :  { %v4079_v28 = vld [vmem:[%s20880_s3 + $0x15c0] sm:$0xff]  ;;  %v3598_v30 = vld [vmem:[%s20880_s3 + $0x6b8] sm:$0xff]  ;;  %v10496_v34 = vpack.c.bf16 %v3590_v22, %v3583_v48  ;;  %v3640_v48 = vld [vmem:[%s20880_s3 + $0x808] sm:$0xff] }
 0x422   :  { %10473 = vmatpush1.bf16.msra.mxu1 %v10472_v44  ;;  %v3562_v44 = vld [vmem:[%s20880_s3 + $0x598] sm:$0xff]  ;;  %v3647_v22 = vld [vmem:[%s20880_s3 + $0x840] sm:$0xff] }
 0x423   :  { %10217 = vmatpush1.bf16.msra.mxu0 %v10216_v60  ;;  %10475 = vmatprep.subr.bf16.mxu1 %v10474_v45  ;;  %v10230_v60 = vpack.c.bf16 %v4037_v26, %v4030_v15  ;;  %v4036_v45 = vld [vmem:[%s20880_s3 + $0x1468] sm:$0xff]  ;;  %v10488_v63 = vpack.c.bf16 %v3562_v44, %v3555_v46  ;;  %v3597_v15 = vld [vmem:[%s20880_s3 + $0x6b0] sm:$0xff]  ;;  %v3619_v46 = vld [vmem:[%s20880_s3 + $0x760] sm:$0xff] }
 0x424   :  { %10219 = vmatprep.subr.bf16.mxu0 %v10218_v2  ;;  %v4051_v2 = vld [vmem:[%s20880_s3 + $0x14e0] sm:$0xff]  ;;  %v10232_v0 = vpack.c.bf16 %v4036_v45, %v4029_v40  ;;  %v3604_v26 = vld [vmem:[%s20880_s3 + $0x6e8] sm:$0xff]  ;;  %v4086_v44 = vld [vmem:[%s20880_s3 + $0x15f8] sm:$0xff] }
 0x425   :  { %v3612_v40 = vld [vmem:[%s20880_s3 + $0x728] sm:$0xff]  ;;  %v10500_v45 = vpack.c.bf16 %v3604_v26, %v3597_v15  ;;  %v3654_v15 = vld [vmem:[%s20880_s3 + $0x878] sm:$0xff]  ;;  %v3661_v26 = vld [vmem:[%s20880_s3 + $0x8b0] sm:$0xff] }
 0x426   :  { %10477 = vmatpush1.bf16.msra.mxu1 %v10476_v42  ;;  %v3576_v42 = vld [vmem:[%s20880_s3 + $0x608] sm:$0xff]  ;;  %v10502_v55 = vpack.c.bf16 %v3619_v46, %v3612_v40  ;;  %v10514_v46 = vpack.c.bf16 %v3661_v26, %v3654_v15  ;;  %v4177_v15 = vld [vmem:[%s20880_s3 + $0x18d0] sm:$0xff] }
 0x427   :  { %10221 = vmatpush1.bf16.msra.mxu0 %v10220_v5  ;;  %10479 = vmatprep.subr.bf16.mxu1 %v10478_v7  ;;  %v10234_v5 = vpack.c.bf16 %v4051_v2, %v4044_v9  ;;  %v4050_v7 = vld [vmem:[%s20880_s3 + $0x14d8] sm:$0xff]  ;;  %v10492_v50 = vpack.c.bf16 %v3576_v42, %v3569_v12  ;;  %v4085_v9 = vld [vmem:[%s20880_s3 + $0x15f0] sm:$0xff]  ;;  %v3611_v2 = vld [vmem:[%s20880_s3 + $0x720] sm:$0xff] }
 0x428   :  { %10223 = vmatprep.subr.bf16.mxu0 %v10222_v19  ;;  %v4065_v19 = vld [vmem:[%s20880_s3 + $0x1550] sm:$0xff]  ;;  %v10236_v21 = vpack.c.bf16 %v4050_v7, %v4043_v1  ;;  %v3626_v1 = vld [vmem:[%s20880_s3 + $0x798] sm:$0xff]  ;;  %v4100_v42 = vld [vmem:[%s20880_s3 + $0x1668] sm:$0xff] }
 0x429   :  { %v3633_v12 = vld [vmem:[%s20880_s3 + $0x7d0] sm:$0xff] }
 0x42a   :  { %10481 = vmatpush1.bf16.msra.mxu1 %v10480_v47  ;;  %v10238_v47 = vpack.c.bf16 %v4065_v19, %v4058_v14  ;;  %v10506_v13 = vpack.c.bf16 %v3633_v12, %v3626_v1  ;;  %v4099_v14 = vld [vmem:[%s20880_s3 + $0x1660] sm:$0xff]  ;;  %v3625_v19 = vld [vmem:[%s20880_s3 + $0x790] sm:$0xff] }
 0x42b   :  { %10225 = vmatpush1.bf16.msra.mxu0 %v10224_v23  ;;  %10483 = vmatprep.subr.bf16.mxu1 %v10482_v43  ;;  %v4057_v23 = vld [vmem:[%s20880_s3 + $0x1510] sm:$0xff]  ;;  %v4064_v43 = vld [vmem:[%s20880_s3 + $0x1548] sm:$0xff] }
 0x42c   :  { %10227 = vmatprep.subr.bf16.mxu0 %v10226_v33  ;;  %v3605_v33 = vld [vmem:[%s20880_s3 + $0x6f0] sm:$0xff]  ;;  %v10240_v35 = vpack.c.bf16 %v4064_v43, %v4057_v23 }
 0x42d   :  { %v4121_v23 = vld [vmem:[%s20880_s3 + $0x1710] sm:$0xff] }
 0x42e   :  { %10485 = vmatpush1.bf16.msra.mxu1 %v10484_v38  ;;  %v10242_v38 = vpack.c.bf16 %v4079_v28, %v4072_v3  ;;  %v10510_v28 = vpack.c.bf16 %v3647_v22, %v3640_v48  ;;  %v4163_v48 = vld [vmem:[%s20880_s3 + $0x1860] sm:$0xff] }
 0x42f   :  { %10229 = vmatpush1.bf16.msra.mxu0 %v10228_v39  ;;  %10487 = vmatprep.subr.bf16.mxu1 %v10486_v18  ;;  %v10498_v39 = vpack.c.bf16 %v3605_v33, %v3598_v30  ;;  %v4078_v18 = vld [vmem:[%s20880_s3 + $0x15b8] sm:$0xff]  ;;  %v4113_v30 = vld [vmem:[%s20880_s3 + $0x16d0] sm:$0xff]  ;;  %v3639_v33 = vld [vmem:[%s20880_s3 + $0x800] sm:$0xff] }
 0x430   :  { %10231 = vmatprep.subr.bf16.mxu0 %v10230_v60  ;;  %v4093_v60 = vld [vmem:[%s20880_s3 + $0x1630] sm:$0xff]  ;;  %v10244_v54 = vpack.c.bf16 %v4078_v18, %v4071_v37  ;;  %v4120_v37 = vld [vmem:[%s20880_s3 + $0x1708] sm:$0xff] }
 0x431   :  { %v10256_v40 = vpack.c.bf16 %v4120_v37, %v4113_v30  ;;  %v4170_v37 = vld [vmem:[%s20880_s3 + $0x1898] sm:$0xff] }
 0x432   :  { %10489 = vmatpush1.bf16.msra.mxu1 %v10488_v63  ;;  %v3618_v63 = vld [vmem:[%s20880_s3 + $0x758] sm:$0xff] }
 0x433   :  { %10233 = vmatpush1.bf16.msra.mxu0 %v10232_v0  ;;  %10491 = vmatprep.subr.bf16.mxu1 %v10490_v17  ;;  %v10246_v0 = vpack.c.bf16 %v4093_v60, %v4086_v44  ;;  %v4092_v17 = vld [vmem:[%s20880_s3 + $0x1628] sm:$0xff]  ;;  %v10504_v7 = vpack.c.bf16 %v3618_v63, %v3611_v2  ;;  %v4127_v44 = vld [vmem:[%s20880_s3 + $0x1740] sm:$0xff]  ;;  %v3653_v60 = vld [vmem:[%s20880_s3 + $0x870] sm:$0xff] }
 0x434   :  { %10235 = vmatprep.subr.bf16.mxu0 %v10234_v5  ;;  %v4107_v5 = vld [vmem:[%s20880_s3 + $0x16a0] sm:$0xff]  ;;  %v10248_v51 = vpack.c.bf16 %v4092_v17, %v4085_v9  ;;  %v3668_v9 = vld [vmem:[%s20880_s3 + $0x8e8] sm:$0xff]  ;;  %v4142_v63 = vld [vmem:[%s20880_s3 + $0x17b8] sm:$0xff] }
 0x435   :  { %v3675_v2 = vld [vmem:[%s20880_s3 + $0x920] sm:$0xff] }
 0x436   :  { %10493 = vmatpush1.bf16.msra.mxu1 %v10492_v50  ;;  %v3632_v50 = vld [vmem:[%s20880_s3 + $0x7c8] sm:$0xff]  ;;  %v10518_v12 = vpack.c.bf16 %v3675_v2, %v3668_v9  ;;  %v4191_v9 = vld [vmem:[%s20880_s3 + $0x1940] sm:$0xff] }
 0x437   :  { %10237 = vmatpush1.bf16.msra.mxu0 %v10236_v21  ;;  %10495 = vmatprep.subr.bf16.mxu1 %v10494_v57  ;;  %v10250_v21 = vpack.c.bf16 %v4107_v5, %v4100_v42  ;;  %v4106_v57 = vld [vmem:[%s20880_s3 + $0x1698] sm:$0xff]  ;;  %v10508_v43 = vpack.c.bf16 %v3632_v50, %v3625_v19  ;;  %v4141_v42 = vld [vmem:[%s20880_s3 + $0x17b0] sm:$0xff]  ;;  %v3667_v5 = vld [vmem:[%s20880_s3 + $0x8e0] sm:$0xff] }
 0x438   :  { %10239 = vmatprep.subr.bf16.mxu0 %v10238_v47  ;;  %v4114_v47 = vld [vmem:[%s20880_s3 + $0x16d8] sm:$0xff]  ;;  %v10252_v3 = vpack.c.bf16 %v4106_v57, %v4099_v14  ;;  %v4148_v14 = vld [vmem:[%s20880_s3 + $0x17e8] sm:$0xff]  ;;  %v3689_v50 = vld [vmem:[%s20880_s3 + $0x990] sm:$0xff] }
 0x439   :  { %v3682_v19 = vld [vmem:[%s20880_s3 + $0x958] sm:$0xff]  ;;  %v4156_v57 = vld [vmem:[%s20880_s3 + $0x1828] sm:$0xff] }
 0x43a   :  { %5500 = vmatmul.mubr.f32.vlgmr.msra.gmra.mrb[12].mxu0 %v16189_v52  ;;  %10497 = vmatpush1.bf16.msra.mxu1 %v10496_v34  ;;  %v3646_v34 = vld [vmem:[%s20880_s3 + $0x838] sm:$0xff]  ;;  %v10266_v30 = vpack.c.bf16 %v4163_v48, %v4156_v57 }
 0x43b   :  { %10241 = vmatpush1.bf16.msra.mxu0 %v10240_v35  ;;  %5570 = vmatprep.mubr.f32.mxu0 %v16197_v56  ;;  %v10254_v35 = vpack.c.bf16 %v4121_v23, %v4114_v47  ;;  %v10512_v18 = vpack.c.bf16 %v3646_v34, %v3639_v33  ;;  %v10264_v47 = vpack.c.bf16 %v4148_v14, %v4141_v42  ;;  %v4162_v33 = vld [vmem:[%s20880_s3 + $0x1858] sm:$0xff]  ;;  %v3696_v34 = vld [vmem:[%s20880_s3 + $0x9c8] sm:$0xff] }
 0x43c   :  { %10243 = vmatprep.subr.bf16.mxu0 %v10242_v38  ;;  %10499 = vmatprep.subr.bf16.mxu1 %v10498_v39  ;;  %v4128_v38 = vld [vmem:[%s20880_s3 + $0x1748] sm:$0xff]  ;;  %v4135_v39 = vld [vmem:[%s20880_s3 + $0x1780] sm:$0xff]  ;;  %v10522_v23 = vpack.c.bf16 %v3689_v50, %v3682_v19  ;;  %v4198_v14 = vld [vmem:[%s20880_s3 + $0x1978] sm:$0xff] }
 0x43d   :  { %v4205_v19 = vld [vmem:[%s20880_s3 + $0x19b0] sm:$0xff] }
 0x43e   :  { %10501 = vmatpush1.bf16.msra.mxu1 %v10500_v45  ;;  %v3660_v45 = vld [vmem:[%s20880_s3 + $0x8a8] sm:$0xff] }
 0x43f   :  { %10245 = vmatpush1.bf16.msra.mxu0 %v10244_v54  ;;  %10503 = vmatprep.subr.bf16.mxu1 %v10502_v55  ;;  %v10258_v54 = vpack.c.bf16 %v4135_v39, %v4128_v38  ;;  %v4134_v55 = vld [vmem:[%s20880_s3 + $0x1778] sm:$0xff]  ;;  %v10516_v17 = vpack.c.bf16 %v3660_v45, %v3653_v60  ;;  %v4176_v60 = vld [vmem:[%s20880_s3 + $0x18c8] sm:$0xff] }
 0x440   :  { %10247 = vmatprep.subr.bf16.mxu0 %v10246_v0  ;;  %v4149_v0 = vld [vmem:[%s20880_s3 + $0x17f0] sm:$0xff]  ;;  %v10260_v1 = vpack.c.bf16 %v4134_v55, %v4127_v44  ;;  %v10270_v44 = vpack.c.bf16 %v4177_v15, %v4170_v37  ;;  %v3710_v45 = vld [vmem:[%s20880_s3 + $0xa38] sm:$0xff]  ;;  %v4184_v55 = vld [vmem:[%s20880_s3 + $0x1908] sm:$0xff] }
 0x441   :  { %5855 = vmatmul.mubr.f32.vlgmr.msra.gmra.mrb[12].mxu1 %v15719_v62  ;;  %v10274_v42 = vpack.c.bf16 %v4191_v9, %v4184_v55 }
 0x442   :  { %10505 = vmatpush1.bf16.msra.mxu1 %v10504_v7  ;;  %5925 = vmatprep.mubr.f32.mxu1 %v15727_v8  ;;  %v3674_v7 = vld [vmem:[%s20880_s3 + $0x918] sm:$0xff] }
 0x443   :  { %10249 = vmatpush1.bf16.msra.mxu0 %v10248_v51  ;;  %10507 = vmatprep.subr.bf16.mxu1 %v10506_v13  ;;  %v10262_v13 = vpack.c.bf16 %v4149_v0, %v4142_v63  ;;  %v10520_v22 = vpack.c.bf16 %v3674_v7, %v3667_v5  ;;  %v4190_v5 = vld [vmem:[%s20880_s3 + $0x1938] sm:$0xff]  ;;  %v3724_v7 = vld [vmem:[%s20880_s3 + $0xaa8] sm:$0xff] }
 0x444   :  { %10251 = vmatprep.subr.bf16.mxu0 %v10250_v21 }
 0x446   :  { %10509 = vmatpush1.bf16.msra.mxu1 %v10508_v43  ;;  %v4155_v43 = vld [vmem:[%s20880_s3 + $0x1820] sm:$0xff] }
 0x447   :  { %10253 = vmatpush1.bf16.msra.mxu0 %v10252_v3  ;;  %10511 = vmatprep.subr.bf16.mxu1 %v10510_v28  ;;  %v3681_v3 = vld [vmem:[%s20880_s3 + $0x950] sm:$0xff]  ;;  %v3688_v28 = vld [vmem:[%s20880_s3 + $0x988] sm:$0xff]  ;;  %v10268_v38 = vpack.c.bf16 %v4162_v33, %v4155_v43  ;;  %v10278_v43 = vpack.c.bf16 %v4205_v19, %v4198_v14 }
 0x448   :  { %10255 = vmatprep.subr.bf16.mxu0 %v10254_v35  ;;  %v3703_v35 = vld [vmem:[%s20880_s3 + $0xa00] sm:$0xff]  ;;  %v10524_v26 = vpack.c.bf16 %v3688_v28, %v3681_v3  ;;  %v4204_v3 = vld [vmem:[%s20880_s3 + $0x19a8] sm:$0xff]  ;;  %v3738_v28 = vld [vmem:[%s20880_s3 + $0xb18] sm:$0xff] }
 0x449   :  { %v10526_v39 = vpack.c.bf16 %v3703_v35, %v3696_v34  ;;  %v4212_v33 = vld [vmem:[%s20880_s3 + $0x19e8] sm:$0xff]  ;;  %v4219_v34 = vld [vmem:[%s20880_s3 + $0x1a20] sm:$0xff] }
 0x44a   :  { %10513 = vmatpush1.bf16.msra.mxu1 %v10512_v18  ;;  %v4169_v18 = vld [vmem:[%s20880_s3 + $0x1890] sm:$0xff] }
 0x44b   :  { %10257 = vmatpush1.bf16.msra.mxu0 %v10256_v40  ;;  %10515 = vmatprep.subr.bf16.mxu1 %v10514_v46  ;;  %v3695_v40 = vld [vmem:[%s20880_s3 + $0x9c0] sm:$0xff]  ;;  %v3702_v46 = vld [vmem:[%s20880_s3 + $0x9f8] sm:$0xff]  ;;  %v10272_v63 = vpack.c.bf16 %v4176_v60, %v4169_v18  ;;  %v10282_v18 = vpack.c.bf16 %v4219_v34, %v4212_v33 }
 0x44c   :  { %10259 = vmatprep.subr.bf16.mxu0 %v10258_v54  ;;  %v3717_v54 = vld [vmem:[%s20880_s3 + $0xa70] sm:$0xff]  ;;  %v10528_v2 = vpack.c.bf16 %v3702_v46, %v3695_v40  ;;  %v4218_v40 = vld [vmem:[%s20880_s3 + $0x1a18] sm:$0xff]  ;;  %v3752_v46 = vld [vmem:[%s20880_s3 + $0xb88] sm:$0xff] }
 0x44d   :  { %v17704_v51 = vpop.f32.mrb[10].mxu0  ;;  %v10530_v0 = vpack.c.bf16 %v3717_v54, %v3710_v45  ;;  %v4226_v60 = vld [vmem:[%s20880_s3 + $0x1a58] sm:$0xff]  ;;  %v4233_v45 = vld [vmem:[%s20880_s3 + $0x1a90] sm:$0xff] }
 0x44e   :  { %v17715_v21 = vpop.f32.mrb[11].mxu0  ;;  %10517 = vmatpush1.bf16.msra.mxu1 %v10516_v17  ;;  %v4183_v17 = vld [vmem:[%s20880_s3 + $0x1900] sm:$0xff] }
 0x44f   :  { %10261 = vmatpush1.bf16.msra.mxu0 %v10260_v1  ;;  %10519 = vmatprep.subr.bf16.mxu1 %v10518_v12  ;;  %v3709_v1 = vld [vmem:[%s20880_s3 + $0xa30] sm:$0xff]  ;;  %v3716_v12 = vld [vmem:[%s20880_s3 + $0xa68] sm:$0xff]  ;;  %v10276_v57 = vpack.c.bf16 %v4190_v5, %v4183_v17  ;;  %v10286_v17 = vpack.c.bf16 %v4233_v45, %v4226_v60 }
 0x450   :  { %10263 = vmatprep.subr.bf16.mxu0 %v10262_v13  ;;  %v3731_v13 = vld [vmem:[%s20880_s3 + $0xae0] sm:$0xff]  ;;  %v10532_v50 = vpack.c.bf16 %v3716_v12, %v3709_v1  ;;  %v4232_v1 = vld [vmem:[%s20880_s3 + $0x1a88] sm:$0xff]  ;;  %v3766_v12 = vld [vmem:[%s20880_s3 + $0xbf8] sm:$0xff] }
 0x451   :  { %v10534_v48 = vpack.c.bf16 %v3731_v13, %v3724_v7  ;;  %v4240_v5 = vld [vmem:[%s20880_s3 + $0x1ac8] sm:$0xff]  ;;  %v4247_v7 = vld [vmem:[%s20880_s3 + $0x1b00] sm:$0xff] }
 0x452   :  { %10521 = vmatpush1.bf16.msra.mxu1 %v10520_v22  ;;  %v4197_v22 = vld [vmem:[%s20880_s3 + $0x1970] sm:$0xff] }
 0x453   :  { %10265 = vmatpush1.bf16.msra.mxu0 %v10264_v47  ;;  %10523 = vmatprep.subr.bf16.mxu1 %v10522_v23  ;;  %v3723_v47 = vld [vmem:[%s20880_s3 + $0xaa0] sm:$0xff]  ;;  %v3730_v23 = vld [vmem:[%s20880_s3 + $0xad8] sm:$0xff]  ;;  %v10280_v37 = vpack.c.bf16 %v4204_v3, %v4197_v22  ;;  %v10290_v22 = vpack.c.bf16 %v4247_v7, %v4240_v5 }
 0x454   :  { %10267 = vmatprep.subr.bf16.mxu0 %v10266_v30  ;;  %v3745_v30 = vld [vmem:[%s20880_s3 + $0xb50] sm:$0xff]  ;;  %v10536_v35 = vpack.c.bf16 %v3730_v23, %v3723_v47  ;;  %v4246_v47 = vld [vmem:[%s20880_s3 + $0x1af8] sm:$0xff]  ;;  %v3780_v23 = vld [vmem:[%s20880_s3 + $0xc68] sm:$0xff] }
 0x455   :  { %v10538_v15 = vpack.c.bf16 %v3745_v30, %v3738_v28  ;;  %v4254_v3 = vld [vmem:[%s20880_s3 + $0x1b38] sm:$0xff]  ;;  %v4261_v28 = vld [vmem:[%s20880_s3 + $0x1b70] sm:$0xff] }
 0x456   :  { %10525 = vmatpush1.bf16.msra.mxu1 %v10524_v26  ;;  %v4211_v26 = vld [vmem:[%s20880_s3 + $0x19e0] sm:$0xff] }
 0x457   :  { %10269 = vmatpush1.bf16.msra.mxu0 %v10268_v38  ;;  %10527 = vmatprep.subr.bf16.mxu1 %v10526_v39  ;;  %v3737_v38 = vld [vmem:[%s20880_s3 + $0xb10] sm:$0xff]  ;;  %v3744_v39 = vld [vmem:[%s20880_s3 + $0xb48] sm:$0xff]  ;;  %v10284_v55 = vpack.c.bf16 %v4218_v40, %v4211_v26  ;;  %v10294_v26 = vpack.c.bf16 %v4261_v28, %v4254_v3  ;;  %v4295_v28 = vld [vmem:[%s20880_s3 + $0x1c80] sm:$0xff] }
 0x458   :  { %10271 = vmatprep.subr.bf16.mxu0 %v10270_v44  ;;  %v3759_v44 = vld [vmem:[%s20880_s3 + $0xbc0] sm:$0xff]  ;;  %v10540_v54 = vpack.c.bf16 %v3744_v39, %v3737_v38  ;;  %v4260_v38 = vld [vmem:[%s20880_s3 + $0x1b68] sm:$0xff]  ;;  %v3794_v39 = vld [vmem:[%s20880_s3 + $0xcd8] sm:$0xff] }
 0x459   :  { %v10542_v9 = vpack.c.bf16 %v3759_v44, %v3752_v46  ;;  %v4268_v40 = vld [vmem:[%s20880_s3 + $0x1ba8] sm:$0xff]  ;;  %v4275_v46 = vld [vmem:[%s20880_s3 + $0x1be0] sm:$0xff] }
 0x45a   :  { %10529 = vmatpush1.bf16.msra.mxu1 %v10528_v2  ;;  %v4225_v2 = vld [vmem:[%s20880_s3 + $0x1a50] sm:$0xff] }
 0x45b   :  { %10273 = vmatpush1.bf16.msra.mxu0 %v10272_v63  ;;  %10531 = vmatprep.subr.bf16.mxu1 %v10530_v0  ;;  %v3751_v63 = vld [vmem:[%s20880_s3 + $0xb80] sm:$0xff]  ;;  %v3758_v0 = vld [vmem:[%s20880_s3 + $0xbb8] sm:$0xff]  ;;  %v10288_v14 = vpack.c.bf16 %v4232_v1, %v4225_v2  ;;  %v10298_v2 = vpack.c.bf16 %v4275_v46, %v4268_v40 }
 0x45c   :  { %10275 = vmatprep.subr.bf16.mxu0 %v10274_v42  ;;  %v3773_v42 = vld [vmem:[%s20880_s3 + $0xc30] sm:$0xff]  ;;  %v10544_v13 = vpack.c.bf16 %v3758_v0, %v3751_v63  ;;  %v4274_v63 = vld [vmem:[%s20880_s3 + $0x1bd8] sm:$0xff]  ;;  %v3808_v0 = vld [vmem:[%s20880_s3 + $0xd48] sm:$0xff] }
 0x45d   :  { %v10546_v19 = vpack.c.bf16 %v3773_v42, %v3766_v12  ;;  %v4282_v1 = vld [vmem:[%s20880_s3 + $0x1c18] sm:$0xff]  ;;  %v4289_v12 = vld [vmem:[%s20880_s3 + $0x1c50] sm:$0xff] }
 0x45e   :  { %10533 = vmatpush1.bf16.msra.mxu1 %v10532_v50  ;;  %v4239_v50 = vld [vmem:[%s20880_s3 + $0x1ac0] sm:$0xff] }
 0x45f   :  { %10277 = vmatpush1.bf16.msra.mxu0 %v10276_v57  ;;  %10535 = vmatprep.subr.bf16.mxu1 %v10534_v48  ;;  %v3765_v57 = vld [vmem:[%s20880_s3 + $0xbf0] sm:$0xff]  ;;  %v3772_v48 = vld [vmem:[%s20880_s3 + $0xc28] sm:$0xff]  ;;  %v10292_v33 = vpack.c.bf16 %v4246_v47, %v4239_v50  ;;  %v3822_v47 = vld [vmem:[%s20880_s3 + $0xdb8] sm:$0xff] }
 0x460   :  { %10279 = vmatprep.subr.bf16.mxu0 %v10278_v43  ;;  %v3787_v43 = vld [vmem:[%s20880_s3 + $0xca0] sm:$0xff]  ;;  %v10548_v30 = vpack.c.bf16 %v3772_v48, %v3765_v57  ;;  %v4281_v50 = vld [vmem:[%s20880_s3 + $0x1c10] sm:$0xff]  ;;  %v4288_v57 = vld [vmem:[%s20880_s3 + $0x1c48] sm:$0xff] }
 0x461   :  { %v10550_v34 = vpack.c.bf16 %v3787_v43, %v3780_v23  ;;  %v4296_v48 = vld [vmem:[%s20880_s3 + $0x1c88] sm:$0xff]  ;;  %v3829_v23 = vld [vmem:[%s20880_s3 + $0xdf0] sm:$0xff]  ;;  %v10304_v3 = vpack.c.bf16 %v4288_v57, %v4281_v50  ;;  %v3871_v50 = vld [vmem:[%s20880_s3 + $0xf40] sm:$0xff] }
 0x462   :  { %10537 = vmatpush1.bf16.msra.mxu1 %v10536_v35  ;;  %v4253_v35 = vld [vmem:[%s20880_s3 + $0x1b30] sm:$0xff]  ;;  %v4338_v57 = vld [vmem:[%s20880_s3 + $0x1dd8] sm:$0xff] }
 0x463   :  { %10281 = vmatpush1.bf16.msra.mxu0 %v10280_v37  ;;  %10539 = vmatprep.subr.bf16.mxu1 %v10538_v15  ;;  %v3779_v37 = vld [vmem:[%s20880_s3 + $0xc60] sm:$0xff]  ;;  %v3786_v15 = vld [vmem:[%s20880_s3 + $0xc98] sm:$0xff]  ;;  %v10296_v60 = vpack.c.bf16 %v4260_v38, %v4253_v35  ;;  %v10562_v35 = vpack.c.bf16 %v3829_v23, %v3822_v47 }
 0x464   :  { %10283 = vmatprep.subr.bf16.mxu0 %v10282_v18  ;;  %v3801_v18 = vld [vmem:[%s20880_s3 + $0xd10] sm:$0xff]  ;;  %v10552_v44 = vpack.c.bf16 %v3786_v15, %v3779_v37  ;;  %v4302_v37 = vld [vmem:[%s20880_s3 + $0x1cb8] sm:$0xff]  ;;  %v3836_v15 = vld [vmem:[%s20880_s3 + $0xe28] sm:$0xff] }
 0x465   :  { %v10554_v45 = vpack.c.bf16 %v3801_v18, %v3794_v39  ;;  %v4310_v38 = vld [vmem:[%s20880_s3 + $0x1cf8] sm:$0xff]  ;;  %v4317_v39 = vld [vmem:[%s20880_s3 + $0x1d30] sm:$0xff]  ;;  %v10308_v40 = vpack.c.bf16 %v4302_v37, %v4295_v28  ;;  %v4352_v37 = vld [vmem:[%s20880_s3 + $0x1e48] sm:$0xff] }
 0x466   :  { %10541 = vmatpush1.bf16.msra.mxu1 %v10540_v54  ;;  %v4267_v54 = vld [vmem:[%s20880_s3 + $0x1ba0] sm:$0xff]  ;;  %v3870_v28 = vld [vmem:[%s20880_s3 + $0xf38] sm:$0xff] }
 0x467   :  { %10285 = vmatpush1.bf16.msra.mxu0 %v10284_v55  ;;  %10543 = vmatprep.subr.bf16.mxu1 %v10542_v9  ;;  %v3793_v55 = vld [vmem:[%s20880_s3 + $0xcd0] sm:$0xff]  ;;  %v3800_v9 = vld [vmem:[%s20880_s3 + $0xd08] sm:$0xff]  ;;  %v10300_v5 = vpack.c.bf16 %v4274_v63, %v4267_v54  ;;  %v10310_v54 = vpack.c.bf16 %v4317_v39, %v4310_v38 }
 0x468   :  { %10287 = vmatprep.subr.bf16.mxu0 %v10286_v17  ;;  %v3815_v17 = vld [vmem:[%s20880_s3 + $0xd80] sm:$0xff]  ;;  %v10556_v42 = vpack.c.bf16 %v3800_v9, %v3793_v55  ;;  %v4316_v55 = vld [vmem:[%s20880_s3 + $0x1d28] sm:$0xff]  ;;  %v3850_v9 = vld [vmem:[%s20880_s3 + $0xe98] sm:$0xff] }
 0x469   :  { %v10558_v7 = vpack.c.bf16 %v3815_v17, %v3808_v0  ;;  %v4324_v63 = vld [vmem:[%s20880_s3 + $0x1d68] sm:$0xff]  ;;  %v4331_v0 = vld [vmem:[%s20880_s3 + $0x1da0] sm:$0xff] }
 0x46a   :  { %10545 = vmatpush1.bf16.msra.mxu1 %v10544_v13  ;;  %v3807_v13 = vld [vmem:[%s20880_s3 + $0xd40] sm:$0xff] }
 0x46b   :  { %10289 = vmatpush1.bf16.msra.mxu0 %v10288_v14  ;;  %10547 = vmatprep.subr.bf16.mxu1 %v10546_v19  ;;  %v3814_v14 = vld [vmem:[%s20880_s3 + $0xd78] sm:$0xff]  ;;  %v10302_v19 = vpack.c.bf16 %v4289_v12, %v4282_v1 }
 0x46c   :  { %10291 = vmatprep.subr.bf16.mxu0 %v10290_v22  ;;  %v4303_v22 = vld [vmem:[%s20880_s3 + $0x1cc0] sm:$0xff]  ;;  %v10560_v43 = vpack.c.bf16 %v3814_v14, %v3807_v13  ;;  %v10314_v13 = vpack.c.bf16 %v4331_v0, %v4324_v63  ;;  %v4330_v14 = vld [vmem:[%s20880_s3 + $0x1d98] sm:$0xff] }
 0x46e   :  { %10549 = vmatpush1.bf16.msra.mxu1 %v10548_v30  ;;  %v3821_v30 = vld [vmem:[%s20880_s3 + $0xdb0] sm:$0xff] }
 0x46f   :  { %10293 = vmatpush1.bf16.msra.mxu0 %v10292_v33  ;;  %10551 = vmatprep.subr.bf16.mxu1 %v10550_v34  ;;  %v3828_v33 = vld [vmem:[%s20880_s3 + $0xde8] sm:$0xff]  ;;  %v10306_v34 = vpack.c.bf16 %v4303_v22, %v4296_v48  ;;  %v4345_v48 = vld [vmem:[%s20880_s3 + $0x1e10] sm:$0xff] }
 0x470   :  { %10295 = vmatprep.subr.bf16.mxu0 %v10294_v26  ;;  %v3843_v26 = vld [vmem:[%s20880_s3 + $0xe60] sm:$0xff]  ;;  %v10564_v18 = vpack.c.bf16 %v3828_v33, %v3821_v30  ;;  %v10318_v30 = vpack.c.bf16 %v4345_v48, %v4338_v57  ;;  %v4344_v33 = vld [vmem:[%s20880_s3 + $0x1e08] sm:$0xff] }
 0x471   :  { %v10566_v46 = vpack.c.bf16 %v3843_v26, %v3836_v15  ;;  %v4359_v15 = vld [vmem:[%s20880_s3 + $0x1e80] sm:$0xff] }
 0x472   :  { %10553 = vmatpush1.bf16.msra.mxu1 %v10552_v44  ;;  %v4309_v44 = vld [vmem:[%s20880_s3 + $0x1cf0] sm:$0xff] }
 0x473   :  { %10297 = vmatpush1.bf16.msra.mxu0 %v10296_v60  ;;  %10555 = vmatprep.subr.bf16.mxu1 %v10554_v45  ;;  %v3835_v60 = vld [vmem:[%s20880_s3 + $0xe20] sm:$0xff]  ;;  %v3842_v45 = vld [vmem:[%s20880_s3 + $0xe58] sm:$0xff]  ;;  %v10312_v1 = vpack.c.bf16 %v4316_v55, %v4309_v44  ;;  %v10322_v44 = vpack.c.bf16 %v4359_v15, %v4352_v37 }
 0x474   :  { %10299 = vmatprep.subr.bf16.mxu0 %v10298_v2  ;;  %v3857_v2 = vld [vmem:[%s20880_s3 + $0xed0] sm:$0xff]  ;;  %v10568_v17 = vpack.c.bf16 %v3842_v45, %v3835_v60  ;;  %v4358_v60 = vld [vmem:[%s20880_s3 + $0x1e78] sm:$0xff]  ;;  %v3892_v45 = vld [vmem:[%s20880_s3 + $0xfe8] sm:$0xff] }
 0x475   :  { %v10570_v12 = vpack.c.bf16 %v3857_v2, %v3850_v9  ;;  %v4366_v55 = vld [vmem:[%s20880_s3 + $0x1eb8] sm:$0xff]  ;;  %v4373_v9 = vld [vmem:[%s20880_s3 + $0x1ef0] sm:$0xff] }
 0x476   :  { %10557 = vmatpush1.bf16.msra.mxu1 %v10556_v42  ;;  %v4323_v42 = vld [vmem:[%s20880_s3 + $0x1d60] sm:$0xff] }
 0x477   :  { %10301 = vmatpush1.bf16.msra.mxu0 %v10300_v5  ;;  %10559 = vmatprep.subr.bf16.mxu1 %v10558_v7  ;;  %v3849_v5 = vld [vmem:[%s20880_s3 + $0xe90] sm:$0xff]  ;;  %v3856_v7 = vld [vmem:[%s20880_s3 + $0xec8] sm:$0xff]  ;;  %v10316_v47 = vpack.c.bf16 %v4330_v14, %v4323_v42  ;;  %v10326_v42 = vpack.c.bf16 %v4373_v9, %v4366_v55 }
 0x478   :  { %10303 = vmatprep.subr.bf16.mxu0 %v10302_v19  ;;  %v3864_v19 = vld [vmem:[%s20880_s3 + $0xf08] sm:$0xff]  ;;  %v10572_v22 = vpack.c.bf16 %v3856_v7, %v3849_v5  ;;  %v3906_v7 = vld [vmem:[%s20880_s3 + $0x1058] sm:$0xff] }
 0x479   :  { %v10574_v23 = vpack.c.bf16 %v3871_v50, %v3864_v19  ;;  %v4372_v5 = vld [vmem:[%s20880_s3 + $0x1ee8] sm:$0xff]  ;;  %v4387_v19 = vld [vmem:[%s20880_s3 + $0x1f60] sm:$0xff] }
 0x47a   :  { %5571 = vmatmul.mubr.f32.vlgmr.msra.gmra.mrb[12].mxu0 %v16444_v4  ;;  %10561 = vmatpush1.bf16.msra.mxu1 %v10560_v43  ;;  %v4337_v43 = vld [vmem:[%s20880_s3 + $0x1dd0] sm:$0xff]  ;;  %v4380_v14 = vld [vmem:[%s20880_s3 + $0x1f28] sm:$0xff] }
 0x47b   :  { %10305 = vmatpush1.bf16.msra.mxu0 %v10304_v3  ;;  %5641 = vmatprep.mubr.f32.mxu0 %v16455_v16  ;;  %v3863_v3 = vld [vmem:[%s20880_s3 + $0xf00] sm:$0xff]  ;;  %v10320_v38 = vpack.c.bf16 %v4344_v33, %v4337_v43  ;;  %v10330_v43 = vpack.c.bf16 %v4387_v19, %v4380_v14  ;;  %v4394_v33 = vld [vmem:[%s20880_s3 + $0x1f98] sm:$0xff] }
 0x47c   :  { %10307 = vmatprep.subr.bf16.mxu0 %v10306_v34  ;;  %10563 = vmatprep.subr.bf16.mxu1 %v10562_v35  ;;  %v3878_v34 = vld [vmem:[%s20880_s3 + $0xf78] sm:$0xff]  ;;  %v3885_v35 = vld [vmem:[%s20880_s3 + $0xfb0] sm:$0xff]  ;;  %v10576_v26 = vpack.c.bf16 %v3870_v28, %v3863_v3  ;;  %v3920_v28 = vld [vmem:[%s20880_s3 + $0x10c8] sm:$0xff] }
 0x47d   :  { %v10578_v39 = vpack.c.bf16 %v3885_v35, %v3878_v34  ;;  %v4386_v3 = vld [vmem:[%s20880_s3 + $0x1f58] sm:$0xff]  ;;  %v4401_v34 = vld [vmem:[%s20880_s3 + $0x1fd0] sm:$0xff] }
 0x47e   :  { %10565 = vmatpush1.bf16.msra.mxu1 %v10564_v18  ;;  %v4351_v18 = vld [vmem:[%s20880_s3 + $0x1e40] sm:$0xff] }
 0x47f   :  { %10309 = vmatpush1.bf16.msra.mxu0 %v10308_v40  ;;  %10567 = vmatprep.subr.bf16.mxu1 %v10566_v46  ;;  %v3877_v40 = vld [vmem:[%s20880_s3 + $0xf70] sm:$0xff]  ;;  %v3884_v46 = vld [vmem:[%s20880_s3 + $0xfa8] sm:$0xff]  ;;  %v10324_v63 = vpack.c.bf16 %v4358_v60, %v4351_v18  ;;  %v10334_v18 = vpack.c.bf16 %v4401_v34, %v4394_v33 }
 0x480   :  { %10311 = vmatprep.subr.bf16.mxu0 %v10310_v54  ;;  %v3899_v54 = vld [vmem:[%s20880_s3 + $0x1020] sm:$0xff]  ;;  %v10580_v2 = vpack.c.bf16 %v3884_v46, %v3877_v40  ;;  %v4400_v40 = vld [vmem:[%s20880_s3 + $0x1fc8] sm:$0xff]  ;;  %v3934_v46 = vld [vmem:[%s20880_s3 + $0x1138] sm:$0xff] }
 0x481   :  { %5926 = vmatmul.mubr.f32.vlgmr.msra.gmra.mrb[12].mxu1 %v15958_v25  ;;  %v10582_v0 = vpack.c.bf16 %v3899_v54, %v3892_v45  ;;  %v4408_v60 = vld [vmem:[%s20880_s3 + $0x2008] sm:$0xff]  ;;  %v4415_v45 = vld [vmem:[%s20880_s3 + $0x2040] sm:$0xff] }
 0x482   :  { %10569 = vmatpush1.bf16.msra.mxu1 %v10568_v17  ;;  %5996 = vmatprep.mubr.f32.mxu1 %v15966_v27  ;;  %v4365_v17 = vld [vmem:[%s20880_s3 + $0x1eb0] sm:$0xff] }
 0x483   :  { %10313 = vmatpush1.bf16.msra.mxu0 %v10312_v1  ;;  %10571 = vmatprep.subr.bf16.mxu1 %v10570_v12  ;;  %v3891_v1 = vld [vmem:[%s20880_s3 + $0xfe0] sm:$0xff]  ;;  %v3898_v12 = vld [vmem:[%s20880_s3 + $0x1018] sm:$0xff]  ;;  %v10328_v57 = vpack.c.bf16 %v4372_v5, %v4365_v17  ;;  %v10338_v17 = vpack.c.bf16 %v4415_v45, %v4408_v60 }
 0x484   :  { %10315 = vmatprep.subr.bf16.mxu0 %v10314_v13  ;;  %v3913_v13 = vld [vmem:[%s20880_s3 + $0x1090] sm:$0xff]  ;;  %v10584_v50 = vpack.c.bf16 %v3898_v12, %v3891_v1  ;;  %v4414_v1 = vld [vmem:[%s20880_s3 + $0x2038] sm:$0xff]  ;;  %v3948_v12 = vld [vmem:[%s20880_s3 + $0x11a8] sm:$0xff] }
 0x485   :  { %v10586_v48 = vpack.c.bf16 %v3913_v13, %v3906_v7  ;;  %v4422_v5 = vld [vmem:[%s20880_s3 + $0x2078] sm:$0xff]  ;;  %v4429_v7 = vld [vmem:[%s20880_s3 + $0x20b0] sm:$0xff] }
 0x486   :  { %10573 = vmatpush1.bf16.msra.mxu1 %v10572_v22  ;;  %v4379_v22 = vld [vmem:[%s20880_s3 + $0x1f20] sm:$0xff] }
 0x487   :  { %10317 = vmatpush1.bf16.msra.mxu0 %v10316_v47  ;;  %10575 = vmatprep.subr.bf16.mxu1 %v10574_v23  ;;  %v3905_v47 = vld [vmem:[%s20880_s3 + $0x1050] sm:$0xff]  ;;  %v3912_v23 = vld [vmem:[%s20880_s3 + $0x1088] sm:$0xff]  ;;  %v10332_v37 = vpack.c.bf16 %v4386_v3, %v4379_v22  ;;  %v10342_v22 = vpack.c.bf16 %v4429_v7, %v4422_v5 }
 0x488   :  { %10319 = vmatprep.subr.bf16.mxu0 %v10318_v30  ;;  %v3927_v30 = vld [vmem:[%s20880_s3 + $0x1100] sm:$0xff]  ;;  %v10588_v35 = vpack.c.bf16 %v3912_v23, %v3905_v47  ;;  %v4428_v47 = vld [vmem:[%s20880_s3 + $0x20a8] sm:$0xff]  ;;  %v3962_v23 = vld [vmem:[%s20880_s3 + $0x1218] sm:$0xff] }
 0x489   :  { %v10590_v15 = vpack.c.bf16 %v3927_v30, %v3920_v28  ;;  %v4436_v3 = vld [vmem:[%s20880_s3 + $0x20e8] sm:$0xff]  ;;  %v4443_v28 = vld [vmem:[%s20880_s3 + $0x2120] sm:$0xff] }
 0x48a   :  { %10577 = vmatpush1.bf16.msra.mxu1 %v10576_v26  ;;  %v4393_v26 = vld [vmem:[%s20880_s3 + $0x1f90] sm:$0xff] }
 0x48b   :  { %10321 = vmatpush1.bf16.msra.mxu0 %v10320_v38  ;;  %10579 = vmatprep.subr.bf16.mxu1 %v10578_v39  ;;  %v3919_v38 = vld [vmem:[%s20880_s3 + $0x10c0] sm:$0xff]  ;;  %v3926_v39 = vld [vmem:[%s20880_s3 + $0x10f8] sm:$0xff]  ;;  %v10336_v55 = vpack.c.bf16 %v4400_v40, %v4393_v26  ;;  %v10346_v26 = vpack.c.bf16 %v4443_v28, %v4436_v3 }
 0x48c   :  { %10323 = vmatprep.subr.bf16.mxu0 %v10322_v44  ;;  %v3941_v44 = vld [vmem:[%s20880_s3 + $0x1170] sm:$0xff]  ;;  %v10592_v54 = vpack.c.bf16 %v3926_v39, %v3919_v38  ;;  %v4442_v38 = vld [vmem:[%s20880_s3 + $0x2118] sm:$0xff]  ;;  %v3976_v39 = vld [vmem:[%s20880_s3 + $0x1288] sm:$0xff] }
 0x48d   :  { %v10594_v9 = vpack.c.bf16 %v3941_v44, %v3934_v46  ;;  %v4450_v40 = vld [vmem:[%s20880_s3 + $0x2158] sm:$0xff]  ;;  %v4457_v46 = vld [vmem:[%s20880_s3 + $0x2190] sm:$0xff] }
 0x48e   :  { %10581 = vmatpush1.bf16.msra.mxu1 %v10580_v2  ;;  %v4407_v2 = vld [vmem:[%s20880_s3 + $0x2000] sm:$0xff] }
 0x48f   :  { %10325 = vmatpush1.bf16.msra.mxu0 %v10324_v63  ;;  %10583 = vmatprep.subr.bf16.mxu1 %v10582_v0  ;;  %v3933_v63 = vld [vmem:[%s20880_s3 + $0x1130] sm:$0xff]  ;;  %v3940_v0 = vld [vmem:[%s20880_s3 + $0x1168] sm:$0xff]  ;;  %v10340_v14 = vpack.c.bf16 %v4414_v1, %v4407_v2  ;;  %v10350_v2 = vpack.c.bf16 %v4457_v46, %v4450_v40 }
 0x490   :  { %10327 = vmatprep.subr.bf16.mxu0 %v10326_v42  ;;  %v3955_v42 = vld [vmem:[%s20880_s3 + $0x11e0] sm:$0xff]  ;;  %v10596_v13 = vpack.c.bf16 %v3940_v0, %v3933_v63  ;;  %v4456_v63 = vld [vmem:[%s20880_s3 + $0x2188] sm:$0xff]  ;;  %v3990_v0 = vld [vmem:[%s20880_s3 + $0x12f8] sm:$0xff] }
 0x491   :  { %v10598_v19 = vpack.c.bf16 %v3955_v42, %v3948_v12  ;;  %v4464_v1 = vld [vmem:[%s20880_s3 + $0x21c8] sm:$0xff]  ;;  %v4471_v12 = vld [vmem:[%s20880_s3 + $0x2200] sm:$0xff] }
 0x492   :  { %10585 = vmatpush1.bf16.msra.mxu1 %v10584_v50  ;;  %v4421_v50 = vld [vmem:[%s20880_s3 + $0x2070] sm:$0xff] }
 0x493   :  { %10329 = vmatpush1.bf16.msra.mxu0 %v10328_v57  ;;  %10587 = vmatprep.subr.bf16.mxu1 %v10586_v48  ;;  %v3947_v57 = vld [vmem:[%s20880_s3 + $0x11a0] sm:$0xff]  ;;  %v3954_v48 = vld [vmem:[%s20880_s3 + $0x11d8] sm:$0xff]  ;;  %v10344_v33 = vpack.c.bf16 %v4428_v47, %v4421_v50  ;;  %v10354_v50 = vpack.c.bf16 %v4471_v12, %v4464_v1 }
 0x494   :  { %10331 = vmatprep.subr.bf16.mxu0 %v10330_v43  ;;  %v3969_v43 = vld [vmem:[%s20880_s3 + $0x1250] sm:$0xff]  ;;  %v10600_v30 = vpack.c.bf16 %v3954_v48, %v3947_v57  ;;  %v4470_v57 = vld [vmem:[%s20880_s3 + $0x21f8] sm:$0xff]  ;;  %v4004_v48 = vld [vmem:[%s20880_s3 + $0x1368] sm:$0xff] }
 0x495   :  { %v10602_v34 = vpack.c.bf16 %v3969_v43, %v3962_v23  ;;  %v4478_v47 = vld [vmem:[%s20880_s3 + $0x2238] sm:$0xff]  ;;  %v4485_v23 = vld [vmem:[%s20880_s3 + $0x2270] sm:$0xff] }
 0x496   :  { %10589 = vmatpush1.bf16.msra.mxu1 %v10588_v35  ;;  %v4435_v35 = vld [vmem:[%s20880_s3 + $0x20e0] sm:$0xff] }
 0x497   :  { %10333 = vmatpush1.bf16.msra.mxu0 %v10332_v37  ;;  %10591 = vmatprep.subr.bf16.mxu1 %v10590_v15  ;;  %v3961_v37 = vld [vmem:[%s20880_s3 + $0x1210] sm:$0xff]  ;;  %v3968_v15 = vld [vmem:[%s20880_s3 + $0x1248] sm:$0xff]  ;;  %v10348_v60 = vpack.c.bf16 %v4442_v38, %v4435_v35  ;;  %v10358_v35 = vpack.c.bf16 %v4485_v23, %v4478_v47  ;;  %v4519_v23 = vld [vmem:[%s20880_s3 + $0x2380] sm:$0xff] }
 0x498   :  { %10335 = vmatprep.subr.bf16.mxu0 %v10334_v18  ;;  %v3983_v18 = vld [vmem:[%s20880_s3 + $0x12c0] sm:$0xff]  ;;  %v10604_v44 = vpack.c.bf16 %v3968_v15, %v3961_v37  ;;  %v4484_v37 = vld [vmem:[%s20880_s3 + $0x2268] sm:$0xff]  ;;  %v4018_v15 = vld [vmem:[%s20880_s3 + $0x13d8] sm:$0xff] }
 0x499   :  { %v10606_v45 = vpack.c.bf16 %v3983_v18, %v3976_v39  ;;  %v4492_v38 = vld [vmem:[%s20880_s3 + $0x22a8] sm:$0xff]  ;;  %v4499_v39 = vld [vmem:[%s20880_s3 + $0x22e0] sm:$0xff] }
 0x49a   :  { %10593 = vmatpush1.bf16.msra.mxu1 %v10592_v54  ;;  %v4449_v54 = vld [vmem:[%s20880_s3 + $0x2150] sm:$0xff] }
 0x49b   :  { %10337 = vmatpush1.bf16.msra.mxu0 %v10336_v55  ;;  %10595 = vmatprep.subr.bf16.mxu1 %v10594_v9  ;;  %v3975_v55 = vld [vmem:[%s20880_s3 + $0x1280] sm:$0xff]  ;;  %v3982_v9 = vld [vmem:[%s20880_s3 + $0x12b8] sm:$0xff]  ;;  %v10352_v5 = vpack.c.bf16 %v4456_v63, %v4449_v54  ;;  %v10362_v54 = vpack.c.bf16 %v4499_v39, %v4492_v38 }
 0x49c   :  { %10339 = vmatprep.subr.bf16.mxu0 %v10338_v17  ;;  %v3997_v17 = vld [vmem:[%s20880_s3 + $0x1330] sm:$0xff]  ;;  %v10608_v42 = vpack.c.bf16 %v3982_v9, %v3975_v55  ;;  %v4498_v55 = vld [vmem:[%s20880_s3 + $0x22d8] sm:$0xff]  ;;  %v4032_v9 = vld [vmem:[%s20880_s3 + $0x1448] sm:$0xff] }
 0x49d   :  { %v10610_v7 = vpack.c.bf16 %v3997_v17, %v3990_v0  ;;  %v4506_v63 = vld [vmem:[%s20880_s3 + $0x2318] sm:$0xff]  ;;  %v4513_v0 = vld [vmem:[%s20880_s3 + $0x2350] sm:$0xff] }
 0x49e   :  { %10597 = vmatpush1.bf16.msra.mxu1 %v10596_v13  ;;  %v4463_v13 = vld [vmem:[%s20880_s3 + $0x21c0] sm:$0xff] }
 0x49f   :  { %10341 = vmatpush1.bf16.msra.mxu0 %v10340_v14  ;;  %10599 = vmatprep.subr.bf16.mxu1 %v10598_v19  ;;  %v3989_v14 = vld [vmem:[%s20880_s3 + $0x12f0] sm:$0xff]  ;;  %v3996_v19 = vld [vmem:[%s20880_s3 + $0x1328] sm:$0xff]  ;;  %v10356_v3 = vpack.c.bf16 %v4470_v57, %v4463_v13  ;;  %v4046_v57 = vld [vmem:[%s20880_s3 + $0x14b8] sm:$0xff] }
 0x4a0   :  { %10343 = vmatprep.subr.bf16.mxu0 %v10342_v22  ;;  %v4011_v22 = vld [vmem:[%s20880_s3 + $0x13a0] sm:$0xff]  ;;  %v10612_v43 = vpack.c.bf16 %v3996_v19, %v3989_v14  ;;  %v4505_v13 = vld [vmem:[%s20880_s3 + $0x2310] sm:$0xff]  ;;  %v4512_v14 = vld [vmem:[%s20880_s3 + $0x2348] sm:$0xff] }
 0x4a1   :  { %v10614_v28 = vpack.c.bf16 %v4011_v22, %v4004_v48  ;;  %v4520_v19 = vld [vmem:[%s20880_s3 + $0x2388] sm:$0xff]  ;;  %v4053_v48 = vld [vmem:[%s20880_s3 + $0x14f0] sm:$0xff]  ;;  %v10368_v47 = vpack.c.bf16 %v4512_v14, %v4505_v13  ;;  %v4095_v13 = vld [vmem:[%s20880_s3 + $0x1640] sm:$0xff] }
 0x4a2   :  { %10601 = vmatpush1.bf16.msra.mxu1 %v10600_v30  ;;  %v4477_v30 = vld [vmem:[%s20880_s3 + $0x2230] sm:$0xff]  ;;  %v4562_v14 = vld [vmem:[%s20880_s3 + $0x24d8] sm:$0xff] }
 0x4a3   :  { %10345 = vmatpush1.bf16.msra.mxu0 %v10344_v33  ;;  %10603 = vmatprep.subr.bf16.mxu1 %v10602_v34  ;;  %v4003_v33 = vld [vmem:[%s20880_s3 + $0x1360] sm:$0xff]  ;;  %v4010_v34 = vld [vmem:[%s20880_s3 + $0x1398] sm:$0xff]  ;;  %v10360_v40 = vpack.c.bf16 %v4484_v37, %v4477_v30  ;;  %v10626_v30 = vpack.c.bf16 %v4053_v48, %v4046_v57 }
 0x4a4   :  { %10347 = vmatprep.subr.bf16.mxu0 %v10346_v26  ;;  %v4025_v26 = vld [vmem:[%s20880_s3 + $0x1410] sm:$0xff]  ;;  %v10616_v18 = vpack.c.bf16 %v4010_v34, %v4003_v33  ;;  %v4526_v33 = vld [vmem:[%s20880_s3 + $0x23b8] sm:$0xff]  ;;  %v4060_v34 = vld [vmem:[%s20880_s3 + $0x1528] sm:$0xff] }
 0x4a5   :  { %v10618_v46 = vpack.c.bf16 %v4025_v26, %v4018_v15  ;;  %v4534_v37 = vld [vmem:[%s20880_s3 + $0x23f8] sm:$0xff]  ;;  %v4541_v15 = vld [vmem:[%s20880_s3 + $0x2430] sm:$0xff]  ;;  %v10372_v38 = vpack.c.bf16 %v4526_v33, %v4519_v23  ;;  %v4576_v33 = vld [vmem:[%s20880_s3 + $0x2548] sm:$0xff] }
 0x4a6   :  { %10605 = vmatpush1.bf16.msra.mxu1 %v10604_v44  ;;  %v4491_v44 = vld [vmem:[%s20880_s3 + $0x22a0] sm:$0xff]  ;;  %v4094_v23 = vld [vmem:[%s20880_s3 + $0x1638] sm:$0xff] }
 0x4a7   :  { %10349 = vmatpush1.bf16.msra.mxu0 %v10348_v60  ;;  %10607 = vmatprep.subr.bf16.mxu1 %v10606_v45  ;;  %v4017_v60 = vld [vmem:[%s20880_s3 + $0x13d0] sm:$0xff]  ;;  %v4024_v45 = vld [vmem:[%s20880_s3 + $0x1408] sm:$0xff]  ;;  %v10364_v1 = vpack.c.bf16 %v4498_v55, %v4491_v44  ;;  %v10374_v44 = vpack.c.bf16 %v4541_v15, %v4534_v37 }
 0x4a8   :  { %10351 = vmatprep.subr.bf16.mxu0 %v10350_v2  ;;  %v4039_v2 = vld [vmem:[%s20880_s3 + $0x1480] sm:$0xff]  ;;  %v10620_v17 = vpack.c.bf16 %v4024_v45, %v4017_v60  ;;  %v4540_v60 = vld [vmem:[%s20880_s3 + $0x2428] sm:$0xff]  ;;  %v4074_v45 = vld [vmem:[%s20880_s3 + $0x1598] sm:$0xff] }
 0x4a9   :  { %v10622_v12 = vpack.c.bf16 %v4039_v2, %v4032_v9  ;;  %v4548_v55 = vld [vmem:[%s20880_s3 + $0x2468] sm:$0xff]  ;;  %v4555_v9 = vld [vmem:[%s20880_s3 + $0x24a0] sm:$0xff] }
 0x4aa   :  { %10609 = vmatpush1.bf16.msra.mxu1 %v10608_v42  ;;  %v4031_v42 = vld [vmem:[%s20880_s3 + $0x1440] sm:$0xff] }
 0x4ab   :  { %10353 = vmatpush1.bf16.msra.mxu0 %v10352_v5  ;;  %10611 = vmatprep.subr.bf16.mxu1 %v10610_v7  ;;  %v4038_v5 = vld [vmem:[%s20880_s3 + $0x1478] sm:$0xff]  ;;  %v10366_v7 = vpack.c.bf16 %v4513_v0, %v4506_v63 }
 0x4ac   :  { %10355 = vmatprep.subr.bf16.mxu0 %v10354_v50  ;;  %v4527_v50 = vld [vmem:[%s20880_s3 + $0x23c0] sm:$0xff]  ;;  %v10624_v22 = vpack.c.bf16 %v4038_v5, %v4031_v42  ;;  %v10378_v42 = vpack.c.bf16 %v4555_v9, %v4548_v55  ;;  %v4554_v5 = vld [vmem:[%s20880_s3 + $0x2498] sm:$0xff] }
 0x4ae   :  { %10613 = vmatpush1.bf16.msra.mxu1 %v10612_v43  ;;  %v4045_v43 = vld [vmem:[%s20880_s3 + $0x14b0] sm:$0xff] }
 0x4af   :  { %10357 = vmatpush1.bf16.msra.mxu0 %v10356_v3  ;;  %10615 = vmatprep.subr.bf16.mxu1 %v10614_v28  ;;  %v4052_v3 = vld [vmem:[%s20880_s3 + $0x14e8] sm:$0xff]  ;;  %v10370_v28 = vpack.c.bf16 %v4527_v50, %v4520_v19  ;;  %v4569_v19 = vld [vmem:[%s20880_s3 + $0x2510] sm:$0xff] }
 0x4b0   :  { %10359 = vmatprep.subr.bf16.mxu0 %v10358_v35  ;;  %v4067_v35 = vld [vmem:[%s20880_s3 + $0x1560] sm:$0xff]  ;;  %v10628_v26 = vpack.c.bf16 %v4052_v3, %v4045_v43  ;;  %v10382_v43 = vpack.c.bf16 %v4569_v19, %v4562_v14  ;;  %v4568_v3 = vld [vmem:[%s20880_s3 + $0x2508] sm:$0xff] }
 0x4b1   :  { %v10630_v39 = vpack.c.bf16 %v4067_v35, %v4060_v34  ;;  %v4583_v34 = vld [vmem:[%s20880_s3 + $0x2580] sm:$0xff] }
 0x4b2   :  { %10617 = vmatpush1.bf16.msra.mxu1 %v10616_v18  ;;  %v4533_v18 = vld [vmem:[%s20880_s3 + $0x23f0] sm:$0xff]  ;;  %v4755_v14 = vld [vmem:[%s20881_s4] sm:$0x7f] }
 0x4b3   :  { %10361 = vmatpush1.bf16.msra.mxu0 %v10360_v40  ;;  %10619 = vmatprep.subr.bf16.mxu1 %v10618_v46  ;;  %v4059_v40 = vld [vmem:[%s20880_s3 + $0x1520] sm:$0xff]  ;;  %v4066_v46 = vld [vmem:[%s20880_s3 + $0x1558] sm:$0xff]  ;;  %v10376_v63 = vpack.c.bf16 %v4540_v60, %v4533_v18  ;;  %v10386_v18 = vpack.c.bf16 %v4583_v34, %v4576_v33  ;;  %v4625_v33 = vld [vmem:[%s20880_s3 + $0x26d0] sm:$0xff]  ;;  %v4764_v34 = vrot.slane %v4755_v14, %v15376_v49 }
 0x4b4   :  { %10363 = vmatprep.subr.bf16.mxu0 %v10362_v54  ;;  %v4081_v54 = vld [vmem:[%s20880_s3 + $0x15d0] sm:$0xff]  ;;  %v10632_v2 = vpack.c.bf16 %v4066_v46, %v4059_v40  ;;  %v4582_v40 = vld [vmem:[%s20880_s3 + $0x2578] sm:$0xff]  ;;  %v4116_v46 = vld [vmem:[%s20880_s3 + $0x16e8] sm:$0xff] }
 0x4b5   :  { %v10634_v0 = vpack.c.bf16 %v4081_v54, %v4074_v45  ;;  %v4590_v60 = vld [vmem:[%s20880_s3 + $0x25b8] sm:$0xff]  ;;  %v4597_v45 = vld [vmem:[%s20880_s3 + $0x25f0] sm:$0xff] }
 0x4b6   :  { %10621 = vmatpush1.bf16.msra.mxu1 %v10620_v17  ;;  %v4547_v17 = vld [vmem:[%s20880_s3 + $0x2460] sm:$0xff] }
 0x4b7   :  { %10365 = vmatpush1.bf16.msra.mxu0 %v10364_v1  ;;  %10623 = vmatprep.subr.bf16.mxu1 %v10622_v12  ;;  %v4073_v1 = vld [vmem:[%s20880_s3 + $0x1590] sm:$0xff]  ;;  %v4080_v12 = vld [vmem:[%s20880_s3 + $0x15c8] sm:$0xff]  ;;  %v10380_v57 = vpack.c.bf16 %v4554_v5, %v4547_v17  ;;  %v10390_v17 = vpack.c.bf16 %v4597_v45, %v4590_v60 }
 0x4b8   :  { %10367 = vmatprep.subr.bf16.mxu0 %v10366_v7  ;;  %v4088_v7 = vld [vmem:[%s20880_s3 + $0x1608] sm:$0xff]  ;;  %v10636_v50 = vpack.c.bf16 %v4080_v12, %v4073_v1  ;;  %v4130_v12 = vld [vmem:[%s20880_s3 + $0x1758] sm:$0xff]  ;;  %v4165_v60 = vld [vmem:[%s20880_s3 + $0x1870] sm:$0xff] }
 0x4b9   :  { %v10638_v48 = vpack.c.bf16 %v4095_v13, %v4088_v7  ;;  %v4596_v1 = vld [vmem:[%s20880_s3 + $0x25e8] sm:$0xff]  ;;  %v4611_v7 = vld [vmem:[%s20880_s3 + $0x2660] sm:$0xff] }
 0x4ba   :  { %5642 = vmatmul.mubr.f32.vlgmr.msra.gmra.mrb[12].mxu0 %v16837_v41  ;;  %10625 = vmatpush1.bf16.msra.mxu1 %v10624_v22  ;;  %v4561_v22 = vld [vmem:[%s20880_s3 + $0x24d0] sm:$0xff]  ;;  %v4604_v5 = vld [vmem:[%s20880_s3 + $0x2628] sm:$0xff] }
 0x4bb   :  { %10369 = vmatpush1.bf16.msra.mxu0 %v10368_v47  ;;  %5712 = vmatprep.mubr.f32.mxu0 %v16849_v61  ;;  %v4087_v47 = vld [vmem:[%s20880_s3 + $0x1600] sm:$0xff]  ;;  %v10384_v37 = vpack.c.bf16 %v4568_v3, %v4561_v22  ;;  %v4136_v22 = vld [vmem:[%s20880_s3 + $0x1788] sm:$0xff] }
 0x4bc   :  { %10371 = vmatprep.subr.bf16.mxu0 %v10370_v28  ;;  %10627 = vmatprep.subr.bf16.mxu1 %v10626_v30  ;;  %v4102_v28 = vld [vmem:[%s20880_s3 + $0x1678] sm:$0xff]  ;;  %v4109_v30 = vld [vmem:[%s20880_s3 + $0x16b0] sm:$0xff]  ;;  %v10640_v35 = vpack.c.bf16 %v4094_v23, %v4087_v47  ;;  %v10394_v47 = vpack.c.bf16 %v4611_v7, %v4604_v5  ;;  %v4151_v3 = vld [vmem:[%s20880_s3 + $0x1800] sm:$0xff] }
 0x4bd   :  { %v10642_v15 = vpack.c.bf16 %v4109_v30, %v4102_v28  ;;  %v4610_v23 = vld [vmem:[%s20880_s3 + $0x2658] sm:$0xff]  ;;  %v4760_v28 = vrot.slane %v4755_v14, %v15672_v36  ;;  %v4164_v5 = vld [vmem:[%s20880_s3 + $0x1868] sm:$0xff] }
 0x4be   :  { %10629 = vmatpush1.bf16.msra.mxu1 %v10628_v26  ;;  %v4575_v26 = vld [vmem:[%s20880_s3 + $0x2540] sm:$0xff]  ;;  %v4618_v30 = vld [vmem:[%s20880_s3 + $0x2698] sm:$0xff]  ;;  %v4172_v14 = vld [vmem:[%s20880_s3 + $0x18a8] sm:$0xff] }
 0x4bf   :  { %10373 = vmatpush1.bf16.msra.mxu0 %v10372_v38  ;;  %10631 = vmatprep.subr.bf16.mxu1 %v10630_v39  ;;  %v4101_v38 = vld [vmem:[%s20880_s3 + $0x1670] sm:$0xff]  ;;  %v4108_v39 = vld [vmem:[%s20880_s3 + $0x16a8] sm:$0xff]  ;;  %v10388_v55 = vpack.c.bf16 %v4582_v40, %v4575_v26  ;;  %v10398_v40 = vpack.c.bf16 %v4625_v33, %v4618_v30  ;;  %v4186_v30 = vld [vmem:[%s20880_s3 + $0x1918] sm:$0xff] }
 0x4c0   :  { %10375 = vmatprep.subr.bf16.mxu0 %v10374_v44  ;;  %v4123_v44 = vld [vmem:[%s20880_s3 + $0x1720] sm:$0xff]  ;;  %v10644_v54 = vpack.c.bf16 %v4108_v39, %v4101_v38  ;;  %v4617_v26 = vld [vmem:[%s20880_s3 + $0x2690] sm:$0xff]  ;;  %v4150_v39 = vld [vmem:[%s20880_s3 + $0x17f8] sm:$0xff] }
 0x4c1   :  { %5997 = vmatmul.mubr.f32.vlgmr.msra.gmra.mrb[12].mxu1 %v16189_v52  ;;  %v10646_v9 = vpack.c.bf16 %v4123_v44, %v4116_v46  ;;  %v4143_v38 = vld [vmem:[%s20880_s3 + $0x17c0] sm:$0xff]  ;;  %v4624_v46 = vld [vmem:[%s20880_s3 + $0x26c8] sm:$0xff]  ;;  %v4158_v44 = vld [vmem:[%s20880_s3 + $0x1838] sm:$0xff] }
 0x4c2   :  { %10633 = vmatpush1.bf16.msra.mxu1 %v10632_v2  ;;  %6067 = vmatprep.mubr.f32.mxu1 %v16197_v56  ;;  %v4589_v2 = vld [vmem:[%s20880_s3 + $0x25b0] sm:$0xff] }
 0x4c3   :  { %10377 = vmatpush1.bf16.msra.mxu0 %v10376_v63  ;;  %10635 = vmatprep.subr.bf16.mxu1 %v10634_v0  ;;  %v4115_v63 = vld [vmem:[%s20880_s3 + $0x16e0] sm:$0xff]  ;;  %v4122_v0 = vld [vmem:[%s20880_s3 + $0x1718] sm:$0xff]  ;;  %v10392_v19 = vpack.c.bf16 %v4596_v1, %v4589_v2  ;;  %v10658_v1 = vpack.c.bf16 %v4165_v60, %v4158_v44  ;;  %v4193_v33 = vld [vmem:[%s20880_s3 + $0x1950] sm:$0xff] }
 0x4c4   :  { %10379 = vmatprep.subr.bf16.mxu0 %v10378_v42  ;;  %v4137_v42 = vld [vmem:[%s20880_s3 + $0x1790] sm:$0xff]  ;;  %v10648_v13 = vpack.c.bf16 %v4122_v0, %v4115_v63  ;;  %v10656_v63 = vpack.c.bf16 %v4150_v39, %v4143_v38  ;;  %v4659_v38 = vld [vmem:[%s20880_s3 + $0x27e0] sm:$0xff]  ;;  %v4200_v44 = vld [vmem:[%s20880_s3 + $0x1988] sm:$0xff] }
 0x4c5   :  { %v4185_v39 = vld [vmem:[%s20880_s3 + $0x1910] sm:$0xff]  ;;  %v4207_v60 = vld [vmem:[%s20880_s3 + $0x19c0] sm:$0xff] }
 0x4c6   :  { %10637 = vmatpush1.bf16.msra.mxu1 %v10636_v50  ;;  %v10650_v50 = vpack.c.bf16 %v4137_v42, %v4130_v12  ;;  %v4631_v12 = vld [vmem:[%s20880_s3 + $0x2700] sm:$0xff]  ;;  %v4157_v42 = vld [vmem:[%s20880_s3 + $0x1830] sm:$0xff] }
 0x4c7   :  { %10381 = vmatpush1.bf16.msra.mxu0 %v10380_v57  ;;  %10639 = vmatprep.subr.bf16.mxu1 %v10638_v48  ;;  %v4603_v57 = vld [vmem:[%s20880_s3 + $0x2620] sm:$0xff]  ;;  %v4129_v48 = vld [vmem:[%s20880_s3 + $0x1750] sm:$0xff] }
 0x4c8   :  { %10383 = vmatprep.subr.bf16.mxu0 %v10382_v43  ;;  %v4144_v43 = vld [vmem:[%s20880_s3 + $0x17c8] sm:$0xff] }
 0x4ca   :  { %10641 = vmatpush1.bf16.msra.mxu1 %v10640_v35  ;;  %v10652_v35 = vpack.c.bf16 %v4136_v22, %v4129_v48 }
 0x4cb   :  { %10385 = vmatpush1.bf16.msra.mxu0 %v10384_v37  ;;  %10643 = vmatprep.subr.bf16.mxu1 %v10642_v15  ;;  %v10396_v37 = vpack.c.bf16 %v4610_v23, %v4603_v57  ;;  %v10654_v15 = vpack.c.bf16 %v4151_v3, %v4144_v43  ;;  %v10660_v57 = vpack.c.bf16 %v4164_v5, %v4157_v42  ;;  %v4171_v23 = vld [vmem:[%s20880_s3 + $0x18a0] sm:$0xff]  ;;  %v4178_v43 = vld [vmem:[%s20880_s3 + $0x18d8] sm:$0xff]  ;;  %v4680_v42 = vld [vmem:[%s20880_s3 + $0x2888] sm:$0xff] }
 0x4cc   :  { %10387 = vmatprep.subr.bf16.mxu0 %v10386_v18  ;;  %v4214_v5 = vld [vmem:[%s20880_s3 + $0x19f8] sm:$0xff] }
 0x4ce   :  { %10645 = vmatpush1.bf16.msra.mxu1 %v10644_v54 }
 0x4cf   :  { %10389 = vmatpush1.bf16.msra.mxu0 %v10388_v55  ;;  %10647 = vmatprep.subr.bf16.mxu1 %v10646_v9  ;;  %v4632_v55 = vld [vmem:[%s20880_s3 + $0x2708] sm:$0xff]  ;;  %v4639_v9 = vld [vmem:[%s20880_s3 + $0x2740] sm:$0xff] }
 0x4d0   :  { %10391 = vmatprep.subr.bf16.mxu0 %v10390_v17  ;;  %v10400_v17 = vpack.c.bf16 %v4624_v46, %v4617_v26  ;;  %v10666_v26 = vpack.c.bf16 %v4193_v33, %v4186_v30  ;;  %v4666_v46 = vld [vmem:[%s20880_s3 + $0x2818] sm:$0xff]  ;;  %v4709_v30 = vld [vmem:[%s20880_s3 + $0x2970] sm:$0xff] }
 0x4d2   :  { %10649 = vmatpush1.bf16.msra.mxu1 %v10648_v13  ;;  %v4638_v13 = vld [vmem:[%s20880_s3 + $0x2738] sm:$0xff] }
 0x4d3   :  { %10393 = vmatpush1.bf16.msra.mxu0 %v10392_v19  ;;  %10651 = vmatprep.subr.bf16.mxu1 %v10650_v50  ;;  %v4179_v19 = vld [vmem:[%s20880_s3 + $0x18e0] sm:$0xff]  ;;  %v4646_v50 = vld [vmem:[%s20880_s3 + $0x2778] sm:$0xff]  ;;  %v10404_v48 = vpack.c.bf16 %v4638_v13, %v4631_v12  ;;  %v4688_v13 = vld [vmem:[%s20880_s3 + $0x28c8] sm:$0xff] }
 0x4d4   :  { %v5217_v18 = vpop.f32.mrb[10].mxu1  ;;  %10395 = vmatprep.subr.bf16.mxu0 %v10394_v47  ;;  %v10662_v22 = vpack.c.bf16 %v4179_v19, %v4172_v14  ;;  %v4645_v47 = vld [vmem:[%s20880_s3 + $0x2770] sm:$0xff]  ;;  %v4695_v14 = vld [vmem:[%s20880_s3 + $0x2900] sm:$0xff] }
 0x4d5   :  { %v11373_v45 = vadd.f32 %v5217_v18, %v4760_v28  ;;  %v5219_v54 = vpop.f32.mrb[11].mxu1  ;;  %v4652_v28 = vld [vmem:[%s20880_s3 + $0x27a8] sm:$0xff] }
 0x4d6   :  { %v11375_v2 = vadd.f32 %v5219_v54, %v4764_v34  ;;  %10653 = vmatpush1.bf16.msra.mxu1 %v10652_v35  ;;  %v4660_v34 = vld [vmem:[%s20880_s3 + $0x27e8] sm:$0xff]  ;;  %v4667_v35 = vld [vmem:[%s20880_s3 + $0x2820] sm:$0xff]  ;;  %v4681_v54 = vld [vmem:[%s20880_s3 + $0x2890] sm:$0xff] }
 0x4d7   :  { %v18553_v0 = vadd.f32 %v11373_v45, %v17704_v51  ;;  %10397 = vmatpush1.bf16.msra.mxu0 %v10396_v37  ;;  %10655 = vmatprep.subr.bf16.mxu1 %v10654_v15  ;;  %v10402_v51 = vpack.c.bf16 %v4639_v9, %v4632_v55  ;;  %v10664_v37 = vpack.c.bf16 %v4178_v43, %v4171_v23  ;;  %v4192_v18 = vld [vmem:[%s20880_s3 + $0x1948] sm:$0xff]  ;;  %v4674_v45 = vld [vmem:[%s20880_s3 + $0x2858] sm:$0xff] }
 0x4d8   :  { %v18565_v7 = vadd.f32 %v11375_v2, %v17715_v21  ;;  %10399 = vmatprep.subr.bf16.mxu0 %v10398_v40  ;;  %v4653_v21 = vld [vmem:[%s20880_s3 + $0x27b0] sm:$0xff]  ;;  %v10408_v15 = vpack.c.bf16 %v4652_v28, %v4645_v47  ;;  %v10410_v40 = vpack.c.bf16 %v4667_v35, %v4660_v34  ;;  %v10668_v55 = vpack.c.bf16 %v4192_v18, %v4185_v39  ;;  %v4694_v23 = vld [vmem:[%s20880_s3 + $0x28f8] sm:$0xff]  ;;  %v4228_v43 = vld [vmem:[%s20880_s3 + $0x1a68] sm:$0xff] }
 0x4d9   :  { %v10406_v3 = vpack.c.bf16 %v4653_v21, %v4646_v50  ;;  %v10412_v9 = vpack.c.bf16 %v4666_v46, %v4659_v38  ;;  %v10670_v2 = vpack.c.bf16 %v4207_v60, %v4200_v44  ;;  %v10414_v12 = vpack.c.bf16 %v4681_v54, %v4674_v45  ;;  %v4702_v28 = vld [vmem:[%s20880_s3 + $0x2938] sm:$0xff]  ;;  %v4708_v39 = vld [vmem:[%s20880_s3 + $0x2968] sm:$0xff]  ;;  %v4723_v44 = vld [vmem:[%s20880_s3 + $0x29e0] sm:$0xff] }
 0x4da   :  { %10657 = vmatpush1.bf16.msra.mxu1 %v10656_v63  ;;  %v4673_v63 = vld [vmem:[%s20880_s3 + $0x2850] sm:$0xff]  ;;  %v10418_v47 = vpack.c.bf16 %v4695_v14, %v4688_v13  ;;  %v10422_v38 = vpack.c.bf16 %v4709_v30, %v4702_v28  ;;  %v4242_v18 = vld [vmem:[%s20880_s3 + $0x1ad8] sm:$0xff]  ;;  %v4716_v46 = vld [vmem:[%s20880_s3 + $0x29a8] sm:$0xff] }
 0x4db   :  { %10401 = vmatpush1.bf16.msra.mxu0 %v10400_v17  ;;  %10659 = vmatprep.subr.bf16.mxu1 %v10658_v1  ;;  %v4199_v17 = vld [vmem:[%s20880_s3 + $0x1980] sm:$0xff]  ;;  %v4206_v1 = vld [vmem:[%s20880_s3 + $0x19b8] sm:$0xff]  ;;  %v10416_v50 = vpack.c.bf16 %v4680_v42, %v4673_v63  ;;  %v10426_v63 = vpack.c.bf16 %v4723_v44, %v4716_v46 }
 0x4dc   :  { %10403 = vmatprep.subr.bf16.mxu0 %v10402_v51  ;;  %v4221_v51 = vld [vmem:[%s20880_s3 + $0x1a30] sm:$0xff]  ;;  %v10672_v19 = vpack.c.bf16 %v4206_v1, %v4199_v17  ;;  %v4722_v17 = vld [vmem:[%s20880_s3 + $0x29d8] sm:$0xff]  ;;  %v4256_v1 = vld [vmem:[%s20880_s3 + $0x1b48] sm:$0xff] }
 0x4dd   :  { %v10674_v21 = vpack.c.bf16 %v4221_v51, %v4214_v5  ;;  %v4730_v42 = vld [vmem:[%s20880_s3 + $0x2a18] sm:$0xff]  ;;  %v4737_v5 = vld [vmem:[%s20880_s3 + $0x2a50] sm:$0xff] }
 0x4de   :  { %10661 = vmatpush1.bf16.msra.mxu1 %v10660_v57  ;;  %v4687_v57 = vld [vmem:[%s20880_s3 + $0x28c0] sm:$0xff] }
 0x4df   :  { %10405 = vmatpush1.bf16.msra.mxu0 %v10404_v48  ;;  %10663 = vmatprep.subr.bf16.mxu1 %v10662_v22  ;;  %v4213_v48 = vld [vmem:[%s20880_s3 + $0x19f0] sm:$0xff]  ;;  %v4220_v22 = vld [vmem:[%s20880_s3 + $0x1a28] sm:$0xff]  ;;  %v10420_v34 = vpack.c.bf16 %v4694_v23, %v4687_v57  ;;  %v10430_v57 = vpack.c.bf16 %v4737_v5, %v4730_v42 }
 0x4e0   :  { %10407 = vmatprep.subr.bf16.mxu0 %v10406_v3  ;;  %v4235_v3 = vld [vmem:[%s20880_s3 + $0x1aa0] sm:$0xff]  ;;  %v10676_v33 = vpack.c.bf16 %v4220_v22, %v4213_v48  ;;  %v4736_v48 = vld [vmem:[%s20880_s3 + $0x2a48] sm:$0xff]  ;;  %v4270_v22 = vld [vmem:[%s20880_s3 + $0x1bb8] sm:$0xff] }
 0x4e1   :  { %v10678_v35 = vpack.c.bf16 %v4235_v3, %v4228_v43  ;;  %v4744_v23 = vld [vmem:[%s20880_s3 + $0x2a88] sm:$0xff]  ;;  %v4751_v43 = vld [vmem:[%s20880_s3 + $0x2ac0] sm:$0xff]  ;;  %v4297_v5 = vld [vmem:[%s20880_s3 + $0x1c90] sm:$0xff] }
 0x4e2   :  { %10665 = vmatpush1.bf16.msra.mxu1 %v10664_v37  ;;  %v4701_v37 = vld [vmem:[%s20880_s3 + $0x2930] sm:$0xff] }
 0x4e3   :  { %10409 = vmatpush1.bf16.msra.mxu0 %v10408_v15  ;;  %10667 = vmatprep.subr.bf16.mxu1 %v10666_v26  ;;  %v4227_v15 = vld [vmem:[%s20880_s3 + $0x1a60] sm:$0xff]  ;;  %v4234_v26 = vld [vmem:[%s20880_s3 + $0x1a98] sm:$0xff]  ;;  %v10424_v45 = vpack.c.bf16 %v4708_v39, %v4701_v37  ;;  %v10434_v37 = vpack.c.bf16 %v4751_v43, %v4744_v23  ;;  %v3501_v39 = vld [vmem:[%s20880_s3 + $0x3b0] sm:$0xff] }
 0x4e4   :  { %10411 = vmatprep.subr.bf16.mxu0 %v10410_v40  ;;  %v4249_v40 = vld [vmem:[%s20880_s3 + $0x1b10] sm:$0xff]  ;;  %v10680_v60 = vpack.c.bf16 %v4234_v26, %v4227_v15  ;;  %v4750_v15 = vld [vmem:[%s20880_s3 + $0x2ab8] sm:$0xff]  ;;  %v4284_v26 = vld [vmem:[%s20880_s3 + $0x1c28] sm:$0xff] }
 0x4e5   :  { %v10682_v54 = vpack.c.bf16 %v4249_v40, %v4242_v18  ;;  %v3508_v18 = vld [vmem:[%s20880_s3 + $0x3e8] sm:$0xff] }
 0x4e6   :  { %10669 = vmatpush1.bf16.msra.mxu1 %v10668_v55  ;;  %v4715_v55 = vld [vmem:[%s20880_s3 + $0x29a0] sm:$0xff] }
 0x4e7   :  { %10413 = vmatpush1.bf16.msra.mxu0 %v10412_v9  ;;  %10671 = vmatprep.subr.bf16.mxu1 %v10670_v2  ;;  %v4241_v9 = vld [vmem:[%s20880_s3 + $0x1ad0] sm:$0xff]  ;;  %v4248_v2 = vld [vmem:[%s20880_s3 + $0x1b08] sm:$0xff]  ;;  %v10428_v13 = vpack.c.bf16 %v4722_v17, %v4715_v55 }
 0x4e8   :  { %10415 = vmatprep.subr.bf16.mxu0 %v10414_v12  ;;  %v4263_v12 = vld [vmem:[%s20880_s3 + $0x1b80] sm:$0xff]  ;;  %v10684_v51 = vpack.c.bf16 %v4248_v2, %v4241_v9  ;;  %v3389_v55 = vld [vmem:[%s20880_s3 + $0x30] sm:$0xff]  ;;  %v3396_v9 = vld [vmem:[%s20880_s3 + $0x68] sm:$0xff] }
 0x4e9   :  { %v10686_v14 = vpack.c.bf16 %v4263_v12, %v4256_v1  ;;  %v4298_v2 = vld [vmem:[%s20880_s3 + $0x1c98] sm:$0xff]  ;;  %v3515_v1 = vld [vmem:[%s20880_s3 + $0x420] sm:$0xff]  ;;  %v10832_v42 = vpack.c.bf16 %v3396_v9, %v3389_v55  ;;  %v3557_v55 = vld [vmem:[%s20880_s3 + $0x570] sm:$0xff] }
 0x4ea   :  { %10673 = vmatpush1.bf16.msra.mxu1 %v10672_v19  ;;  %v4729_v19 = vld [vmem:[%s20880_s3 + $0x2a10] sm:$0xff]  ;;  %v3522_v12 = vld [vmem:[%s20880_s3 + $0x458] sm:$0xff]  ;;  %v3564_v9 = vld [vmem:[%s20880_s3 + $0x5a8] sm:$0xff] }
 0x4eb   :  { %10417 = vmatpush1.bf16.msra.mxu0 %v10416_v50  ;;  %10675 = vmatprep.subr.bf16.mxu1 %v10674_v21  ;;  %v4255_v50 = vld [vmem:[%s20880_s3 + $0x1b40] sm:$0xff]  ;;  %v4262_v21 = vld [vmem:[%s20880_s3 + $0x1b78] sm:$0xff]  ;;  %v10432_v28 = vpack.c.bf16 %v4736_v48, %v4729_v19  ;;  %v3529_v48 = vld [vmem:[%s20880_s3 + $0x490] sm:$0xff] }
 0x4ec   :  { %10419 = vmatprep.subr.bf16.mxu0 %v10418_v47  ;;  %v4277_v47 = vld [vmem:[%s20880_s3 + $0x1bf0] sm:$0xff]  ;;  %v10688_v3 = vpack.c.bf16 %v4262_v21, %v4255_v50  ;;  %v3410_v19 = vld [vmem:[%s20880_s3 + $0xd8] sm:$0xff]  ;;  %v4312_v50 = vld [vmem:[%s20880_s3 + $0x1d08] sm:$0xff] }
 0x4ed   :  { %v10690_v30 = vpack.c.bf16 %v4277_v47, %v4270_v22  ;;  %v4319_v21 = vld [vmem:[%s20880_s3 + $0x1d40] sm:$0xff]  ;;  %v3536_v22 = vld [vmem:[%s20880_s3 + $0x4c8] sm:$0xff] }
 0x4ee   :  { %10677 = vmatpush1.bf16.msra.mxu1 %v10676_v33  ;;  %v4743_v33 = vld [vmem:[%s20880_s3 + $0x2a80] sm:$0xff]  ;;  %v10702_v43 = vpack.c.bf16 %v4319_v21, %v4312_v50  ;;  %v3578_v50 = vld [vmem:[%s20880_s3 + $0x618] sm:$0xff] }
 0x4ef   :  { %10421 = vmatpush1.bf16.msra.mxu0 %v10420_v34  ;;  %10679 = vmatprep.subr.bf16.mxu1 %v10678_v35  ;;  %v4269_v34 = vld [vmem:[%s20880_s3 + $0x1bb0] sm:$0xff]  ;;  %v4276_v35 = vld [vmem:[%s20880_s3 + $0x1be8] sm:$0xff]  ;;  %v10436_v46 = vpack.c.bf16 %v4750_v15, %v4743_v33  ;;  %v10838_v33 = vpack.c.bf16 %v3536_v22, %v3529_v48  ;;  %v3543_v15 = vld [vmem:[%s20880_s3 + $0x500] sm:$0xff] }
 0x4f0   :  { %10423 = vmatprep.subr.bf16.mxu0 %v10422_v38  ;;  %v4291_v38 = vld [vmem:[%s20880_s3 + $0x1c60] sm:$0xff]  ;;  %v10692_v40 = vpack.c.bf16 %v4276_v35, %v4269_v34  ;;  %v3424_v34 = vld [vmem:[%s20880_s3 + $0x148] sm:$0xff]  ;;  %v4326_v35 = vld [vmem:[%s20880_s3 + $0x1d78] sm:$0xff] }
 0x4f1   :  { %v10694_v44 = vpack.c.bf16 %v4291_v38, %v4284_v26  ;;  %v4353_v22 = vld [vmem:[%s20880_s3 + $0x1e50] sm:$0xff] }
 0x4f2   :  { %10681 = vmatpush1.bf16.msra.mxu1 %v10680_v60  ;;  %v4283_v60 = vld [vmem:[%s20880_s3 + $0x1c20] sm:$0xff] }
 0x4f3   :  { %10425 = vmatpush1.bf16.msra.mxu0 %v10424_v45  ;;  %10683 = vmatprep.subr.bf16.mxu1 %v10682_v54  ;;  %v4290_v45 = vld [vmem:[%s20880_s3 + $0x1c58] sm:$0xff]  ;;  %v10830_v54 = vpack.c.bf16 %v3508_v18, %v3501_v39  ;;  %v4325_v18 = vld [vmem:[%s20880_s3 + $0x1d70] sm:$0xff] }
 0x4f4   :  { %10427 = vmatprep.subr.bf16.mxu0 %v10426_v63  ;;  %v4305_v63 = vld [vmem:[%s20880_s3 + $0x1cd0] sm:$0xff]  ;;  %v10696_v17 = vpack.c.bf16 %v4290_v45, %v4283_v60  ;;  %v3438_v60 = vld [vmem:[%s20880_s3 + $0x1b8] sm:$0xff]  ;;  %v4340_v45 = vld [vmem:[%s20880_s3 + $0x1de8] sm:$0xff] }
 0x4f6   :  { %10685 = vmatpush1.bf16.msra.mxu1 %v10684_v51  ;;  %v4304_v51 = vld [vmem:[%s20880_s3 + $0x1cc8] sm:$0xff] }
 0x4f7   :  { %10429 = vmatpush1.bf16.msra.mxu0 %v10428_v13  ;;  %10687 = vmatprep.subr.bf16.mxu1 %v10686_v14  ;;  %v3403_v13 = vld [vmem:[%s20880_s3 + $0xa0] sm:$0xff]  ;;  %v10698_v14 = vpack.c.bf16 %v4305_v63, %v4298_v2  ;;  %v10700_v47 = vpack.c.bf16 %v4304_v51, %v4297_v5  ;;  %v10846_v5 = vpack.c.bf16 %v3564_v9, %v3557_v55  ;;  %v3452_v51 = vld [vmem:[%s20880_s3 + $0x228] sm:$0xff]  ;;  %v4381_v9 = vld [vmem:[%s20880_s3 + $0x1f30] sm:$0xff] }
 0x4f8   :  { %10431 = vmatprep.subr.bf16.mxu0 %v10430_v57  ;;  %v10834_v57 = vpack.c.bf16 %v3522_v12, %v3515_v1  ;;  %v10836_v23 = vpack.c.bf16 %v3410_v19, %v3403_v13  ;;  %v4339_v1 = vld [vmem:[%s20880_s3 + $0x1de0] sm:$0xff]  ;;  %v4346_v12 = vld [vmem:[%s20880_s3 + $0x1e18] sm:$0xff] }
 0x4f9   :  { %v4354_v13 = vld [vmem:[%s20880_s3 + $0x1e58] sm:$0xff]  ;;  %v3571_v19 = vld [vmem:[%s20880_s3 + $0x5e0] sm:$0xff]  ;;  %v10712_v21 = vpack.c.bf16 %v4346_v12, %v4339_v1  ;;  %v4396_v12 = vld [vmem:[%s20880_s3 + $0x1fa8] sm:$0xff] }
 0x4fa   :  { %5713 = vmatmul.mubr.f32.vlgmr.msra.gmra.mrb[12].mxu0 %v17231_v6  ;;  %10689 = vmatpush1.bf16.msra.mxu1 %v10688_v3  ;;  %v4311_v3 = vld [vmem:[%s20880_s3 + $0x1d00] sm:$0xff]  ;;  %v3494_v1 = vld [vmem:[%s20880_s3 + $0x378] sm:$0xff] }
 0x4fb   :  { %10433 = vmatpush1.bf16.msra.mxu0 %v10432_v28  ;;  %10691 = vmatprep.subr.bf16.mxu1 %v10690_v30  ;;  %v4318_v28 = vld [vmem:[%s20880_s3 + $0x1d38] sm:$0xff]  ;;  %v3417_v30 = vld [vmem:[%s20880_s3 + $0x110] sm:$0xff] }
 0x4fc   :  { %10435 = vmatprep.subr.bf16.mxu0 %v10434_v37  ;;  %5783 = vmatprep.mubr.f32.mxu0 %v11481_v24  ;;  %v4333_v37 = vld [vmem:[%s20880_s3 + $0x1db0] sm:$0xff]  ;;  %v10704_v26 = vpack.c.bf16 %v4318_v28, %v4311_v3  ;;  %v10840_v38 = vpack.c.bf16 %v3424_v34, %v3417_v30  ;;  %v3466_v3 = vld [vmem:[%s20880_s3 + $0x298] sm:$0xff]  ;;  %v4368_v28 = vld [vmem:[%s20880_s3 + $0x1ec8] sm:$0xff] }
 0x4fd   :  { %v10706_v39 = vpack.c.bf16 %v4333_v37, %v4326_v35  ;;  %v4375_v30 = vld [vmem:[%s20880_s3 + $0x1f00] sm:$0xff]  ;;  %v3592_v34 = vld [vmem:[%s20880_s3 + $0x688] sm:$0xff] }
 0x4fe   :  { %10693 = vmatpush1.bf16.msra.mxu1 %v10692_v40  ;;  %v4332_v40 = vld [vmem:[%s20880_s3 + $0x1da8] sm:$0xff] }
 0x4ff   :  { %10437 = vmatpush1.bf16.msra.mxu0 %v10436_v46  ;;  %10695 = vmatprep.subr.bf16.mxu1 %v10694_v44  ;;  %v3431_v46 = vld [vmem:[%s20880_s3 + $0x180] sm:$0xff]  ;;  %v10708_v2 = vpack.c.bf16 %v4332_v40, %v4325_v18  ;;  %v3480_v18 = vld [vmem:[%s20880_s3 + $0x308] sm:$0xff]  ;;  %v4382_v40 = vld [vmem:[%s20880_s3 + $0x1f38] sm:$0xff] }
 0x500   :  { %10831 = vmatprep.subr.bf16.mxu0 %v10830_v54  ;;  %v4347_v54 = vld [vmem:[%s20880_s3 + $0x1e20] sm:$0xff]  ;;  %v10844_v63 = vpack.c.bf16 %v3438_v60, %v3431_v46  ;;  %v4389_v46 = vld [vmem:[%s20880_s3 + $0x1f70] sm:$0xff]  ;;  %v3606_v60 = vld [vmem:[%s20880_s3 + $0x6f8] sm:$0xff] }
 0x501   :  { %6068 = vmatmul.mubr.f32.vlgmr.msra.gmra.mrb[12].mxu1 %v16444_v4  ;;  %v10722_v55 = vpack.c.bf16 %v4389_v46, %v4382_v40 }
 0x502   :  { %7865 = vmatmul.mubr.msk.f32.vlgmr.msra.gmra.mrb[12].mxu0 %vm4792_vm2, %v16393_v29  ;;  %10697 = vmatpush1.bf16.msra.mxu1 %v10696_v17  ;;  %v10710_v17 = vpack.c.bf16 %v4347_v54, %v4340_v45 }
 0x503   :  { %6138 = vmatprep.mubr.f32.mxu1 %v16455_v16  ;;  %10833 = vmatpush3.bf16.msra.mxu0 %v10832_v42  ;;  %v3445_v42 = vld [vmem:[%s20880_s3 + $0x1f0] sm:$0xff] }
 0x504   :  { %6351 = vmatprep.mubr.f32.mxu0 %v15459_v31  ;;  %10699 = vmatprep.subr.bf16.mxu1 %v10698_v14  ;;  %v3550_v31 = vld [vmem:[%s20880_s3 + $0x538] sm:$0xff]  ;;  %v4361_v14 = vld [vmem:[%s20880_s3 + $0x1e90] sm:$0xff] }
 0x505   :  { %10835 = vmatprep.subr.bf16.mxu0 %v10834_v57  ;;  %v10842_v44 = vpack.c.bf16 %v3550_v31, %v3543_v15  ;;  %v10848_v57 = vpack.c.bf16 %v3452_v51, %v3445_v42  ;;  %v10714_v48 = vpack.c.bf16 %v4361_v14, %v4354_v13  ;;  %v10718_v15 = vpack.c.bf16 %v4375_v30, %v4368_v28  ;;  %v4367_v31 = vld [vmem:[%s20880_s3 + $0x1ec0] sm:$0xff]  ;;  %v3732_v51 = vld [vmem:[%s20880_s3 + $0xae8] sm:$0xff] }
 0x506   :  { %10701 = vmatpush1.bf16.msra.mxu1 %v10700_v47  ;;  %v4360_v47 = vld [vmem:[%s20880_s3 + $0x1e88] sm:$0xff]  ;;  %v4403_v42 = vld [vmem:[%s20880_s3 + $0x1fe0] sm:$0xff] }
 0x507   :  { %10837 = vmatpush3.bf16.msra.mxu0 %v10836_v23  ;;  %10703 = vmatprep.subr.bf16.mxu1 %v10702_v43  ;;  %v3459_v23 = vld [vmem:[%s20880_s3 + $0x260] sm:$0xff]  ;;  %v10850_v43 = vpack.c.bf16 %v3578_v50, %v3571_v19  ;;  %v10716_v35 = vpack.c.bf16 %v4360_v47, %v4353_v22  ;;  %v10726_v19 = vpack.c.bf16 %v4403_v42, %v4396_v12  ;;  %v3620_v22 = vld [vmem:[%s20880_s3 + $0x768] sm:$0xff]  ;;  %v4410_v47 = vld [vmem:[%s20880_s3 + $0x2018] sm:$0xff] }
 0x508   :  { %10839 = vmatprep.subr.bf16.mxu0 %v10838_v33  ;;  %v3585_v33 = vld [vmem:[%s20880_s3 + $0x650] sm:$0xff]  ;;  %v10852_v37 = vpack.c.bf16 %v3466_v3, %v3459_v23  ;;  %v4395_v50 = vld [vmem:[%s20880_s3 + $0x1fa0] sm:$0xff]  ;;  %v3746_v3 = vld [vmem:[%s20880_s3 + $0xb58] sm:$0xff] }
 0x509   :  { %v4417_v23 = vld [vmem:[%s20880_s3 + $0x2050] sm:$0xff] }
 0x50a   :  { %10705 = vmatpush1.bf16.msra.mxu1 %v10704_v26  ;;  %v4374_v26 = vld [vmem:[%s20880_s3 + $0x1ef8] sm:$0xff]  ;;  %v4437_v42 = vld [vmem:[%s20880_s3 + $0x20f0] sm:$0xff] }
 0x50b   :  { %10841 = vmatpush3.bf16.msra.mxu0 %v10840_v38  ;;  %10707 = vmatprep.subr.bf16.mxu1 %v10706_v39  ;;  %v3473_v38 = vld [vmem:[%s20880_s3 + $0x2d0] sm:$0xff]  ;;  %v10854_v39 = vpack.c.bf16 %v3592_v34, %v3585_v33  ;;  %v10720_v45 = vpack.c.bf16 %v4374_v26, %v4367_v31  ;;  %v4416_v34 = vld [vmem:[%s20880_s3 + $0x2048] sm:$0xff]  ;;  %v3634_v31 = vld [vmem:[%s20880_s3 + $0x7d8] sm:$0xff] }
 0x50c   :  { %10843 = vmatprep.subr.bf16.mxu0 %v10842_v44  ;;  %v3599_v44 = vld [vmem:[%s20880_s3 + $0x6c0] sm:$0xff]  ;;  %v10856_v54 = vpack.c.bf16 %v3480_v18, %v3473_v38  ;;  %v4409_v33 = vld [vmem:[%s20880_s3 + $0x2010] sm:$0xff]  ;;  %v4424_v26 = vld [vmem:[%s20880_s3 + $0x2088] sm:$0xff] }
 0x50d   :  { %v4431_v38 = vld [vmem:[%s20880_s3 + $0x20c0] sm:$0xff]  ;;  %v3760_v18 = vld [vmem:[%s20880_s3 + $0xbc8] sm:$0xff]  ;;  %v10732_v40 = vpack.c.bf16 %v4416_v34, %v4409_v33  ;;  %v4466_v33 = vld [vmem:[%s20880_s3 + $0x21d8] sm:$0xff] }
 0x50e   :  { %10709 = vmatpush1.bf16.msra.mxu1 %v10708_v2  ;;  %v4388_v2 = vld [vmem:[%s20880_s3 + $0x1f68] sm:$0xff]  ;;  %v4473_v34 = vld [vmem:[%s20880_s3 + $0x2210] sm:$0xff] }
 0x50f   :  { %10845 = vmatpush3.bf16.msra.mxu0 %v10844_v63  ;;  %10711 = vmatprep.subr.bf16.mxu1 %v10710_v17  ;;  %v3487_v63 = vld [vmem:[%s20880_s3 + $0x340] sm:$0xff]  ;;  %v10858_v17 = vpack.c.bf16 %v3606_v60, %v3599_v44  ;;  %v10724_v13 = vpack.c.bf16 %v4388_v2, %v4381_v9  ;;  %v10734_v44 = vpack.c.bf16 %v4431_v38, %v4424_v26  ;;  %v4445_v9 = vld [vmem:[%s20880_s3 + $0x2130] sm:$0xff] }
 0x510   :  { %10847 = vmatprep.subr.bf16.mxu0 %v10846_v5  ;;  %v3725_v5 = vld [vmem:[%s20880_s3 + $0xab0] sm:$0xff]  ;;  %v10860_v14 = vpack.c.bf16 %v3494_v1, %v3487_v63  ;;  %v4423_v60 = vld [vmem:[%s20880_s3 + $0x2080] sm:$0xff]  ;;  %v3774_v63 = vld [vmem:[%s20880_s3 + $0xc38] sm:$0xff]  ;;  %v10746_v26 = vpack.c.bf16 %v4473_v34, %v4466_v33 }
 0x511   :  { %v3767_v2 = vld [vmem:[%s20880_s3 + $0xc00] sm:$0xff]  ;;  %v4465_v38 = vld [vmem:[%s20880_s3 + $0x21d0] sm:$0xff] }
 0x512   :  { %10713 = vmatpush1.bf16.msra.mxu1 %v10712_v21  ;;  %v4402_v21 = vld [vmem:[%s20880_s3 + $0x1fd8] sm:$0xff]  ;;  %v4507_v34 = vld [vmem:[%s20880_s3 + $0x2320] sm:$0xff] }
 0x513   :  { %10849 = vmatpush3.bf16.msra.mxu0 %v10848_v57  ;;  %10715 = vmatprep.subr.bf16.mxu1 %v10714_v48  ;;  %v10862_v57 = vpack.c.bf16 %v3732_v51, %v3725_v5  ;;  %v3613_v48 = vld [vmem:[%s20880_s3 + $0x730] sm:$0xff]  ;;  %v10728_v28 = vpack.c.bf16 %v4402_v21, %v4395_v50  ;;  %v4444_v5 = vld [vmem:[%s20880_s3 + $0x2128] sm:$0xff]  ;;  %v3655_v51 = vld [vmem:[%s20880_s3 + $0x880] sm:$0xff] }
 0x514   :  { %10851 = vmatprep.subr.bf16.mxu0 %v10850_v43  ;;  %v3739_v43 = vld [vmem:[%s20880_s3 + $0xb20] sm:$0xff]  ;;  %v10864_v30 = vpack.c.bf16 %v3620_v22, %v3613_v48  ;;  %v3781_v21 = vld [vmem:[%s20880_s3 + $0xc70] sm:$0xff]  ;;  %v10740_v48 = vpack.c.bf16 %v4444_v5, %v4437_v42 }
 0x515   :  { %v4459_v50 = vld [vmem:[%s20880_s3 + $0x21a0] sm:$0xff]  ;;  %v4501_v42 = vld [vmem:[%s20880_s3 + $0x22f0] sm:$0xff] }
 0x516   :  { %10717 = vmatpush1.bf16.msra.mxu1 %v10716_v35  ;;  %v3627_v35 = vld [vmem:[%s20880_s3 + $0x7a0] sm:$0xff] }
 0x517   :  { %10853 = vmatpush3.bf16.msra.mxu0 %v10852_v37  ;;  %10719 = vmatprep.subr.bf16.mxu1 %v10718_v15  ;;  %v10730_v37 = vpack.c.bf16 %v4417_v23, %v4410_v47  ;;  %v10866_v15 = vpack.c.bf16 %v3746_v3, %v3739_v43  ;;  %v10868_v46 = vpack.c.bf16 %v3634_v31, %v3627_v35  ;;  %v4451_v23 = vld [vmem:[%s20880_s3 + $0x2160] sm:$0xff]  ;;  %v4458_v43 = vld [vmem:[%s20880_s3 + $0x2198] sm:$0xff]  ;;  %v3669_v3 = vld [vmem:[%s20880_s3 + $0x8f0] sm:$0xff] }
 0x518   :  { %10855 = vmatprep.subr.bf16.mxu0 %v10854_v39  ;;  %v3753_v39 = vld [vmem:[%s20880_s3 + $0xb90] sm:$0xff]  ;;  %v3795_v35 = vld [vmem:[%s20880_s3 + $0xce0] sm:$0xff] }
 0x519   :  { %v3823_v5 = vld [vmem:[%s20880_s3 + $0xdc0] sm:$0xff] }
 0x51a   :  { %10721 = vmatpush1.bf16.msra.mxu1 %v10720_v45  ;;  %v4430_v45 = vld [vmem:[%s20880_s3 + $0x20b8] sm:$0xff] }
 0x51b   :  { %10857 = vmatpush3.bf16.msra.mxu0 %v10856_v54  ;;  %10723 = vmatprep.subr.bf16.mxu1 %v10722_v55  ;;  %v3641_v54 = vld [vmem:[%s20880_s3 + $0x810] sm:$0xff]  ;;  %v4438_v55 = vld [vmem:[%s20880_s3 + $0x20f8] sm:$0xff] }
 0x51c   :  { %10859 = vmatprep.subr.bf16.mxu0 %v10858_v17  ;;  %v10736_v17 = vpack.c.bf16 %v4430_v45, %v4423_v60  ;;  %v10738_v12 = vpack.c.bf16 %v4445_v9, %v4438_v55  ;;  %v4487_v60 = vld [vmem:[%s20880_s3 + $0x2280] sm:$0xff]  ;;  %v3809_v45 = vld [vmem:[%s20880_s3 + $0xd50] sm:$0xff] }
 0x51d   :  { %v4479_v9 = vld [vmem:[%s20880_s3 + $0x2240] sm:$0xff] }
 0x51e   :  { %10725 = vmatpush1.bf16.msra.mxu1 %v10724_v13  ;;  %v10874_v13 = vpack.c.bf16 %v3774_v63, %v3767_v2  ;;  %v4486_v2 = vld [vmem:[%s20880_s3 + $0x2278] sm:$0xff]  ;;  %v3697_v63 = vld [vmem:[%s20880_s3 + $0x9d0] sm:$0xff] }
 0x51f   :  { %10861 = vmatpush3.bf16.msra.mxu0 %v10860_v14  ;;  %10727 = vmatprep.subr.bf16.mxu1 %v10726_v19  ;;  %v3662_v14 = vld [vmem:[%s20880_s3 + $0x8b8] sm:$0xff]  ;;  %v4452_v19 = vld [vmem:[%s20880_s3 + $0x2168] sm:$0xff] }
 0x520   :  { %10863 = vmatprep.subr.bf16.mxu0 %v10862_v57  ;;  %v3788_v57 = vld [vmem:[%s20880_s3 + $0xca8] sm:$0xff]  ;;  %v10876_v22 = vpack.c.bf16 %v3662_v14, %v3655_v51  ;;  %v10742_v47 = vpack.c.bf16 %v4459_v50, %v4452_v19  ;;  %v3830_v51 = vld [vmem:[%s20880_s3 + $0xdf8] sm:$0xff]  ;;  %v4493_v50 = vld [vmem:[%s20880_s3 + $0x22b0] sm:$0xff] }
 0x522   :  { %6352 = vmatmul.mubr.f32.vlgmr.msra.gmra.mrb[14].mxu0 %v15719_v62  ;;  %10729 = vmatpush1.bf16.msra.mxu1 %v10728_v28  ;;  %v10870_v62 = vpack.c.bf16 %v3760_v18, %v3753_v39  ;;  %v10878_v28 = vpack.c.bf16 %v3788_v57, %v3781_v21  ;;  %v4472_v39 = vld [vmem:[%s20880_s3 + $0x2208] sm:$0xff]  ;;  %v3683_v18 = vld [vmem:[%s20880_s3 + $0x960] sm:$0xff] }
 0x523   :  { %10865 = vmatpush3.bf16.msra.mxu0 %v10864_v30  ;;  %6421 = vmatprep.mubr.f32.mxu0 %v15727_v8  ;;  %v3648_v8 = vld [vmem:[%s20880_s3 + $0x848] sm:$0xff]  ;;  %v3711_v57 = vld [vmem:[%s20880_s3 + $0xa40] sm:$0xff] }
 0x524   :  { %10731 = vmatprep.subr.bf16.mxu1 %v10730_v37  ;;  %10867 = vmatprep.subr.bf16.mxu0 %v10866_v15  ;;  %v10872_v1 = vpack.c.bf16 %v3648_v8, %v3641_v54  ;;  %v3676_v30 = vld [vmem:[%s20880_s3 + $0x928] sm:$0xff]  ;;  %v3802_v37 = vld [vmem:[%s20880_s3 + $0xd18] sm:$0xff]  ;;  %v10744_v15 = vpack.c.bf16 %v4458_v43, %v4451_v23  ;;  %v4515_v23 = vld [vmem:[%s20880_s3 + $0x2360] sm:$0xff] }
 0x525   :  { %v10880_v31 = vpack.c.bf16 %v3676_v30, %v3669_v3  ;;  %v3816_v54 = vld [vmem:[%s20880_s3 + $0xd88] sm:$0xff]  ;;  %v3949_v43 = vld [vmem:[%s20880_s3 + $0x11b0] sm:$0xff] }
 0x526   :  { %10733 = vmatpush1.bf16.msra.mxu1 %v10732_v40  ;;  %v10882_v40 = vpack.c.bf16 %v3802_v37, %v3795_v35  ;;  %v4500_v21 = vld [vmem:[%s20880_s3 + $0x22e8] sm:$0xff]  ;;  %v4514_v35 = vld [vmem:[%s20880_s3 + $0x2358] sm:$0xff] }
 0x527   :  { %10869 = vmatpush3.bf16.msra.mxu0 %v10868_v46  ;;  %10735 = vmatprep.subr.bf16.mxu1 %v10734_v44  ;;  %v3690_v46 = vld [vmem:[%s20880_s3 + $0x998] sm:$0xff]  ;;  %v4480_v44 = vld [vmem:[%s20880_s3 + $0x2248] sm:$0xff] }
 0x528   :  { %10871 = vmatprep.subr.bf16.mxu0 %v10870_v62  ;;  %v10748_v62 = vpack.c.bf16 %v4472_v39, %v4465_v38  ;;  %v10884_v8 = vpack.c.bf16 %v3690_v46, %v3683_v18  ;;  %v10750_v55 = vpack.c.bf16 %v4487_v60, %v4480_v44  ;;  %v3956_v3 = vld [vmem:[%s20880_s3 + $0x11e8] sm:$0xff]  ;;  %v4529_v38 = vld [vmem:[%s20880_s3 + $0x23d0] sm:$0xff]  ;;  %v10760_v39 = vpack.c.bf16 %v4514_v35, %v4507_v34  ;;  %v3963_v18 = vld [vmem:[%s20880_s3 + $0x1220] sm:$0xff] }
 0x529   :  { %v10894_v37 = vpack.c.bf16 %v3956_v3, %v3949_v43  ;;  %v4521_v44 = vld [vmem:[%s20880_s3 + $0x2390] sm:$0xff]  ;;  %v4528_v60 = vld [vmem:[%s20880_s3 + $0x23c8] sm:$0xff]  ;;  %v3886_v3 = vld [vmem:[%s20880_s3 + $0xfb8] sm:$0xff] }
 0x52a   :  { %10737 = vmatpush1.bf16.msra.mxu1 %v10736_v17  ;;  %v10886_v17 = vpack.c.bf16 %v3816_v54, %v3809_v45  ;;  %v3851_v45 = vld [vmem:[%s20880_s3 + $0xea0] sm:$0xff]  ;;  %v4012_v34 = vld [vmem:[%s20880_s3 + $0x13a8] sm:$0xff] }
 0x52b   :  { %10873 = vmatpush3.bf16.msra.mxu0 %v10872_v1  ;;  %10739 = vmatprep.subr.bf16.mxu1 %v10738_v12  ;;  %v3704_v1 = vld [vmem:[%s20880_s3 + $0xa08] sm:$0xff]  ;;  %v4494_v12 = vld [vmem:[%s20880_s3 + $0x22b8] sm:$0xff] }
 0x52c   :  { %10875 = vmatprep.subr.bf16.mxu0 %v10874_v13  ;;  %v10752_v13 = vpack.c.bf16 %v4486_v2, %v4479_v9  ;;  %v10888_v14 = vpack.c.bf16 %v3704_v1, %v3697_v63  ;;  %v10754_v19 = vpack.c.bf16 %v4501_v42, %v4494_v12  ;;  %v3977_v2 = vld [vmem:[%s20880_s3 + $0x1290] sm:$0xff]  ;;  %v3984_v63 = vld [vmem:[%s20880_s3 + $0x12c8] sm:$0xff]  ;;  %v4535_v42 = vld [vmem:[%s20880_s3 + $0x2400] sm:$0xff] }
 0x52e   :  { %10741 = vmatpush1.bf16.msra.mxu1 %v10740_v48  ;;  %v10890_v48 = vpack.c.bf16 %v3830_v51, %v3823_v5  ;;  %v4542_v5 = vld [vmem:[%s20880_s3 + $0x2438] sm:$0xff]  ;;  %v3865_v51 = vld [vmem:[%s20880_s3 + $0xf10] sm:$0xff] }
 0x52f   :  { %10877 = vmatpush3.bf16.msra.mxu0 %v10876_v22  ;;  %10743 = vmatprep.subr.bf16.mxu1 %v10742_v47  ;;  %v3718_v22 = vld [vmem:[%s20880_s3 + $0xa78] sm:$0xff]  ;;  %v4508_v47 = vld [vmem:[%s20880_s3 + $0x2328] sm:$0xff] }
 0x530   :  { %10879 = vmatprep.subr.bf16.mxu0 %v10878_v28  ;;  %v10756_v28 = vpack.c.bf16 %v4500_v21, %v4493_v50  ;;  %v10892_v30 = vpack.c.bf16 %v3718_v22, %v3711_v57  ;;  %v10758_v33 = vpack.c.bf16 %v4515_v23, %v4508_v47  ;;  %v3991_v50 = vld [vmem:[%s20880_s3 + $0x1300] sm:$0xff]  ;;  %v10768_v21 = vpack.c.bf16 %v4542_v5, %v4535_v42  ;;  %v4549_v22 = vld [vmem:[%s20880_s3 + $0x2470] sm:$0xff]  ;;  %v4556_v47 = vld [vmem:[%s20880_s3 + $0x24a8] sm:$0xff] }
 0x531   :  { %v3879_v23 = vld [vmem:[%s20880_s3 + $0xf80] sm:$0xff]  ;;  %v10772_v35 = vpack.c.bf16 %v4556_v47, %v4549_v22  ;;  %v4040_v42 = vld [vmem:[%s20880_s3 + $0x1488] sm:$0xff]  ;;  %v4054_v22 = vld [vmem:[%s20880_s3 + $0x14f8] sm:$0xff] }
 0x532   :  { %10745 = vmatpush1.bf16.msra.mxu1 %v10744_v15  ;;  %v3837_v15 = vld [vmem:[%s20880_s3 + $0xe30] sm:$0xff] }
 0x533   :  { %10881 = vmatpush3.bf16.msra.mxu0 %v10880_v31  ;;  %10747 = vmatprep.subr.bf16.mxu1 %v10746_v26  ;;  %v3844_v31 = vld [vmem:[%s20880_s3 + $0xe68] sm:$0xff]  ;;  %v4522_v26 = vld [vmem:[%s20880_s3 + $0x2398] sm:$0xff] }
 0x534   :  { %10883 = vmatprep.subr.bf16.mxu0 %v10882_v40  ;;  %v3970_v40 = vld [vmem:[%s20880_s3 + $0x1258] sm:$0xff]  ;;  %v10896_v46 = vpack.c.bf16 %v3844_v31, %v3837_v15  ;;  %v10762_v54 = vpack.c.bf16 %v4529_v38, %v4522_v26  ;;  %v4563_v31 = vld [vmem:[%s20880_s3 + $0x24e0] sm:$0xff]  ;;  %v3893_v38 = vld [vmem:[%s20880_s3 + $0xff0] sm:$0xff] }
 0x535   :  { %v10898_v9 = vpack.c.bf16 %v3970_v40, %v3963_v18  ;;  %v4570_v26 = vld [vmem:[%s20880_s3 + $0x2518] sm:$0xff]  ;;  %v3900_v18 = vld [vmem:[%s20880_s3 + $0x1028] sm:$0xff] }
 0x536   :  { %10749 = vmatpush1.bf16.msra.mxu1 %v10748_v62  ;;  %v3858_v62 = vld [vmem:[%s20880_s3 + $0xed8] sm:$0xff] }
 0x537   :  { %10885 = vmatpush3.bf16.msra.mxu0 %v10884_v8  ;;  %10751 = vmatprep.subr.bf16.mxu1 %v10750_v55  ;;  %v4536_v8 = vld [vmem:[%s20880_s3 + $0x2408] sm:$0xff]  ;;  %v4543_v55 = vld [vmem:[%s20880_s3 + $0x2440] sm:$0xff]  ;;  %v10900_v1 = vpack.c.bf16 %v3858_v62, %v3851_v45  ;;  %v4578_v40 = vld [vmem:[%s20880_s3 + $0x2558] sm:$0xff]  ;;  %v10776_v45 = vpack.c.bf16 %v4570_v26, %v4563_v31 }
 0x538   :  { %10887 = vmatprep.subr.bf16.mxu0 %v10886_v17  ;;  %v10764_v17 = vpack.c.bf16 %v4528_v60, %v4521_v44  ;;  %v10766_v12 = vpack.c.bf16 %v4543_v55, %v4536_v8  ;;  %v4019_v44 = vld [vmem:[%s20880_s3 + $0x13e0] sm:$0xff]  ;;  %v4026_v60 = vld [vmem:[%s20880_s3 + $0x1418] sm:$0xff]  ;;  %v4577_v8 = vld [vmem:[%s20880_s3 + $0x2550] sm:$0xff] }
 0x539   :  { %v4584_v55 = vld [vmem:[%s20880_s3 + $0x2588] sm:$0xff] }
 0x53a   :  { %10753 = vmatpush1.bf16.msra.mxu1 %v10752_v13  ;;  %v3872_v13 = vld [vmem:[%s20880_s3 + $0xf48] sm:$0xff]  ;;  %v10780_v5 = vpack.c.bf16 %v4584_v55, %v4577_v8  ;;  %v4194_v8 = vld [vmem:[%s20880_s3 + $0x1958] sm:$0xff] }
 0x53b   :  { %10889 = vmatpush3.bf16.msra.mxu0 %v10888_v14  ;;  %10755 = vmatprep.subr.bf16.mxu1 %v10754_v19  ;;  %v4550_v14 = vld [vmem:[%s20880_s3 + $0x2478] sm:$0xff]  ;;  %v4557_v19 = vld [vmem:[%s20880_s3 + $0x24b0] sm:$0xff]  ;;  %v10904_v57 = vpack.c.bf16 %v3872_v13, %v3865_v51  ;;  %v4591_v13 = vld [vmem:[%s20880_s3 + $0x25c0] sm:$0xff] }
 0x53c   :  { %10891 = vmatprep.subr.bf16.mxu0 %v10890_v48  ;;  %v10770_v48 = vpack.c.bf16 %v4557_v19, %v4550_v14  ;;  %v4598_v14 = vld [vmem:[%s20880_s3 + $0x25f8] sm:$0xff]  ;;  %v3921_v19 = vld [vmem:[%s20880_s3 + $0x10d0] sm:$0xff]  ;;  %v4180_v31 = vld [vmem:[%s20880_s3 + $0x18e8] sm:$0xff] }
 0x53d   :  { %v10784_v47 = vpack.c.bf16 %v4598_v14, %v4591_v13  ;;  %v4208_v13 = vld [vmem:[%s20880_s3 + $0x19c8] sm:$0xff] }
 0x53e   :  { %10757 = vmatpush1.bf16.msra.mxu1 %v10756_v28  ;;  %v4564_v28 = vld [vmem:[%s20880_s3 + $0x24e8] sm:$0xff] }
 0x53f   :  { %10893 = vmatpush3.bf16.msra.mxu0 %v10892_v30  ;;  %10759 = vmatprep.subr.bf16.mxu1 %v10758_v33  ;;  %v4571_v30 = vld [vmem:[%s20880_s3 + $0x2520] sm:$0xff]  ;;  %v4005_v33 = vld [vmem:[%s20880_s3 + $0x1370] sm:$0xff] }
 0x540   :  { %10895 = vmatprep.subr.bf16.mxu0 %v10894_v37  ;;  %v10908_v37 = vpack.c.bf16 %v3886_v3, %v3879_v23  ;;  %v10774_v15 = vpack.c.bf16 %v4571_v30, %v4564_v28  ;;  %v4605_v3 = vld [vmem:[%s20880_s3 + $0x2630] sm:$0xff]  ;;  %v4612_v28 = vld [vmem:[%s20880_s3 + $0x2668] sm:$0xff]  ;;  %v3935_v30 = vld [vmem:[%s20880_s3 + $0x1140] sm:$0xff] }
 0x541   :  { %6139 = vmatmul.mubr.f32.vlgmr.msra.gmra.mrb[12].mxu1 %v16837_v41  ;;  %v10788_v26 = vpack.c.bf16 %v4612_v28, %v4605_v3 }
 0x542   :  { %6422 = vmatmul.mubr.f32.vlgmr.msra.gmra.mrb[16].mxu0 %v15958_v25  ;;  %10761 = vmatpush1.bf16.msra.mxu1 %v10760_v39  ;;  %v10902_v25 = vpack.c.bf16 %v3984_v63, %v3977_v2  ;;  %v10910_v39 = vpack.c.bf16 %v4012_v34, %v4005_v33  ;;  %v10914_v2 = vpack.c.bf16 %v4026_v60, %v4019_v44  ;;  %v3914_v63 = vld [vmem:[%s20880_s3 + $0x1098] sm:$0xff]  ;;  %v4061_v44 = vld [vmem:[%s20880_s3 + $0x1530] sm:$0xff]  ;;  %v4068_v60 = vld [vmem:[%s20880_s3 + $0x1568] sm:$0xff] }
 0x543   :  { %6209 = vmatprep.mubr.f32.mxu1 %v16849_v61  ;;  %10897 = vmatpush3.bf16.msra.mxu0 %v10896_v46  ;;  %v4585_v46 = vld [vmem:[%s20880_s3 + $0x2590] sm:$0xff]  ;;  %v3942_v34 = vld [vmem:[%s20880_s3 + $0x1178] sm:$0xff] }
 0x544   :  { %6491 = vmatprep.mubr.f32.mxu0 %v15966_v27  ;;  %10763 = vmatprep.subr.bf16.mxu1 %v10762_v54  ;;  %v3998_v27 = vld [vmem:[%s20880_s3 + $0x1338] sm:$0xff]  ;;  %v10912_v54 = vpack.c.bf16 %v3900_v18, %v3893_v38  ;;  %v10778_v62 = vpack.c.bf16 %v4585_v46, %v4578_v40  ;;  %v10924_v38 = vpack.c.bf16 %v3942_v34, %v3935_v30  ;;  %v4619_v18 = vld [vmem:[%s20880_s3 + $0x26a0] sm:$0xff]  ;;  %v4661_v30 = vld [vmem:[%s20880_s3 + $0x27f0] sm:$0xff] }
 0x545   :  { %10899 = vmatprep.subr.bf16.mxu0 %v10898_v9  ;;  %v10906_v43 = vpack.c.bf16 %v3998_v27, %v3991_v50  ;;  %v3907_v9 = vld [vmem:[%s20880_s3 + $0x1060] sm:$0xff]  ;;  %v3928_v27 = vld [vmem:[%s20880_s3 + $0x1108] sm:$0xff]  ;;  %v4626_v40 = vld [vmem:[%s20880_s3 + $0x26d8] sm:$0xff] }
 0x546   :  { %10765 = vmatpush1.bf16.msra.mxu1 %v10764_v17  ;;  %v4592_v17 = vld [vmem:[%s20880_s3 + $0x25c8] sm:$0xff]  ;;  %v10916_v51 = vpack.c.bf16 %v3914_v63, %v3907_v9  ;;  %v10920_v23 = vpack.c.bf16 %v3928_v27, %v3921_v19  ;;  %v10792_v55 = vpack.c.bf16 %v4626_v40, %v4619_v18  ;;  %v10928_v9 = vpack.c.bf16 %v4068_v60, %v4061_v44  ;;  %v4647_v27 = vld [vmem:[%s20880_s3 + $0x2780] sm:$0xff]  ;;  %v4682_v44 = vld [vmem:[%s20880_s3 + $0x2898] sm:$0xff] }
 0x547   :  { %10901 = vmatpush3.bf16.msra.mxu0 %v10900_v1  ;;  %10767 = vmatprep.subr.bf16.mxu1 %v10766_v12  ;;  %v4599_v1 = vld [vmem:[%s20880_s3 + $0x2600] sm:$0xff]  ;;  %v4033_v12 = vld [vmem:[%s20880_s3 + $0x1450] sm:$0xff]  ;;  %v4640_v63 = vld [vmem:[%s20880_s3 + $0x2748] sm:$0xff] }
 0x548   :  { %10903 = vmatprep.subr.bf16.mxu0 %v10902_v25  ;;  %v10782_v25 = vpack.c.bf16 %v4599_v1, %v4592_v17  ;;  %v10918_v50 = vpack.c.bf16 %v4040_v42, %v4033_v12  ;;  %v4075_v17 = vld [vmem:[%s20880_s3 + $0x15a0] sm:$0xff]  ;;  %v4082_v42 = vld [vmem:[%s20880_s3 + $0x15d8] sm:$0xff]  ;;  %v4117_v60 = vld [vmem:[%s20880_s3 + $0x16f0] sm:$0xff] }
 0x549   :  { %v10932_v19 = vpack.c.bf16 %v4082_v42, %v4075_v17  ;;  %v4103_v34 = vld [vmem:[%s20880_s3 + $0x1680] sm:$0xff] }
 0x54a   :  { %10769 = vmatpush1.bf16.msra.mxu1 %v10768_v21  ;;  %v4606_v21 = vld [vmem:[%s20880_s3 + $0x2638] sm:$0xff]  ;;  %v4131_v42 = vld [vmem:[%s20880_s3 + $0x1760] sm:$0xff] }
 0x54b   :  { %10905 = vmatpush3.bf16.msra.mxu0 %v10904_v57  ;;  %10771 = vmatprep.subr.bf16.mxu1 %v10770_v48  ;;  %v4613_v57 = vld [vmem:[%s20880_s3 + $0x2670] sm:$0xff]  ;;  %v4047_v48 = vld [vmem:[%s20880_s3 + $0x14c0] sm:$0xff] }
 0x54c   :  { %10907 = vmatprep.subr.bf16.mxu0 %v10906_v43  ;;  %v10786_v43 = vpack.c.bf16 %v4613_v57, %v4606_v21  ;;  %v10922_v33 = vpack.c.bf16 %v4054_v22, %v4047_v48  ;;  %v4654_v21 = vld [vmem:[%s20880_s3 + $0x27b8] sm:$0xff]  ;;  %v4089_v57 = vld [vmem:[%s20880_s3 + $0x1610] sm:$0xff] }
 0x54d   :  { %v4662_v48 = vld [vmem:[%s20880_s3 + $0x27f8] sm:$0xff]  ;;  %v4669_v22 = vld [vmem:[%s20880_s3 + $0x2830] sm:$0xff] }
 0x54e   :  { %10773 = vmatpush1.bf16.msra.mxu1 %v10772_v35  ;;  %v4620_v35 = vld [vmem:[%s20880_s3 + $0x26a8] sm:$0xff]  ;;  %v10802_v28 = vpack.c.bf16 %v4669_v22, %v4662_v48 }
 0x54f   :  { %10909 = vmatpush3.bf16.msra.mxu0 %v10908_v37  ;;  %10775 = vmatprep.subr.bf16.mxu1 %v10774_v15  ;;  %v4627_v37 = vld [vmem:[%s20880_s3 + $0x26e0] sm:$0xff]  ;;  %v4173_v15 = vld [vmem:[%s20880_s3 + $0x18b0] sm:$0xff]  ;;  %v4152_v22 = vld [vmem:[%s20880_s3 + $0x1808] sm:$0xff] }
 0x550   :  { %10911 = vmatprep.subr.bf16.mxu0 %v10910_v39  ;;  %v10790_v39 = vpack.c.bf16 %v4627_v37, %v4620_v35  ;;  %v10926_v46 = vpack.c.bf16 %v4180_v31, %v4173_v15  ;;  %v4110_v37 = vld [vmem:[%s20880_s3 + $0x16b8] sm:$0xff]  ;;  %v4676_v15 = vld [vmem:[%s20880_s3 + $0x2868] sm:$0xff]  ;;  %v4683_v31 = vld [vmem:[%s20880_s3 + $0x28a0] sm:$0xff] }
 0x551   :  { %v10940_v18 = vpack.c.bf16 %v4110_v37, %v4103_v34  ;;  %v10806_v40 = vpack.c.bf16 %v4683_v31, %v4676_v15  ;;  %v4717_v34 = vld [vmem:[%s20880_s3 + $0x29b0] sm:$0xff]  ;;  %v4159_v37 = vld [vmem:[%s20880_s3 + $0x1840] sm:$0xff]  ;;  %v4166_v31 = vld [vmem:[%s20880_s3 + $0x1878] sm:$0xff] }
 0x552   :  { %10777 = vmatpush1.bf16.msra.mxu1 %v10776_v45  ;;  %v4634_v45 = vld [vmem:[%s20880_s3 + $0x2718] sm:$0xff] }
 0x553   :  { %10913 = vmatpush3.bf16.msra.mxu0 %v10912_v54  ;;  %10779 = vmatprep.subr.bf16.mxu1 %v10778_v62  ;;  %v4641_v54 = vld [vmem:[%s20880_s3 + $0x2750] sm:$0xff]  ;;  %v4187_v62 = vld [vmem:[%s20880_s3 + $0x1920] sm:$0xff] }
 0x554   :  { %10915 = vmatprep.subr.bf16.mxu0 %v10914_v2  ;;  %v4633_v2 = vld [vmem:[%s20880_s3 + $0x2710] sm:$0xff]  ;;  %v10794_v1 = vpack.c.bf16 %v4641_v54, %v4634_v45  ;;  %v10930_v12 = vpack.c.bf16 %v4194_v8, %v4187_v62  ;;  %v4124_v54 = vld [vmem:[%s20880_s3 + $0x1728] sm:$0xff]  ;;  %v4690_v62 = vld [vmem:[%s20880_s3 + $0x28d8] sm:$0xff] }
 0x555   :  { %v10796_v14 = vpack.c.bf16 %v4640_v63, %v4633_v2  ;;  %v4697_v8 = vld [vmem:[%s20880_s3 + $0x2910] sm:$0xff]  ;;  %v10944_v63 = vpack.c.bf16 %v4124_v54, %v4117_v60  ;;  %v4731_v60 = vld [vmem:[%s20880_s3 + $0x2a20] sm:$0xff] }
 0x556   :  { %10781 = vmatpush1.bf16.msra.mxu1 %v10780_v5  ;;  %v4648_v5 = vld [vmem:[%s20880_s3 + $0x2788] sm:$0xff]  ;;  %v10810_v17 = vpack.c.bf16 %v4697_v8, %v4690_v62  ;;  %v4285_v62 = vld [vmem:[%s20880_s3 + $0x1c30] sm:$0xff] }
 0x557   :  { %10917 = vmatpush3.bf16.msra.mxu0 %v10916_v51  ;;  %10783 = vmatprep.subr.bf16.mxu1 %v10782_v25  ;;  %v4655_v51 = vld [vmem:[%s20880_s3 + $0x27c0] sm:$0xff]  ;;  %v4201_v25 = vld [vmem:[%s20880_s3 + $0x1990] sm:$0xff]  ;;  %v4292_v8 = vld [vmem:[%s20880_s3 + $0x1c68] sm:$0xff] }
 0x558   :  { %10919 = vmatprep.subr.bf16.mxu0 %v10918_v50  ;;  %v10798_v50 = vpack.c.bf16 %v4655_v51, %v4648_v5  ;;  %v4138_v51 = vld [vmem:[%s20880_s3 + $0x1798] sm:$0xff] }
 0x55a   :  { %10785 = vmatpush1.bf16.msra.mxu1 %v10784_v47  ;;  %v4215_v47 = vld [vmem:[%s20880_s3 + $0x1a00] sm:$0xff] }
 0x55b   :  { %10921 = vmatpush3.bf16.msra.mxu0 %v10920_v23  ;;  %10787 = vmatprep.subr.bf16.mxu1 %v10786_v43  ;;  %v4222_v23 = vld [vmem:[%s20880_s3 + $0x1a38] sm:$0xff]  ;;  %v10800_v43 = vpack.c.bf16 %v4654_v21, %v4647_v27  ;;  %v10948_v27 = vpack.c.bf16 %v4138_v51, %v4131_v42  ;;  %v4752_v42 = vld [vmem:[%s20880_s3 + $0x2ac8] sm:$0xff] }
 0x55c   :  { %10923 = vmatprep.subr.bf16.mxu0 %v10922_v33  ;;  %v4668_v33 = vld [vmem:[%s20880_s3 + $0x2828] sm:$0xff]  ;;  %v10938_v35 = vpack.c.bf16 %v4222_v23, %v4215_v47  ;;  %v4718_v47 = vld [vmem:[%s20880_s3 + $0x29b8] sm:$0xff]  ;;  %v4725_v23 = vld [vmem:[%s20880_s3 + $0x29f0] sm:$0xff] }
 0x55e   :  { %10789 = vmatpush1.bf16.msra.mxu1 %v10788_v26  ;;  %v4229_v26 = vld [vmem:[%s20880_s3 + $0x1a70] sm:$0xff] }
 0x55f   :  { %10925 = vmatpush3.bf16.msra.mxu0 %v10924_v38  ;;  %10791 = vmatprep.subr.bf16.mxu1 %v10790_v39  ;;  %v4236_v38 = vld [vmem:[%s20880_s3 + $0x1aa8] sm:$0xff]  ;;  %v10804_v39 = vpack.c.bf16 %v4668_v33, %v4661_v30  ;;  %v10818_v33 = vpack.c.bf16 %v4725_v23, %v4718_v47  ;;  %v6840_v47 = vld [vmem:[%s20882_s5 + $0x1c0] sm:$0xff]  ;;  %v6843_v23 = vld [vmem:[%s20882_s5 + $0x1d8] sm:$0xff] }
 0x560   :  { %10927 = vmatprep.subr.bf16.mxu0 %v10926_v46  ;;  %v4675_v46 = vld [vmem:[%s20880_s3 + $0x2860] sm:$0xff]  ;;  %v10942_v45 = vpack.c.bf16 %v4236_v38, %v4229_v26  ;;  %v4732_v26 = vld [vmem:[%s20880_s3 + $0x2a28] sm:$0xff] }
 0x561   :  { %v10808_v2 = vpack.c.bf16 %v4682_v44, %v4675_v46  ;;  %v4739_v38 = vld [vmem:[%s20880_s3 + $0x2a60] sm:$0xff]  ;;  %v10956_v46 = vpack.c.bf16 %v4166_v31, %v4159_v37  ;;  %v6795_v37 = vld [vmem:[%s20882_s5 + $0x58] sm:$0xff] }
 0x562   :  { %6492 = vmatmul.mubr.f32.vlgmr.msra.gmra.mrb[18].mxu0 %v16189_v52  ;;  %10793 = vmatpush1.bf16.msra.mxu1 %v10792_v55  ;;  %v10934_v52 = vpack.c.bf16 %v4208_v13, %v4201_v25  ;;  %v4243_v55 = vld [vmem:[%s20880_s3 + $0x1ae0] sm:$0xff]  ;;  %v4704_v25 = vld [vmem:[%s20880_s3 + $0x2948] sm:$0xff]  ;;  %v10822_v44 = vpack.c.bf16 %v4739_v38, %v4732_v26  ;;  %v4334_v26 = vld [vmem:[%s20880_s3 + $0x1db8] sm:$0xff] }
 0x563   :  { %10929 = vmatpush3.bf16.msra.mxu0 %v10928_v9  ;;  %6561 = vmatprep.mubr.f32.mxu0 %v16197_v56  ;;  %v4096_v56 = vld [vmem:[%s20880_s3 + $0x1648] sm:$0xff]  ;;  %v4250_v9 = vld [vmem:[%s20880_s3 + $0x1b18] sm:$0xff]  ;;  %v4711_v13 = vld [vmem:[%s20880_s3 + $0x2980] sm:$0xff] }
 0x564   :  { %10795 = vmatprep.subr.bf16.mxu1 %v10794_v1  ;;  %10931 = vmatprep.subr.bf16.mxu0 %v10930_v12  ;;  %v10936_v3 = vpack.c.bf16 %v4096_v56, %v4089_v57  ;;  %v4689_v1 = vld [vmem:[%s20880_s3 + $0x28d0] sm:$0xff]  ;;  %v4696_v12 = vld [vmem:[%s20880_s3 + $0x2908] sm:$0xff]  ;;  %v10946_v5 = vpack.c.bf16 %v4250_v9, %v4243_v55  ;;  %v10814_v21 = vpack.c.bf16 %v4711_v13, %v4704_v25  ;;  %v4703_v57 = vld [vmem:[%s20880_s3 + $0x2940] sm:$0xff] }
 0x565   :  { %v4145_v56 = vld [vmem:[%s20880_s3 + $0x17d0] sm:$0xff]  ;;  %v4746_v55 = vld [vmem:[%s20880_s3 + $0x2a98] sm:$0xff] }
 0x566   :  { %10797 = vmatpush1.bf16.msra.mxu1 %v10796_v14  ;;  %v4257_v14 = vld [vmem:[%s20880_s3 + $0x1b50] sm:$0xff]  ;;  %v10952_v30 = vpack.c.bf16 %v4152_v22, %v4145_v56  ;;  %v4306_v13 = vld [vmem:[%s20880_s3 + $0x1cd8] sm:$0xff]  ;;  %v6789_v22 = vld [vmem:[%s20882_s5 + $0x28] sm:$0xff] }
 0x567   :  { %10933 = vmatpush3.bf16.msra.mxu0 %v10932_v19  ;;  %10799 = vmatprep.subr.bf16.mxu1 %v10798_v50  ;;  %v4264_v19 = vld [vmem:[%s20880_s3 + $0x1b88] sm:$0xff]  ;;  %v10812_v50 = vpack.c.bf16 %v4696_v12, %v4689_v1  ;;  %v4753_v9 = vld [vmem:[%s20880_s3 + $0x2ad0] sm:$0xff]  ;;  %v10960_v1 = vpack.c.bf16 %v4292_v8, %v4285_v62 }
 0x568   :  { %10935 = vmatprep.subr.bf16.mxu0 %v10934_v52  ;;  %v4710_v52 = vld [vmem:[%s20880_s3 + $0x2978] sm:$0xff]  ;;  %v10950_v48 = vpack.c.bf16 %v4264_v19, %v4257_v14  ;;  %v4745_v12 = vld [vmem:[%s20880_s3 + $0x2a90] sm:$0xff]  ;;  %v10826_v51 = vpack.c.bf16 %v4753_v9, %v4746_v55  ;;  %v6837_v19 = vld [vmem:[%s20882_s5 + $0x1a8] sm:$0xff] }
 0x569   :  { %v6834_v14 = vld [vmem:[%s20882_s5 + $0x190] sm:$0xff]  ;;  %v6801_v62 = vld [vmem:[%s20882_s5 + $0x88] sm:$0xff]  ;;  %v6852_v9 = vld [vmem:[%s20882_s5 + $0x220] sm:$0xff] }
 0x56a   :  { %10801 = vmatpush1.bf16.msra.mxu1 %v10800_v43  ;;  %v4271_v43 = vld [vmem:[%s20880_s3 + $0x1bc0] sm:$0xff]  ;;  %v4313_v56 = vld [vmem:[%s20880_s3 + $0x1d10] sm:$0xff]  ;;  %v4348_v55 = vld [vmem:[%s20880_s3 + $0x1e28] sm:$0xff] }
 0x56b   :  { %10937 = vmatpush3.bf16.msra.mxu0 %v10936_v3  ;;  %10803 = vmatprep.subr.bf16.mxu1 %v10802_v28  ;;  %v4278_v3 = vld [vmem:[%s20880_s3 + $0x1bf8] sm:$0xff]  ;;  %v10816_v28 = vpack.c.bf16 %v4710_v52, %v4703_v57  ;;  %v11224_v52 = vpack.c.bf16 %v6837_v19, %v6834_v14  ;;  %v6846_v38 = vld [vmem:[%s20882_s5 + $0x1f0] sm:$0xff] }
 0x56c   :  { %10939 = vmatprep.subr.bf16.mxu0 %v10938_v35  ;;  %v4724_v35 = vld [vmem:[%s20880_s3 + $0x29e8] sm:$0xff]  ;;  %v10954_v15 = vpack.c.bf16 %v4278_v3, %v4271_v43  ;;  %v4439_v43 = vld [vmem:[%s20880_s3 + $0x2100] sm:$0xff]  ;;  %v4446_v3 = vld [vmem:[%s20880_s3 + $0x2138] sm:$0xff] }
 0x56d   :  { %v10970_v31 = vpack.c.bf16 %v4446_v3, %v4439_v43  ;;  %v4362_v14 = vld [vmem:[%s20880_s3 + $0x1e98] sm:$0xff]  ;;  %v6858_v19 = vld [vmem:[%s20882_s5 + $0x250] sm:$0xff]  ;;  %v4495_v3 = vld [vmem:[%s20880_s3 + $0x22c0] sm:$0xff] }
 0x56e   :  { %10805 = vmatpush1.bf16.msra.mxu1 %v10804_v39  ;;  %v4397_v39 = vld [vmem:[%s20880_s3 + $0x1fb0] sm:$0xff]  ;;  %v6867_v43 = vld [vmem:[%s20882_s5 + $0x298] sm:$0xff] }
 0x56f   :  { %10941 = vmatpush3.bf16.msra.mxu0 %v10940_v18  ;;  %10807 = vmatprep.subr.bf16.mxu1 %v10806_v40  ;;  %v4404_v18 = vld [vmem:[%s20880_s3 + $0x1fe8] sm:$0xff]  ;;  %v10820_v40 = vpack.c.bf16 %v4724_v35, %v4717_v34  ;;  %v4327_v34 = vld [vmem:[%s20880_s3 + $0x1d80] sm:$0xff] }
 0x570   :  { %10943 = vmatprep.subr.bf16.mxu0 %v10942_v45  ;;  %v4738_v45 = vld [vmem:[%s20880_s3 + $0x2a58] sm:$0xff]  ;;  %v10958_v54 = vpack.c.bf16 %v4404_v18, %v4397_v39  ;;  %v6792_v35 = vld [vmem:[%s20882_s5 + $0x40] sm:$0xff]  ;;  %v6849_v39 = vld [vmem:[%s20882_s5 + $0x208] sm:$0xff] }
 0x571   :  { %v4453_v18 = vld [vmem:[%s20880_s3 + $0x2170] sm:$0xff] }
 0x572   :  { %10809 = vmatpush1.bf16.msra.mxu1 %v10808_v2  ;;  %v4411_v2 = vld [vmem:[%s20880_s3 + $0x2020] sm:$0xff] }
 0x573   :  { %10945 = vmatpush3.bf16.msra.mxu0 %v10944_v63  ;;  %10811 = vmatprep.subr.bf16.mxu1 %v10810_v17  ;;  %v4418_v63 = vld [vmem:[%s20880_s3 + $0x2058] sm:$0xff]  ;;  %v10824_v17 = vpack.c.bf16 %v4738_v45, %v4731_v60  ;;  %v11232_v60 = vpack.c.bf16 %v6849_v39, %v6846_v38  ;;  %v4341_v45 = vld [vmem:[%s20880_s3 + $0x1df0] sm:$0xff] }
 0x574   :  { %10947 = vmatprep.subr.bf16.mxu0 %v10946_v5  ;;  %v4299_v5 = vld [vmem:[%s20880_s3 + $0x1ca0] sm:$0xff]  ;;  %v10962_v25 = vpack.c.bf16 %v4418_v63, %v4411_v2  ;;  %v6855_v2 = vld [vmem:[%s20882_s5 + $0x238] sm:$0xff]  ;;  %v6870_v39 = vld [vmem:[%s20882_s5 + $0x2b0] sm:$0xff] }
 0x575   :  { %v10964_v57 = vpack.c.bf16 %v4306_v13, %v4299_v5  ;;  %v4467_v63 = vld [vmem:[%s20880_s3 + $0x21e0] sm:$0xff]  ;;  %v4390_v38 = vld [vmem:[%s20880_s3 + $0x1f78] sm:$0xff] }
 0x576   :  { %10813 = vmatpush1.bf16.msra.mxu1 %v10812_v50  ;;  %v4425_v50 = vld [vmem:[%s20880_s3 + $0x2090] sm:$0xff]  ;;  %v4355_v5 = vld [vmem:[%s20880_s3 + $0x1e60] sm:$0xff] }
 0x577   :  { %10949 = vmatpush3.bf16.msra.mxu0 %v10948_v27  ;;  %10815 = vmatprep.subr.bf16.mxu1 %v10814_v21  ;;  %v4432_v27 = vld [vmem:[%s20880_s3 + $0x20c8] sm:$0xff]  ;;  %v10828_v21 = vpack.c.bf16 %v4752_v42, %v4745_v12  ;;  %v10976_v12 = vpack.c.bf16 %v4348_v55, %v4341_v45  ;;  %v11236_v42 = vpack.c.bf16 %v6855_v2, %v6852_v9  ;;  %v4509_v55 = vld [vmem:[%s20880_s3 + $0x2330] sm:$0xff]  ;;  %v4635_v2 = vld [vmem:[%s20880_s3 + $0x2720] sm:$0xff] }
 0x578   :  { %10951 = vmatprep.subr.bf16.mxu0 %v10950_v48  ;;  %v6786_v48 = vld [vmem:[%s20882_s5 + $0x10] sm:$0xff]  ;;  %v4516_v9 = vld [vmem:[%s20880_s3 + $0x2368] sm:$0xff] }
 0x57a   :  { %10817 = vmatpush1.bf16.msra.mxu1 %v10816_v28  ;;  %v11226_v28 = vpack.c.bf16 %v6789_v22, %v6786_v48  ;;  %v4369_v48 = vld [vmem:[%s20880_s3 + $0x1ed0] sm:$0xff] }
 0x57b   :  { %10953 = vmatpush3.bf16.msra.mxu0 %v10952_v30  ;;  %10819 = vmatprep.subr.bf16.mxu1 %v10818_v33  ;;  %v11228_v33 = vpack.c.bf16 %v6843_v23, %v6840_v47  ;;  %v6810_v22 = vld [vmem:[%s20882_s5 + $0xd0] sm:$0xff]  ;;  %v4376_v47 = vld [vmem:[%s20880_s3 + $0x1f08] sm:$0xff]  ;;  %v6864_v23 = vld [vmem:[%s20882_s5 + $0x280] sm:$0xff] }
 0x57c   :  { %10955 = vmatprep.subr.bf16.mxu0 %v10954_v15  ;;  %v6778_v15 = vmax.f32 %v18565_v7, 0.0  ;;  %v6799_v7 = vld [vmem:[%s20882_s5 + $0x78] sm:$0xff] }
 0x57e   :  { %10821 = vmatpush1.bf16.msra.mxu1 %v10820_v40  ;;  %v4460_v40 = vld [vmem:[%s20880_s3 + $0x21a8] sm:$0xff] }
 0x57f   :  { %10957 = vmatpush3.bf16.msra.mxu0 %v10956_v46  ;;  %10823 = vmatprep.subr.bf16.mxu1 %v10822_v44  ;;  %v11230_v46 = vpack.c.bf16 %v6795_v37, %v6792_v35  ;;  %v10972_v44 = vpack.c.bf16 %v4334_v26, %v4327_v34  ;;  %v10974_v8 = vpack.c.bf16 %v4460_v40, %v4453_v18  ;;  %v4383_v35 = vld [vmem:[%s20880_s3 + $0x1f40] sm:$0xff]  ;;  %v6873_v18 = vld [vmem:[%s20882_s5 + $0x2c8] sm:$0xff]  ;;  %v4621_v40 = vld [vmem:[%s20880_s3 + $0x26b0] sm:$0xff] }
 0x580   :  { %10959 = vmatprep.subr.bf16.mxu0 %v10958_v54  ;;  %v6798_v54 = vld [vmem:[%s20882_s5 + $0x70] sm:$0xff]  ;;  %v11244_v34 = vpack.c.bf16 %v6867_v43, %v6864_v23  ;;  %v6816_v37 = vld [vmem:[%s20882_s5 + $0x100] sm:$0xff]  ;;  %v11248_v45 = vpack.c.bf16 %v6873_v18, %v6870_v39  ;;  %v4558_v23 = vld [vmem:[%s20880_s3 + $0x24b8] sm:$0xff] }
 0x581   :  { %6210 = vmatmul.mubr.f32.vlgmr.msra.gmra.mrb[12].mxu1 %v17231_v6  ;;  %v4677_v43 = vld [vmem:[%s20880_s3 + $0x2870] sm:$0xff]  ;;  %v4586_v39 = vld [vmem:[%s20880_s3 + $0x2598] sm:$0xff] }
 0x582   :  { %6562 = vmatmul.mubr.f32.vlgmr.msra.gmra.mrb[20].mxu0 %v16444_v4  ;;  %10825 = vmatpush1.bf16.msra.mxu1 %v10824_v17  ;;  %v10966_v4 = vpack.c.bf16 %v4432_v27, %v4425_v50  ;;  %v4474_v17 = vld [vmem:[%s20880_s3 + $0x2218] sm:$0xff]  ;;  %v6861_v50 = vld [vmem:[%s20882_s5 + $0x268] sm:$0xff]  ;;  %v4481_v27 = vld [vmem:[%s20880_s3 + $0x2250] sm:$0xff] }
 0x583   :  { %10961 = vmatpush3.bf16.msra.mxu0 %v10960_v1  ;;  %6631 = vmatprep.mubr.f32.mxu0 %v16455_v16  ;;  %v4320_v16 = vld [vmem:[%s20880_s3 + $0x1d48] sm:$0xff]  ;;  %v11234_v1 = vpack.c.bf16 %v6801_v62, %v6798_v54  ;;  %v10978_v13 = vpack.c.bf16 %v4474_v17, %v4467_v63  ;;  %v6822_v54 = vld [vmem:[%s20882_s5 + $0x130] sm:$0xff]  ;;  %v4642_v63 = vld [vmem:[%s20880_s3 + $0x2758] sm:$0xff] }
 0x584   :  { %10827 = vmatprep.subr.bf16.mxu1 %v10826_v51  ;;  %10963 = vmatprep.subr.bf16.mxu0 %v10962_v25  ;;  %v10968_v30 = vpack.c.bf16 %v4320_v16, %v4313_v56  ;;  %v6804_v51 = vld [vmem:[%s20882_s5 + $0xa0] sm:$0xff]  ;;  %v6807_v25 = vld [vmem:[%s20882_s5 + $0xb8] sm:$0xff]  ;;  %v11240_v56 = vpack.c.bf16 %v6861_v50, %v6858_v19  ;;  %v6825_v62 = vld [vmem:[%s20882_s5 + $0x148] sm:$0xff] }
 0x585   :  { %6280 = vmatprep.mubr.f32.mxu1 %v11481_v24  ;;  %v6876_v17 = vld [vmem:[%s20882_s5 + $0x2e0] sm:$0xff]  ;;  %v4530_v19 = vld [vmem:[%s20880_s3 + $0x23d8] sm:$0xff]  ;;  %v4649_v50 = vld [vmem:[%s20880_s3 + $0x2790] sm:$0xff] }
 0x586   :  { %10829 = vmatpush1.bf16.msra.mxu1 %v10828_v21  ;;  %v4488_v21 = vld [vmem:[%s20880_s3 + $0x2288] sm:$0xff]  ;;  %v4705_v18 = vld [vmem:[%s20880_s3 + $0x2950] sm:$0xff] }
 0x587   :  { %10965 = vmatpush3.bf16.msra.mxu0 %v10964_v57  ;;  %11225 = vmatprep.subr.bf16.mxu1 %v11224_v52  ;;  %v11238_v57 = vpack.c.bf16 %v6807_v25, %v6804_v51  ;;  %v10980_v52 = vpack.c.bf16 %v4362_v14, %v4355_v5  ;;  %v10982_v16 = vpack.c.bf16 %v4488_v21, %v4481_v27  ;;  %v6828_v5 = vld [vmem:[%s20882_s5 + $0x160] sm:$0xff]  ;;  %v6831_v51 = vld [vmem:[%s20882_s5 + $0x178] sm:$0xff]  ;;  %v4656_v27 = vld [vmem:[%s20880_s3 + $0x27c8] sm:$0xff] }
 0x588   :  { %10967 = vmatprep.subr.bf16.mxu0 %v10966_v4  ;;  %v6813_v4 = vld [vmem:[%s20882_s5 + $0xe8] sm:$0xff]  ;;  %v10994_v25 = vpack.c.bf16 %v4642_v63, %v4635_v2  ;;  %v4523_v14 = vld [vmem:[%s20880_s3 + $0x23a0] sm:$0xff]  ;;  %v11254_v21 = vpack.c.bf16 %v6831_v51, %v6828_v5  ;;  %v4614_v2 = vld [vmem:[%s20880_s3 + $0x2678] sm:$0xff] }
 0x589   :  { %7866 = vmatmul.mubr.msk.f32.vlgmr.msra.gmra.mrb[12].mxu1 %vm4792_vm2, %v16393_v29  ;;  %v4754_v5 = vld [vmem:[%s20880_s3 + $0x2ad8] sm:$0xff]  ;;  %v6785_v51 = vld [vmem:[%s20882_s5 + $0x8] sm:$0xff] }
 0x58a   :  { %11227 = vmatpush3.bf16.msra.mxu1 %v11226_v28  ;;  %7446 = vmatprep.mubr.f32.mxu1 %v6778_v15  ;;  %v4502_v28 = vld [vmem:[%s20880_s3 + $0x22f8] sm:$0xff] }
 0x58b   :  { %10969 = vmatpush3.bf16.msra.mxu0 %v10968_v30  ;;  %11229 = vmatprep.subr.bf16.mxu1 %v11228_v33  ;;  %v11242_v30 = vpack.c.bf16 %v6813_v4, %v6810_v22  ;;  %v10984_v33 = vpack.c.bf16 %v4376_v47, %v4369_v48  ;;  %v10986_v26 = vpack.c.bf16 %v4502_v28, %v4495_v3  ;;  %v4544_v48 = vld [vmem:[%s20880_s3 + $0x2448] sm:$0xff]  ;;  %v6777_v22 = vmax.f32 %v18553_v0, 0.0  ;;  %v4551_v47 = vld [vmem:[%s20880_s3 + $0x2480] sm:$0xff]  ;;  %v6899_v0 = vld [vmem:[%s20882_s5 + $0x398] sm:$0xff] }
 0x58c   :  { %10971 = vmatprep.subr.bf16.mxu0 %v10970_v31  ;;  %v6819_v31 = vld [vmem:[%s20882_s5 + $0x118] sm:$0xff]  ;;  %v4684_v3 = vld [vmem:[%s20880_s3 + $0x28a8] sm:$0xff]  ;;  %v11004_v28 = vpack.c.bf16 %v4558_v23, %v4551_v47  ;;  %v6984_v23 = vld [vmem:[%s20882_s5 + $0x640] sm:$0xff] }
 0x58e   :  { %11231 = vmatpush3.bf16.msra.mxu1 %v11230_v46  ;;  %v4628_v46 = vld [vmem:[%s20880_s3 + $0x26e8] sm:$0xff] }
 0x58f   :  { %10973 = vmatpush3.bf16.msra.mxu0 %v10972_v44  ;;  %11233 = vmatprep.subr.bf16.mxu1 %v11232_v60  ;;  %v11246_v44 = vpack.c.bf16 %v6819_v31, %v6816_v37  ;;  %v10988_v60 = vpack.c.bf16 %v4390_v38, %v4383_v35  ;;  %v4691_v35 = vld [vmem:[%s20880_s3 + $0x28e0] sm:$0xff]  ;;  %v4698_v37 = vld [vmem:[%s20880_s3 + $0x2918] sm:$0xff] }
 0x590   :  { %10975 = vmatprep.subr.bf16.mxu0 %v10974_v8  ;;  %v10990_v8 = vpack.c.bf16 %v4628_v46, %v4621_v40  ;;  %v4579_v38 = vld [vmem:[%s20880_s3 + $0x2560] sm:$0xff]  ;;  %v4712_v40 = vld [vmem:[%s20880_s3 + $0x2988] sm:$0xff] }
 0x591   :  { %v11012_v46 = vpack.c.bf16 %v4586_v39, %v4579_v38  ;;  %v6990_v39 = vld [vmem:[%s20882_s5 + $0x670] sm:$0xff] }
 0x592   :  { %11235 = vmatpush3.bf16.msra.mxu1 %v11234_v1  ;;  %v6879_v1 = vld [vmem:[%s20882_s5 + $0x2f8] sm:$0xff] }
 0x593   :  { %10977 = vmatpush3.bf16.msra.mxu0 %v10976_v12  ;;  %11237 = vmatprep.subr.bf16.mxu1 %v11236_v42  ;;  %v11250_v12 = vpack.c.bf16 %v6825_v62, %v6822_v54  ;;  %v10992_v42 = vpack.c.bf16 %v4516_v9, %v4509_v55  ;;  %v4719_v54 = vld [vmem:[%s20880_s3 + $0x29c0] sm:$0xff]  ;;  %v4726_v62 = vld [vmem:[%s20880_s3 + $0x29f8] sm:$0xff] }
 0x594   :  { %10979 = vmatprep.subr.bf16.mxu0 %v10978_v13  ;;  %v11252_v13 = vpack.c.bf16 %v6879_v1, %v6876_v17  ;;  %v11018_v55 = vpack.c.bf16 %v4726_v62, %v4719_v54  ;;  %v4607_v9 = vld [vmem:[%s20880_s3 + $0x2640] sm:$0xff]  ;;  %v4733_v17 = vld [vmem:[%s20880_s3 + $0x2a30] sm:$0xff]  ;;  %v4740_v1 = vld [vmem:[%s20880_s3 + $0x2a68] sm:$0xff] }
 0x595   :  { %v11020_v63 = vpack.c.bf16 %v4614_v2, %v4607_v9  ;;  %v6802_v2 = vld [vmem:[%s20882_s5 + $0x90] sm:$0xff] }
 0x596   :  { %11239 = vmatpush3.bf16.msra.mxu1 %v11238_v57  ;;  %v10996_v57 = vpack.c.bf16 %v4530_v19, %v4523_v14  ;;  %v7029_v14 = vld [vmem:[%s20882_s5 + $0x7a8] sm:$0xff] }
 0x597   :  { %10981 = vmatpush3.bf16.msra.mxu0 %v10980_v52  ;;  %11241 = vmatprep.subr.bf16.mxu1 %v11240_v56  ;;  %v10998_v52 = vpack.c.bf16 %v4656_v27, %v4649_v50  ;;  %v4537_v56 = vld [vmem:[%s20880_s3 + $0x2410] sm:$0xff] }
 0x598   :  { %10983 = vmatprep.subr.bf16.mxu0 %v10982_v16  ;;  %v11000_v4 = vpack.c.bf16 %v4544_v48, %v4537_v56  ;;  %v6978_v27 = vld [vmem:[%s20882_s5 + $0x610] sm:$0xff]  ;;  %v6791_v48 = vld [vmem:[%s20882_s5 + $0x38] sm:$0xff] }
 0x59a   :  { %11243 = vmatpush3.bf16.msra.mxu1 %v11242_v30  ;;  %v11006_v30 = vpack.c.bf16 %v4684_v3, %v4677_v43  ;;  %v6987_v43 = vld [vmem:[%s20882_s5 + $0x658] sm:$0xff] }
 0x59b   :  { %10985 = vmatpush3.bf16.msra.mxu0 %v10984_v33  ;;  %11245 = vmatprep.subr.bf16.mxu1 %v11244_v34  ;;  %v4565_v33 = vld [vmem:[%s20880_s3 + $0x24f0] sm:$0xff]  ;;  %v4572_v34 = vld [vmem:[%s20880_s3 + $0x2528] sm:$0xff] }
 0x59c   :  { %10987 = vmatprep.subr.bf16.mxu0 %v10986_v26  ;;  %v11008_v31 = vpack.c.bf16 %v4572_v34, %v4565_v33  ;;  %v11010_v26 = vpack.c.bf16 %v4698_v37, %v4691_v35  ;;  %v11294_v33 = vpack.c.bf16 %v6987_v43, %v6984_v23  ;;  %v6797_v34 = vld [vmem:[%s20882_s5 + $0x68] sm:$0xff]  ;;  %v6800_v35 = vld [vmem:[%s20882_s5 + $0x80] sm:$0xff]  ;;  %v7038_v37 = vld [vmem:[%s20882_s5 + $0x7f0] sm:$0xff] }
 0x59d   :  { %v6814_v43 = vld [vmem:[%s20882_s5 + $0xf0] sm:$0xff] }
 0x59e   :  { %11247 = vmatpush3.bf16.msra.mxu1 %v11246_v44  ;;  %v11014_v44 = vpack.c.bf16 %v4712_v40, %v4705_v18  ;;  %v11036_v18 = vpack.c.bf16 %v6800_v35, %v6797_v34  ;;  %v6796_v40 = vld [vmem:[%s20882_s5 + $0x60] sm:$0xff]  ;;  %v7062_v34 = vld [vmem:[%s20882_s5 + $0x8b0] sm:$0xff]  ;;  %v7065_v35 = vld [vmem:[%s20882_s5 + $0x8c8] sm:$0xff] }
 0x59f   :  { %10989 = vmatpush3.bf16.msra.mxu0 %v10988_v60  ;;  %11249 = vmatprep.subr.bf16.mxu1 %v11248_v45  ;;  %v4593_v60 = vld [vmem:[%s20880_s3 + $0x25d0] sm:$0xff]  ;;  %v4600_v45 = vld [vmem:[%s20880_s3 + $0x2608] sm:$0xff]  ;;  %v11038_v54 = vpack.c.bf16 %v6799_v7, %v6796_v40  ;;  %v6827_v7 = vld [vmem:[%s20882_s5 + $0x158] sm:$0xff] }
 0x5a0   :  { %10991 = vmatprep.subr.bf16.mxu0 %v10990_v8  ;;  %v11016_v8 = vpack.c.bf16 %v4600_v45, %v4593_v60  ;;  %v7044_v60 = vld [vmem:[%s20882_s5 + $0x820] sm:$0xff]  ;;  %v7047_v45 = vld [vmem:[%s20882_s5 + $0x838] sm:$0xff] }
 0x5a1   :  { %v11300_v62 = vpack.c.bf16 %v7047_v45, %v7044_v60 }
 0x5a2   :  { %6632 = vmatmul.mubr.f32.vlgmr.msra.gmra.mrb[22].mxu0 %v16837_v41  ;;  %11251 = vmatpush3.bf16.msra.mxu1 %v11250_v12  ;;  %v4663_v41 = vld [vmem:[%s20880_s3 + $0x2800] sm:$0xff]  ;;  %v11023_v12 = vpack.c.bf16 %v4740_v1, %v4733_v17  ;;  %v6809_v1 = vld [vmem:[%s20882_s5 + $0xc8] sm:$0xff] }
 0x5a3   :  { %10993 = vmatpush3.bf16.msra.mxu0 %v10992_v42  ;;  %6701 = vmatprep.mubr.f32.mxu0 %v16849_v61  ;;  %v4670_v61 = vld [vmem:[%s20880_s3 + $0x2838] sm:$0xff]  ;;  %v4747_v42 = vld [vmem:[%s20880_s3 + $0x2aa0] sm:$0xff] }
 0x5a4   :  { %10995 = vmatprep.subr.bf16.mxu0 %v10994_v25  ;;  %11253 = vmatprep.subr.bf16.mxu1 %v11252_v13  ;;  %v11002_v16 = vpack.c.bf16 %v4670_v61, %v4663_v41  ;;  %v6788_v25 = vld [vmem:[%s20882_s5 + $0x20] sm:$0xff]  ;;  %v7026_v13 = vld [vmem:[%s20882_s5 + $0x790] sm:$0xff]  ;;  %v11026_v19 = vpack.c.bf16 %v4754_v5, %v4747_v42  ;;  %v7053_v5 = vld [vmem:[%s20882_s5 + $0x868] sm:$0xff] }
 0x5a5   :  { %v11288_v50 = vpack.c.bf16 %v7029_v14, %v7026_v13  ;;  %v6794_v41 = vld [vmem:[%s20882_s5 + $0x50] sm:$0xff]  ;;  %v7032_v61 = vld [vmem:[%s20882_s5 + $0x7c0] sm:$0xff]  ;;  %v7005_v14 = vld [vmem:[%s20882_s5 + $0x6e8] sm:$0xff] }
 0x5a6   :  { %11255 = vmatpush3.bf16.msra.mxu1 %v11254_v21  ;;  %v11028_v21 = vpack.c.bf16 %v6788_v25, %v6785_v51  ;;  %v11032_v3 = vpack.c.bf16 %v6794_v41, %v6791_v48  ;;  %v7050_v42 = vld [vmem:[%s20882_s5 + $0x850] sm:$0xff]  ;;  %v7056_v48 = vld [vmem:[%s20882_s5 + $0x880] sm:$0xff]  ;;  %v7059_v41 = vld [vmem:[%s20882_s5 + $0x898] sm:$0xff] }
 0x5a7   :  { %10997 = vmatpush3.bf16.msra.mxu0 %v10996_v57  ;;  %v6784_v57 = vld [vmem:[%s20882_s5] sm:$0xff]  ;;  %11289 = vmatprep.subr.bf16.mxu1 %v11288_v50  ;;  %v11304_v25 = vpack.c.bf16 %v7053_v5, %v7050_v42  ;;  %v7002_v13 = vld [vmem:[%s20882_s5 + $0x6d0] sm:$0xff]  ;;  %v6835_v5 = vld [vmem:[%s20882_s5 + $0x198] sm:$0xff] }
 0x5a8   :  { %10999 = vmatprep.subr.bf16.mxu0 %v10998_v52  ;;  %v6787_v52 = vld [vmem:[%s20882_s5 + $0x18] sm:$0xff]  ;;  %v6808_v50 = vld [vmem:[%s20882_s5 + $0xc0] sm:$0xff] }
 0x5a9   :  { %7447 = vmatmul.mubr.f32.vlgmr.msra.gmra.mrb[14].mxu1 %v6777_v22  ;;  %v6832_v42 = vld [vmem:[%s20882_s5 + $0x180] sm:$0xff] }
 0x5ab   :  { %11001 = vmatpush3.bf16.msra.mxu0 %v11000_v4  ;;  %v7035_v4 = vld [vmem:[%s20882_s5 + $0x7d8] sm:$0xff] }
 0x5ac   :  { %11003 = vmatprep.subr.bf16.mxu0 %v11002_v16  ;;  %v11030_v16 = vpack.c.bf16 %v6787_v52, %v6784_v57  ;;  %v11292_v47 = vpack.c.bf16 %v7035_v4, %v7032_v61  ;;  %v6815_v57 = vld [vmem:[%s20882_s5 + $0xf8] sm:$0xff]  ;;  %v6818_v52 = vld [vmem:[%s20882_s5 + $0x110] sm:$0xff]  ;;  %v11308_v4 = vpack.c.bf16 %v7059_v41, %v7056_v48  ;;  %v6844_v48 = vld [vmem:[%s20882_s5 + $0x1e0] sm:$0xff] }
 0x5ad   :  { %v11048_v23 = vpack.c.bf16 %v6818_v52, %v6815_v57  ;;  %v6847_v41 = vld [vmem:[%s20882_s5 + $0x1f8] sm:$0xff] }
 0x5af   :  { %11005 = vmatpush3.bf16.msra.mxu0 %v11004_v28  ;;  %v6790_v28 = vld [vmem:[%s20882_s5 + $0x30] sm:$0xff] }
 0x5b0   :  { %11007 = vmatprep.subr.bf16.mxu0 %v11006_v30  ;;  %v6793_v30 = vld [vmem:[%s20882_s5 + $0x48] sm:$0xff] }
 0x5b3   :  { %11009 = vmatpush3.bf16.msra.mxu0 %v11008_v31  ;;  %v7041_v31 = vld [vmem:[%s20882_s5 + $0x808] sm:$0xff] }
 0x5b4   :  { %11011 = vmatprep.subr.bf16.mxu0 %v11010_v26  ;;  %v11034_v26 = vpack.c.bf16 %v6793_v30, %v6790_v28  ;;  %v11296_v38 = vpack.c.bf16 %v7041_v31, %v7038_v37  ;;  %v6821_v30 = vld [vmem:[%s20882_s5 + $0x128] sm:$0xff]  ;;  %v11312_v31 = vpack.c.bf16 %v7065_v35, %v7062_v34  ;;  %v6856_v34 = vld [vmem:[%s20882_s5 + $0x240] sm:$0xff]  ;;  %v6859_v35 = vld [vmem:[%s20882_s5 + $0x258] sm:$0xff] }
 0x5b7   :  { %11013 = vmatpush3.bf16.msra.mxu0 %v11012_v46  ;;  %v6803_v46 = vld [vmem:[%s20882_s5 + $0x98] sm:$0xff] }
 0x5b8   :  { %11015 = vmatprep.subr.bf16.mxu0 %v11014_v44  ;;  %v6806_v44 = vld [vmem:[%s20882_s5 + $0xb0] sm:$0xff] }
 0x5b9   :  { %v11040_v9 = vpack.c.bf16 %v6806_v44, %v6803_v46  ;;  %v7068_v46 = vld [vmem:[%s20882_s5 + $0x8e0] sm:$0xff]  ;;  %v7071_v44 = vld [vmem:[%s20882_s5 + $0x8f8] sm:$0xff] }
 0x5ba   :  { %v11316_v45 = vpack.c.bf16 %v7071_v44, %v7068_v46  ;;  %v6872_v46 = vld [vmem:[%s20882_s5 + $0x2c0] sm:$0xff] }
 0x5bb   :  { %11017 = vmatpush3.bf16.msra.mxu0 %v11016_v8  ;;  %v6996_v8 = vld [vmem:[%s20882_s5 + $0x6a0] sm:$0xff] }
 0x5bc   :  { %11019 = vmatprep.subr.bf16.mxu0 %v11018_v55  ;;  %v6999_v55 = vld [vmem:[%s20882_s5 + $0x6b8] sm:$0xff] }
 0x5bd   :  { %v11302_v17 = vpack.c.bf16 %v6999_v55, %v6996_v8  ;;  %v6826_v55 = vld [vmem:[%s20882_s5 + $0x150] sm:$0xff] }
 0x5bf   :  { %11021 = vmatpush3.bf16.msra.mxu0 %v11020_v63  ;;  %v6805_v63 = vld [vmem:[%s20882_s5 + $0xa8] sm:$0xff] }
 0x5c0   :  { %11022 = vmatprep.subr.bf16.mxu0 %v11482_v10  ;;  %v11042_v51 = vpack.c.bf16 %v6805_v63, %v6802_v2  ;;  %v6833_v63 = vld [vmem:[%s20882_s5 + $0x188] sm:$0xff] }
 0x5c2   :  { %6702 = vmatmul.mubr.f32.vlgmr.msra.gmra.mrb[24].mxu0 %v17231_v6  ;;  %v6981_v6 = vld [vmem:[%s20882_s5 + $0x628] sm:$0xff] }
 0x5c3   :  { %11024 = vmatpush3.bf16.msra.mxu0 %v11023_v12  ;;  %8358 = vmatprep.mubr.msk.f32.mxu0 %vm11483_vm1, %v11481_v24  ;;  %v11290_v56 = vpack.c.bf16 %v6981_v6, %v6978_v27  ;;  %v6812_v12 = vld [vmem:[%s20882_s5 + $0xe0] sm:$0xff]  ;;  %v6811_v27 = vld [vmem:[%s20882_s5 + $0xd8] sm:$0xff]  ;;  %v11306_v6 = vpack.c.bf16 %v7005_v14, %v7002_v13  ;;  %v11062_v13 = vpack.c.bf16 %v6835_v5, %v6832_v42 }
 0x5c4   :  { %11025 = vmatprep.subr.bf16.mxu0 %v11482_v10  ;;  %v11046_v61 = vpack.c.bf16 %v6811_v27, %v6808_v50  ;;  %v6841_v50 = vld [vmem:[%s20882_s5 + $0x1c8] sm:$0xff]  ;;  %v6884_v42 = vld [vmem:[%s20882_s5 + $0x320] sm:$0xff] }
 0x5c5   :  { %11291 = vmatpush3.bf16.msra.mxu1 %v11290_v56  ;;  %v6845_v27 = vld [vmem:[%s20882_s5 + $0x1e8] sm:$0xff] }
 0x5c6   :  { %11293 = vmatprep.subr.bf16.mxu1 %v11292_v47  ;;  %v7011_v47 = vld [vmem:[%s20882_s5 + $0x718] sm:$0xff] }
 0x5c7   :  { %11027 = vmatpush3.bf16.msra.mxu0 %v11026_v19  ;;  %v11044_v19 = vpack.c.bf16 %v6812_v12, %v6809_v1 }
 0x5c8   :  { %11029 = vmatprep.subr.bf16.mxu0 %v11028_v21 }
 0x5c9   :  { %11295 = vmatpush3.bf16.msra.mxu1 %v11294_v33  ;;  %v6824_v33 = vld [vmem:[%s20882_s5 + $0x140] sm:$0xff] }
 0x5ca   :  { %8359 = vmatmul.mubr.msk.f32.vlgmr.msra.gmra.mrb[26].mxu0 %vm4792_vm2, %v16393_v29  ;;  %v6993_v29 = vld [vmem:[%s20882_s5 + $0x688] sm:$0xff]  ;;  %11297 = vmatprep.subr.bf16.mxu1 %v11296_v38 }
 0x5cb   :  { %11031 = vmatpush1.bf16.msra.mxu0 %v11030_v16  ;;  %7162 = vmatprep.mubr.f32.mxu0 %v6778_v15  ;;  %v11298_v15 = vpack.c.bf16 %v6993_v29, %v6990_v39  ;;  %v7008_v16 = vld [vmem:[%s20882_s5 + $0x700] sm:$0xff]  ;;  %v7017_v38 = vld [vmem:[%s20882_s5 + $0x748] sm:$0xff]  ;;  %v11052_v39 = vpack.c.bf16 %v6824_v33, %v6821_v30 }
 0x5cc   :  { %11033 = vmatprep.subr.bf16.mxu0 %v11032_v3  ;;  %v6817_v3 = vld [vmem:[%s20882_s5 + $0x108] sm:$0xff]  ;;  %v11310_v28 = vpack.c.bf16 %v7011_v47, %v7008_v16  ;;  %v6820_v29 = vld [vmem:[%s20882_s5 + $0x120] sm:$0xff]  ;;  %v11070_v16 = vpack.c.bf16 %v6847_v41, %v6844_v48 }
 0x5cd   :  { %11299 = vmatpush3.bf16.msra.mxu1 %v11298_v15  ;;  %v11050_v37 = vpack.c.bf16 %v6817_v3, %v6814_v43  ;;  %v6830_v15 = vld [vmem:[%s20882_s5 + $0x170] sm:$0xff]  ;;  %v6853_v43 = vld [vmem:[%s20882_s5 + $0x228] sm:$0xff]  ;;  %v6896_v48 = vld [vmem:[%s20882_s5 + $0x380] sm:$0xff] }
 0x5ce   :  { %11301 = vmatprep.subr.bf16.mxu1 %v11300_v62  ;;  %v7023_v62 = vld [vmem:[%s20882_s5 + $0x778] sm:$0xff]  ;;  %v11056_v8 = vpack.c.bf16 %v6830_v15, %v6827_v7  ;;  %v6857_v3 = vld [vmem:[%s20882_s5 + $0x248] sm:$0xff] }
 0x5cf   :  { %11035 = vmatpush1.bf16.msra.mxu0 %v11034_v26  ;;  %v7014_v26 = vld [vmem:[%s20882_s5 + $0x730] sm:$0xff]  ;;  %v6865_v7 = vld [vmem:[%s20882_s5 + $0x288] sm:$0xff] }
 0x5d0   :  { %11037 = vmatprep.subr.bf16.mxu0 %v11036_v18  ;;  %v6823_v18 = vld [vmem:[%s20882_s5 + $0x138] sm:$0xff]  ;;  %v11314_v40 = vpack.c.bf16 %v7017_v38, %v7014_v26  ;;  %v6866_v26 = vld [vmem:[%s20882_s5 + $0x290] sm:$0xff]  ;;  %v6869_v15 = vld [vmem:[%s20882_s5 + $0x2a8] sm:$0xff] }
 0x5d1   :  { %11303 = vmatpush3.bf16.msra.mxu1 %v11302_v17  ;;  %v11054_v60 = vpack.c.bf16 %v6823_v18, %v6820_v29  ;;  %v6836_v17 = vld [vmem:[%s20882_s5 + $0x1a0] sm:$0xff]  ;;  %v11078_v29 = vpack.c.bf16 %v6859_v35, %v6856_v34 }
 0x5d2   :  { %11305 = vmatprep.subr.bf16.mxu1 %v11304_v25  ;;  %v11060_v12 = vpack.c.bf16 %v6836_v17, %v6833_v63  ;;  %v6842_v25 = vld [vmem:[%s20882_s5 + $0x1d0] sm:$0xff]  ;;  %v6877_v63 = vld [vmem:[%s20882_s5 + $0x2e8] sm:$0xff]  ;;  %v20189_v17 = vld [vmem:[%s20881_s4] sm:$0x7f] }
 0x5d3   :  { %11039 = vmatpush1.bf16.msra.mxu0 %v11038_v54  ;;  %v7020_v54 = vld [vmem:[%s20882_s5 + $0x760] sm:$0xff] }
 0x5d4   :  { %11041 = vmatprep.subr.bf16.mxu0 %v11040_v9  ;;  %v6829_v9 = vld [vmem:[%s20882_s5 + $0x168] sm:$0xff]  ;;  %v11318_v2 = vpack.c.bf16 %v7023_v62, %v7020_v54  ;;  %v6871_v54 = vld [vmem:[%s20882_s5 + $0x2b8] sm:$0xff] }
 0x5d5   :  { %v20012_v21 = vpop.f32.mrb[12].mxu0  ;;  %11307 = vmatpush3.bf16.msra.mxu1 %v11306_v6  ;;  %v11058_v1 = vpack.c.bf16 %v6829_v9, %v6826_v55  ;;  %v6848_v6 = vld [vmem:[%s20882_s5 + $0x200] sm:$0xff]  ;;  %v6875_v62 = vld [vmem:[%s20882_s5 + $0x2d8] sm:$0xff] }
 0x5d6   :  { %v20020_v56 = vpop.f32.mrb[13].mxu0  ;;  %11309 = vmatprep.subr.bf16.mxu1 %v11308_v4  ;;  %v11068_v52 = vpack.c.bf16 %v6848_v6, %v6845_v27  ;;  %v6854_v4 = vld [vmem:[%s20882_s5 + $0x230] sm:$0xff] }
 0x5d7   :  { %11043 = vmatpush1.bf16.msra.mxu0 %v11042_v51  ;;  %v6839_v51 = vld [vmem:[%s20882_s5 + $0x1b8] sm:$0xff]  ;;  %v6886_v6 = vld [vmem:[%s20882_s5 + $0x330] sm:$0xff] }
 0x5d8   :  { %11045 = vmatprep.subr.bf16.mxu0 %v11044_v19  ;;  %v11064_v14 = vpack.c.bf16 %v6842_v25, %v6839_v51  ;;  %v6838_v19 = vld [vmem:[%s20882_s5 + $0x1b0] sm:$0xff]  ;;  %v6880_v25 = vld [vmem:[%s20882_s5 + $0x300] sm:$0xff] }
 0x5d9   :  { %11311 = vmatpush3.bf16.msra.mxu1 %v11310_v28  ;;  %v11066_v57 = vpack.c.bf16 %v6841_v50, %v6838_v19  ;;  %v6860_v28 = vld [vmem:[%s20882_s5 + $0x260] sm:$0xff]  ;;  %v6890_v19 = vld [vmem:[%s20882_s5 + $0x350] sm:$0xff] }
 0x5da   :  { %11313 = vmatprep.subr.bf16.mxu1 %v11312_v31  ;;  %v11076_v33 = vpack.c.bf16 %v6860_v28, %v6857_v3  ;;  %v6863_v31 = vld [vmem:[%s20882_s5 + $0x278] sm:$0xff]  ;;  %v6901_v3 = vld [vmem:[%s20882_s5 + $0x3a8] sm:$0xff] }
 0x5db   :  { %11047 = vmatpush1.bf16.msra.mxu0 %v11046_v61  ;;  %v6851_v61 = vld [vmem:[%s20882_s5 + $0x218] sm:$0xff]  ;;  %v11080_v18 = vpack.c.bf16 %v6866_v26, %v6863_v31  ;;  %v6905_v28 = vld [vmem:[%s20882_s5 + $0x3c8] sm:$0xff] }
 0x5dc   :  { %11049 = vmatprep.subr.bf16.mxu0 %v11048_v23  ;;  %v11072_v47 = vpack.c.bf16 %v6854_v4, %v6851_v61  ;;  %v6850_v23 = vld [vmem:[%s20882_s5 + $0x210] sm:$0xff]  ;;  %v6892_v4 = vld [vmem:[%s20882_s5 + $0x360] sm:$0xff]  ;;  %v6907_v31 = vld [vmem:[%s20882_s5 + $0x3d8] sm:$0xff] }
 0x5dd   :  { %11315 = vmatpush3.bf16.msra.mxu1 %v11314_v40  ;;  %v11074_v30 = vpack.c.bf16 %v6853_v43, %v6850_v23  ;;  %v6862_v40 = vld [vmem:[%s20882_s5 + $0x270] sm:$0xff] }
 0x5de   :  { %11317 = vmatprep.subr.bf16.mxu1 %v11316_v45  ;;  %v11082_v44 = vpack.c.bf16 %v6865_v7, %v6862_v40  ;;  %v6868_v45 = vld [vmem:[%s20882_s5 + $0x2a0] sm:$0xff]  ;;  %v6898_v43 = vld [vmem:[%s20882_s5 + $0x390] sm:$0xff] }
 0x5df   :  { %11051 = vmatpush1.bf16.msra.mxu0 %v11050_v37  ;;  %v11086_v55 = vpack.c.bf16 %v6871_v54, %v6868_v45  ;;  %v11106_v34 = vpack.c.bf16 %v6901_v3, %v6898_v43  ;;  %v6917_v45 = vld [vmem:[%s20882_s5 + $0x428] sm:$0xff] }
 0x5e0   :  { %11053 = vmatprep.subr.bf16.mxu0 %v11052_v39 }
 0x5e1   :  { %11319 = vmatpush3.bf16.msra.mxu1 %v11318_v2  ;;  %v6874_v2 = vld [vmem:[%s20882_s5 + $0x2d0] sm:$0xff] }
 0x5e2   :  { %v11090_v5 = vpack.c.bf16 %v6877_v63, %v6874_v2  ;;  %v6926_v2 = vld [vmem:[%s20882_s5 + $0x470] sm:$0xff] }
 0x5e3   :  { %11055 = vmatpush1.bf16.msra.mxu0 %v11054_v60  ;;  %v11084_v60 = vpack.c.bf16 %v6872_v46, %v6869_v15  ;;  %v6910_v46 = vld [vmem:[%s20882_s5 + $0x3f0] sm:$0xff] }
 0x5e4   :  { %11057 = vmatprep.subr.bf16.mxu0 %v11056_v8  ;;  %v6878_v8 = vld [vmem:[%s20882_s5 + $0x2f0] sm:$0xff] }
 0x5e5   :  { %v11088_v9 = vpack.c.bf16 %v6878_v8, %v6875_v62  ;;  %v6916_v8 = vld [vmem:[%s20882_s5 + $0x420] sm:$0xff] }
 0x5e7   :  { %11059 = vmatpush1.bf16.msra.mxu0 %v11058_v1  ;;  %v4772_v1 = vrot.slane %v20189_v17, %v15681_v59  ;;  %v6883_v59 = vld [vmem:[%s20882_s5 + $0x318] sm:$0xff] }
 0x5e8   :  { %11061 = vmatprep.subr.bf16.mxu0 %v11060_v12  ;;  %v6881_v12 = vld [vmem:[%s20882_s5 + $0x308] sm:$0xff]  ;;  %v11094_v50 = vpack.c.bf16 %v6883_v59, %v6880_v25 }
 0x5e9   :  { %v11092_v51 = vpack.c.bf16 %v6884_v42, %v6881_v12  ;;  %v6922_v12 = vld [vmem:[%s20882_s5 + $0x450] sm:$0xff]  ;;  %v6925_v42 = vld [vmem:[%s20882_s5 + $0x468] sm:$0xff] }
 0x5ea   :  { %v11122_v25 = vpack.c.bf16 %v6925_v42, %v6922_v12  ;;  %v6970_v42 = vld [vmem:[%s20882_s5 + $0x5d0] sm:$0xff] }
 0x5eb   :  { %11063 = vmatpush1.bf16.msra.mxu0 %v11062_v13  ;;  %v20206_v13 = vadd.f32 %v20020_v56, %v4772_v1  ;;  %v6889_v56 = vld [vmem:[%s20882_s5 + $0x348] sm:$0xff] }
 0x5ec   :  { %11065 = vmatprep.subr.bf16.mxu0 %v11064_v14  ;;  %v6887_v14 = vld [vmem:[%s20882_s5 + $0x338] sm:$0xff]  ;;  %v11098_v41 = vpack.c.bf16 %v6889_v56, %v6886_v6 }
 0x5ed   :  { %v11096_v27 = vpack.c.bf16 %v6890_v19, %v6887_v14  ;;  %v6928_v14 = vld [vmem:[%s20882_s5 + $0x480] sm:$0xff]  ;;  %v6931_v19 = vld [vmem:[%s20882_s5 + $0x498] sm:$0xff] }
 0x5ee   :  { %v11126_v6 = vpack.c.bf16 %v6931_v19, %v6928_v14 }
 0x5ef   :  { %11067 = vmatpush1.bf16.msra.mxu0 %v11066_v57  ;;  %v6780_v57 = vmax.f32 %v20206_v13, 0.0  ;;  %v6951_v13 = vld [vmem:[%s20882_s5 + $0x538] sm:$0xff] }
 0x5f0   :  { %11069 = vmatprep.subr.bf16.mxu0 %v11068_v52  ;;  %v6893_v52 = vld [vmem:[%s20882_s5 + $0x368] sm:$0xff] }
 0x5f1   :  { %v11100_v61 = vpack.c.bf16 %v6896_v48, %v6893_v52  ;;  %v6934_v52 = vld [vmem:[%s20882_s5 + $0x4b0] sm:$0xff]  ;;  %v6937_v48 = vld [vmem:[%s20882_s5 + $0x4c8] sm:$0xff] }
 0x5f3   :  { %11071 = vmatpush1.bf16.msra.mxu0 %v11070_v16  ;;  %v6895_v16 = vld [vmem:[%s20882_s5 + $0x378] sm:$0xff] }
 0x5f4   :  { %11073 = vmatprep.subr.bf16.mxu0 %v11072_v47  ;;  %v11102_v47 = vpack.c.bf16 %v6895_v16, %v6892_v4  ;;  %v11130_v4 = vpack.c.bf16 %v6937_v48, %v6934_v52 }
 0x5f5   :  { %v8012_v37 = vpop.f32.mrb[14].mxu0 }
 0x5f6   :  { %v8013_v38 = vpop.f32.mrb[15].mxu0 }
 0x5f7   :  { %v20154_v39 = vadd.f32 %v8013_v38, %v8012_v37  ;;  %11075 = vmatpush1.bf16.msra.mxu0 %v11074_v30  ;;  %v6908_v30 = vld [vmem:[%s20882_s5 + $0x3e0] sm:$0xff]  ;;  %v6911_v38 = vld [vmem:[%s20882_s5 + $0x3f8] sm:$0xff] }
 0x5f8   :  { %11077 = vmatprep.subr.bf16.mxu0 %v11076_v33  ;;  %v4784_v33 = vrot.slane %v20189_v17, %v1343_v11  ;;  %v11108_v35 = vpack.c.bf16 %v6908_v30, %v6905_v28  ;;  %v6904_v37 = vld [vmem:[%s20882_s5 + $0x3c0] sm:$0xff]  ;;  %v6914_v11 = vld [vmem:[%s20882_s5 + $0x410] sm:$0xff]  ;;  %v6949_v30 = vld [vmem:[%s20882_s5 + $0x528] sm:$0xff] }
 0x5f9   :  { %v11110_v7 = vpack.c.bf16 %v6907_v31, %v6904_v37  ;;  %v11112_v15 = vpack.c.bf16 %v6914_v11, %v6911_v38  ;;  %v6946_v28 = vld [vmem:[%s20882_s5 + $0x510] sm:$0xff]  ;;  %v6952_v31 = vld [vmem:[%s20882_s5 + $0x540] sm:$0xff]  ;;  %v6959_v11 = vld [vmem:[%s20882_s5 + $0x578] sm:$0xff] }
 0x5fb   :  { %11079 = vmatpush1.bf16.msra.mxu0 %v11078_v29 }
 0x5fc   :  { %11081 = vmatprep.subr.bf16.mxu0 %v11080_v18  ;;  %v6354_v18 = vadd.f32 %v20154_v39, %v4784_v33  ;;  %v6920_v39 = vld [vmem:[%s20882_s5 + $0x440] sm:$0xff]  ;;  %v6953_v33 = vld [vmem:[%s20882_s5 + $0x548] sm:$0xff] }
 0x5fd   :  { %v11116_v62 = vpack.c.bf16 %v6920_v39, %v6917_v45  ;;  %v6965_v39 = vld [vmem:[%s20882_s5 + $0x5a8] sm:$0xff] }
 0x5ff   :  { %11083 = vmatpush1.bf16.msra.mxu0 %v11082_v44  ;;  %v6913_v44 = vld [vmem:[%s20882_s5 + $0x408] sm:$0xff] }
 0x600   :  { %11085 = vmatprep.subr.bf16.mxu0 %v11084_v60  ;;  %v11114_v54 = vpack.c.bf16 %v6913_v44, %v6910_v46  ;;  %v6958_v46 = vld [vmem:[%s20882_s5 + $0x570] sm:$0xff]  ;;  %v6961_v44 = vld [vmem:[%s20882_s5 + $0x588] sm:$0xff] }
 0x603   :  { %11087 = vmatpush1.bf16.msra.mxu0 %v11086_v55  ;;  %v6919_v55 = vld [vmem:[%s20882_s5 + $0x438] sm:$0xff] }
 0x604   :  { %11089 = vmatprep.subr.bf16.mxu0 %v11088_v9  ;;  %v6923_v9 = vld [vmem:[%s20882_s5 + $0x458] sm:$0xff]  ;;  %v11118_v63 = vpack.c.bf16 %v6919_v55, %v6916_v8  ;;  %v6964_v55 = vld [vmem:[%s20882_s5 + $0x5a0] sm:$0xff] }
 0x605   :  { %v11120_v1 = vpack.c.bf16 %v6926_v2, %v6923_v9  ;;  %v6971_v9 = vld [vmem:[%s20882_s5 + $0x5d8] sm:$0xff]  ;;  %v6974_v2 = vld [vmem:[%s20882_s5 + $0x5f0] sm:$0xff] }
 0x606   :  { %v11152_v12 = vpack.c.bf16 %v6974_v2, %v6971_v9  ;;  %v4780_v9 = vrot.slane %v20189_v17, %v1339_v58  ;;  %v7022_v58 = vld [vmem:[%s20882_s5 + $0x770] sm:$0xff] }
 0x607   :  { %11091 = vmatpush1.bf16.msra.mxu0 %v11090_v5  ;;  %v6929_v5 = vld [vmem:[%s20882_s5 + $0x488] sm:$0xff] }
 0x608   :  { %11093 = vmatprep.subr.bf16.mxu0 %v11092_v51  ;;  %v6932_v51 = vld [vmem:[%s20882_s5 + $0x4a0] sm:$0xff] }
 0x609   :  { %v11124_v59 = vpack.c.bf16 %v6932_v51, %v6929_v5  ;;  %v6973_v5 = vld [vmem:[%s20882_s5 + $0x5e8] sm:$0xff] }
 0x60a   :  { %7163 = vmatmul.mubr.f32.vlgmr.msra.gmra.mrb[28].mxu0 %v6777_v22  ;;  %v6902_v22 = vld [vmem:[%s20882_s5 + $0x3b0] sm:$0xff]  ;;  %v6977_v51 = vld [vmem:[%s20882_s5 + $0x608] sm:$0xff] }
 0x60b   :  { %11095 = vmatpush1.bf16.msra.mxu0 %v11094_v50  ;;  %7233 = vmatprep.mubr.f32.mxu0 %v6780_v57  ;;  %v11104_v23 = vpack.c.bf16 %v6902_v22, %v6899_v0  ;;  %v6935_v50 = vld [vmem:[%s20882_s5 + $0x4b8] sm:$0xff]  ;;  %v6940_v0 = vld [vmem:[%s20882_s5 + $0x4e0] sm:$0xff] }
 0x60c   :  { %11097 = vmatprep.subr.bf16.mxu0 %v11096_v27  ;;  %v6938_v27 = vld [vmem:[%s20882_s5 + $0x4d0] sm:$0xff]  ;;  %v6943_v22 = vld [vmem:[%s20882_s5 + $0x4f8] sm:$0xff] }
 0x60d   :  { %v11128_v56 = vpack.c.bf16 %v6938_v27, %v6935_v50  ;;  %v11134_v43 = vpack.c.bf16 %v6943_v22, %v6940_v0  ;;  %v6976_v50 = vld [vmem:[%s20882_s5 + $0x600] sm:$0xff]  ;;  %v6979_v27 = vld [vmem:[%s20882_s5 + $0x618] sm:$0xff] }
 0x60f   :  { %11099 = vmatpush1.bf16.msra.mxu0 %v11098_v41  ;;  %v6941_v41 = vld [vmem:[%s20882_s5 + $0x4e8] sm:$0xff] }
 0x610   :  { %11101 = vmatprep.subr.bf16.mxu0 %v11100_v61  ;;  %v6944_v61 = vld [vmem:[%s20882_s5 + $0x500] sm:$0xff] }
 0x611   :  { %v11132_v16 = vpack.c.bf16 %v6944_v61, %v6941_v41  ;;  %v6982_v41 = vld [vmem:[%s20882_s5 + $0x630] sm:$0xff]  ;;  %v6985_v61 = vld [vmem:[%s20882_s5 + $0x648] sm:$0xff] }
 0x612   :  { %v11162_v0 = vpack.c.bf16 %v6985_v61, %v6982_v41  ;;  %v7027_v41 = vld [vmem:[%s20882_s5 + $0x798] sm:$0xff] }
 0x613   :  { %11103 = vmatpush1.bf16.msra.mxu0 %v11102_v47  ;;  %v6947_v47 = vld [vmem:[%s20882_s5 + $0x518] sm:$0xff] }
 0x614   :  { %11105 = vmatprep.subr.bf16.mxu0 %v11104_v23  ;;  %v6950_v23 = vld [vmem:[%s20882_s5 + $0x530] sm:$0xff]  ;;  %v7031_v61 = vld [vmem:[%s20882_s5 + $0x7b8] sm:$0xff] }
 0x615   :  { %v8047_v26 = vpop.f32.mrb[16].mxu0  ;;  %v11136_v3 = vpack.c.bf16 %v6950_v23, %v6947_v47  ;;  %v6988_v47 = vld [vmem:[%s20882_s5 + $0x660] sm:$0xff]  ;;  %v6991_v23 = vld [vmem:[%s20882_s5 + $0x678] sm:$0xff] }
 0x616   :  { %v8048_v29 = vpop.f32.mrb[17].mxu0 }
 0x617   :  { %v8049_v40 = vadd.f32 %v8048_v29, %v8047_v26  ;;  %11107 = vmatpush1.bf16.msra.mxu0 %v11106_v34  ;;  %v6956_v34 = vld [vmem:[%s20882_s5 + $0x560] sm:$0xff]  ;;  %v6955_v26 = vld [vmem:[%s20882_s5 + $0x558] sm:$0xff]  ;;  %v6962_v29 = vld [vmem:[%s20882_s5 + $0x590] sm:$0xff] }
 0x618   :  { %11109 = vmatprep.subr.bf16.mxu0 %v11108_v35  ;;  %v11138_v35 = vpack.c.bf16 %v6949_v30, %v6946_v28  ;;  %v11140_v37 = vpack.c.bf16 %v6956_v34, %v6953_v33  ;;  %v11166_v28 = vpack.c.bf16 %v6991_v23, %v6988_v47  ;;  %v6994_v33 = vld [vmem:[%s20882_s5 + $0x690] sm:$0xff]  ;;  %v6997_v34 = vld [vmem:[%s20882_s5 + $0x6a8] sm:$0xff] }
 0x619   :  { %v20277_v60 = vadd.f32 %v8049_v40, %v6354_v18  ;;  %v7033_v47 = vld [vmem:[%s20882_s5 + $0x7c8] sm:$0xff] }
 0x61a   :  { %v7037_v23 = vld [vmem:[%s20882_s5 + $0x7e8] sm:$0xff] }
 0x61b   :  { %11111 = vmatpush1.bf16.msra.mxu0 %v11110_v7  ;;  %v11142_v7 = vpack.c.bf16 %v6955_v26, %v6952_v31  ;;  %v11170_v31 = vpack.c.bf16 %v6997_v34, %v6994_v33  ;;  %v7039_v33 = vld [vmem:[%s20882_s5 + $0x7f8] sm:$0xff] }
 0x61c   :  { %11113 = vmatprep.subr.bf16.mxu0 %v11112_v15  ;;  %v11144_v15 = vpack.c.bf16 %v6962_v29, %v6959_v11  ;;  %v7003_v11 = vld [vmem:[%s20882_s5 + $0x6d8] sm:$0xff] }
 0x61d   :  { %v7043_v34 = vld [vmem:[%s20882_s5 + $0x818] sm:$0xff] }
 0x61f   :  { %11115 = vmatpush1.bf16.msra.mxu0 %v11114_v54  ;;  %v6968_v54 = vld [vmem:[%s20882_s5 + $0x5c0] sm:$0xff] }
 0x620   :  { %11117 = vmatprep.subr.bf16.mxu0 %v11116_v62  ;;  %v11146_v62 = vpack.c.bf16 %v6961_v44, %v6958_v46  ;;  %v11148_v8 = vpack.c.bf16 %v6968_v54, %v6965_v39  ;;  %v7006_v39 = vld [vmem:[%s20882_s5 + $0x6f0] sm:$0xff]  ;;  %v7009_v54 = vld [vmem:[%s20882_s5 + $0x708] sm:$0xff] }
 0x621   :  { %v11178_v2 = vpack.c.bf16 %v7009_v54, %v7006_v39  ;;  %v7058_v39 = vld [vmem:[%s20882_s5 + $0x890] sm:$0xff] }
 0x623   :  { %11119 = vmatpush1.bf16.msra.mxu0 %v11118_v63 }
 0x624   :  { %11121 = vmatprep.subr.bf16.mxu0 %v11120_v1  ;;  %v4768_v1 = vrot.slane %v20189_v17, %v15900_v53 }
 0x626   :  { %v20411_v14 = vadd.f32 %v20012_v21, %v4768_v1  ;;  %v11158_v21 = vpack.c.bf16 %v6979_v27, %v6976_v50  ;;  %v7015_v1 = vld [vmem:[%s20882_s5 + $0x738] sm:$0xff]  ;;  %v7025_v27 = vld [vmem:[%s20882_s5 + $0x788] sm:$0xff] }
 0x627   :  { %11123 = vmatpush1.bf16.msra.mxu0 %v11122_v25  ;;  %v6980_v25 = vld [vmem:[%s20882_s5 + $0x620] sm:$0xff] }
 0x628   :  { %11125 = vmatprep.subr.bf16.mxu0 %v11124_v59  ;;  %v11154_v59 = vpack.c.bf16 %v6973_v5, %v6970_v42  ;;  %v11156_v19 = vpack.c.bf16 %v6980_v25, %v6977_v51  ;;  %v6779_v52 = vmax.f32 %v20411_v14, 0.0  ;;  %v11184_v25 = vpack.c.bf16 %v7022_v58, %v7019_v32  ;;  %v7060_v58 = vld [vmem:[%s20882_s5 + $0x8a0] sm:$0xff]  ;;  %v7690_v14 = vld [vmem:[%s20883_s7 + $0xc8] sm:$0xff] }
 0x62b   :  { %11127 = vmatpush1.bf16.msra.mxu0 %v11126_v6  ;;  %v6983_v6 = vld [vmem:[%s20882_s5 + $0x638] sm:$0xff] }
 0x62c   :  { %11129 = vmatprep.subr.bf16.mxu0 %v11128_v56  ;;  %v6986_v56 = vld [vmem:[%s20882_s5 + $0x650] sm:$0xff] }
 0x62d   :  { %v11160_v48 = vpack.c.bf16 %v6986_v56, %v6983_v6  ;;  %v7028_v6 = vld [vmem:[%s20882_s5 + $0x7a0] sm:$0xff] }
 0x62f   :  { %11131 = vmatpush1.bf16.msra.mxu0 %v11130_v4  ;;  %v6989_v4 = vld [vmem:[%s20882_s5 + $0x668] sm:$0xff] }
 0x630   :  { %11133 = vmatprep.subr.bf16.mxu0 %v11132_v16  ;;  %v6992_v16 = vld [vmem:[%s20882_s5 + $0x680] sm:$0xff] }
 0x631   :  { %v11164_v22 = vpack.c.bf16 %v6992_v16, %v6989_v4  ;;  %v7034_v4 = vld [vmem:[%s20882_s5 + $0x7d0] sm:$0xff] }
 0x633   :  { %11135 = vmatpush1.bf16.msra.mxu0 %v11134_v43  ;;  %v6995_v43 = vld [vmem:[%s20882_s5 + $0x698] sm:$0xff] }
 0x634   :  { %11137 = vmatprep.subr.bf16.mxu0 %v11136_v3  ;;  %v6998_v3 = vld [vmem:[%s20882_s5 + $0x6b0] sm:$0xff] }
 0x635   :  { %v8082_v38 = vpop.f32.mrb[18].mxu0  ;;  %v11168_v30 = vpack.c.bf16 %v6998_v3, %v6995_v43  ;;  %v7040_v43 = vld [vmem:[%s20882_s5 + $0x800] sm:$0xff] }
 0x636   :  { %v8083_v18 = vpop.f32.mrb[19].mxu0 }
 0x637   :  { %v8084_v40 = vadd.f32 %v8083_v18, %v8082_v38  ;;  %11139 = vmatpush1.bf16.msra.mxu0 %v11138_v35  ;;  %v7001_v35 = vld [vmem:[%s20882_s5 + $0x6c8] sm:$0xff]  ;;  %v7000_v38 = vld [vmem:[%s20882_s5 + $0x6c0] sm:$0xff]  ;;  %v7007_v18 = vld [vmem:[%s20882_s5 + $0x6f8] sm:$0xff] }
 0x638   :  { %11141 = vmatprep.subr.bf16.mxu0 %v11140_v37  ;;  %v7004_v37 = vld [vmem:[%s20882_s5 + $0x6e0] sm:$0xff]  ;;  %v11174_v46 = vpack.c.bf16 %v7003_v11, %v7000_v38  ;;  %v7045_v38 = vld [vmem:[%s20882_s5 + $0x828] sm:$0xff] }
 0x639   :  { %v20376_v45 = vadd.f32 %v8084_v40, %v20277_v60  ;;  %v6967_v60 = vld [vmem:[%s20882_s5 + $0x5b8] sm:$0xff]  ;;  %v11172_v26 = vpack.c.bf16 %v7004_v37, %v7001_v35  ;;  %v7010_v40 = vld [vmem:[%s20882_s5 + $0x710] sm:$0xff]  ;;  %v7049_v11 = vld [vmem:[%s20882_s5 + $0x848] sm:$0xff] }
 0x63a   :  { %v11150_v63 = vpack.c.bf16 %v6967_v60, %v6964_v55  ;;  %v11176_v44 = vpack.c.bf16 %v7010_v40, %v7007_v18  ;;  %v7013_v55 = vld [vmem:[%s20882_s5 + $0x728] sm:$0xff]  ;;  %v7016_v60 = vld [vmem:[%s20882_s5 + $0x740] sm:$0xff]  ;;  %v7046_v35 = vld [vmem:[%s20882_s5 + $0x830] sm:$0xff] }
 0x63b   :  { %11143 = vmatpush1.bf16.msra.mxu0 %v11142_v7 }
 0x63c   :  { %11145 = vmatprep.subr.bf16.mxu0 %v11144_v15 }
 0x63f   :  { %11147 = vmatpush1.bf16.msra.mxu0 %v11146_v62 }
 0x640   :  { %11149 = vmatprep.subr.bf16.mxu0 %v11148_v8  ;;  %v4776_v8 = vrot.slane %v20189_v17, %v16140_v20  ;;  %v7012_v20 = vld [vmem:[%s20882_s5 + $0x720] sm:$0xff] }
 0x641   :  { %v11182_v5 = vpack.c.bf16 %v7015_v1, %v7012_v20  ;;  %v7064_v20 = vld [vmem:[%s20882_s5 + $0x8c0] sm:$0xff] }
 0x643   :  { %11151 = vmatpush1.bf16.msra.mxu0 %v11150_v63 }
 0x644   :  { %11153 = vmatprep.subr.bf16.mxu0 %v11152_v12 }
 0x647   :  { %11155 = vmatpush1.bf16.msra.mxu0 %v11154_v59  ;;  %v7018_v59 = vld [vmem:[%s20882_s5 + $0x750] sm:$0xff] }
 0x648   :  { %11157 = vmatprep.subr.bf16.mxu0 %v11156_v19  ;;  %v7021_v19 = vld [vmem:[%s20882_s5 + $0x768] sm:$0xff] }
 0x649   :  { %v11186_v56 = vpack.c.bf16 %v7021_v19, %v7018_v59 }
 0x64a   :  { %7234 = vmatmul.mubr.f32.vlgmr.msra.gmra.mrb[28].mxu0 %v6779_v52 }
 0x64b   :  { %11159 = vmatpush1.bf16.msra.mxu0 %v11158_v21  ;;  %v11188_v21 = vpack.c.bf16 %v7028_v6, %v7025_v27  ;;  %v7066_v27 = vld [vmem:[%s20882_s5 + $0x8d0] sm:$0xff]  ;;  %v7069_v6 = vld [vmem:[%s20882_s5 + $0x8e8] sm:$0xff] }
 0x64c   :  { %11161 = vmatprep.subr.bf16.mxu0 %v11160_v48  ;;  %v7024_v48 = vld [vmem:[%s20882_s5 + $0x780] sm:$0xff] }
 0x64d   :  { %v11190_v16 = vpack.c.bf16 %v7027_v41, %v7024_v48  ;;  %v11218_v48 = vpack.c.bf16 %v7069_v6, %v7066_v27  ;;  %v6918_v27 = vld [vmem:[%s20882_s5 + $0x430] sm:$0xff]  ;;  %v6921_v6 = vld [vmem:[%s20882_s5 + $0x448] sm:$0xff] }
 0x64f   :  { %11163 = vmatpush1.bf16.msra.mxu0 %v11162_v0  ;;  %v11192_v0 = vpack.c.bf16 %v7034_v4, %v7031_v61  ;;  %v7072_v61 = vld [vmem:[%s20882_s5 + $0x900] sm:$0xff]  ;;  %v7075_v4 = vld [vmem:[%s20882_s5 + $0x918] sm:$0xff] }
 0x650   :  { %11165 = vmatprep.subr.bf16.mxu0 %v11164_v22  ;;  %v7030_v22 = vld [vmem:[%s20882_s5 + $0x7b0] sm:$0xff] }
 0x651   :  { %v11194_v3 = vpack.c.bf16 %v7033_v47, %v7030_v22  ;;  %v11222_v22 = vpack.c.bf16 %v7075_v4, %v7072_v61  ;;  %v6924_v61 = vld [vmem:[%s20882_s5 + $0x460] sm:$0xff]  ;;  %v6927_v4 = vld [vmem:[%s20882_s5 + $0x478] sm:$0xff] }
 0x653   :  { %11167 = vmatpush1.bf16.msra.mxu0 %v11166_v28  ;;  %v11196_v28 = vpack.c.bf16 %v7040_v43, %v7037_v23 }
 0x654   :  { %11169 = vmatprep.subr.bf16.mxu0 %v11168_v30  ;;  %v7036_v30 = vld [vmem:[%s20882_s5 + $0x7e0] sm:$0xff] }
 0x655   :  { %v8117_v29 = vpop.f32.mrb[20].mxu0  ;;  %v11198_v37 = vpack.c.bf16 %v7039_v33, %v7036_v30  ;;  %v6882_v30 = vld [vmem:[%s20882_s5 + $0x310] sm:$0xff]  ;;  %v6885_v33 = vld [vmem:[%s20882_s5 + $0x328] sm:$0xff] }
 0x656   :  { %v8118_v7 = vpop.f32.mrb[21].mxu0 }
 0x657   :  { %v8119_v15 = vadd.f32 %v8118_v7, %v8117_v29  ;;  %11171 = vmatpush1.bf16.msra.mxu0 %v11170_v31  ;;  %v11200_v31 = vpack.c.bf16 %v7046_v35, %v7043_v34  ;;  %v7052_v29 = vld [vmem:[%s20882_s5 + $0x860] sm:$0xff] }
 0x658   :  { %11173 = vmatprep.subr.bf16.mxu0 %v11172_v26  ;;  %v7042_v26 = vld [vmem:[%s20882_s5 + $0x810] sm:$0xff]  ;;  %v11204_v40 = vpack.c.bf16 %v7052_v29, %v7049_v11  ;;  %v7048_v7 = vld [vmem:[%s20882_s5 + $0x840] sm:$0xff]  ;;  %v6891_v29 = vld [vmem:[%s20882_s5 + $0x358] sm:$0xff] }
 0x659   :  { %v20483_v62 = vadd.f32 %v8119_v15, %v20376_v45  ;;  %v11180_v45 = vpack.c.bf16 %v7016_v60, %v7013_v55  ;;  %v11202_v18 = vpack.c.bf16 %v7045_v38, %v7042_v26  ;;  %v7051_v15 = vld [vmem:[%s20882_s5 + $0x858] sm:$0xff]  ;;  %v6888_v11 = vld [vmem:[%s20882_s5 + $0x340] sm:$0xff] }
 0x65a   :  { %v11206_v55 = vpack.c.bf16 %v7051_v15, %v7048_v7  ;;  %v11262_v7 = vpack.c.bf16 %v6891_v29, %v6888_v11 }
 0x65b   :  { %11175 = vmatpush1.bf16.msra.mxu0 %v11174_v46 }
 0x65c   :  { %v6282_v63 = vpop.f32.mrb[12].mxu1  ;;  %11177 = vmatprep.subr.bf16.mxu0 %v11176_v44  ;;  %v7055_v44 = vld [vmem:[%s20882_s5 + $0x878] sm:$0xff] }
 0x65d   :  { %v20502_v12 = vadd.f32 %v6282_v63, %v4776_v8  ;;  %v6284_v42 = vpop.f32.mrb[13].mxu1  ;;  %v11208_v60 = vpack.c.bf16 %v7058_v39, %v7055_v44  ;;  %v6897_v44 = vld [vmem:[%s20882_s5 + $0x388] sm:$0xff]  ;;  %v6948_v39 = vld [vmem:[%s20882_s5 + $0x520] sm:$0xff] }
 0x65e   :  { %v11380_v17 = vadd.f32 %v6284_v42, %v4780_v9  ;;  %v7054_v9 = vld [vmem:[%s20882_s5 + $0x870] sm:$0xff] }
 0x65f   :  { %11179 = vmatpush1.bf16.msra.mxu0 %v11178_v2  ;;  %v6781_v50 = vmax.f32 %v20502_v12, 0.0  ;;  %v7057_v2 = vld [vmem:[%s20882_s5 + $0x888] sm:$0xff]  ;;  %v6936_v12 = vld [vmem:[%s20882_s5 + $0x4c0] sm:$0xff] }
 0x660   :  { %v6782_v51 = vmax.f32 %v11380_v17, 0.0  ;;  %11181 = vmatprep.subr.bf16.mxu0 %v11180_v45  ;;  %v7061_v45 = vld [vmem:[%s20882_s5 + $0x8a8] sm:$0xff]  ;;  %v11210_v1 = vpack.c.bf16 %v7057_v2, %v7054_v9 }
 0x661   :  { %v11212_v32 = vpack.c.bf16 %v7064_v20, %v7061_v45  ;;  %v6957_v9 = vld [vmem:[%s20882_s5 + $0x568] sm:$0xff]  ;;  %v6906_v45 = vld [vmem:[%s20882_s5 + $0x3d0] sm:$0xff] }
 0x662   :  { %7304 = vmatprep.mubr.f32.mxu0 %v6782_v51  ;;  %7586 = vmatprep.mubr.f32.mxu1 %v6782_v51  ;;  %v7070_v51 = vld [vmem:[%s20882_s5 + $0x8f0] sm:$0xff]  ;;  %v6909_v20 = vld [vmem:[%s20882_s5 + $0x3e8] sm:$0xff] }
 0x663   :  { %11183 = vmatpush1.bf16.msra.mxu0 %v11182_v5  ;;  %7587 = vmatmul.mubr.f32.vlgmr.msra.gmra.mrb[16].mxu1 %v6781_v50  ;;  %v7067_v5 = vld [vmem:[%s20882_s5 + $0x8d8] sm:$0xff] }
 0x664   :  { %11185 = vmatprep.subr.bf16.mxu0 %v11184_v25  ;;  %v11216_v19 = vpack.c.bf16 %v7070_v51, %v7067_v5  ;;  %v6966_v5 = vld [vmem:[%s20882_s5 + $0x5b0] sm:$0xff]  ;;  %v6969_v51 = vld [vmem:[%s20882_s5 + $0x5c8] sm:$0xff] }
 0x667   :  { %11187 = vmatpush1.bf16.msra.mxu0 %v11186_v56  ;;  %v7073_v56 = vld [vmem:[%s20882_s5 + $0x908] sm:$0xff] }
 0x668   :  { %11189 = vmatprep.subr.bf16.mxu0 %v11188_v21  ;;  %v7076_v21 = vld [vmem:[%s20882_s5 + $0x920] sm:$0xff] }
 0x669   :  { %v11220_v41 = vpack.c.bf16 %v7076_v21, %v7073_v56  ;;  %v6972_v56 = vld [vmem:[%s20882_s5 + $0x5e0] sm:$0xff]  ;;  %v6975_v21 = vld [vmem:[%s20882_s5 + $0x5f8] sm:$0xff] }
 0x66b   :  { %11191 = vmatpush1.bf16.msra.mxu0 %v11190_v16  ;;  %v6930_v16 = vld [vmem:[%s20882_s5 + $0x490] sm:$0xff] }
 0x66c   :  { %11193 = vmatprep.subr.bf16.mxu0 %v11192_v0  ;;  %v6933_v0 = vld [vmem:[%s20882_s5 + $0x4a8] sm:$0xff] }
 0x66d   :  { %v11256_v47 = vpack.c.bf16 %v6933_v0, %v6930_v16  ;;  %v7681_v16 = vld [vmem:[%s20883_s7 + $0x80] sm:$0xff]  ;;  %v7682_v0 = vld [vmem:[%s20883_s7 + $0x88] sm:$0xff] }
 0x66f   :  { %11195 = vmatpush1.bf16.msra.mxu0 %v11194_v3 }
 0x670   :  { %11197 = vmatprep.subr.bf16.mxu0 %v11196_v28 }
 0x673   :  { %11199 = vmatpush1.bf16.msra.mxu0 %v11198_v37 }
 0x674   :  { %11201 = vmatprep.subr.bf16.mxu0 %v11200_v31  ;;  %v11258_v31 = vpack.c.bf16 %v6885_v33, %v6882_v30 }
 0x675   :  { %v8152_v46 = vpop.f32.mrb[22].mxu0 }
 0x676   :  { %v8153_v54 = vpop.f32.mrb[23].mxu0 }
 0x677   :  { %v8154_v8 = vadd.f32 %v8153_v54, %v8152_v46  ;;  %11203 = vmatpush1.bf16.msra.mxu0 %v11202_v18  ;;  %v6942_v18 = vld [vmem:[%s20882_s5 + $0x4f0] sm:$0xff]  ;;  %v11268_v54 = vpack.c.bf16 %v6951_v13, %v6948_v39 }
 0x678   :  { %11205 = vmatprep.subr.bf16.mxu0 %v11204_v40  ;;  %v6945_v40 = vld [vmem:[%s20882_s5 + $0x508] sm:$0xff]  ;;  %v6894_v46 = vld [vmem:[%s20882_s5 + $0x370] sm:$0xff] }
 0x679   :  { %v6634_v63 = vadd.f32 %v8154_v8, %v20483_v62  ;;  %v7063_v62 = vld [vmem:[%s20882_s5 + $0x8b8] sm:$0xff]  ;;  %v11264_v15 = vpack.c.bf16 %v6945_v40, %v6942_v18  ;;  %v6900_v8 = vld [vmem:[%s20882_s5 + $0x3a0] sm:$0xff]  ;;  %v7670_v40 = vld [vmem:[%s20883_s7 + $0x28] sm:$0xff] }
 0x67a   :  { %v11214_v59 = vpack.c.bf16 %v7063_v62, %v7060_v58  ;;  %v6912_v62 = vld [vmem:[%s20882_s5 + $0x400] sm:$0xff]  ;;  %v7671_v13 = vld [vmem:[%s20883_s7 + $0x30] sm:$0xff] }
 0x67b   :  { %11207 = vmatpush1.bf16.msra.mxu0 %v11206_v55  ;;  %v6903_v55 = vld [vmem:[%s20882_s5 + $0x3b8] sm:$0xff]  ;;  %v7669_v18 = vld [vmem:[%s20883_s7 + $0x20] sm:$0xff] }
 0x67c   :  { %v8227_v42 = vpop.f32.mrb[14].mxu1  ;;  %11209 = vmatprep.subr.bf16.mxu0 %v11208_v60  ;;  %v6954_v60 = vld [vmem:[%s20882_s5 + $0x550] sm:$0xff]  ;;  %v11270_v2 = vpack.c.bf16 %v6903_v55, %v6900_v8  ;;  %v7673_v55 = vld [vmem:[%s20883_s7 + $0x40] sm:$0xff] }
 0x67d   :  { %v8228_v17 = vpop.f32.mrb[15].mxu1 }
 0x67e   :  { %v20610_v25 = vadd.f32 %v8228_v17, %v8227_v42  ;;  %v6963_v42 = vld [vmem:[%s20882_s5 + $0x598] sm:$0xff] }
 0x67f   :  { %11211 = vmatpush1.bf16.msra.mxu0 %v11210_v1  ;;  %v6960_v1 = vld [vmem:[%s20882_s5 + $0x580] sm:$0xff]  ;;  %v6915_v17 = vld [vmem:[%s20882_s5 + $0x418] sm:$0xff] }
 0x680   :  { %11213 = vmatprep.subr.bf16.mxu0 %v11212_v32  ;;  %v11274_v32 = vpack.c.bf16 %v6909_v20, %v6906_v45  ;;  %v11276_v58 = vpack.c.bf16 %v6963_v42, %v6960_v1  ;;  %v7676_v45 = vld [vmem:[%s20883_s7 + $0x58] sm:$0xff]  ;;  %v7693_v20 = vld [vmem:[%s20883_s7 + $0xe0] sm:$0xff] }
 0x683   :  { %11215 = vmatpush1.bf16.msra.mxu0 %v11214_v59  ;;  %v11278_v59 = vpack.c.bf16 %v6915_v17, %v6912_v62  ;;  %v7695_v17 = vld [vmem:[%s20883_s7 + $0xf0] sm:$0xff] }
 0x684   :  { %11217 = vmatprep.subr.bf16.mxu0 %v11216_v19  ;;  %v11280_v19 = vpack.c.bf16 %v6969_v51, %v6966_v5  ;;  %v7696_v5 = vld [vmem:[%s20883_s7 + $0xf8] sm:$0xff] }
 0x685   :  { %v11351_v51 = vpack.c.bf16 %v7696_v5, %v7695_v17 }
 0x687   :  { %11219 = vmatpush1.bf16.msra.mxu0 %v11218_v48  ;;  %v11282_v48 = vpack.c.bf16 %v6921_v6, %v6918_v27  ;;  %v7697_v6 = vld [vmem:[%s20883_s7 + $0x100] sm:$0xff] }
 0x688   :  { %11221 = vmatprep.subr.bf16.mxu0 %v11220_v41  ;;  %v11284_v41 = vpack.c.bf16 %v6975_v21, %v6972_v56  ;;  %v7698_v56 = vld [vmem:[%s20883_s7 + $0x108] sm:$0xff] }
 0x689   :  { %v11356_v21 = vpack.c.bf16 %v7698_v56, %v7697_v6 }
 0x68a   :  { %7305 = vmatmul.mubr.f32.vlgmr.msra.gmra.mrb[28].mxu0 %v6781_v50  ;;  %v6939_v50 = vld [vmem:[%s20882_s5 + $0x4d8] sm:$0xff] }
 0x68b   :  { %11223 = vmatpush1.bf16.msra.mxu0 %v11222_v22  ;;  %7375 = vmatprep.mubr.f32.mxu0 %v11481_v24  ;;  %v11260_v38 = vpack.c.bf16 %v6939_v50, %v6936_v12  ;;  %v7665_v22 = vld [vmem:[%s20883_s7] sm:$0xff]  ;;  %v7668_v12 = vld [vmem:[%s20883_s7 + $0x18] sm:$0xff] }
 0x68c   :  { %11257 = vmatprep.subr.bf16.mxu0 %v11256_v47  ;;  %v11323_v47 = vpack.c.bf16 %v7682_v0, %v7681_v16  ;;  %v7685_v50 = vld [vmem:[%s20883_s7 + $0xa0] sm:$0xff] }
 0x68e   :  { %11324 = vmatprep.subr.bf16.mxu1 %v11323_v47 }
 0x695   :  { %v8187_v23 = vpop.f32.mrb[24].mxu0 }
 0x696   :  { %v8188_v43 = vpop.f32.mrb[25].mxu0 }
 0x697   :  { %v8189_v3 = vadd.f32 %v8188_v43, %v8187_v23  ;;  %v7666_v23 = vld [vmem:[%s20883_s7 + $0x8] sm:$0xff]  ;;  %v7683_v43 = vld [vmem:[%s20883_s7 + $0x90] sm:$0xff] }
 0x698   :  { %v11325_v30 = vpack.c.bf16 %v7666_v23, %v7665_v22  ;;  %v7078_v22 = vld [vmem:[%s20884_s6] sm:$0x7] }
 0x699   :  { %v6704_v28 = vadd.f32 %v8189_v3, %v6634_v63  ;;  %v11272_v63 = vpack.c.bf16 %v6957_v9, %v6954_v60  ;;  %v7684_v3 = vld [vmem:[%s20883_s7 + $0x98] sm:$0xff]  ;;  %v7674_v60 = vld [vmem:[%s20883_s7 + $0x48] sm:$0xff]  ;;  %v7691_v9 = vld [vmem:[%s20883_s7 + $0xd0] sm:$0xff]  ;;  %v7083_v47 = vrot.slane %v7078_v22, %v15672_v36 }
 0x69a   :  { %v11327_v33 = vpack.c.bf16 %v7684_v3, %v7683_v43  ;;  %11326 = vmatpush3.bf16.msra.mxu1 %v11325_v30 }
 0x69c   :  { %11328 = vmatprep.subr.bf16.mxu1 %v11327_v33 }
 0x69d   :  { %v6773_v34 = vpop.f32.mrb[26].mxu0 }
 0x69e   :  { %v20651_v35 = vadd.f32 %v6773_v34, %v6704_v28  ;;  %v8360_v37 = vpop.f32.mrb[27].mxu0  ;;  %v11286_v28 = vpack.c.bf16 %v6927_v4, %v6924_v61  ;;  %v7667_v34 = vld [vmem:[%s20883_s7 + $0x10] sm:$0xff] }
 0x69f   :  { %v7074_v37 = vld [vmem:[%s20882_s5 + $0x910] sm:$0xff]  ;;  %v11329_v11 = vpack.c.bf16 %v7668_v12, %v7667_v34  ;;  %v7091_v34 = vrot.slane %v7078_v22, %v15900_v53  ;;  %v7870_v53 = vld [vmem:[%s20885_s8] ss:$0 sm:$0xff] }
 0x6a0   :  { %v6783_v26 = vmax.f32 %v20651_v35, 0.0  ;;  %v7692_v35 = vld [vmem:[%s20883_s7 + $0xd8] sm:$0xff] }
 0x6a1   :  { %11330 = vmatpush3.bf16.msra.mxu1 %v11329_v11 }
 0x6a2   :  { %7868 = vmatmul.mubr.msk.f32.vlgmr.msra.gmra.mrb[28].mxu0 %vm1382_vm0, %v6783_v26 }
 0x6a3   :  { %11259 = vmatpush3.bf16.msra.mxu0 %v11258_v31  ;;  %7516 = vmatprep.mubr.f32.mxu0 %v6780_v57  ;;  %v11266_v57 = vpack.c.bf16 %v6897_v44, %v6894_v46  ;;  %v7077_v31 = vld [vmem:[%s20882_s5 + $0x928] sm:$0xff]  ;;  %v7688_v46 = vld [vmem:[%s20883_s7 + $0xb8] sm:$0xff]  ;;  %v11333_v44 = vpack.c.bf16 %v7670_v40, %v7669_v18 }
 0x6a4   :  { %11261 = vmatprep.subr.bf16.mxu0 %v11260_v38  ;;  %v7686_v38 = vld [vmem:[%s20883_s7 + $0xa8] sm:$0xff] }
 0x6a5   :  { %v11331_v29 = vpack.c.bf16 %v7686_v38, %v7685_v50 }
 0x6a7   :  { %11263 = vmatpush3.bf16.msra.mxu0 %v11262_v7  ;;  %v11321_v7 = vpack.c.bf16 %v7077_v31, %v7074_v37  ;;  %11332 = vmatprep.subr.bf16.mxu1 %v11331_v29  ;;  %v7449_v37 = vadd.f32 %v20610_v25, %v7091_v34 }
 0x6a8   :  { %11265 = vmatprep.subr.bf16.mxu0 %v11264_v15  ;;  %v7687_v15 = vld [vmem:[%s20883_s7 + $0xb0] sm:$0xff]  ;;  %11334 = vmatpush3.bf16.msra.mxu1 %v11333_v44 }
 0x6a9   :  { %v11335_v39 = vpack.c.bf16 %v7688_v46, %v7687_v15 }
 0x6ab   :  { %11267 = vmatpush3.bf16.msra.mxu0 %v11266_v57  ;;  %v7672_v57 = vld [vmem:[%s20883_s7 + $0x38] sm:$0xff]  ;;  %11336 = vmatprep.subr.bf16.mxu1 %v11335_v39 }
 0x6ac   :  { %11269 = vmatprep.subr.bf16.mxu0 %v11268_v54  ;;  %v7689_v54 = vld [vmem:[%s20883_s7 + $0xc0] sm:$0xff] }
 0x6ad   :  { %v11339_v8 = vpack.c.bf16 %v7690_v14, %v7689_v54 }
 0x6af   :  { %11271 = vmatpush3.bf16.msra.mxu0 %v11270_v2  ;;  %v11343_v2 = vpack.c.bf16 %v7692_v35, %v7691_v9 }
 0x6b0   :  { %11273 = vmatprep.subr.bf16.mxu0 %v11272_v63  ;;  %v7675_v63 = vld [vmem:[%s20883_s7 + $0x50] sm:$0xff] }
 0x6b1   :  { %v11345_v1 = vpack.c.bf16 %v7676_v45, %v7675_v63 }
 0x6b3   :  { %11275 = vmatpush3.bf16.msra.mxu0 %v11274_v32  ;;  %v7677_v32 = vld [vmem:[%s20883_s7 + $0x60] sm:$0xff] }
 0x6b4   :  { %11277 = vmatprep.subr.bf16.mxu0 %v11276_v58  ;;  %v7678_v58 = vld [vmem:[%s20883_s7 + $0x68] sm:$0xff] }
 0x6b5   :  { %v11349_v62 = vpack.c.bf16 %v7678_v58, %v7677_v32 }
 0x6b7   :  { %11279 = vmatpush3.bf16.msra.mxu0 %v11278_v59  ;;  %v7679_v59 = vld [vmem:[%s20883_s7 + $0x70] sm:$0xff] }
 0x6b8   :  { %11281 = vmatprep.subr.bf16.mxu0 %v11280_v19  ;;  %v7680_v19 = vld [vmem:[%s20883_s7 + $0x78] sm:$0xff] }
 0x6b9   :  { %v11353_v27 = vpack.c.bf16 %v7680_v19, %v7679_v59 }
 0x6bb   :  { %11283 = vmatpush3.bf16.msra.mxu0 %v11282_v48  ;;  %v7699_v48 = vld [vmem:[%s20883_s7 + $0x110] sm:$0xff] }
 0x6bc   :  { %11285 = vmatprep.subr.bf16.mxu0 %v11284_v41  ;;  %v7700_v41 = vld [vmem:[%s20883_s7 + $0x118] sm:$0xff] }
 0x6bd   :  { %v11359_v61 = vpack.c.bf16 %v7700_v41, %v7699_v48 }
 0x6bf   :  { %11287 = vmatpush3.bf16.msra.mxu0 %v11286_v28 }
 0x6c0   :  { %11320 = vmatprep.subr.bf16.mxu0 %v11482_v10 }
 0x6c2   :  { %7517 = vmatmul.mubr.f32.vlgmr.msra.gmra.mrb[30].mxu0 %v6779_v52  ;;  %v11337_v52 = vpack.c.bf16 %v7672_v57, %v7671_v13 }
 0x6c3   :  { %11322 = vmatpush3.bf16.msra.mxu0 %v11321_v7  ;;  %8365 = vmatprep.mubr.msk.f32.mxu0 %vm11483_vm1, %v11481_v24 }
 0x6c4   :  { %11355 = vmatprep.subr.bf16.mxu0 %v11482_v10  ;;  %11338 = vmatpush3.bf16.msra.mxu1 %v11337_v52 }
 0x6c5   :  { %11340 = vmatprep.subr.bf16.mxu1 %v11339_v8 }
 0x6c6   :  { %8366 = vmatmul.mubr.msk.f32.vlgmr.msra.gmra.mrb[32].mxu0 %vm1382_vm0, %v6783_v26  ;;  %v11341_v26 = vpack.c.bf16 %v7674_v60, %v7673_v55 }
 0x6c7   :  { %8376 = vmatprep.mubr.msk.f32.mxu0 %vm11483_vm1, %v11481_v24  ;;  %v7694_v24 = vld [vmem:[%s20883_s7 + $0xe8] sm:$0xff]  ;;  %11357 = vmatpush3.bf16.msra.mxu0 %v11356_v21 }
 0x6c8   :  { %11342 = vmatpush3.bf16.msra.mxu1 %v11341_v26  ;;  %v11347_v42 = vpack.c.bf16 %v7694_v24, %v7693_v20  ;;  %11358 = vmatprep.subr.bf16.mxu0 %v11482_v10  ;;  %v7087_v10 = vrot.slane %v7078_v22, %v15376_v49 }
 0x6c9   :  { %11344 = vmatprep.subr.bf16.mxu1 %v11343_v2 }
 0x6cb   :  { %11360 = vmatpush3.bf16.msra.mxu0 %v11359_v61 }
 0x6cc   :  { %11346 = vmatpush3.bf16.msra.mxu1 %v11345_v1 }
 0x6cd   :  { %11348 = vmatprep.subr.bf16.mxu1 %v11347_v42 }
 0x6d0   :  { %11350 = vmatpush3.bf16.msra.mxu1 %v11349_v62 }
 0x6d1   :  { %11352 = vmatprep.subr.bf16.mxu1 %v11351_v51 }
 0x6d4   :  { %11354 = vmatpush3.bf16.msra.mxu1 %v11353_v27 }
 0x736   :  { %v8297_v4 = vpop.f32.mrb[16].mxu1 }
 0x737   :  { %v8298_v16 = vpop.f32.mrb[17].mxu1 }
 0x738   :  { %v8299_v0 = vadd.f32 %v8298_v16, %v8297_v4 }
 0x775   :  { %v7377_v23 = vpop.f32.mrb[28].mxu0 }
 0x776   :  { %v11381_v43 = vadd.f32 %v7377_v23, %v7083_v47  ;;  %v7379_v3 = vpop.f32.mrb[29].mxu0 }
 0x777   :  { %v11382_v28 = vadd.f32 %v7379_v3, %v7087_v10 }
 0x778   :  { %v7662_v33 = vmax.f32 %v11381_v43, 0.0 }
 0x779   :  { %v7663_v30 = vmax.f32 %v11382_v28, 0.0 }
 0x77b   :  { %7775 = vmatprep.mubr.f32.mxu1 %v7663_v30 }
 0x77c   :  { %7776 = vmatmul.mubr.f32.vlgmr.msra.gmra.mrb[18].mxu1 %v7662_v33 }
 0x795   :  { %v8262_v12 = vpop.f32.mrb[30].mxu0 }
 0x796   :  { %v8263_v50 = vpop.f32.mrb[31].mxu0 }
 0x797   :  { %v8264_v31 = vadd.f32 %v8263_v50, %v8262_v12 }
 0x799   :  { %v7519_v38 = vadd.f32 %v8264_v31, %v7449_v37  ;;  %v7658_v11 = vpop.f32.mrb[32].mxu0 }
 0x79a   :  { %v8367_v36 = vpop.f32.mrb[33].mxu0 }
 0x79b   :  { %v7589_v29 = vadd.f32 %v8299_v0, %v7519_v38 }
 0x79d   :  { %v7659_v49 = vadd.f32 %v7658_v11, %v7589_v29 }
 0x79f   :  { %v7664_v18 = vmax.f32 %v7659_v49, 0.0 }
 0x7a1   :  { %8377 = vmatmul.mubr.msk.f32.vlgmr.msra.gmra.mrb[34].mxu0 %vm4792_vm2, %v7664_v18 }
 0x84f   :  { %v8335_v40 = vpop.f32.mrb[18].mxu1 }
 0x850   :  { %v8336_v7 = vpop.f32.mrb[19].mxu1 }
 0x851   :  { %v8337_v15 = vadd.f32 %v8336_v7, %v8335_v40 }
 0x853   :  { %v7778_v46 = vadd.f32 %v8337_v15, %v7870_v53 }
 0x874   :  { %v7847_v44 = vpop.f32.mrb[34].mxu0 }
 0x875   :  { %v7848_v25 = vadd.f32 %v7847_v44, %v7778_v46  ;;  %v8378_v39 = vpop.f32.mrb[35].mxu0 }
 0x877   :  { %7852 = vst.msk [vmem:[%s20886_s9] sm:$0xff] %vm7851_vm3, %v7848_v25 }

</bundles_post_ra>
